<compile_context>
chip_gen: v7x
topology: tpu7x:2x2x1
jax: 0.10.0
libtpu: 0.0.40
codegen_flags: <defaults>
</compile_context>

<pallas_src>
import functools
import math

import jax
import jax.numpy as jnp
from jax import lax
from jax.experimental import pallas as pl
from jax.experimental.pallas import tpu as pltpu


_COMPILER_PARAMS = pltpu.CompilerParams(vmem_limit_bytes=32 * 1024 * 1024)


def _vmem_specs(n):
    return [pl.BlockSpec(memory_space=pltpu.MemorySpace.VMEM) for _ in range(n)]


# ----------------------------------------------------------------------------
# In-kernel helpers (operate on values, not refs)
# ----------------------------------------------------------------------------

def _ln(x, alpha, bias):
    """alpha * (x - mean) / (std_unbiased + eps) + bias  (torch .std is unbiased)."""
    d = x.shape[-1]
    mean = jnp.mean(x, axis=-1, keepdims=True)
    xc = x - mean
    var = jnp.sum(xc * xc, axis=-1, keepdims=True) * (1.0 / (d - 1))
    return alpha * xc / (jnp.sqrt(var) + 1e-6) + bias


def _mha(q, k, v, mask, *, heads, batch, sq, sk):
    """q:[B*Sq,D], k/v:[B*Sk,D] (f32), mask:[B, 1|Sq, Sk] int -> [B*Sq, D] f32."""
    d_model = q.shape[-1]
    dk = d_model // heads
    scale = 1.0 / math.sqrt(dk)
    neg = jnp.float32(-1e9)
    # Hoisted single bf16 cast of the full Q/K/V (review item: no per-head casts).
    qb = q.astype(jnp.bfloat16)
    kb = k.astype(jnp.bfloat16)
    vb = v.astype(jnp.bfloat16)
    rows = []
    for b in range(batch):                       # static unroll (tiny B)
        m_b = mask[b]                            # [1|Sq, Sk], broadcast in-kernel
        q_b = qb[b * sq:(b + 1) * sq]
        k_b = kb[b * sk:(b + 1) * sk]
        v_b = vb[b * sk:(b + 1) * sk]
        heads_out = []
        for h in range(heads):                   # static unroll; lane-dim slices
            qh = q_b[:, h * dk:(h + 1) * dk]
            kh = k_b[:, h * dk:(h + 1) * dk]
            vh = v_b[:, h * dk:(h + 1) * dk]
            s = lax.dot_general(qh, kh, (((1,), (1,)), ((), ())),
                                preferred_element_type=jnp.float32) * scale
            s = jnp.where(m_b == 0, neg, s)
            s = s - jnp.max(s, axis=-1, keepdims=True)
            p = jnp.exp(s)
            p = p * pl.reciprocal(jnp.sum(p, axis=-1, keepdims=True), approx=True)
            heads_out.append(jnp.dot(p.astype(jnp.bfloat16), vh,
                                     preferred_element_type=jnp.float32))
        rows.append(jnp.concatenate(heads_out, axis=-1))   # [Sq, D]
    return jnp.concatenate(rows, axis=0)                   # [B*Sq, D]


def _mm(x_f32, w_ref, b_ref):
    """bf16 MXU matmul with f32 accumulation + f32 bias."""
    return jnp.dot(x_f32.astype(jnp.bfloat16), w_ref[...],
                   preferred_element_type=jnp.float32) + b_ref[...]


# ----------------------------------------------------------------------------
# Fused layer kernels (one pallas_call per transformer layer)
# ----------------------------------------------------------------------------

def _encoder_layer_kernel(x_ref, mask_ref,
                          ln1a, ln1b, wqkv, bqkv, wo, bo,
                          ln2a, ln2b, w1, b1, w2, b2,
                          fna, fnb,
                          o_ref, *, heads, batch, seq, apply_final_ln):
    x = x_ref[...]                                  # [B*S, D] f32 residual stream
    d = x.shape[-1]
    mask = mask_ref[...]                            # [B, 1, S] int32

    # --- self-attention sublayer: x + Wo(MHA(LN(x))) ---
    xn = _ln(x, ln1a[...], ln1b[...])
    qkv = _mm(xn, wqkv, bqkv)                       # fused [D, 3D] projection
    a = _mha(qkv[:, :d], qkv[:, d:2 * d], qkv[:, 2 * d:], mask,
             heads=heads, batch=batch, sq=seq, sk=seq)
    x = x + _mm(a, wo, bo)

    # --- feed-forward sublayer: x + W2(relu(W1(LN(x)))) ---
    xn = _ln(x, ln2a[...], ln2b[...])
    h = jnp.maximum(_mm(xn, w1, b1), 0.0)
    x = x + _mm(h, w2, b2)

    if apply_final_ln:                              # encoder's final Norm fused here
        x = _ln(x, fna[...], fnb[...])
    o_ref[...] = x


def _decoder_layer_kernel(y_ref, e_ref, smask_ref, tmask_ref,
                          s_lna, s_lnb, s_wqkv, s_bqkv, s_wo, s_bo,
                          c_lna, c_lnb, c_wq, c_bq, c_wkv, c_bkv, c_wo, c_bo,
                          f_lna, f_lnb, w1, b1, w2, b2,
                          o_ref, *, heads, batch, sq, sk):
    y = y_ref[...]                                  # [B*St, D] residual stream
    e = e_ref[...]                                  # [B*Ss, D] encoder output (normed)
    d = y.shape[-1]

    # --- masked self-attention ---
    yn = _ln(y, s_lna[...], s_lnb[...])
    qkv = _mm(yn, s_wqkv, s_bqkv)
    a = _mha(qkv[:, :d], qkv[:, d:2 * d], qkv[:, 2 * d:], tmask_ref[...],
             heads=heads, batch=batch, sq=sq, sk=sq)
    y = y + _mm(a, s_wo, s_bo)

    # --- cross-attention over encoder outputs ---
    yn = _ln(y, c_lna[...], c_lnb[...])
    q = _mm(yn, c_wq, c_bq)
    kv = _mm(e, c_wkv, c_bkv)                       # fused [D, 2D] K/V projection
    a = _mha(q, kv[:, :d], kv[:, d:], smask_ref[...],
             heads=heads, batch=batch, sq=sq, sk=sk)
    y = y + _mm(a, c_wo, c_bo)

    # --- feed-forward ---
    yn = _ln(y, f_lna[...], f_lnb[...])
    h = jnp.maximum(_mm(yn, w1, b1), 0.0)
    y = y + _mm(h, w2, b2)

    o_ref[...] = y


def _ln_out_proj_kernel(y_ref, lna, lnb, w_ref, b_ref, o_ref):
    """Final decoder Norm fused with the (vocab-padded, lane-dense) projection."""
    yn = _ln(y_ref[...], lna[...], lnb[...])
    o_ref[...] = _mm(yn, w_ref, b_ref)


# ----------------------------------------------------------------------------
# Pallas wrappers — single grid step, everything resident in VMEM
# ----------------------------------------------------------------------------

def encoder_layer(x, mask, p, enc_norm, *, heads, batch, seq, apply_final_ln):
    M, D = x.shape
    args = [
        x, mask,
        p["ln1_a"].reshape(1, D), p["ln1_b"].reshape(1, D),
        p["wqkv"], p["bqkv"].reshape(1, 3 * D),
        p["wo"], p["bo"].reshape(1, D),
        p["ln2_a"].reshape(1, D), p["ln2_b"].reshape(1, D),
        p["w1"], p["b1"].reshape(1, -1),
        p["w2"], p["b2"].reshape(1, D),
        enc_norm[0].reshape(1, D), enc_norm[1].reshape(1, D),
    ]
    return pl.pallas_call(
        functools.partial(_encoder_layer_kernel, heads=heads, batch=batch,
                          seq=seq, apply_final_ln=apply_final_ln),
        out_shape=jax.ShapeDtypeStruct((M, D), jnp.float32),
        in_specs=_vmem_specs(len(args)),
        out_specs=pl.BlockSpec(memory_space=pltpu.MemorySpace.VMEM),
        compiler_params=_COMPILER_PARAMS,
    )(*args)


def decoder_layer(y, e_out, src_mask, trg_mask, p, *, heads, batch, sq, sk):
    M, D = y.shape
    args = [
        y, e_out, src_mask, trg_mask,
        p["s_ln_a"].reshape(1, D), p["s_ln_b"].reshape(1, D),
        p["s_wqkv"], p["s_bqkv"].reshape(1, 3 * D),
        p["s_wo"], p["s_bo"].reshape(1, D),
        p["c_ln_a"].reshape(1, D), p["c_ln_b"].reshape(1, D),
        p["c_wq"], p["c_bq"].reshape(1, D),
        p["c_wkv"], p["c_bkv"].reshape(1, 2 * D),
        p["c_wo"], p["c_bo"].reshape(1, D),
        p["f_ln_a"].reshape(1, D), p["f_ln_b"].reshape(1, D),
        p["w1"], p["b1"].reshape(1, -1),
        p["w2"], p["b2"].reshape(1, D),
    ]
    return pl.pallas_call(
        functools.partial(_decoder_layer_kernel, heads=heads, batch=batch,
                          sq=sq, sk=sk),
        out_shape=jax.ShapeDtypeStruct((M, D), jnp.float32),
        in_specs=_vmem_specs(len(args)),
        out_specs=pl.BlockSpec(memory_space=pltpu.MemorySpace.VMEM),
        compiler_params=_COMPILER_PARAMS,
    )(*args)


def ln_out_projection(y, ln_a, ln_b, w_pad, b_pad):
    M, D = y.shape
    Vp = w_pad.shape[1]
    args = [y, ln_a.reshape(1, D), ln_b.reshape(1, D), w_pad, b_pad.reshape(1, Vp)]
    return pl.pallas_call(
        _ln_out_proj_kernel,
        out_shape=jax.ShapeDtypeStruct((M, Vp), jnp.float32),
        in_specs=_vmem_specs(len(args)),
        out_specs=pl.BlockSpec(memory_space=pltpu.MemorySpace.VMEM),
        compiler_params=_COMPILER_PARAMS,
    )(*args)


# ----------------------------------------------------------------------------
# Model forward (glue in plain JAX; hot path = 5 fused Pallas kernels)
# ----------------------------------------------------------------------------

def embedder(tokens, table, pe, d_model):
    x = table[tokens]                               # embedding gather (glue)
    x = x * jnp.sqrt(jnp.float32(d_model))          # * sqrt(d_model)
    x = x + pe[: tokens.shape[1]][None]             # positional encoding
    return x                                        # dropout = identity (eval)


def transformer_forward(params, src, trg, src_mask, trg_mask, *, heads, d_model,
                        trg_vocab):
    B, Ss = src.shape
    _, St = trg.shape

    # ---- Encoder: one fused kernel per layer; final Norm fused into last layer
    x = embedder(src, params["src_embed"], params["pe"], d_model)
    x = x.reshape(B * Ss, d_model)
    n_enc = len(params["enc_layers"])
    for li, lp in enumerate(params["enc_layers"]):
        x = encoder_layer(x, src_mask, lp,
                          (params["enc_norm_a"], params["enc_norm_b"]),
                          heads=heads, batch=B, seq=Ss,
                          apply_final_ln=(li == n_enc - 1))
    e_out = x                                        # [B*Ss, D], already normed

    # ---- Decoder: one fused kernel per layer
    y = embedder(trg, params["trg_embed"], params["pe"], d_model)
    y = y.reshape(B * St, d_model)
    for lp in params["dec_layers"]:
        y = decoder_layer(y, e_out, src_mask, trg_mask, lp,
                          heads=heads, batch=B, sq=St, sk=Ss)

    # ---- Final decoder Norm fused into the lane-dense vocab projection
    logits_p = ln_out_projection(y, params["dec_norm_a"], params["dec_norm_b"],
                                 params["out_w_pad"], params["out_b_pad"])
    return logits_p[:, :trg_vocab].reshape(B, St, trg_vocab)


# ----------------------------------------------------------------------------
# Deterministic parameter construction
# ----------------------------------------------------------------------------

def _positional_encoding(max_seq_len, d_model):
    pos = jnp.arange(max_seq_len, dtype=jnp.float32)[:, None]
    i = jnp.arange(d_model // 2, dtype=jnp.float32)[None, :]
    angles = pos / jnp.power(10000.0, (2.0 * i) / d_model)
    pe = jnp.zeros((max_seq_len, d_model), jnp.float32)
    pe = pe.at[:, 0::2].set(jnp.sin(angles))
    pe = pe.at[:, 1::2].set(jnp.cos(angles))
    return pe


def make_params(key, src_vocab, trg_vocab, d_model, N, heads, d_ff, max_seq_len):
    keys = iter(jax.random.split(key, 1024))

    def w(shape, scale=0.02, dtype=jnp.bfloat16):
        return (jax.random.normal(next(keys), shape, jnp.float32) * scale).astype(dtype)

    def zeros(n):
        return jnp.zeros((n,), jnp.float32)

    def ones(n):
        return jnp.ones((n,), jnp.float32)

    def enc_layer_params():
        return dict(
            ln1_a=ones(d_model), ln1_b=zeros(d_model),
            wqkv=w((d_model, 3 * d_model)), bqkv=zeros(3 * d_model),
            wo=w((d_model, d_model)), bo=zeros(d_model),
            ln2_a=ones(d_model), ln2_b=zeros(d_model),
            w1=w((d_model, d_ff)), b1=zeros(d_ff),
            w2=w((d_ff, d_model)), b2=zeros(d_model),
        )

    def dec_layer_params():
        return dict(
            s_ln_a=ones(d_model), s_ln_b=zeros(d_model),
            s_wqkv=w((d_model, 3 * d_model)), s_bqkv=zeros(3 * d_model),
            s_wo=w((d_model, d_model)), s_bo=zeros(d_model),
            c_ln_a=ones(d_model), c_ln_b=zeros(d_model),
            c_wq=w((d_model, d_model)), c_bq=zeros(d_model),
            c_wkv=w((d_model, 2 * d_model)), c_bkv=zeros(2 * d_model),
            c_wo=w((d_model, d_model)), c_bo=zeros(d_model),
            f_ln_a=ones(d_model), f_ln_b=zeros(d_model),
            w1=w((d_model, d_ff)), b1=zeros(d_ff),
            w2=w((d_ff, d_model)), b2=zeros(d_model),
        )

    enc_layers = [enc_layer_params() for _ in range(N)]
    dec_layers = [dec_layer_params() for _ in range(N)]

    # Output projection: vocab padded to a multiple of 128 for lane-dense stores.
    vocab_pad = ((trg_vocab + 127) // 128) * 128
    out_w = jax.random.normal(next(keys), (d_model, trg_vocab), jnp.float32) * 0.02
    out_w_pad = (jnp.zeros((d_model, vocab_pad), jnp.float32)
                 .at[:, :trg_vocab].set(out_w).astype(jnp.bfloat16))
    out_b_pad = jnp.zeros((vocab_pad,), jnp.float32)

    return dict(
        src_embed=w((src_vocab, d_model), 0.1, jnp.float32),
        trg_embed=w((trg_vocab, d_model), 0.1, jnp.float32),
        pe=_positional_encoding(max_seq_len, d_model),
        enc_layers=enc_layers,
        dec_layers=dec_layers,
        enc_norm_a=ones(d_model), enc_norm_b=zeros(d_model),
        dec_norm_a=ones(d_model), dec_norm_b=zeros(d_model),
        out_w_pad=out_w_pad, out_b_pad=out_b_pad,
    )


# ----------------------------------------------------------------------------
# Main
# ----------------------------------------------------------------------------

if __name__ == "__main__":
    B = 2
    S_SRC = 8
    S_TRG = 8
    SRC_VOCAB = 11
    TRG_VOCAB = 13
    D_MODEL = 32            # embed_dim == d_model for the residual stream
    N_LAYERS = 2
    HEADS = 4
    D_FF = 64
    MAX_SEQ_LEN = 16

    key = jax.random.PRNGKey(0)
    kp, ks, kt = jax.random.split(key, 3)

    params = make_params(kp, SRC_VOCAB, TRG_VOCAB, D_MODEL, N_LAYERS, HEADS,
                         D_FF, MAX_SEQ_LEN)

    src = jax.random.randint(ks, (B, S_SRC), 0, SRC_VOCAB, dtype=jnp.int32)
    trg = jax.random.randint(kt, (B, S_TRG), 0, TRG_VOCAB, dtype=jnp.int32)

    # src_mask: [B, 1, S_src] (all valid); trg_mask: [B, S_trg, S_trg] (causal)
    src_mask = jnp.ones((B, 1, S_SRC), jnp.int32)
    trg_mask = jnp.tril(jnp.ones((S_TRG, S_TRG), jnp.int32))[None].repeat(B, axis=0)

    fwd = jax.jit(functools.partial(transformer_forward,
                                    heads=HEADS, d_model=D_MODEL,
                                    trg_vocab=TRG_VOCAB))
    out = fwd(params, src, trg, src_mask, trg_mask)
    out = jax.block_until_ready(out)

    assert out.shape == (B, S_TRG, TRG_VOCAB), out.shape
    assert bool(jnp.all(jnp.isfinite(out)))
    print("KERNEL_OK")
</pallas_src>

<mosaic_0001>
module attributes {stable_mosaic.version = 11 : i64} {
  func.func @_encoder_layer_kernel(%arg0: memref<16x32xf32, #tpu.memory_space<vmem>>, %arg1: memref<2x1x8xi32, #tpu.memory_space<vmem>>, %arg2: memref<1x32xf32, #tpu.memory_space<vmem>>, %arg3: memref<1x32xf32, #tpu.memory_space<vmem>>, %arg4: memref<32x96xbf16, #tpu.memory_space<vmem>>, %arg5: memref<1x96xf32, #tpu.memory_space<vmem>>, %arg6: memref<32x32xbf16, #tpu.memory_space<vmem>>, %arg7: memref<1x32xf32, #tpu.memory_space<vmem>>, %arg8: memref<1x32xf32, #tpu.memory_space<vmem>>, %arg9: memref<1x32xf32, #tpu.memory_space<vmem>>, %arg10: memref<32x64xbf16, #tpu.memory_space<vmem>>, %arg11: memref<1x64xf32, #tpu.memory_space<vmem>>, %arg12: memref<64x32xbf16, #tpu.memory_space<vmem>>, %arg13: memref<1x32xf32, #tpu.memory_space<vmem>>, %arg14: memref<1x32xf32, #tpu.memory_space<vmem>>, %arg15: memref<1x32xf32, #tpu.memory_space<vmem>>, %arg16: memref<16x32xf32, #tpu.memory_space<vmem>>) attributes {dimension_semantics = [], scalar_prefetch = 0 : i64, scratch_operands = 0 : i64, tpu.core_type = #tpu.core_type<tc>} {
    %c0 = arith.constant 0 : index
    %c0_0 = arith.constant 0 : index
    %0 = vector.load %arg0[%c0, %c0_0] : memref<16x32xf32, #tpu.memory_space<vmem>>, vector<16x32xf32>
    %c0_1 = arith.constant 0 : index
    %c0_2 = arith.constant 0 : index
    %c0_3 = arith.constant 0 : index
    %1 = vector.load %arg1[%c0_1, %c0_2, %c0_3] : memref<2x1x8xi32, #tpu.memory_space<vmem>>, vector<2x1x8xi32>
    %c0_4 = arith.constant 0 : index
    %c0_5 = arith.constant 0 : index
    %2 = vector.load %arg2[%c0_4, %c0_5] : memref<1x32xf32, #tpu.memory_space<vmem>>, vector<1x32xf32>
    %c0_6 = arith.constant 0 : index
    %c0_7 = arith.constant 0 : index
    %3 = vector.load %arg3[%c0_6, %c0_7] : memref<1x32xf32, #tpu.memory_space<vmem>>, vector<1x32xf32>
    %cst = arith.constant dense<0.000000e+00> : vector<16xf32>
    %4 = vector.multi_reduction <add>, %0, %cst [1] : vector<16x32xf32> to vector<16xf32>
    %5 = vector.shape_cast %4 : vector<16xf32> to vector<16x1xf32>
    %cst_8 = arith.constant 3.200000e+01 : f32
    %6 = vector.broadcast %cst_8 : f32 to vector<16x1xf32>
    %7 = arith.divf %5, %6 : vector<16x1xf32>
    %8 = vector.broadcast %7 : vector<16x1xf32> to vector<16x32xf32>
    %9 = arith.subf %0, %8 : vector<16x32xf32>
    %10 = arith.mulf %9, %9 : vector<16x32xf32>
    %cst_9 = arith.constant dense<0.000000e+00> : vector<16xf32>
    %11 = vector.multi_reduction <add>, %10, %cst_9 [1] : vector<16x32xf32> to vector<16xf32>
    %12 = vector.shape_cast %11 : vector<16xf32> to vector<16x1xf32>
    %cst_10 = arith.constant 0.0322580636 : f32
    %13 = vector.broadcast %cst_10 : f32 to vector<16x1xf32>
    %14 = arith.mulf %12, %13 : vector<16x1xf32>
    %15 = vector.broadcast %2 : vector<1x32xf32> to vector<16x32xf32>
    %16 = arith.mulf %15, %9 : vector<16x32xf32>
    %17 = math.sqrt %14 : vector<16x1xf32>
    %cst_11 = arith.constant 9.99999997E-7 : f32
    %18 = vector.broadcast %cst_11 : f32 to vector<16x1xf32>
    %19 = arith.addf %17, %18 : vector<16x1xf32>
    %20 = vector.broadcast %19 : vector<16x1xf32> to vector<16x32xf32>
    %21 = arith.divf %16, %20 : vector<16x32xf32>
    %22 = vector.broadcast %3 : vector<1x32xf32> to vector<16x32xf32>
    %23 = arith.addf %21, %22 : vector<16x32xf32>
    %24 = arith.truncf %23 : vector<16x32xf32> to vector<16x32xbf16>
    %c0_12 = arith.constant 0 : index
    %c0_13 = arith.constant 0 : index
    %25 = vector.load %arg4[%c0_12, %c0_13] : memref<32x96xbf16, #tpu.memory_space<vmem>>, vector<32x96xbf16>
    %cst_14 = arith.constant dense<0.000000e+00> : vector<16x96xf32>
    %26 = tpu.matmul %24, %25, %cst_14 {dimension_numbers = #tpu.dot_dimension_numbers<[1], [0], [0], [1], [0, 0, 1, 1], [], []>} : vector<16x32xbf16>, vector<32x96xbf16>, vector<16x96xf32> -> vector<16x96xf32>
    %c0_15 = arith.constant 0 : index
    %c0_16 = arith.constant 0 : index
    %27 = vector.load %arg5[%c0_15, %c0_16] : memref<1x96xf32, #tpu.memory_space<vmem>>, vector<1x96xf32>
    %28 = vector.broadcast %27 : vector<1x96xf32> to vector<16x96xf32>
    %29 = arith.addf %26, %28 : vector<16x96xf32>
    %30 = vector.extract_strided_slice %29 {offsets = [0, 0], sizes = [16, 32], strides = [1, 1]} : vector<16x96xf32> to vector<16x32xf32>
    %31 = vector.extract_strided_slice %29 {offsets = [0, 32], sizes = [16, 32], strides = [1, 1]} : vector<16x96xf32> to vector<16x32xf32>
    %32 = vector.extract_strided_slice %29 {offsets = [0, 64], sizes = [16, 32], strides = [1, 1]} : vector<16x96xf32> to vector<16x32xf32>
    %33 = arith.truncf %30 : vector<16x32xf32> to vector<16x32xbf16>
    %34 = arith.truncf %31 : vector<16x32xf32> to vector<16x32xbf16>
    %35 = arith.truncf %32 : vector<16x32xf32> to vector<16x32xbf16>
    %36 = vector.extract_strided_slice %1 {offsets = [0, 0, 0], sizes = [1, 1, 8], strides = [1, 1, 1]} : vector<2x1x8xi32> to vector<1x1x8xi32>
    %37 = vector.shape_cast %36 : vector<1x1x8xi32> to vector<1x8xi32>
    %38 = vector.extract_strided_slice %33 {offsets = [0, 0], sizes = [8, 32], strides = [1, 1]} : vector<16x32xbf16> to vector<8x32xbf16>
    %39 = vector.extract_strided_slice %34 {offsets = [0, 0], sizes = [8, 32], strides = [1, 1]} : vector<16x32xbf16> to vector<8x32xbf16>
    %40 = vector.extract_strided_slice %35 {offsets = [0, 0], sizes = [8, 32], strides = [1, 1]} : vector<16x32xbf16> to vector<8x32xbf16>
    %41 = vector.extract_strided_slice %38 {offsets = [0, 0], sizes = [8, 8], strides = [1, 1]} : vector<8x32xbf16> to vector<8x8xbf16>
    %42 = vector.extract_strided_slice %39 {offsets = [0, 0], sizes = [8, 8], strides = [1, 1]} : vector<8x32xbf16> to vector<8x8xbf16>
    %43 = vector.extract_strided_slice %40 {offsets = [0, 0], sizes = [8, 8], strides = [1, 1]} : vector<8x32xbf16> to vector<8x8xbf16>
    %cst_17 = arith.constant dense<0.000000e+00> : vector<8x8xf32>
    %44 = tpu.matmul %41, %42, %cst_17 {dimension_numbers = #tpu.dot_dimension_numbers<[1], [1], [0], [0], [0, 0, 1, 0], [], []>} : vector<8x8xbf16>, vector<8x8xbf16>, vector<8x8xf32> -> vector<8x8xf32>
    %cst_18 = arith.constant 0.353553385 : f32
    %45 = vector.broadcast %cst_18 : f32 to vector<8x8xf32>
    %46 = arith.mulf %44, %45 : vector<8x8xf32>
    %c0_i32 = arith.constant 0 : i32
    %47 = vector.broadcast %c0_i32 : i32 to vector<1x8xi32>
    %48 = arith.cmpi eq, %37, %47 : vector<1x8xi32>
    %cst_19 = arith.constant -1.000000e+09 : f32
    %49 = vector.shape_cast %48 : vector<1x8xi1> to vector<1x8xi1>
    %50 = vector.broadcast %49 : vector<1x8xi1> to vector<8x8xi1>
    %51 = vector.broadcast %cst_19 : f32 to vector<8x8xf32>
    %52 = arith.select %50, %51, %46 : vector<8x8xi1>, vector<8x8xf32>
    %cst_20 = arith.constant dense<0xFF800000> : vector<8xf32>
    %53 = vector.multi_reduction <maximumf>, %52, %cst_20 [1] : vector<8x8xf32> to vector<8xf32>
    %54 = vector.shape_cast %53 : vector<8xf32> to vector<8x1xf32>
    %55 = vector.broadcast %54 : vector<8x1xf32> to vector<8x8xf32>
    %56 = arith.subf %52, %55 : vector<8x8xf32>
    %57 = math.exp %56 : vector<8x8xf32>
    %cst_21 = arith.constant dense<0.000000e+00> : vector<8xf32>
    %58 = vector.multi_reduction <add>, %57, %cst_21 [1] : vector<8x8xf32> to vector<8xf32>
    %59 = vector.shape_cast %58 : vector<8xf32> to vector<8x1xf32>
    %60 = tpu.reciprocal %59 {approx = true} : vector<8x1xf32> -> vector<8x1xf32>
    %61 = vector.broadcast %60 : vector<8x1xf32> to vector<8x8xf32>
    %62 = arith.mulf %57, %61 : vector<8x8xf32>
    %63 = arith.truncf %62 : vector<8x8xf32> to vector<8x8xbf16>
    %cst_22 = arith.constant dense<0.000000e+00> : vector<8x8xf32>
    %64 = tpu.matmul %63, %43, %cst_22 {dimension_numbers = #tpu.dot_dimension_numbers<[1], [0], [0], [1], [0, 0, 1, 1], [], []>} : vector<8x8xbf16>, vector<8x8xbf16>, vector<8x8xf32> -> vector<8x8xf32>
    %65 = vector.extract_strided_slice %38 {offsets = [0, 8], sizes = [8, 8], strides = [1, 1]} : vector<8x32xbf16> to vector<8x8xbf16>
    %66 = vector.extract_strided_slice %39 {offsets = [0, 8], sizes = [8, 8], strides = [1, 1]} : vector<8x32xbf16> to vector<8x8xbf16>
    %67 = vector.extract_strided_slice %40 {offsets = [0, 8], sizes = [8, 8], strides = [1, 1]} : vector<8x32xbf16> to vector<8x8xbf16>
    %cst_23 = arith.constant dense<0.000000e+00> : vector<8x8xf32>
    %68 = tpu.matmul %65, %66, %cst_23 {dimension_numbers = #tpu.dot_dimension_numbers<[1], [1], [0], [0], [0, 0, 1, 0], [], []>} : vector<8x8xbf16>, vector<8x8xbf16>, vector<8x8xf32> -> vector<8x8xf32>
    %cst_24 = arith.constant 0.353553385 : f32
    %69 = vector.broadcast %cst_24 : f32 to vector<8x8xf32>
    %70 = arith.mulf %68, %69 : vector<8x8xf32>
    %c0_i32_25 = arith.constant 0 : i32
    %71 = vector.broadcast %c0_i32_25 : i32 to vector<1x8xi32>
    %72 = arith.cmpi eq, %37, %71 : vector<1x8xi32>
    %cst_26 = arith.constant -1.000000e+09 : f32
    %73 = vector.shape_cast %72 : vector<1x8xi1> to vector<1x8xi1>
    %74 = vector.broadcast %73 : vector<1x8xi1> to vector<8x8xi1>
    %75 = vector.broadcast %cst_26 : f32 to vector<8x8xf32>
    %76 = arith.select %74, %75, %70 : vector<8x8xi1>, vector<8x8xf32>
    %cst_27 = arith.constant dense<0xFF800000> : vector<8xf32>
    %77 = vector.multi_reduction <maximumf>, %76, %cst_27 [1] : vector<8x8xf32> to vector<8xf32>
    %78 = vector.shape_cast %77 : vector<8xf32> to vector<8x1xf32>
    %79 = vector.broadcast %78 : vector<8x1xf32> to vector<8x8xf32>
    %80 = arith.subf %76, %79 : vector<8x8xf32>
    %81 = math.exp %80 : vector<8x8xf32>
    %cst_28 = arith.constant dense<0.000000e+00> : vector<8xf32>
    %82 = vector.multi_reduction <add>, %81, %cst_28 [1] : vector<8x8xf32> to vector<8xf32>
    %83 = vector.shape_cast %82 : vector<8xf32> to vector<8x1xf32>
    %84 = tpu.reciprocal %83 {approx = true} : vector<8x1xf32> -> vector<8x1xf32>
    %85 = vector.broadcast %84 : vector<8x1xf32> to vector<8x8xf32>
    %86 = arith.mulf %81, %85 : vector<8x8xf32>
    %87 = arith.truncf %86 : vector<8x8xf32> to vector<8x8xbf16>
    %cst_29 = arith.constant dense<0.000000e+00> : vector<8x8xf32>
    %88 = tpu.matmul %87, %67, %cst_29 {dimension_numbers = #tpu.dot_dimension_numbers<[1], [0], [0], [1], [0, 0, 1, 1], [], []>} : vector<8x8xbf16>, vector<8x8xbf16>, vector<8x8xf32> -> vector<8x8xf32>
    %89 = vector.extract_strided_slice %38 {offsets = [0, 16], sizes = [8, 8], strides = [1, 1]} : vector<8x32xbf16> to vector<8x8xbf16>
    %90 = vector.extract_strided_slice %39 {offsets = [0, 16], sizes = [8, 8], strides = [1, 1]} : vector<8x32xbf16> to vector<8x8xbf16>
    %91 = vector.extract_strided_slice %40 {offsets = [0, 16], sizes = [8, 8], strides = [1, 1]} : vector<8x32xbf16> to vector<8x8xbf16>
    %cst_30 = arith.constant dense<0.000000e+00> : vector<8x8xf32>
    %92 = tpu.matmul %89, %90, %cst_30 {dimension_numbers = #tpu.dot_dimension_numbers<[1], [1], [0], [0], [0, 0, 1, 0], [], []>} : vector<8x8xbf16>, vector<8x8xbf16>, vector<8x8xf32> -> vector<8x8xf32>
    %cst_31 = arith.constant 0.353553385 : f32
    %93 = vector.broadcast %cst_31 : f32 to vector<8x8xf32>
    %94 = arith.mulf %92, %93 : vector<8x8xf32>
    %c0_i32_32 = arith.constant 0 : i32
    %95 = vector.broadcast %c0_i32_32 : i32 to vector<1x8xi32>
    %96 = arith.cmpi eq, %37, %95 : vector<1x8xi32>
    %cst_33 = arith.constant -1.000000e+09 : f32
    %97 = vector.shape_cast %96 : vector<1x8xi1> to vector<1x8xi1>
    %98 = vector.broadcast %97 : vector<1x8xi1> to vector<8x8xi1>
    %99 = vector.broadcast %cst_33 : f32 to vector<8x8xf32>
    %100 = arith.select %98, %99, %94 : vector<8x8xi1>, vector<8x8xf32>
    %cst_34 = arith.constant dense<0xFF800000> : vector<8xf32>
    %101 = vector.multi_reduction <maximumf>, %100, %cst_34 [1] : vector<8x8xf32> to vector<8xf32>
    %102 = vector.shape_cast %101 : vector<8xf32> to vector<8x1xf32>
    %103 = vector.broadcast %102 : vector<8x1xf32> to vector<8x8xf32>
    %104 = arith.subf %100, %103 : vector<8x8xf32>
    %105 = math.exp %104 : vector<8x8xf32>
    %cst_35 = arith.constant dense<0.000000e+00> : vector<8xf32>
    %106 = vector.multi_reduction <add>, %105, %cst_35 [1] : vector<8x8xf32> to vector<8xf32>
    %107 = vector.shape_cast %106 : vector<8xf32> to vector<8x1xf32>
    %108 = tpu.reciprocal %107 {approx = true} : vector<8x1xf32> -> vector<8x1xf32>
    %109 = vector.broadcast %108 : vector<8x1xf32> to vector<8x8xf32>
    %110 = arith.mulf %105, %109 : vector<8x8xf32>
    %111 = arith.truncf %110 : vector<8x8xf32> to vector<8x8xbf16>
    %cst_36 = arith.constant dense<0.000000e+00> : vector<8x8xf32>
    %112 = tpu.matmul %111, %91, %cst_36 {dimension_numbers = #tpu.dot_dimension_numbers<[1], [0], [0], [1], [0, 0, 1, 1], [], []>} : vector<8x8xbf16>, vector<8x8xbf16>, vector<8x8xf32> -> vector<8x8xf32>
    %113 = vector.extract_strided_slice %38 {offsets = [0, 24], sizes = [8, 8], strides = [1, 1]} : vector<8x32xbf16> to vector<8x8xbf16>
    %114 = vector.extract_strided_slice %39 {offsets = [0, 24], sizes = [8, 8], strides = [1, 1]} : vector<8x32xbf16> to vector<8x8xbf16>
    %115 = vector.extract_strided_slice %40 {offsets = [0, 24], sizes = [8, 8], strides = [1, 1]} : vector<8x32xbf16> to vector<8x8xbf16>
    %cst_37 = arith.constant dense<0.000000e+00> : vector<8x8xf32>
    %116 = tpu.matmul %113, %114, %cst_37 {dimension_numbers = #tpu.dot_dimension_numbers<[1], [1], [0], [0], [0, 0, 1, 0], [], []>} : vector<8x8xbf16>, vector<8x8xbf16>, vector<8x8xf32> -> vector<8x8xf32>
    %cst_38 = arith.constant 0.353553385 : f32
    %117 = vector.broadcast %cst_38 : f32 to vector<8x8xf32>
    %118 = arith.mulf %116, %117 : vector<8x8xf32>
    %c0_i32_39 = arith.constant 0 : i32
    %119 = vector.broadcast %c0_i32_39 : i32 to vector<1x8xi32>
    %120 = arith.cmpi eq, %37, %119 : vector<1x8xi32>
    %cst_40 = arith.constant -1.000000e+09 : f32
    %121 = vector.shape_cast %120 : vector<1x8xi1> to vector<1x8xi1>
    %122 = vector.broadcast %121 : vector<1x8xi1> to vector<8x8xi1>
    %123 = vector.broadcast %cst_40 : f32 to vector<8x8xf32>
    %124 = arith.select %122, %123, %118 : vector<8x8xi1>, vector<8x8xf32>
    %cst_41 = arith.constant dense<0xFF800000> : vector<8xf32>
    %125 = vector.multi_reduction <maximumf>, %124, %cst_41 [1] : vector<8x8xf32> to vector<8xf32>
    %126 = vector.shape_cast %125 : vector<8xf32> to vector<8x1xf32>
    %127 = vector.broadcast %126 : vector<8x1xf32> to vector<8x8xf32>
    %128 = arith.subf %124, %127 : vector<8x8xf32>
    %129 = math.exp %128 : vector<8x8xf32>
    %cst_42 = arith.constant dense<0.000000e+00> : vector<8xf32>
    %130 = vector.multi_reduction <add>, %129, %cst_42 [1] : vector<8x8xf32> to vector<8xf32>
    %131 = vector.shape_cast %130 : vector<8xf32> to vector<8x1xf32>
    %132 = tpu.reciprocal %131 {approx = true} : vector<8x1xf32> -> vector<8x1xf32>
    %133 = vector.broadcast %132 : vector<8x1xf32> to vector<8x8xf32>
    %134 = arith.mulf %129, %133 : vector<8x8xf32>
    %135 = arith.truncf %134 : vector<8x8xf32> to vector<8x8xbf16>
    %cst_43 = arith.constant dense<0.000000e+00> : vector<8x8xf32>
    %136 = tpu.matmul %135, %115, %cst_43 {dimension_numbers = #tpu.dot_dimension_numbers<[1], [0], [0], [1], [0, 0, 1, 1], [], []>} : vector<8x8xbf16>, vector<8x8xbf16>, vector<8x8xf32> -> vector<8x8xf32>
    %137 = tpu.concatenate %64, %88, %112, %136 in 1 : vector<8x8xf32>, vector<8x8xf32>, vector<8x8xf32>, vector<8x8xf32> -> vector<8x32xf32>
    %138 = vector.extract_strided_slice %1 {offsets = [1, 0, 0], sizes = [1, 1, 8], strides = [1, 1, 1]} : vector<2x1x8xi32> to vector<1x1x8xi32>
    %139 = vector.shape_cast %138 : vector<1x1x8xi32> to vector<1x8xi32>
    %140 = vector.extract_strided_slice %33 {offsets = [8, 0], sizes = [8, 32], strides = [1, 1]} : vector<16x32xbf16> to vector<8x32xbf16>
    %141 = vector.extract_strided_slice %34 {offsets = [8, 0], sizes = [8, 32], strides = [1, 1]} : vector<16x32xbf16> to vector<8x32xbf16>
    %142 = vector.extract_strided_slice %35 {offsets = [8, 0], sizes = [8, 32], strides = [1, 1]} : vector<16x32xbf16> to vector<8x32xbf16>
    %143 = vector.extract_strided_slice %140 {offsets = [0, 0], sizes = [8, 8], strides = [1, 1]} : vector<8x32xbf16> to vector<8x8xbf16>
    %144 = vector.extract_strided_slice %141 {offsets = [0, 0], sizes = [8, 8], strides = [1, 1]} : vector<8x32xbf16> to vector<8x8xbf16>
    %145 = vector.extract_strided_slice %142 {offsets = [0, 0], sizes = [8, 8], strides = [1, 1]} : vector<8x32xbf16> to vector<8x8xbf16>
    %cst_44 = arith.constant dense<0.000000e+00> : vector<8x8xf32>
    %146 = tpu.matmul %143, %144, %cst_44 {dimension_numbers = #tpu.dot_dimension_numbers<[1], [1], [0], [0], [0, 0, 1, 0], [], []>} : vector<8x8xbf16>, vector<8x8xbf16>, vector<8x8xf32> -> vector<8x8xf32>
    %cst_45 = arith.constant 0.353553385 : f32
    %147 = vector.broadcast %cst_45 : f32 to vector<8x8xf32>
    %148 = arith.mulf %146, %147 : vector<8x8xf32>
    %c0_i32_46 = arith.constant 0 : i32
    %149 = vector.broadcast %c0_i32_46 : i32 to vector<1x8xi32>
    %150 = arith.cmpi eq, %139, %149 : vector<1x8xi32>
    %cst_47 = arith.constant -1.000000e+09 : f32
    %151 = vector.shape_cast %150 : vector<1x8xi1> to vector<1x8xi1>
    %152 = vector.broadcast %151 : vector<1x8xi1> to vector<8x8xi1>
    %153 = vector.broadcast %cst_47 : f32 to vector<8x8xf32>
    %154 = arith.select %152, %153, %148 : vector<8x8xi1>, vector<8x8xf32>
    %cst_48 = arith.constant dense<0xFF800000> : vector<8xf32>
    %155 = vector.multi_reduction <maximumf>, %154, %cst_48 [1] : vector<8x8xf32> to vector<8xf32>
    %156 = vector.shape_cast %155 : vector<8xf32> to vector<8x1xf32>
    %157 = vector.broadcast %156 : vector<8x1xf32> to vector<8x8xf32>
    %158 = arith.subf %154, %157 : vector<8x8xf32>
    %159 = math.exp %158 : vector<8x8xf32>
    %cst_49 = arith.constant dense<0.000000e+00> : vector<8xf32>
    %160 = vector.multi_reduction <add>, %159, %cst_49 [1] : vector<8x8xf32> to vector<8xf32>
    %161 = vector.shape_cast %160 : vector<8xf32> to vector<8x1xf32>
    %162 = tpu.reciprocal %161 {approx = true} : vector<8x1xf32> -> vector<8x1xf32>
    %163 = vector.broadcast %162 : vector<8x1xf32> to vector<8x8xf32>
    %164 = arith.mulf %159, %163 : vector<8x8xf32>
    %165 = arith.truncf %164 : vector<8x8xf32> to vector<8x8xbf16>
    %cst_50 = arith.constant dense<0.000000e+00> : vector<8x8xf32>
    %166 = tpu.matmul %165, %145, %cst_50 {dimension_numbers = #tpu.dot_dimension_numbers<[1], [0], [0], [1], [0, 0, 1, 1], [], []>} : vector<8x8xbf16>, vector<8x8xbf16>, vector<8x8xf32> -> vector<8x8xf32>
    %167 = vector.extract_strided_slice %140 {offsets = [0, 8], sizes = [8, 8], strides = [1, 1]} : vector<8x32xbf16> to vector<8x8xbf16>
    %168 = vector.extract_strided_slice %141 {offsets = [0, 8], sizes = [8, 8], strides = [1, 1]} : vector<8x32xbf16> to vector<8x8xbf16>
    %169 = vector.extract_strided_slice %142 {offsets = [0, 8], sizes = [8, 8], strides = [1, 1]} : vector<8x32xbf16> to vector<8x8xbf16>
    %cst_51 = arith.constant dense<0.000000e+00> : vector<8x8xf32>
    %170 = tpu.matmul %167, %168, %cst_51 {dimension_numbers = #tpu.dot_dimension_numbers<[1], [1], [0], [0], [0, 0, 1, 0], [], []>} : vector<8x8xbf16>, vector<8x8xbf16>, vector<8x8xf32> -> vector<8x8xf32>
    %cst_52 = arith.constant 0.353553385 : f32
    %171 = vector.broadcast %cst_52 : f32 to vector<8x8xf32>
    %172 = arith.mulf %170, %171 : vector<8x8xf32>
    %c0_i32_53 = arith.constant 0 : i32
    %173 = vector.broadcast %c0_i32_53 : i32 to vector<1x8xi32>
    %174 = arith.cmpi eq, %139, %173 : vector<1x8xi32>
    %cst_54 = arith.constant -1.000000e+09 : f32
    %175 = vector.shape_cast %174 : vector<1x8xi1> to vector<1x8xi1>
    %176 = vector.broadcast %175 : vector<1x8xi1> to vector<8x8xi1>
    %177 = vector.broadcast %cst_54 : f32 to vector<8x8xf32>
    %178 = arith.select %176, %177, %172 : vector<8x8xi1>, vector<8x8xf32>
    %cst_55 = arith.constant dense<0xFF800000> : vector<8xf32>
    %179 = vector.multi_reduction <maximumf>, %178, %cst_55 [1] : vector<8x8xf32> to vector<8xf32>
    %180 = vector.shape_cast %179 : vector<8xf32> to vector<8x1xf32>
    %181 = vector.broadcast %180 : vector<8x1xf32> to vector<8x8xf32>
    %182 = arith.subf %178, %181 : vector<8x8xf32>
    %183 = math.exp %182 : vector<8x8xf32>
    %cst_56 = arith.constant dense<0.000000e+00> : vector<8xf32>
    %184 = vector.multi_reduction <add>, %183, %cst_56 [1] : vector<8x8xf32> to vector<8xf32>
    %185 = vector.shape_cast %184 : vector<8xf32> to vector<8x1xf32>
    %186 = tpu.reciprocal %185 {approx = true} : vector<8x1xf32> -> vector<8x1xf32>
    %187 = vector.broadcast %186 : vector<8x1xf32> to vector<8x8xf32>
    %188 = arith.mulf %183, %187 : vector<8x8xf32>
    %189 = arith.truncf %188 : vector<8x8xf32> to vector<8x8xbf16>
    %cst_57 = arith.constant dense<0.000000e+00> : vector<8x8xf32>
    %190 = tpu.matmul %189, %169, %cst_57 {dimension_numbers = #tpu.dot_dimension_numbers<[1], [0], [0], [1], [0, 0, 1, 1], [], []>} : vector<8x8xbf16>, vector<8x8xbf16>, vector<8x8xf32> -> vector<8x8xf32>
    %191 = vector.extract_strided_slice %140 {offsets = [0, 16], sizes = [8, 8], strides = [1, 1]} : vector<8x32xbf16> to vector<8x8xbf16>
    %192 = vector.extract_strided_slice %141 {offsets = [0, 16], sizes = [8, 8], strides = [1, 1]} : vector<8x32xbf16> to vector<8x8xbf16>
    %193 = vector.extract_strided_slice %142 {offsets = [0, 16], sizes = [8, 8], strides = [1, 1]} : vector<8x32xbf16> to vector<8x8xbf16>
    %cst_58 = arith.constant dense<0.000000e+00> : vector<8x8xf32>
    %194 = tpu.matmul %191, %192, %cst_58 {dimension_numbers = #tpu.dot_dimension_numbers<[1], [1], [0], [0], [0, 0, 1, 0], [], []>} : vector<8x8xbf16>, vector<8x8xbf16>, vector<8x8xf32> -> vector<8x8xf32>
    %cst_59 = arith.constant 0.353553385 : f32
    %195 = vector.broadcast %cst_59 : f32 to vector<8x8xf32>
    %196 = arith.mulf %194, %195 : vector<8x8xf32>
    %c0_i32_60 = arith.constant 0 : i32
    %197 = vector.broadcast %c0_i32_60 : i32 to vector<1x8xi32>
    %198 = arith.cmpi eq, %139, %197 : vector<1x8xi32>
    %cst_61 = arith.constant -1.000000e+09 : f32
    %199 = vector.shape_cast %198 : vector<1x8xi1> to vector<1x8xi1>
    %200 = vector.broadcast %199 : vector<1x8xi1> to vector<8x8xi1>
    %201 = vector.broadcast %cst_61 : f32 to vector<8x8xf32>
    %202 = arith.select %200, %201, %196 : vector<8x8xi1>, vector<8x8xf32>
    %cst_62 = arith.constant dense<0xFF800000> : vector<8xf32>
    %203 = vector.multi_reduction <maximumf>, %202, %cst_62 [1] : vector<8x8xf32> to vector<8xf32>
    %204 = vector.shape_cast %203 : vector<8xf32> to vector<8x1xf32>
    %205 = vector.broadcast %204 : vector<8x1xf32> to vector<8x8xf32>
    %206 = arith.subf %202, %205 : vector<8x8xf32>
    %207 = math.exp %206 : vector<8x8xf32>
    %cst_63 = arith.constant dense<0.000000e+00> : vector<8xf32>
    %208 = vector.multi_reduction <add>, %207, %cst_63 [1] : vector<8x8xf32> to vector<8xf32>
    %209 = vector.shape_cast %208 : vector<8xf32> to vector<8x1xf32>
    %210 = tpu.reciprocal %209 {approx = true} : vector<8x1xf32> -> vector<8x1xf32>
    %211 = vector.broadcast %210 : vector<8x1xf32> to vector<8x8xf32>
    %212 = arith.mulf %207, %211 : vector<8x8xf32>
    %213 = arith.truncf %212 : vector<8x8xf32> to vector<8x8xbf16>
    %cst_64 = arith.constant dense<0.000000e+00> : vector<8x8xf32>
    %214 = tpu.matmul %213, %193, %cst_64 {dimension_numbers = #tpu.dot_dimension_numbers<[1], [0], [0], [1], [0, 0, 1, 1], [], []>} : vector<8x8xbf16>, vector<8x8xbf16>, vector<8x8xf32> -> vector<8x8xf32>
    %215 = vector.extract_strided_slice %140 {offsets = [0, 24], sizes = [8, 8], strides = [1, 1]} : vector<8x32xbf16> to vector<8x8xbf16>
    %216 = vector.extract_strided_slice %141 {offsets = [0, 24], sizes = [8, 8], strides = [1, 1]} : vector<8x32xbf16> to vector<8x8xbf16>
    %217 = vector.extract_strided_slice %142 {offsets = [0, 24], sizes = [8, 8], strides = [1, 1]} : vector<8x32xbf16> to vector<8x8xbf16>
    %cst_65 = arith.constant dense<0.000000e+00> : vector<8x8xf32>
    %218 = tpu.matmul %215, %216, %cst_65 {dimension_numbers = #tpu.dot_dimension_numbers<[1], [1], [0], [0], [0, 0, 1, 0], [], []>} : vector<8x8xbf16>, vector<8x8xbf16>, vector<8x8xf32> -> vector<8x8xf32>
    %cst_66 = arith.constant 0.353553385 : f32
    %219 = vector.broadcast %cst_66 : f32 to vector<8x8xf32>
    %220 = arith.mulf %218, %219 : vector<8x8xf32>
    %c0_i32_67 = arith.constant 0 : i32
    %221 = vector.broadcast %c0_i32_67 : i32 to vector<1x8xi32>
    %222 = arith.cmpi eq, %139, %221 : vector<1x8xi32>
    %cst_68 = arith.constant -1.000000e+09 : f32
    %223 = vector.shape_cast %222 : vector<1x8xi1> to vector<1x8xi1>
    %224 = vector.broadcast %223 : vector<1x8xi1> to vector<8x8xi1>
    %225 = vector.broadcast %cst_68 : f32 to vector<8x8xf32>
    %226 = arith.select %224, %225, %220 : vector<8x8xi1>, vector<8x8xf32>
    %cst_69 = arith.constant dense<0xFF800000> : vector<8xf32>
    %227 = vector.multi_reduction <maximumf>, %226, %cst_69 [1] : vector<8x8xf32> to vector<8xf32>
    %228 = vector.shape_cast %227 : vector<8xf32> to vector<8x1xf32>
    %229 = vector.broadcast %228 : vector<8x1xf32> to vector<8x8xf32>
    %230 = arith.subf %226, %229 : vector<8x8xf32>
    %231 = math.exp %230 : vector<8x8xf32>
    %cst_70 = arith.constant dense<0.000000e+00> : vector<8xf32>
    %232 = vector.multi_reduction <add>, %231, %cst_70 [1] : vector<8x8xf32> to vector<8xf32>
    %233 = vector.shape_cast %232 : vector<8xf32> to vector<8x1xf32>
    %234 = tpu.reciprocal %233 {approx = true} : vector<8x1xf32> -> vector<8x1xf32>
    %235 = vector.broadcast %234 : vector<8x1xf32> to vector<8x8xf32>
    %236 = arith.mulf %231, %235 : vector<8x8xf32>
    %237 = arith.truncf %236 : vector<8x8xf32> to vector<8x8xbf16>
    %cst_71 = arith.constant dense<0.000000e+00> : vector<8x8xf32>
    %238 = tpu.matmul %237, %217, %cst_71 {dimension_numbers = #tpu.dot_dimension_numbers<[1], [0], [0], [1], [0, 0, 1, 1], [], []>} : vector<8x8xbf16>, vector<8x8xbf16>, vector<8x8xf32> -> vector<8x8xf32>
    %239 = tpu.concatenate %166, %190, %214, %238 in 1 : vector<8x8xf32>, vector<8x8xf32>, vector<8x8xf32>, vector<8x8xf32> -> vector<8x32xf32>
    %240 = tpu.concatenate %137, %239 in 0 : vector<8x32xf32>, vector<8x32xf32> -> vector<16x32xf32>
    %241 = arith.truncf %240 : vector<16x32xf32> to vector<16x32xbf16>
    %c0_72 = arith.constant 0 : index
    %c0_73 = arith.constant 0 : index
    %242 = vector.load %arg6[%c0_72, %c0_73] : memref<32x32xbf16, #tpu.memory_space<vmem>>, vector<32x32xbf16>
    %cst_74 = arith.constant dense<0.000000e+00> : vector<16x32xf32>
    %243 = tpu.matmul %241, %242, %cst_74 {dimension_numbers = #tpu.dot_dimension_numbers<[1], [0], [0], [1], [0, 0, 1, 1], [], []>} : vector<16x32xbf16>, vector<32x32xbf16>, vector<16x32xf32> -> vector<16x32xf32>
    %c0_75 = arith.constant 0 : index
    %c0_76 = arith.constant 0 : index
    %244 = vector.load %arg7[%c0_75, %c0_76] : memref<1x32xf32, #tpu.memory_space<vmem>>, vector<1x32xf32>
    %245 = vector.broadcast %244 : vector<1x32xf32> to vector<16x32xf32>
    %246 = arith.addf %243, %245 : vector<16x32xf32>
    %247 = arith.addf %0, %246 : vector<16x32xf32>
    %c0_77 = arith.constant 0 : index
    %c0_78 = arith.constant 0 : index
    %248 = vector.load %arg8[%c0_77, %c0_78] : memref<1x32xf32, #tpu.memory_space<vmem>>, vector<1x32xf32>
    %c0_79 = arith.constant 0 : index
    %c0_80 = arith.constant 0 : index
    %249 = vector.load %arg9[%c0_79, %c0_80] : memref<1x32xf32, #tpu.memory_space<vmem>>, vector<1x32xf32>
    %cst_81 = arith.constant dense<0.000000e+00> : vector<16xf32>
    %250 = vector.multi_reduction <add>, %247, %cst_81 [1] : vector<16x32xf32> to vector<16xf32>
    %251 = vector.shape_cast %250 : vector<16xf32> to vector<16x1xf32>
    %cst_82 = arith.constant 3.200000e+01 : f32
    %252 = vector.broadcast %cst_82 : f32 to vector<16x1xf32>
    %253 = arith.divf %251, %252 : vector<16x1xf32>
    %254 = vector.broadcast %253 : vector<16x1xf32> to vector<16x32xf32>
    %255 = arith.subf %247, %254 : vector<16x32xf32>
    %256 = arith.mulf %255, %255 : vector<16x32xf32>
    %cst_83 = arith.constant dense<0.000000e+00> : vector<16xf32>
    %257 = vector.multi_reduction <add>, %256, %cst_83 [1] : vector<16x32xf32> to vector<16xf32>
    %258 = vector.shape_cast %257 : vector<16xf32> to vector<16x1xf32>
    %cst_84 = arith.constant 0.0322580636 : f32
    %259 = vector.broadcast %cst_84 : f32 to vector<16x1xf32>
    %260 = arith.mulf %258, %259 : vector<16x1xf32>
    %261 = vector.broadcast %248 : vector<1x32xf32> to vector<16x32xf32>
    %262 = arith.mulf %261, %255 : vector<16x32xf32>
    %263 = math.sqrt %260 : vector<16x1xf32>
    %cst_85 = arith.constant 9.99999997E-7 : f32
    %264 = vector.broadcast %cst_85 : f32 to vector<16x1xf32>
    %265 = arith.addf %263, %264 : vector<16x1xf32>
    %266 = vector.broadcast %265 : vector<16x1xf32> to vector<16x32xf32>
    %267 = arith.divf %262, %266 : vector<16x32xf32>
    %268 = vector.broadcast %249 : vector<1x32xf32> to vector<16x32xf32>
    %269 = arith.addf %267, %268 : vector<16x32xf32>
    %270 = arith.truncf %269 : vector<16x32xf32> to vector<16x32xbf16>
    %c0_86 = arith.constant 0 : index
    %c0_87 = arith.constant 0 : index
    %271 = vector.load %arg10[%c0_86, %c0_87] : memref<32x64xbf16, #tpu.memory_space<vmem>>, vector<32x64xbf16>
    %cst_88 = arith.constant dense<0.000000e+00> : vector<16x64xf32>
    %272 = tpu.matmul %270, %271, %cst_88 {dimension_numbers = #tpu.dot_dimension_numbers<[1], [0], [0], [1], [0, 0, 1, 1], [], []>} : vector<16x32xbf16>, vector<32x64xbf16>, vector<16x64xf32> -> vector<16x64xf32>
    %c0_89 = arith.constant 0 : index
    %c0_90 = arith.constant 0 : index
    %273 = vector.load %arg11[%c0_89, %c0_90] : memref<1x64xf32, #tpu.memory_space<vmem>>, vector<1x64xf32>
    %274 = vector.broadcast %273 : vector<1x64xf32> to vector<16x64xf32>
    %275 = arith.addf %272, %274 : vector<16x64xf32>
    %cst_91 = arith.constant 0.000000e+00 : f32
    %276 = vector.broadcast %cst_91 : f32 to vector<16x64xf32>
    %277 = arith.maximumf %275, %276 : vector<16x64xf32>
    %278 = arith.truncf %277 : vector<16x64xf32> to vector<16x64xbf16>
    %c0_92 = arith.constant 0 : index
    %c0_93 = arith.constant 0 : index
    %279 = vector.load %arg12[%c0_92, %c0_93] : memref<64x32xbf16, #tpu.memory_space<vmem>>, vector<64x32xbf16>
    %cst_94 = arith.constant dense<0.000000e+00> : vector<16x32xf32>
    %280 = tpu.matmul %278, %279, %cst_94 {dimension_numbers = #tpu.dot_dimension_numbers<[1], [0], [0], [1], [0, 0, 1, 1], [], []>} : vector<16x64xbf16>, vector<64x32xbf16>, vector<16x32xf32> -> vector<16x32xf32>
    %c0_95 = arith.constant 0 : index
    %c0_96 = arith.constant 0 : index
    %281 = vector.load %arg13[%c0_95, %c0_96] : memref<1x32xf32, #tpu.memory_space<vmem>>, vector<1x32xf32>
    %282 = vector.broadcast %281 : vector<1x32xf32> to vector<16x32xf32>
    %283 = arith.addf %280, %282 : vector<16x32xf32>
    %284 = arith.addf %247, %283 : vector<16x32xf32>
    %c0_97 = arith.constant 0 : index
    %c0_98 = arith.constant 0 : index
    %285 = vector.load %arg14[%c0_97, %c0_98] : memref<1x32xf32, #tpu.memory_space<vmem>>, vector<1x32xf32>
    %c0_99 = arith.constant 0 : index
    %c0_100 = arith.constant 0 : index
    %286 = vector.load %arg15[%c0_99, %c0_100] : memref<1x32xf32, #tpu.memory_space<vmem>>, vector<1x32xf32>
    %cst_101 = arith.constant dense<0.000000e+00> : vector<16xf32>
    %287 = vector.multi_reduction <add>, %284, %cst_101 [1] : vector<16x32xf32> to vector<16xf32>
    %288 = vector.shape_cast %287 : vector<16xf32> to vector<16x1xf32>
    %cst_102 = arith.constant 3.200000e+01 : f32
    %289 = vector.broadcast %cst_102 : f32 to vector<16x1xf32>
    %290 = arith.divf %288, %289 : vector<16x1xf32>
    %291 = vector.broadcast %290 : vector<16x1xf32> to vector<16x32xf32>
    %292 = arith.subf %284, %291 : vector<16x32xf32>
    %293 = arith.mulf %292, %292 : vector<16x32xf32>
    %cst_103 = arith.constant dense<0.000000e+00> : vector<16xf32>
    %294 = vector.multi_reduction <add>, %293, %cst_103 [1] : vector<16x32xf32> to vector<16xf32>
    %295 = vector.shape_cast %294 : vector<16xf32> to vector<16x1xf32>
    %cst_104 = arith.constant 0.0322580636 : f32
    %296 = vector.broadcast %cst_104 : f32 to vector<16x1xf32>
    %297 = arith.mulf %295, %296 : vector<16x1xf32>
    %298 = vector.broadcast %285 : vector<1x32xf32> to vector<16x32xf32>
    %299 = arith.mulf %298, %292 : vector<16x32xf32>
    %300 = math.sqrt %297 : vector<16x1xf32>
    %cst_105 = arith.constant 9.99999997E-7 : f32
    %301 = vector.broadcast %cst_105 : f32 to vector<16x1xf32>
    %302 = arith.addf %300, %301 : vector<16x1xf32>
    %303 = vector.broadcast %302 : vector<16x1xf32> to vector<16x32xf32>
    %304 = arith.divf %299, %303 : vector<16x32xf32>
    %305 = vector.broadcast %286 : vector<1x32xf32> to vector<16x32xf32>
    %306 = arith.addf %304, %305 : vector<16x32xf32>
    %c0_106 = arith.constant 0 : index
    %c0_107 = arith.constant 0 : index
    %307 = vector.load %arg16[%c0_106, %c0_107] : memref<16x32xf32, #tpu.memory_space<vmem>>, vector<16x32xf32>
    tpu.vector_store %arg16[%c0_106, %c0_107], %306 {strides = array<i32>} : memref<16x32xf32, #tpu.memory_space<vmem>>, vector<16x32xf32>,
    return
  }
}

module attributes {stable_mosaic.version = 11 : i64} {
  func.func @_encoder_layer_kernel(%arg0: memref<16x32xf32, #tpu.memory_space<vmem>>, %arg1: memref<2x1x8xi32, #tpu.memory_space<vmem>>, %arg2: memref<1x32xf32, #tpu.memory_space<vmem>>, %arg3: memref<1x32xf32, #tpu.memory_space<vmem>>, %arg4: memref<32x96xbf16, #tpu.memory_space<vmem>>, %arg5: memref<1x96xf32, #tpu.memory_space<vmem>>, %arg6: memref<32x32xbf16, #tpu.memory_space<vmem>>, %arg7: memref<1x32xf32, #tpu.memory_space<vmem>>, %arg8: memref<1x32xf32, #tpu.memory_space<vmem>>, %arg9: memref<1x32xf32, #tpu.memory_space<vmem>>, %arg10: memref<32x64xbf16, #tpu.memory_space<vmem>>, %arg11: memref<1x64xf32, #tpu.memory_space<vmem>>, %arg12: memref<64x32xbf16, #tpu.memory_space<vmem>>, %arg13: memref<1x32xf32, #tpu.memory_space<vmem>>, %arg14: memref<1x32xf32, #tpu.memory_space<vmem>>, %arg15: memref<1x32xf32, #tpu.memory_space<vmem>>, %arg16: memref<16x32xf32, #tpu.memory_space<vmem>>) attributes {dimension_semantics = [], scalar_prefetch = 0 : i64, scratch_operands = 0 : i64, tpu.core_type = #tpu.core_type<tc>} {
    %c0 = arith.constant 0 : index
    %c0_0 = arith.constant 0 : index
    %0 = vector.load %arg0[%c0, %c0_0] : memref<16x32xf32, #tpu.memory_space<vmem>>, vector<16x32xf32>
    %c0_1 = arith.constant 0 : index
    %c0_2 = arith.constant 0 : index
    %c0_3 = arith.constant 0 : index
    %1 = vector.load %arg1[%c0_1, %c0_2, %c0_3] : memref<2x1x8xi32, #tpu.memory_space<vmem>>, vector<2x1x8xi32>
    %c0_4 = arith.constant 0 : index
    %c0_5 = arith.constant 0 : index
    %2 = vector.load %arg2[%c0_4, %c0_5] : memref<1x32xf32, #tpu.memory_space<vmem>>, vector<1x32xf32>
    %c0_6 = arith.constant 0 : index
    %c0_7 = arith.constant 0 : index
    %3 = vector.load %arg3[%c0_6, %c0_7] : memref<1x32xf32, #tpu.memory_space<vmem>>, vector<1x32xf32>
    %cst = arith.constant dense<0.000000e+00> : vector<16xf32>
    %4 = vector.multi_reduction <add>, %0, %cst [1] : vector<16x32xf32> to vector<16xf32>
    %5 = vector.shape_cast %4 : vector<16xf32> to vector<16x1xf32>
    %cst_8 = arith.constant 3.200000e+01 : f32
    %6 = vector.broadcast %cst_8 : f32 to vector<16x1xf32>
    %7 = arith.divf %5, %6 : vector<16x1xf32>
    %8 = vector.broadcast %7 : vector<16x1xf32> to vector<16x32xf32>
    %9 = arith.subf %0, %8 : vector<16x32xf32>
    %10 = arith.mulf %9, %9 : vector<16x32xf32>
    %cst_9 = arith.constant dense<0.000000e+00> : vector<16xf32>
    %11 = vector.multi_reduction <add>, %10, %cst_9 [1] : vector<16x32xf32> to vector<16xf32>
    %12 = vector.shape_cast %11 : vector<16xf32> to vector<16x1xf32>
    %cst_10 = arith.constant 0.0322580636 : f32
    %13 = vector.broadcast %cst_10 : f32 to vector<16x1xf32>
    %14 = arith.mulf %12, %13 : vector<16x1xf32>
    %15 = vector.broadcast %2 : vector<1x32xf32> to vector<16x32xf32>
    %16 = arith.mulf %15, %9 : vector<16x32xf32>
    %17 = math.sqrt %14 : vector<16x1xf32>
    %cst_11 = arith.constant 9.99999997E-7 : f32
    %18 = vector.broadcast %cst_11 : f32 to vector<16x1xf32>
    %19 = arith.addf %17, %18 : vector<16x1xf32>
    %20 = vector.broadcast %19 : vector<16x1xf32> to vector<16x32xf32>
    %21 = arith.divf %16, %20 : vector<16x32xf32>
    %22 = vector.broadcast %3 : vector<1x32xf32> to vector<16x32xf32>
    %23 = arith.addf %21, %22 : vector<16x32xf32>
    %24 = arith.truncf %23 : vector<16x32xf32> to vector<16x32xbf16>
    %c0_12 = arith.constant 0 : index
    %c0_13 = arith.constant 0 : index
    %25 = vector.load %arg4[%c0_12, %c0_13] : memref<32x96xbf16, #tpu.memory_space<vmem>>, vector<32x96xbf16>
    %cst_14 = arith.constant dense<0.000000e+00> : vector<16x96xf32>
    %26 = tpu.matmul %24, %25, %cst_14 {dimension_numbers = #tpu.dot_dimension_numbers<[1], [0], [0], [1], [0, 0, 1, 1], [], []>} : vector<16x32xbf16>, vector<32x96xbf16>, vector<16x96xf32> -> vector<16x96xf32>
    %c0_15 = arith.constant 0 : index
    %c0_16 = arith.constant 0 : index
    %27 = vector.load %arg5[%c0_15, %c0_16] : memref<1x96xf32, #tpu.memory_space<vmem>>, vector<1x96xf32>
    %28 = vector.broadcast %27 : vector<1x96xf32> to vector<16x96xf32>
    %29 = arith.addf %26, %28 : vector<16x96xf32>
    %30 = vector.extract_strided_slice %29 {offsets = [0, 0], sizes = [16, 32], strides = [1, 1]} : vector<16x96xf32> to vector<16x32xf32>
    %31 = vector.extract_strided_slice %29 {offsets = [0, 32], sizes = [16, 32], strides = [1, 1]} : vector<16x96xf32> to vector<16x32xf32>
    %32 = vector.extract_strided_slice %29 {offsets = [0, 64], sizes = [16, 32], strides = [1, 1]} : vector<16x96xf32> to vector<16x32xf32>
    %33 = arith.truncf %30 : vector<16x32xf32> to vector<16x32xbf16>
    %34 = arith.truncf %31 : vector<16x32xf32> to vector<16x32xbf16>
    %35 = arith.truncf %32 : vector<16x32xf32> to vector<16x32xbf16>
    %36 = vector.extract_strided_slice %1 {offsets = [0, 0, 0], sizes = [1, 1, 8], strides = [1, 1, 1]} : vector<2x1x8xi32> to vector<1x1x8xi32>
    %37 = vector.shape_cast %36 : vector<1x1x8xi32> to vector<1x8xi32>
    %38 = vector.extract_strided_slice %33 {offsets = [0, 0], sizes = [8, 32], strides = [1, 1]} : vector<16x32xbf16> to vector<8x32xbf16>
    %39 = vector.extract_strided_slice %34 {offsets = [0, 0], sizes = [8, 32], strides = [1, 1]} : vector<16x32xbf16> to vector<8x32xbf16>
    %40 = vector.extract_strided_slice %35 {offsets = [0, 0], sizes = [8, 32], strides = [1, 1]} : vector<16x32xbf16> to vector<8x32xbf16>
    %41 = vector.extract_strided_slice %38 {offsets = [0, 0], sizes = [8, 8], strides = [1, 1]} : vector<8x32xbf16> to vector<8x8xbf16>
    %42 = vector.extract_strided_slice %39 {offsets = [0, 0], sizes = [8, 8], strides = [1, 1]} : vector<8x32xbf16> to vector<8x8xbf16>
    %43 = vector.extract_strided_slice %40 {offsets = [0, 0], sizes = [8, 8], strides = [1, 1]} : vector<8x32xbf16> to vector<8x8xbf16>
    %cst_17 = arith.constant dense<0.000000e+00> : vector<8x8xf32>
    %44 = tpu.matmul %41, %42, %cst_17 {dimension_numbers = #tpu.dot_dimension_numbers<[1], [1], [0], [0], [0, 0, 1, 0], [], []>} : vector<8x8xbf16>, vector<8x8xbf16>, vector<8x8xf32> -> vector<8x8xf32>
    %cst_18 = arith.constant 0.353553385 : f32
    %45 = vector.broadcast %cst_18 : f32 to vector<8x8xf32>
    %46 = arith.mulf %44, %45 : vector<8x8xf32>
    %c0_i32 = arith.constant 0 : i32
    %47 = vector.broadcast %c0_i32 : i32 to vector<1x8xi32>
    %48 = arith.cmpi eq, %37, %47 : vector<1x8xi32>
    %cst_19 = arith.constant -1.000000e+09 : f32
    %49 = vector.shape_cast %48 : vector<1x8xi1> to vector<1x8xi1>
    %50 = vector.broadcast %49 : vector<1x8xi1> to vector<8x8xi1>
    %51 = vector.broadcast %cst_19 : f32 to vector<8x8xf32>
    %52 = arith.select %50, %51, %46 : vector<8x8xi1>, vector<8x8xf32>
    %cst_20 = arith.constant dense<0xFF800000> : vector<8xf32>
    %53 = vector.multi_reduction <maximumf>, %52, %cst_20 [1] : vector<8x8xf32> to vector<8xf32>
    %54 = vector.shape_cast %53 : vector<8xf32> to vector<8x1xf32>
    %55 = vector.broadcast %54 : vector<8x1xf32> to vector<8x8xf32>
    %56 = arith.subf %52, %55 : vector<8x8xf32>
    %57 = math.exp %56 : vector<8x8xf32>
    %cst_21 = arith.constant dense<0.000000e+00> : vector<8xf32>
    %58 = vector.multi_reduction <add>, %57, %cst_21 [1] : vector<8x8xf32> to vector<8xf32>
    %59 = vector.shape_cast %58 : vector<8xf32> to vector<8x1xf32>
    %60 = tpu.reciprocal %59 {approx = true} : vector<8x1xf32> -> vector<8x1xf32>
    %61 = vector.broadcast %60 : vector<8x1xf32> to vector<8x8xf32>
    %62 = arith.mulf %57, %61 : vector<8x8xf32>
    %63 = arith.truncf %62 : vector<8x8xf32> to vector<8x8xbf16>
    %cst_22 = arith.constant dense<0.000000e+00> : vector<8x8xf32>
    %64 = tpu.matmul %63, %43, %cst_22 {dimension_numbers = #tpu.dot_dimension_numbers<[1], [0], [0], [1], [0, 0, 1, 1], [], []>} : vector<8x8xbf16>, vector<8x8xbf16>, vector<8x8xf32> -> vector<8x8xf32>
    %65 = vector.extract_strided_slice %38 {offsets = [0, 8], sizes = [8, 8], strides = [1, 1]} : vector<8x32xbf16> to vector<8x8xbf16>
    %66 = vector.extract_strided_slice %39 {offsets = [0, 8], sizes = [8, 8], strides = [1, 1]} : vector<8x32xbf16> to vector<8x8xbf16>
    %67 = vector.extract_strided_slice %40 {offsets = [0, 8], sizes = [8, 8], strides = [1, 1]} : vector<8x32xbf16> to vector<8x8xbf16>
    %cst_23 = arith.constant dense<0.000000e+00> : vector<8x8xf32>
    %68 = tpu.matmul %65, %66, %cst_23 {dimension_numbers = #tpu.dot_dimension_numbers<[1], [1], [0], [0], [0, 0, 1, 0], [], []>} : vector<8x8xbf16>, vector<8x8xbf16>, vector<8x8xf32> -> vector<8x8xf32>
    %cst_24 = arith.constant 0.353553385 : f32
    %69 = vector.broadcast %cst_24 : f32 to vector<8x8xf32>
    %70 = arith.mulf %68, %69 : vector<8x8xf32>
    %c0_i32_25 = arith.constant 0 : i32
    %71 = vector.broadcast %c0_i32_25 : i32 to vector<1x8xi32>
    %72 = arith.cmpi eq, %37, %71 : vector<1x8xi32>
    %cst_26 = arith.constant -1.000000e+09 : f32
    %73 = vector.shape_cast %72 : vector<1x8xi1> to vector<1x8xi1>
    %74 = vector.broadcast %73 : vector<1x8xi1> to vector<8x8xi1>
    %75 = vector.broadcast %cst_26 : f32 to vector<8x8xf32>
    %76 = arith.select %74, %75, %70 : vector<8x8xi1>, vector<8x8xf32>
    %cst_27 = arith.constant dense<0xFF800000> : vector<8xf32>
    %77 = vector.multi_reduction <maximumf>, %76, %cst_27 [1] : vector<8x8xf32> to vector<8xf32>
    %78 = vector.shape_cast %77 : vector<8xf32> to vector<8x1xf32>
    %79 = vector.broadcast %78 : vector<8x1xf32> to vector<8x8xf32>
    %80 = arith.subf %76, %79 : vector<8x8xf32>
    %81 = math.exp %80 : vector<8x8xf32>
    %cst_28 = arith.constant dense<0.000000e+00> : vector<8xf32>
    %82 = vector.multi_reduction <add>, %81, %cst_28 [1] : vector<8x8xf32> to vector<8xf32>
    %83 = vector.shape_cast %82 : vector<8xf32> to vector<8x1xf32>
    %84 = tpu.reciprocal %83 {approx = true} : vector<8x1xf32> -> vector<8x1xf32>
    %85 = vector.broadcast %84 : vector<8x1xf32> to vector<8x8xf32>
    %86 = arith.mulf %81, %85 : vector<8x8xf32>
    %87 = arith.truncf %86 : vector<8x8xf32> to vector<8x8xbf16>
    %cst_29 = arith.constant dense<0.000000e+00> : vector<8x8xf32>
    %88 = tpu.matmul %87, %67, %cst_29 {dimension_numbers = #tpu.dot_dimension_numbers<[1], [0], [0], [1], [0, 0, 1, 1], [], []>} : vector<8x8xbf16>, vector<8x8xbf16>, vector<8x8xf32> -> vector<8x8xf32>
    %89 = vector.extract_strided_slice %38 {offsets = [0, 16], sizes = [8, 8], strides = [1, 1]} : vector<8x32xbf16> to vector<8x8xbf16>
    %90 = vector.extract_strided_slice %39 {offsets = [0, 16], sizes = [8, 8], strides = [1, 1]} : vector<8x32xbf16> to vector<8x8xbf16>
    %91 = vector.extract_strided_slice %40 {offsets = [0, 16], sizes = [8, 8], strides = [1, 1]} : vector<8x32xbf16> to vector<8x8xbf16>
    %cst_30 = arith.constant dense<0.000000e+00> : vector<8x8xf32>
    %92 = tpu.matmul %89, %90, %cst_30 {dimension_numbers = #tpu.dot_dimension_numbers<[1], [1], [0], [0], [0, 0, 1, 0], [], []>} : vector<8x8xbf16>, vector<8x8xbf16>, vector<8x8xf32> -> vector<8x8xf32>
    %cst_31 = arith.constant 0.353553385 : f32
    %93 = vector.broadcast %cst_31 : f32 to vector<8x8xf32>
    %94 = arith.mulf %92, %93 : vector<8x8xf32>
    %c0_i32_32 = arith.constant 0 : i32
    %95 = vector.broadcast %c0_i32_32 : i32 to vector<1x8xi32>
    %96 = arith.cmpi eq, %37, %95 : vector<1x8xi32>
    %cst_33 = arith.constant -1.000000e+09 : f32
    %97 = vector.shape_cast %96 : vector<1x8xi1> to vector<1x8xi1>
    %98 = vector.broadcast %97 : vector<1x8xi1> to vector<8x8xi1>
    %99 = vector.broadcast %cst_33 : f32 to vector<8x8xf32>
    %100 = arith.select %98, %99, %94 : vector<8x8xi1>, vector<8x8xf32>
    %cst_34 = arith.constant dense<0xFF800000> : vector<8xf32>
    %101 = vector.multi_reduction <maximumf>, %100, %cst_34 [1] : vector<8x8xf32> to vector<8xf32>
    %102 = vector.shape_cast %101 : vector<8xf32> to vector<8x1xf32>
    %103 = vector.broadcast %102 : vector<8x1xf32> to vector<8x8xf32>
    %104 = arith.subf %100, %103 : vector<8x8xf32>
    %105 = math.exp %104 : vector<8x8xf32>
    %cst_35 = arith.constant dense<0.000000e+00> : vector<8xf32>
    %106 = vector.multi_reduction <add>, %105, %cst_35 [1] : vector<8x8xf32> to vector<8xf32>
    %107 = vector.shape_cast %106 : vector<8xf32> to vector<8x1xf32>
    %108 = tpu.reciprocal %107 {approx = true} : vector<8x1xf32> -> vector<8x1xf32>
    %109 = vector.broadcast %108 : vector<8x1xf32> to vector<8x8xf32>
    %110 = arith.mulf %105, %109 : vector<8x8xf32>
    %111 = arith.truncf %110 : vector<8x8xf32> to vector<8x8xbf16>
    %cst_36 = arith.constant dense<0.000000e+00> : vector<8x8xf32>
    %112 = tpu.matmul %111, %91, %cst_36 {dimension_numbers = #tpu.dot_dimension_numbers<[1], [0], [0], [1], [0, 0, 1, 1], [], []>} : vector<8x8xbf16>, vector<8x8xbf16>, vector<8x8xf32> -> vector<8x8xf32>
    %113 = vector.extract_strided_slice %38 {offsets = [0, 24], sizes = [8, 8], strides = [1, 1]} : vector<8x32xbf16> to vector<8x8xbf16>
    %114 = vector.extract_strided_slice %39 {offsets = [0, 24], sizes = [8, 8], strides = [1, 1]} : vector<8x32xbf16> to vector<8x8xbf16>
    %115 = vector.extract_strided_slice %40 {offsets = [0, 24], sizes = [8, 8], strides = [1, 1]} : vector<8x32xbf16> to vector<8x8xbf16>
    %cst_37 = arith.constant dense<0.000000e+00> : vector<8x8xf32>
    %116 = tpu.matmul %113, %114, %cst_37 {dimension_numbers = #tpu.dot_dimension_numbers<[1], [1], [0], [0], [0, 0, 1, 0], [], []>} : vector<8x8xbf16>, vector<8x8xbf16>, vector<8x8xf32> -> vector<8x8xf32>
    %cst_38 = arith.constant 0.353553385 : f32
    %117 = vector.broadcast %cst_38 : f32 to vector<8x8xf32>
    %118 = arith.mulf %116, %117 : vector<8x8xf32>
    %c0_i32_39 = arith.constant 0 : i32
    %119 = vector.broadcast %c0_i32_39 : i32 to vector<1x8xi32>
    %120 = arith.cmpi eq, %37, %119 : vector<1x8xi32>
    %cst_40 = arith.constant -1.000000e+09 : f32
    %121 = vector.shape_cast %120 : vector<1x8xi1> to vector<1x8xi1>
    %122 = vector.broadcast %121 : vector<1x8xi1> to vector<8x8xi1>
    %123 = vector.broadcast %cst_40 : f32 to vector<8x8xf32>
    %124 = arith.select %122, %123, %118 : vector<8x8xi1>, vector<8x8xf32>
    %cst_41 = arith.constant dense<0xFF800000> : vector<8xf32>
    %125 = vector.multi_reduction <maximumf>, %124, %cst_41 [1] : vector<8x8xf32> to vector<8xf32>
    %126 = vector.shape_cast %125 : vector<8xf32> to vector<8x1xf32>
    %127 = vector.broadcast %126 : vector<8x1xf32> to vector<8x8xf32>
    %128 = arith.subf %124, %127 : vector<8x8xf32>
    %129 = math.exp %128 : vector<8x8xf32>
    %cst_42 = arith.constant dense<0.000000e+00> : vector<8xf32>
    %130 = vector.multi_reduction <add>, %129, %cst_42 [1] : vector<8x8xf32> to vector<8xf32>
    %131 = vector.shape_cast %130 : vector<8xf32> to vector<8x1xf32>
    %132 = tpu.reciprocal %131 {approx = true} : vector<8x1xf32> -> vector<8x1xf32>
    %133 = vector.broadcast %132 : vector<8x1xf32> to vector<8x8xf32>
    %134 = arith.mulf %129, %133 : vector<8x8xf32>
    %135 = arith.truncf %134 : vector<8x8xf32> to vector<8x8xbf16>
    %cst_43 = arith.constant dense<0.000000e+00> : vector<8x8xf32>
    %136 = tpu.matmul %135, %115, %cst_43 {dimension_numbers = #tpu.dot_dimension_numbers<[1], [0], [0], [1], [0, 0, 1, 1], [], []>} : vector<8x8xbf16>, vector<8x8xbf16>, vector<8x8xf32> -> vector<8x8xf32>
    %137 = tpu.concatenate %64, %88, %112, %136 in 1 : vector<8x8xf32>, vector<8x8xf32>, vector<8x8xf32>, vector<8x8xf32> -> vector<8x32xf32>
    %138 = vector.extract_strided_slice %1 {offsets = [1, 0, 0], sizes = [1, 1, 8], strides = [1, 1, 1]} : vector<2x1x8xi32> to vector<1x1x8xi32>
    %139 = vector.shape_cast %138 : vector<1x1x8xi32> to vector<1x8xi32>
    %140 = vector.extract_strided_slice %33 {offsets = [8, 0], sizes = [8, 32], strides = [1, 1]} : vector<16x32xbf16> to vector<8x32xbf16>
    %141 = vector.extract_strided_slice %34 {offsets = [8, 0], sizes = [8, 32], strides = [1, 1]} : vector<16x32xbf16> to vector<8x32xbf16>
    %142 = vector.extract_strided_slice %35 {offsets = [8, 0], sizes = [8, 32], strides = [1, 1]} : vector<16x32xbf16> to vector<8x32xbf16>
    %143 = vector.extract_strided_slice %140 {offsets = [0, 0], sizes = [8, 8], strides = [1, 1]} : vector<8x32xbf16> to vector<8x8xbf16>
    %144 = vector.extract_strided_slice %141 {offsets = [0, 0], sizes = [8, 8], strides = [1, 1]} : vector<8x32xbf16> to vector<8x8xbf16>
    %145 = vector.extract_strided_slice %142 {offsets = [0, 0], sizes = [8, 8], strides = [1, 1]} : vector<8x32xbf16> to vector<8x8xbf16>
    %cst_44 = arith.constant dense<0.000000e+00> : vector<8x8xf32>
    %146 = tpu.matmul %143, %144, %cst_44 {dimension_numbers = #tpu.dot_dimension_numbers<[1], [1], [0], [0], [0, 0, 1, 0], [], []>} : vector<8x8xbf16>, vector<8x8xbf16>, vector<8x8xf32> -> vector<8x8xf32>
    %cst_45 = arith.constant 0.353553385 : f32
    %147 = vector.broadcast %cst_45 : f32 to vector<8x8xf32>
    %148 = arith.mulf %146, %147 : vector<8x8xf32>
    %c0_i32_46 = arith.constant 0 : i32
    %149 = vector.broadcast %c0_i32_46 : i32 to vector<1x8xi32>
    %150 = arith.cmpi eq, %139, %149 : vector<1x8xi32>
    %cst_47 = arith.constant -1.000000e+09 : f32
    %151 = vector.shape_cast %150 : vector<1x8xi1> to vector<1x8xi1>
    %152 = vector.broadcast %151 : vector<1x8xi1> to vector<8x8xi1>
    %153 = vector.broadcast %cst_47 : f32 to vector<8x8xf32>
    %154 = arith.select %152, %153, %148 : vector<8x8xi1>, vector<8x8xf32>
    %cst_48 = arith.constant dense<0xFF800000> : vector<8xf32>
    %155 = vector.multi_reduction <maximumf>, %154, %cst_48 [1] : vector<8x8xf32> to vector<8xf32>
    %156 = vector.shape_cast %155 : vector<8xf32> to vector<8x1xf32>
    %157 = vector.broadcast %156 : vector<8x1xf32> to vector<8x8xf32>
    %158 = arith.subf %154, %157 : vector<8x8xf32>
    %159 = math.exp %158 : vector<8x8xf32>
    %cst_49 = arith.constant dense<0.000000e+00> : vector<8xf32>
    %160 = vector.multi_reduction <add>, %159, %cst_49 [1] : vector<8x8xf32> to vector<8xf32>
    %161 = vector.shape_cast %160 : vector<8xf32> to vector<8x1xf32>
    %162 = tpu.reciprocal %161 {approx = true} : vector<8x1xf32> -> vector<8x1xf32>
    %163 = vector.broadcast %162 : vector<8x1xf32> to vector<8x8xf32>
    %164 = arith.mulf %159, %163 : vector<8x8xf32>
    %165 = arith.truncf %164 : vector<8x8xf32> to vector<8x8xbf16>
    %cst_50 = arith.constant dense<0.000000e+00> : vector<8x8xf32>
    %166 = tpu.matmul %165, %145, %cst_50 {dimension_numbers = #tpu.dot_dimension_numbers<[1], [0], [0], [1], [0, 0, 1, 1], [], []>} : vector<8x8xbf16>, vector<8x8xbf16>, vector<8x8xf32> -> vector<8x8xf32>
    %167 = vector.extract_strided_slice %140 {offsets = [0, 8], sizes = [8, 8], strides = [1, 1]} : vector<8x32xbf16> to vector<8x8xbf16>
    %168 = vector.extract_strided_slice %141 {offsets = [0, 8], sizes = [8, 8], strides = [1, 1]} : vector<8x32xbf16> to vector<8x8xbf16>
    %169 = vector.extract_strided_slice %142 {offsets = [0, 8], sizes = [8, 8], strides = [1, 1]} : vector<8x32xbf16> to vector<8x8xbf16>
    %cst_51 = arith.constant dense<0.000000e+00> : vector<8x8xf32>
    %170 = tpu.matmul %167, %168, %cst_51 {dimension_numbers = #tpu.dot_dimension_numbers<[1], [1], [0], [0], [0, 0, 1, 0], [], []>} : vector<8x8xbf16>, vector<8x8xbf16>, vector<8x8xf32> -> vector<8x8xf32>
    %cst_52 = arith.constant 0.353553385 : f32
    %171 = vector.broadcast %cst_52 : f32 to vector<8x8xf32>
    %172 = arith.mulf %170, %171 : vector<8x8xf32>
    %c0_i32_53 = arith.constant 0 : i32
    %173 = vector.broadcast %c0_i32_53 : i32 to vector<1x8xi32>
    %174 = arith.cmpi eq, %139, %173 : vector<1x8xi32>
    %cst_54 = arith.constant -1.000000e+09 : f32
    %175 = vector.shape_cast %174 : vector<1x8xi1> to vector<1x8xi1>
    %176 = vector.broadcast %175 : vector<1x8xi1> to vector<8x8xi1>
    %177 = vector.broadcast %cst_54 : f32 to vector<8x8xf32>
    %178 = arith.select %176, %177, %172 : vector<8x8xi1>, vector<8x8xf32>
    %cst_55 = arith.constant dense<0xFF800000> : vector<8xf32>
    %179 = vector.multi_reduction <maximumf>, %178, %cst_55 [1] : vector<8x8xf32> to vector<8xf32>
    %180 = vector.shape_cast %179 : vector<8xf32> to vector<8x1xf32>
    %181 = vector.broadcast %180 : vector<8x1xf32> to vector<8x8xf32>
    %182 = arith.subf %178, %181 : vector<8x8xf32>
    %183 = math.exp %182 : vector<8x8xf32>
    %cst_56 = arith.constant dense<0.000000e+00> : vector<8xf32>
    %184 = vector.multi_reduction <add>, %183, %cst_56 [1] : vector<8x8xf32> to vector<8xf32>
    %185 = vector.shape_cast %184 : vector<8xf32> to vector<8x1xf32>
    %186 = tpu.reciprocal %185 {approx = true} : vector<8x1xf32> -> vector<8x1xf32>
    %187 = vector.broadcast %186 : vector<8x1xf32> to vector<8x8xf32>
    %188 = arith.mulf %183, %187 : vector<8x8xf32>
    %189 = arith.truncf %188 : vector<8x8xf32> to vector<8x8xbf16>
    %cst_57 = arith.constant dense<0.000000e+00> : vector<8x8xf32>
    %190 = tpu.matmul %189, %169, %cst_57 {dimension_numbers = #tpu.dot_dimension_numbers<[1], [0], [0], [1], [0, 0, 1, 1], [], []>} : vector<8x8xbf16>, vector<8x8xbf16>, vector<8x8xf32> -> vector<8x8xf32>
    %191 = vector.extract_strided_slice %140 {offsets = [0, 16], sizes = [8, 8], strides = [1, 1]} : vector<8x32xbf16> to vector<8x8xbf16>
    %192 = vector.extract_strided_slice %141 {offsets = [0, 16], sizes = [8, 8], strides = [1, 1]} : vector<8x32xbf16> to vector<8x8xbf16>
    %193 = vector.extract_strided_slice %142 {offsets = [0, 16], sizes = [8, 8], strides = [1, 1]} : vector<8x32xbf16> to vector<8x8xbf16>
    %cst_58 = arith.constant dense<0.000000e+00> : vector<8x8xf32>
    %194 = tpu.matmul %191, %192, %cst_58 {dimension_numbers = #tpu.dot_dimension_numbers<[1], [1], [0], [0], [0, 0, 1, 0], [], []>} : vector<8x8xbf16>, vector<8x8xbf16>, vector<8x8xf32> -> vector<8x8xf32>
    %cst_59 = arith.constant 0.353553385 : f32
    %195 = vector.broadcast %cst_59 : f32 to vector<8x8xf32>
    %196 = arith.mulf %194, %195 : vector<8x8xf32>
    %c0_i32_60 = arith.constant 0 : i32
    %197 = vector.broadcast %c0_i32_60 : i32 to vector<1x8xi32>
    %198 = arith.cmpi eq, %139, %197 : vector<1x8xi32>
    %cst_61 = arith.constant -1.000000e+09 : f32
    %199 = vector.shape_cast %198 : vector<1x8xi1> to vector<1x8xi1>
    %200 = vector.broadcast %199 : vector<1x8xi1> to vector<8x8xi1>
    %201 = vector.broadcast %cst_61 : f32 to vector<8x8xf32>
    %202 = arith.select %200, %201, %196 : vector<8x8xi1>, vector<8x8xf32>
    %cst_62 = arith.constant dense<0xFF800000> : vector<8xf32>
    %203 = vector.multi_reduction <maximumf>, %202, %cst_62 [1] : vector<8x8xf32> to vector<8xf32>
    %204 = vector.shape_cast %203 : vector<8xf32> to vector<8x1xf32>
    %205 = vector.broadcast %204 : vector<8x1xf32> to vector<8x8xf32>
    %206 = arith.subf %202, %205 : vector<8x8xf32>
    %207 = math.exp %206 : vector<8x8xf32>
    %cst_63 = arith.constant dense<0.000000e+00> : vector<8xf32>
    %208 = vector.multi_reduction <add>, %207, %cst_63 [1] : vector<8x8xf32> to vector<8xf32>
    %209 = vector.shape_cast %208 : vector<8xf32> to vector<8x1xf32>
    %210 = tpu.reciprocal %209 {approx = true} : vector<8x1xf32> -> vector<8x1xf32>
    %211 = vector.broadcast %210 : vector<8x1xf32> to vector<8x8xf32>
    %212 = arith.mulf %207, %211 : vector<8x8xf32>
    %213 = arith.truncf %212 : vector<8x8xf32> to vector<8x8xbf16>
    %cst_64 = arith.constant dense<0.000000e+00> : vector<8x8xf32>
    %214 = tpu.matmul %213, %193, %cst_64 {dimension_numbers = #tpu.dot_dimension_numbers<[1], [0], [0], [1], [0, 0, 1, 1], [], []>} : vector<8x8xbf16>, vector<8x8xbf16>, vector<8x8xf32> -> vector<8x8xf32>
    %215 = vector.extract_strided_slice %140 {offsets = [0, 24], sizes = [8, 8], strides = [1, 1]} : vector<8x32xbf16> to vector<8x8xbf16>
    %216 = vector.extract_strided_slice %141 {offsets = [0, 24], sizes = [8, 8], strides = [1, 1]} : vector<8x32xbf16> to vector<8x8xbf16>
    %217 = vector.extract_strided_slice %142 {offsets = [0, 24], sizes = [8, 8], strides = [1, 1]} : vector<8x32xbf16> to vector<8x8xbf16>
    %cst_65 = arith.constant dense<0.000000e+00> : vector<8x8xf32>
    %218 = tpu.matmul %215, %216, %cst_65 {dimension_numbers = #tpu.dot_dimension_numbers<[1], [1], [0], [0], [0, 0, 1, 0], [], []>} : vector<8x8xbf16>, vector<8x8xbf16>, vector<8x8xf32> -> vector<8x8xf32>
    %cst_66 = arith.constant 0.353553385 : f32
    %219 = vector.broadcast %cst_66 : f32 to vector<8x8xf32>
    %220 = arith.mulf %218, %219 : vector<8x8xf32>
    %c0_i32_67 = arith.constant 0 : i32
    %221 = vector.broadcast %c0_i32_67 : i32 to vector<1x8xi32>
    %222 = arith.cmpi eq, %139, %221 : vector<1x8xi32>
    %cst_68 = arith.constant -1.000000e+09 : f32
    %223 = vector.shape_cast %222 : vector<1x8xi1> to vector<1x8xi1>
    %224 = vector.broadcast %223 : vector<1x8xi1> to vector<8x8xi1>
    %225 = vector.broadcast %cst_68 : f32 to vector<8x8xf32>
    %226 = arith.select %224, %225, %220 : vector<8x8xi1>, vector<8x8xf32>
    %cst_69 = arith.constant dense<0xFF800000> : vector<8xf32>
    %227 = vector.multi_reduction <maximumf>, %226, %cst_69 [1] : vector<8x8xf32> to vector<8xf32>
    %228 = vector.shape_cast %227 : vector<8xf32> to vector<8x1xf32>
    %229 = vector.broadcast %228 : vector<8x1xf32> to vector<8x8xf32>
    %230 = arith.subf %226, %229 : vector<8x8xf32>
    %231 = math.exp %230 : vector<8x8xf32>
    %cst_70 = arith.constant dense<0.000000e+00> : vector<8xf32>
    %232 = vector.multi_reduction <add>, %231, %cst_70 [1] : vector<8x8xf32> to vector<8xf32>
    %233 = vector.shape_cast %232 : vector<8xf32> to vector<8x1xf32>
    %234 = tpu.reciprocal %233 {approx = true} : vector<8x1xf32> -> vector<8x1xf32>
    %235 = vector.broadcast %234 : vector<8x1xf32> to vector<8x8xf32>
    %236 = arith.mulf %231, %235 : vector<8x8xf32>
    %237 = arith.truncf %236 : vector<8x8xf32> to vector<8x8xbf16>
    %cst_71 = arith.constant dense<0.000000e+00> : vector<8x8xf32>
    %238 = tpu.matmul %237, %217, %cst_71 {dimension_numbers = #tpu.dot_dimension_numbers<[1], [0], [0], [1], [0, 0, 1, 1], [], []>} : vector<8x8xbf16>, vector<8x8xbf16>, vector<8x8xf32> -> vector<8x8xf32>
    %239 = tpu.concatenate %166, %190, %214, %238 in 1 : vector<8x8xf32>, vector<8x8xf32>, vector<8x8xf32>, vector<8x8xf32> -> vector<8x32xf32>
    %240 = tpu.concatenate %137, %239 in 0 : vector<8x32xf32>, vector<8x32xf32> -> vector<16x32xf32>
    %241 = arith.truncf %240 : vector<16x32xf32> to vector<16x32xbf16>
    %c0_72 = arith.constant 0 : index
    %c0_73 = arith.constant 0 : index
    %242 = vector.load %arg6[%c0_72, %c0_73] : memref<32x32xbf16, #tpu.memory_space<vmem>>, vector<32x32xbf16>
    %cst_74 = arith.constant dense<0.000000e+00> : vector<16x32xf32>
    %243 = tpu.matmul %241, %242, %cst_74 {dimension_numbers = #tpu.dot_dimension_numbers<[1], [0], [0], [1], [0, 0, 1, 1], [], []>} : vector<16x32xbf16>, vector<32x32xbf16>, vector<16x32xf32> -> vector<16x32xf32>
    %c0_75 = arith.constant 0 : index
    %c0_76 = arith.constant 0 : index
    %244 = vector.load %arg7[%c0_75, %c0_76] : memref<1x32xf32, #tpu.memory_space<vmem>>, vector<1x32xf32>
    %245 = vector.broadcast %244 : vector<1x32xf32> to vector<16x32xf32>
    %246 = arith.addf %243, %245 : vector<16x32xf32>
    %247 = arith.addf %0, %246 : vector<16x32xf32>
    %c0_77 = arith.constant 0 : index
    %c0_78 = arith.constant 0 : index
    %248 = vector.load %arg8[%c0_77, %c0_78] : memref<1x32xf32, #tpu.memory_space<vmem>>, vector<1x32xf32>
    %c0_79 = arith.constant 0 : index
    %c0_80 = arith.constant 0 : index
    %249 = vector.load %arg9[%c0_79, %c0_80] : memref<1x32xf32, #tpu.memory_space<vmem>>, vector<1x32xf32>
    %cst_81 = arith.constant dense<0.000000e+00> : vector<16xf32>
    %250 = vector.multi_reduction <add>, %247, %cst_81 [1] : vector<16x32xf32> to vector<16xf32>
    %251 = vector.shape_cast %250 : vector<16xf32> to vector<16x1xf32>
    %cst_82 = arith.constant 3.200000e+01 : f32
    %252 = vector.broadcast %cst_82 : f32 to vector<16x1xf32>
    %253 = arith.divf %251, %252 : vector<16x1xf32>
    %254 = vector.broadcast %253 : vector<16x1xf32> to vector<16x32xf32>
    %255 = arith.subf %247, %254 : vector<16x32xf32>
    %256 = arith.mulf %255, %255 : vector<16x32xf32>
    %cst_83 = arith.constant dense<0.000000e+00> : vector<16xf32>
    %257 = vector.multi_reduction <add>, %256, %cst_83 [1] : vector<16x32xf32> to vector<16xf32>
    %258 = vector.shape_cast %257 : vector<16xf32> to vector<16x1xf32>
    %cst_84 = arith.constant 0.0322580636 : f32
    %259 = vector.broadcast %cst_84 : f32 to vector<16x1xf32>
    %260 = arith.mulf %258, %259 : vector<16x1xf32>
    %261 = vector.broadcast %248 : vector<1x32xf32> to vector<16x32xf32>
    %262 = arith.mulf %261, %255 : vector<16x32xf32>
    %263 = math.sqrt %260 : vector<16x1xf32>
    %cst_85 = arith.constant 9.99999997E-7 : f32
    %264 = vector.broadcast %cst_85 : f32 to vector<16x1xf32>
    %265 = arith.addf %263, %264 : vector<16x1xf32>
    %266 = vector.broadcast %265 : vector<16x1xf32> to vector<16x32xf32>
    %267 = arith.divf %262, %266 : vector<16x32xf32>
    %268 = vector.broadcast %249 : vector<1x32xf32> to vector<16x32xf32>
    %269 = arith.addf %267, %268 : vector<16x32xf32>
    %270 = arith.truncf %269 : vector<16x32xf32> to vector<16x32xbf16>
    %c0_86 = arith.constant 0 : index
    %c0_87 = arith.constant 0 : index
    %271 = vector.load %arg10[%c0_86, %c0_87] : memref<32x64xbf16, #tpu.memory_space<vmem>>, vector<32x64xbf16>
    %cst_88 = arith.constant dense<0.000000e+00> : vector<16x64xf32>
    %272 = tpu.matmul %270, %271, %cst_88 {dimension_numbers = #tpu.dot_dimension_numbers<[1], [0], [0], [1], [0, 0, 1, 1], [], []>} : vector<16x32xbf16>, vector<32x64xbf16>, vector<16x64xf32> -> vector<16x64xf32>
    %c0_89 = arith.constant 0 : index
    %c0_90 = arith.constant 0 : index
    %273 = vector.load %arg11[%c0_89, %c0_90] : memref<1x64xf32, #tpu.memory_space<vmem>>, vector<1x64xf32>
    %274 = vector.broadcast %273 : vector<1x64xf32> to vector<16x64xf32>
    %275 = arith.addf %272, %274 : vector<16x64xf32>
    %cst_91 = arith.constant 0.000000e+00 : f32
    %276 = vector.broadcast %cst_91 : f32 to vector<16x64xf32>
    %277 = arith.maximumf %275, %276 : vector<16x64xf32>
    %278 = arith.truncf %277 : vector<16x64xf32> to vector<16x64xbf16>
    %c0_92 = arith.constant 0 : index
    %c0_93 = arith.constant 0 : index
    %279 = vector.load %arg12[%c0_92, %c0_93] : memref<64x32xbf16, #tpu.memory_space<vmem>>, vector<64x32xbf16>
    %cst_94 = arith.constant dense<0.000000e+00> : vector<16x32xf32>
    %280 = tpu.matmul %278, %279, %cst_94 {dimension_numbers = #tpu.dot_dimension_numbers<[1], [0], [0], [1], [0, 0, 1, 1], [], []>} : vector<16x64xbf16>, vector<64x32xbf16>, vector<16x32xf32> -> vector<16x32xf32>
    %c0_95 = arith.constant 0 : index
    %c0_96 = arith.constant 0 : index
    %281 = vector.load %arg13[%c0_95, %c0_96] : memref<1x32xf32, #tpu.memory_space<vmem>>, vector<1x32xf32>
    %282 = vector.broadcast %281 : vector<1x32xf32> to vector<16x32xf32>
    %283 = arith.addf %280, %282 : vector<16x32xf32>
    %284 = arith.addf %247, %283 : vector<16x32xf32>
    %c0_97 = arith.constant 0 : index
    %c0_98 = arith.constant 0 : index
    %285 = vector.load %arg16[%c0_97, %c0_98] : memref<16x32xf32, #tpu.memory_space<vmem>>, vector<16x32xf32>
    tpu.vector_store %arg16[%c0_97, %c0_98], %284 {strides = array<i32>} : memref<16x32xf32, #tpu.memory_space<vmem>>, vector<16x32xf32>,
    return
  }
}

module attributes {stable_mosaic.version = 11 : i64} {
  func.func @_decoder_layer_kernel(%arg0: memref<16x32xf32, #tpu.memory_space<vmem>>, %arg1: memref<16x32xf32, #tpu.memory_space<vmem>>, %arg2: memref<2x1x8xi32, #tpu.memory_space<vmem>>, %arg3: memref<2x8x8xi32, #tpu.memory_space<vmem>>, %arg4: memref<1x32xf32, #tpu.memory_space<vmem>>, %arg5: memref<1x32xf32, #tpu.memory_space<vmem>>, %arg6: memref<32x96xbf16, #tpu.memory_space<vmem>>, %arg7: memref<1x96xf32, #tpu.memory_space<vmem>>, %arg8: memref<32x32xbf16, #tpu.memory_space<vmem>>, %arg9: memref<1x32xf32, #tpu.memory_space<vmem>>, %arg10: memref<1x32xf32, #tpu.memory_space<vmem>>, %arg11: memref<1x32xf32, #tpu.memory_space<vmem>>, %arg12: memref<32x32xbf16, #tpu.memory_space<vmem>>, %arg13: memref<1x32xf32, #tpu.memory_space<vmem>>, %arg14: memref<32x64xbf16, #tpu.memory_space<vmem>>, %arg15: memref<1x64xf32, #tpu.memory_space<vmem>>, %arg16: memref<32x32xbf16, #tpu.memory_space<vmem>>, %arg17: memref<1x32xf32, #tpu.memory_space<vmem>>, %arg18: memref<1x32xf32, #tpu.memory_space<vmem>>, %arg19: memref<1x32xf32, #tpu.memory_space<vmem>>, %arg20: memref<32x64xbf16, #tpu.memory_space<vmem>>, %arg21: memref<1x64xf32, #tpu.memory_space<vmem>>, %arg22: memref<64x32xbf16, #tpu.memory_space<vmem>>, %arg23: memref<1x32xf32, #tpu.memory_space<vmem>>, %arg24: memref<16x32xf32, #tpu.memory_space<vmem>>) attributes {dimension_semantics = [], scalar_prefetch = 0 : i64, scratch_operands = 0 : i64, tpu.core_type = #tpu.core_type<tc>} {
    %c0 = arith.constant 0 : index
    %c0_0 = arith.constant 0 : index
    %0 = vector.load %arg0[%c0, %c0_0] : memref<16x32xf32, #tpu.memory_space<vmem>>, vector<16x32xf32>
    %c0_1 = arith.constant 0 : index
    %c0_2 = arith.constant 0 : index
    %1 = vector.load %arg1[%c0_1, %c0_2] : memref<16x32xf32, #tpu.memory_space<vmem>>, vector<16x32xf32>
    %c0_3 = arith.constant 0 : index
    %c0_4 = arith.constant 0 : index
    %2 = vector.load %arg4[%c0_3, %c0_4] : memref<1x32xf32, #tpu.memory_space<vmem>>, vector<1x32xf32>
    %c0_5 = arith.constant 0 : index
    %c0_6 = arith.constant 0 : index
    %3 = vector.load %arg5[%c0_5, %c0_6] : memref<1x32xf32, #tpu.memory_space<vmem>>, vector<1x32xf32>
    %cst = arith.constant dense<0.000000e+00> : vector<16xf32>
    %4 = vector.multi_reduction <add>, %0, %cst [1] : vector<16x32xf32> to vector<16xf32>
    %5 = vector.shape_cast %4 : vector<16xf32> to vector<16x1xf32>
    %cst_7 = arith.constant 3.200000e+01 : f32
    %6 = vector.broadcast %cst_7 : f32 to vector<16x1xf32>
    %7 = arith.divf %5, %6 : vector<16x1xf32>
    %8 = vector.broadcast %7 : vector<16x1xf32> to vector<16x32xf32>
    %9 = arith.subf %0, %8 : vector<16x32xf32>
    %10 = arith.mulf %9, %9 : vector<16x32xf32>
    %cst_8 = arith.constant dense<0.000000e+00> : vector<16xf32>
    %11 = vector.multi_reduction <add>, %10, %cst_8 [1] : vector<16x32xf32> to vector<16xf32>
    %12 = vector.shape_cast %11 : vector<16xf32> to vector<16x1xf32>
    %cst_9 = arith.constant 0.0322580636 : f32
    %13 = vector.broadcast %cst_9 : f32 to vector<16x1xf32>
    %14 = arith.mulf %12, %13 : vector<16x1xf32>
    %15 = vector.broadcast %2 : vector<1x32xf32> to vector<16x32xf32>
    %16 = arith.mulf %15, %9 : vector<16x32xf32>
    %17 = math.sqrt %14 : vector<16x1xf32>
    %cst_10 = arith.constant 9.99999997E-7 : f32
    %18 = vector.broadcast %cst_10 : f32 to vector<16x1xf32>
    %19 = arith.addf %17, %18 : vector<16x1xf32>
    %20 = vector.broadcast %19 : vector<16x1xf32> to vector<16x32xf32>
    %21 = arith.divf %16, %20 : vector<16x32xf32>
    %22 = vector.broadcast %3 : vector<1x32xf32> to vector<16x32xf32>
    %23 = arith.addf %21, %22 : vector<16x32xf32>
    %24 = arith.truncf %23 : vector<16x32xf32> to vector<16x32xbf16>
    %c0_11 = arith.constant 0 : index
    %c0_12 = arith.constant 0 : index
    %25 = vector.load %arg6[%c0_11, %c0_12] : memref<32x96xbf16, #tpu.memory_space<vmem>>, vector<32x96xbf16>
    %cst_13 = arith.constant dense<0.000000e+00> : vector<16x96xf32>
    %26 = tpu.matmul %24, %25, %cst_13 {dimension_numbers = #tpu.dot_dimension_numbers<[1], [0], [0], [1], [0, 0, 1, 1], [], []>} : vector<16x32xbf16>, vector<32x96xbf16>, vector<16x96xf32> -> vector<16x96xf32>
    %c0_14 = arith.constant 0 : index
    %c0_15 = arith.constant 0 : index
    %27 = vector.load %arg7[%c0_14, %c0_15] : memref<1x96xf32, #tpu.memory_space<vmem>>, vector<1x96xf32>
    %28 = vector.broadcast %27 : vector<1x96xf32> to vector<16x96xf32>
    %29 = arith.addf %26, %28 : vector<16x96xf32>
    %30 = vector.extract_strided_slice %29 {offsets = [0, 0], sizes = [16, 32], strides = [1, 1]} : vector<16x96xf32> to vector<16x32xf32>
    %31 = vector.extract_strided_slice %29 {offsets = [0, 32], sizes = [16, 32], strides = [1, 1]} : vector<16x96xf32> to vector<16x32xf32>
    %32 = vector.extract_strided_slice %29 {offsets = [0, 64], sizes = [16, 32], strides = [1, 1]} : vector<16x96xf32> to vector<16x32xf32>
    %c0_16 = arith.constant 0 : index
    %c0_17 = arith.constant 0 : index
    %c0_18 = arith.constant 0 : index
    %33 = vector.load %arg3[%c0_16, %c0_17, %c0_18] : memref<2x8x8xi32, #tpu.memory_space<vmem>>, vector<2x8x8xi32>
    %34 = arith.truncf %30 : vector<16x32xf32> to vector<16x32xbf16>
    %35 = arith.truncf %31 : vector<16x32xf32> to vector<16x32xbf16>
    %36 = arith.truncf %32 : vector<16x32xf32> to vector<16x32xbf16>
    %37 = vector.extract_strided_slice %33 {offsets = [0, 0, 0], sizes = [1, 8, 8], strides = [1, 1, 1]} : vector<2x8x8xi32> to vector<1x8x8xi32>
    %38 = vector.shape_cast %37 : vector<1x8x8xi32> to vector<8x8xi32>
    %39 = vector.extract_strided_slice %34 {offsets = [0, 0], sizes = [8, 32], strides = [1, 1]} : vector<16x32xbf16> to vector<8x32xbf16>
    %40 = vector.extract_strided_slice %35 {offsets = [0, 0], sizes = [8, 32], strides = [1, 1]} : vector<16x32xbf16> to vector<8x32xbf16>
    %41 = vector.extract_strided_slice %36 {offsets = [0, 0], sizes = [8, 32], strides = [1, 1]} : vector<16x32xbf16> to vector<8x32xbf16>
    %42 = vector.extract_strided_slice %39 {offsets = [0, 0], sizes = [8, 8], strides = [1, 1]} : vector<8x32xbf16> to vector<8x8xbf16>
    %43 = vector.extract_strided_slice %40 {offsets = [0, 0], sizes = [8, 8], strides = [1, 1]} : vector<8x32xbf16> to vector<8x8xbf16>
    %44 = vector.extract_strided_slice %41 {offsets = [0, 0], sizes = [8, 8], strides = [1, 1]} : vector<8x32xbf16> to vector<8x8xbf16>
    %cst_19 = arith.constant dense<0.000000e+00> : vector<8x8xf32>
    %45 = tpu.matmul %42, %43, %cst_19 {dimension_numbers = #tpu.dot_dimension_numbers<[1], [1], [0], [0], [0, 0, 1, 0], [], []>} : vector<8x8xbf16>, vector<8x8xbf16>, vector<8x8xf32> -> vector<8x8xf32>
    %cst_20 = arith.constant 0.353553385 : f32
    %46 = vector.broadcast %cst_20 : f32 to vector<8x8xf32>
    %47 = arith.mulf %45, %46 : vector<8x8xf32>
    %c0_i32 = arith.constant 0 : i32
    %48 = vector.broadcast %c0_i32 : i32 to vector<8x8xi32>
    %49 = arith.cmpi eq, %38, %48 : vector<8x8xi32>
    %cst_21 = arith.constant -1.000000e+09 : f32
    %50 = vector.broadcast %cst_21 : f32 to vector<8x8xf32>
    %51 = arith.select %49, %50, %47 : vector<8x8xi1>, vector<8x8xf32>
    %cst_22 = arith.constant dense<0xFF800000> : vector<8xf32>
    %52 = vector.multi_reduction <maximumf>, %51, %cst_22 [1] : vector<8x8xf32> to vector<8xf32>
    %53 = vector.shape_cast %52 : vector<8xf32> to vector<8x1xf32>
    %54 = vector.broadcast %53 : vector<8x1xf32> to vector<8x8xf32>
    %55 = arith.subf %51, %54 : vector<8x8xf32>
    %56 = math.exp %55 : vector<8x8xf32>
    %cst_23 = arith.constant dense<0.000000e+00> : vector<8xf32>
    %57 = vector.multi_reduction <add>, %56, %cst_23 [1] : vector<8x8xf32> to vector<8xf32>
    %58 = vector.shape_cast %57 : vector<8xf32> to vector<8x1xf32>
    %59 = tpu.reciprocal %58 {approx = true} : vector<8x1xf32> -> vector<8x1xf32>
    %60 = vector.broadcast %59 : vector<8x1xf32> to vector<8x8xf32>
    %61 = arith.mulf %56, %60 : vector<8x8xf32>
    %62 = arith.truncf %61 : vector<8x8xf32> to vector<8x8xbf16>
    %cst_24 = arith.constant dense<0.000000e+00> : vector<8x8xf32>
    %63 = tpu.matmul %62, %44, %cst_24 {dimension_numbers = #tpu.dot_dimension_numbers<[1], [0], [0], [1], [0, 0, 1, 1], [], []>} : vector<8x8xbf16>, vector<8x8xbf16>, vector<8x8xf32> -> vector<8x8xf32>
    %64 = vector.extract_strided_slice %39 {offsets = [0, 8], sizes = [8, 8], strides = [1, 1]} : vector<8x32xbf16> to vector<8x8xbf16>
    %65 = vector.extract_strided_slice %40 {offsets = [0, 8], sizes = [8, 8], strides = [1, 1]} : vector<8x32xbf16> to vector<8x8xbf16>
    %66 = vector.extract_strided_slice %41 {offsets = [0, 8], sizes = [8, 8], strides = [1, 1]} : vector<8x32xbf16> to vector<8x8xbf16>
    %cst_25 = arith.constant dense<0.000000e+00> : vector<8x8xf32>
    %67 = tpu.matmul %64, %65, %cst_25 {dimension_numbers = #tpu.dot_dimension_numbers<[1], [1], [0], [0], [0, 0, 1, 0], [], []>} : vector<8x8xbf16>, vector<8x8xbf16>, vector<8x8xf32> -> vector<8x8xf32>
    %cst_26 = arith.constant 0.353553385 : f32
    %68 = vector.broadcast %cst_26 : f32 to vector<8x8xf32>
    %69 = arith.mulf %67, %68 : vector<8x8xf32>
    %c0_i32_27 = arith.constant 0 : i32
    %70 = vector.broadcast %c0_i32_27 : i32 to vector<8x8xi32>
    %71 = arith.cmpi eq, %38, %70 : vector<8x8xi32>
    %cst_28 = arith.constant -1.000000e+09 : f32
    %72 = vector.broadcast %cst_28 : f32 to vector<8x8xf32>
    %73 = arith.select %71, %72, %69 : vector<8x8xi1>, vector<8x8xf32>
    %cst_29 = arith.constant dense<0xFF800000> : vector<8xf32>
    %74 = vector.multi_reduction <maximumf>, %73, %cst_29 [1] : vector<8x8xf32> to vector<8xf32>
    %75 = vector.shape_cast %74 : vector<8xf32> to vector<8x1xf32>
    %76 = vector.broadcast %75 : vector<8x1xf32> to vector<8x8xf32>
    %77 = arith.subf %73, %76 : vector<8x8xf32>
    %78 = math.exp %77 : vector<8x8xf32>
    %cst_30 = arith.constant dense<0.000000e+00> : vector<8xf32>
    %79 = vector.multi_reduction <add>, %78, %cst_30 [1] : vector<8x8xf32> to vector<8xf32>
    %80 = vector.shape_cast %79 : vector<8xf32> to vector<8x1xf32>
    %81 = tpu.reciprocal %80 {approx = true} : vector<8x1xf32> -> vector<8x1xf32>
    %82 = vector.broadcast %81 : vector<8x1xf32> to vector<8x8xf32>
    %83 = arith.mulf %78, %82 : vector<8x8xf32>
    %84 = arith.truncf %83 : vector<8x8xf32> to vector<8x8xbf16>
    %cst_31 = arith.constant dense<0.000000e+00> : vector<8x8xf32>
    %85 = tpu.matmul %84, %66, %cst_31 {dimension_numbers = #tpu.dot_dimension_numbers<[1], [0], [0], [1], [0, 0, 1, 1], [], []>} : vector<8x8xbf16>, vector<8x8xbf16>, vector<8x8xf32> -> vector<8x8xf32>
    %86 = vector.extract_strided_slice %39 {offsets = [0, 16], sizes = [8, 8], strides = [1, 1]} : vector<8x32xbf16> to vector<8x8xbf16>
    %87 = vector.extract_strided_slice %40 {offsets = [0, 16], sizes = [8, 8], strides = [1, 1]} : vector<8x32xbf16> to vector<8x8xbf16>
    %88 = vector.extract_strided_slice %41 {offsets = [0, 16], sizes = [8, 8], strides = [1, 1]} : vector<8x32xbf16> to vector<8x8xbf16>
    %cst_32 = arith.constant dense<0.000000e+00> : vector<8x8xf32>
    %89 = tpu.matmul %86, %87, %cst_32 {dimension_numbers = #tpu.dot_dimension_numbers<[1], [1], [0], [0], [0, 0, 1, 0], [], []>} : vector<8x8xbf16>, vector<8x8xbf16>, vector<8x8xf32> -> vector<8x8xf32>
    %cst_33 = arith.constant 0.353553385 : f32
    %90 = vector.broadcast %cst_33 : f32 to vector<8x8xf32>
    %91 = arith.mulf %89, %90 : vector<8x8xf32>
    %c0_i32_34 = arith.constant 0 : i32
    %92 = vector.broadcast %c0_i32_34 : i32 to vector<8x8xi32>
    %93 = arith.cmpi eq, %38, %92 : vector<8x8xi32>
    %cst_35 = arith.constant -1.000000e+09 : f32
    %94 = vector.broadcast %cst_35 : f32 to vector<8x8xf32>
    %95 = arith.select %93, %94, %91 : vector<8x8xi1>, vector<8x8xf32>
    %cst_36 = arith.constant dense<0xFF800000> : vector<8xf32>
    %96 = vector.multi_reduction <maximumf>, %95, %cst_36 [1] : vector<8x8xf32> to vector<8xf32>
    %97 = vector.shape_cast %96 : vector<8xf32> to vector<8x1xf32>
    %98 = vector.broadcast %97 : vector<8x1xf32> to vector<8x8xf32>
    %99 = arith.subf %95, %98 : vector<8x8xf32>
    %100 = math.exp %99 : vector<8x8xf32>
    %cst_37 = arith.constant dense<0.000000e+00> : vector<8xf32>
    %101 = vector.multi_reduction <add>, %100, %cst_37 [1] : vector<8x8xf32> to vector<8xf32>
    %102 = vector.shape_cast %101 : vector<8xf32> to vector<8x1xf32>
    %103 = tpu.reciprocal %102 {approx = true} : vector<8x1xf32> -> vector<8x1xf32>
    %104 = vector.broadcast %103 : vector<8x1xf32> to vector<8x8xf32>
    %105 = arith.mulf %100, %104 : vector<8x8xf32>
    %106 = arith.truncf %105 : vector<8x8xf32> to vector<8x8xbf16>
    %cst_38 = arith.constant dense<0.000000e+00> : vector<8x8xf32>
    %107 = tpu.matmul %106, %88, %cst_38 {dimension_numbers = #tpu.dot_dimension_numbers<[1], [0], [0], [1], [0, 0, 1, 1], [], []>} : vector<8x8xbf16>, vector<8x8xbf16>, vector<8x8xf32> -> vector<8x8xf32>
    %108 = vector.extract_strided_slice %39 {offsets = [0, 24], sizes = [8, 8], strides = [1, 1]} : vector<8x32xbf16> to vector<8x8xbf16>
    %109 = vector.extract_strided_slice %40 {offsets = [0, 24], sizes = [8, 8], strides = [1, 1]} : vector<8x32xbf16> to vector<8x8xbf16>
    %110 = vector.extract_strided_slice %41 {offsets = [0, 24], sizes = [8, 8], strides = [1, 1]} : vector<8x32xbf16> to vector<8x8xbf16>
    %cst_39 = arith.constant dense<0.000000e+00> : vector<8x8xf32>
    %111 = tpu.matmul %108, %109, %cst_39 {dimension_numbers = #tpu.dot_dimension_numbers<[1], [1], [0], [0], [0, 0, 1, 0], [], []>} : vector<8x8xbf16>, vector<8x8xbf16>, vector<8x8xf32> -> vector<8x8xf32>
    %cst_40 = arith.constant 0.353553385 : f32
    %112 = vector.broadcast %cst_40 : f32 to vector<8x8xf32>
    %113 = arith.mulf %111, %112 : vector<8x8xf32>
    %c0_i32_41 = arith.constant 0 : i32
    %114 = vector.broadcast %c0_i32_41 : i32 to vector<8x8xi32>
    %115 = arith.cmpi eq, %38, %114 : vector<8x8xi32>
    %cst_42 = arith.constant -1.000000e+09 : f32
    %116 = vector.broadcast %cst_42 : f32 to vector<8x8xf32>
    %117 = arith.select %115, %116, %113 : vector<8x8xi1>, vector<8x8xf32>
    %cst_43 = arith.constant dense<0xFF800000> : vector<8xf32>
    %118 = vector.multi_reduction <maximumf>, %117, %cst_43 [1] : vector<8x8xf32> to vector<8xf32>
    %119 = vector.shape_cast %118 : vector<8xf32> to vector<8x1xf32>
    %120 = vector.broadcast %119 : vector<8x1xf32> to vector<8x8xf32>
    %121 = arith.subf %117, %120 : vector<8x8xf32>
    %122 = math.exp %121 : vector<8x8xf32>
    %cst_44 = arith.constant dense<0.000000e+00> : vector<8xf32>
    %123 = vector.multi_reduction <add>, %122, %cst_44 [1] : vector<8x8xf32> to vector<8xf32>
    %124 = vector.shape_cast %123 : vector<8xf32> to vector<8x1xf32>
    %125 = tpu.reciprocal %124 {approx = true} : vector<8x1xf32> -> vector<8x1xf32>
    %126 = vector.broadcast %125 : vector<8x1xf32> to vector<8x8xf32>
    %127 = arith.mulf %122, %126 : vector<8x8xf32>
    %128 = arith.truncf %127 : vector<8x8xf32> to vector<8x8xbf16>
    %cst_45 = arith.constant dense<0.000000e+00> : vector<8x8xf32>
    %129 = tpu.matmul %128, %110, %cst_45 {dimension_numbers = #tpu.dot_dimension_numbers<[1], [0], [0], [1], [0, 0, 1, 1], [], []>} : vector<8x8xbf16>, vector<8x8xbf16>, vector<8x8xf32> -> vector<8x8xf32>
    %130 = tpu.concatenate %63, %85, %107, %129 in 1 : vector<8x8xf32>, vector<8x8xf32>, vector<8x8xf32>, vector<8x8xf32> -> vector<8x32xf32>
    %131 = vector.extract_strided_slice %33 {offsets = [1, 0, 0], sizes = [1, 8, 8], strides = [1, 1, 1]} : vector<2x8x8xi32> to vector<1x8x8xi32>
    %132 = vector.shape_cast %131 : vector<1x8x8xi32> to vector<8x8xi32>
    %133 = vector.extract_strided_slice %34 {offsets = [8, 0], sizes = [8, 32], strides = [1, 1]} : vector<16x32xbf16> to vector<8x32xbf16>
    %134 = vector.extract_strided_slice %35 {offsets = [8, 0], sizes = [8, 32], strides = [1, 1]} : vector<16x32xbf16> to vector<8x32xbf16>
    %135 = vector.extract_strided_slice %36 {offsets = [8, 0], sizes = [8, 32], strides = [1, 1]} : vector<16x32xbf16> to vector<8x32xbf16>
    %136 = vector.extract_strided_slice %133 {offsets = [0, 0], sizes = [8, 8], strides = [1, 1]} : vector<8x32xbf16> to vector<8x8xbf16>
    %137 = vector.extract_strided_slice %134 {offsets = [0, 0], sizes = [8, 8], strides = [1, 1]} : vector<8x32xbf16> to vector<8x8xbf16>
    %138 = vector.extract_strided_slice %135 {offsets = [0, 0], sizes = [8, 8], strides = [1, 1]} : vector<8x32xbf16> to vector<8x8xbf16>
    %cst_46 = arith.constant dense<0.000000e+00> : vector<8x8xf32>
    %139 = tpu.matmul %136, %137, %cst_46 {dimension_numbers = #tpu.dot_dimension_numbers<[1], [1], [0], [0], [0, 0, 1, 0], [], []>} : vector<8x8xbf16>, vector<8x8xbf16>, vector<8x8xf32> -> vector<8x8xf32>
    %cst_47 = arith.constant 0.353553385 : f32
    %140 = vector.broadcast %cst_47 : f32 to vector<8x8xf32>
    %141 = arith.mulf %139, %140 : vector<8x8xf32>
    %c0_i32_48 = arith.constant 0 : i32
    %142 = vector.broadcast %c0_i32_48 : i32 to vector<8x8xi32>
    %143 = arith.cmpi eq, %132, %142 : vector<8x8xi32>
    %cst_49 = arith.constant -1.000000e+09 : f32
    %144 = vector.broadcast %cst_49 : f32 to vector<8x8xf32>
    %145 = arith.select %143, %144, %141 : vector<8x8xi1>, vector<8x8xf32>
    %cst_50 = arith.constant dense<0xFF800000> : vector<8xf32>
    %146 = vector.multi_reduction <maximumf>, %145, %cst_50 [1] : vector<8x8xf32> to vector<8xf32>
    %147 = vector.shape_cast %146 : vector<8xf32> to vector<8x1xf32>
    %148 = vector.broadcast %147 : vector<8x1xf32> to vector<8x8xf32>
    %149 = arith.subf %145, %148 : vector<8x8xf32>
    %150 = math.exp %149 : vector<8x8xf32>
    %cst_51 = arith.constant dense<0.000000e+00> : vector<8xf32>
    %151 = vector.multi_reduction <add>, %150, %cst_51 [1] : vector<8x8xf32> to vector<8xf32>
    %152 = vector.shape_cast %151 : vector<8xf32> to vector<8x1xf32>
    %153 = tpu.reciprocal %152 {approx = true} : vector<8x1xf32> -> vector<8x1xf32>
    %154 = vector.broadcast %153 : vector<8x1xf32> to vector<8x8xf32>
    %155 = arith.mulf %150, %154 : vector<8x8xf32>
    %156 = arith.truncf %155 : vector<8x8xf32> to vector<8x8xbf16>
    %cst_52 = arith.constant dense<0.000000e+00> : vector<8x8xf32>
    %157 = tpu.matmul %156, %138, %cst_52 {dimension_numbers = #tpu.dot_dimension_numbers<[1], [0], [0], [1], [0, 0, 1, 1], [], []>} : vector<8x8xbf16>, vector<8x8xbf16>, vector<8x8xf32> -> vector<8x8xf32>
    %158 = vector.extract_strided_slice %133 {offsets = [0, 8], sizes = [8, 8], strides = [1, 1]} : vector<8x32xbf16> to vector<8x8xbf16>
    %159 = vector.extract_strided_slice %134 {offsets = [0, 8], sizes = [8, 8], strides = [1, 1]} : vector<8x32xbf16> to vector<8x8xbf16>
    %160 = vector.extract_strided_slice %135 {offsets = [0, 8], sizes = [8, 8], strides = [1, 1]} : vector<8x32xbf16> to vector<8x8xbf16>
    %cst_53 = arith.constant dense<0.000000e+00> : vector<8x8xf32>
    %161 = tpu.matmul %158, %159, %cst_53 {dimension_numbers = #tpu.dot_dimension_numbers<[1], [1], [0], [0], [0, 0, 1, 0], [], []>} : vector<8x8xbf16>, vector<8x8xbf16>, vector<8x8xf32> -> vector<8x8xf32>
    %cst_54 = arith.constant 0.353553385 : f32
    %162 = vector.broadcast %cst_54 : f32 to vector<8x8xf32>
    %163 = arith.mulf %161, %162 : vector<8x8xf32>
    %c0_i32_55 = arith.constant 0 : i32
    %164 = vector.broadcast %c0_i32_55 : i32 to vector<8x8xi32>
    %165 = arith.cmpi eq, %132, %164 : vector<8x8xi32>
    %cst_56 = arith.constant -1.000000e+09 : f32
    %166 = vector.broadcast %cst_56 : f32 to vector<8x8xf32>
    %167 = arith.select %165, %166, %163 : vector<8x8xi1>, vector<8x8xf32>
    %cst_57 = arith.constant dense<0xFF800000> : vector<8xf32>
    %168 = vector.multi_reduction <maximumf>, %167, %cst_57 [1] : vector<8x8xf32> to vector<8xf32>
    %169 = vector.shape_cast %168 : vector<8xf32> to vector<8x1xf32>
    %170 = vector.broadcast %169 : vector<8x1xf32> to vector<8x8xf32>
    %171 = arith.subf %167, %170 : vector<8x8xf32>
    %172 = math.exp %171 : vector<8x8xf32>
    %cst_58 = arith.constant dense<0.000000e+00> : vector<8xf32>
    %173 = vector.multi_reduction <add>, %172, %cst_58 [1] : vector<8x8xf32> to vector<8xf32>
    %174 = vector.shape_cast %173 : vector<8xf32> to vector<8x1xf32>
    %175 = tpu.reciprocal %174 {approx = true} : vector<8x1xf32> -> vector<8x1xf32>
    %176 = vector.broadcast %175 : vector<8x1xf32> to vector<8x8xf32>
    %177 = arith.mulf %172, %176 : vector<8x8xf32>
    %178 = arith.truncf %177 : vector<8x8xf32> to vector<8x8xbf16>
    %cst_59 = arith.constant dense<0.000000e+00> : vector<8x8xf32>
    %179 = tpu.matmul %178, %160, %cst_59 {dimension_numbers = #tpu.dot_dimension_numbers<[1], [0], [0], [1], [0, 0, 1, 1], [], []>} : vector<8x8xbf16>, vector<8x8xbf16>, vector<8x8xf32> -> vector<8x8xf32>
    %180 = vector.extract_strided_slice %133 {offsets = [0, 16], sizes = [8, 8], strides = [1, 1]} : vector<8x32xbf16> to vector<8x8xbf16>
    %181 = vector.extract_strided_slice %134 {offsets = [0, 16], sizes = [8, 8], strides = [1, 1]} : vector<8x32xbf16> to vector<8x8xbf16>
    %182 = vector.extract_strided_slice %135 {offsets = [0, 16], sizes = [8, 8], strides = [1, 1]} : vector<8x32xbf16> to vector<8x8xbf16>
    %cst_60 = arith.constant dense<0.000000e+00> : vector<8x8xf32>
    %183 = tpu.matmul %180, %181, %cst_60 {dimension_numbers = #tpu.dot_dimension_numbers<[1], [1], [0], [0], [0, 0, 1, 0], [], []>} : vector<8x8xbf16>, vector<8x8xbf16>, vector<8x8xf32> -> vector<8x8xf32>
    %cst_61 = arith.constant 0.353553385 : f32
    %184 = vector.broadcast %cst_61 : f32 to vector<8x8xf32>
    %185 = arith.mulf %183, %184 : vector<8x8xf32>
    %c0_i32_62 = arith.constant 0 : i32
    %186 = vector.broadcast %c0_i32_62 : i32 to vector<8x8xi32>
    %187 = arith.cmpi eq, %132, %186 : vector<8x8xi32>
    %cst_63 = arith.constant -1.000000e+09 : f32
    %188 = vector.broadcast %cst_63 : f32 to vector<8x8xf32>
    %189 = arith.select %187, %188, %185 : vector<8x8xi1>, vector<8x8xf32>
    %cst_64 = arith.constant dense<0xFF800000> : vector<8xf32>
    %190 = vector.multi_reduction <maximumf>, %189, %cst_64 [1] : vector<8x8xf32> to vector<8xf32>
    %191 = vector.shape_cast %190 : vector<8xf32> to vector<8x1xf32>
    %192 = vector.broadcast %191 : vector<8x1xf32> to vector<8x8xf32>
    %193 = arith.subf %189, %192 : vector<8x8xf32>
    %194 = math.exp %193 : vector<8x8xf32>
    %cst_65 = arith.constant dense<0.000000e+00> : vector<8xf32>
    %195 = vector.multi_reduction <add>, %194, %cst_65 [1] : vector<8x8xf32> to vector<8xf32>
    %196 = vector.shape_cast %195 : vector<8xf32> to vector<8x1xf32>
    %197 = tpu.reciprocal %196 {approx = true} : vector<8x1xf32> -> vector<8x1xf32>
    %198 = vector.broadcast %197 : vector<8x1xf32> to vector<8x8xf32>
    %199 = arith.mulf %194, %198 : vector<8x8xf32>
    %200 = arith.truncf %199 : vector<8x8xf32> to vector<8x8xbf16>
    %cst_66 = arith.constant dense<0.000000e+00> : vector<8x8xf32>
    %201 = tpu.matmul %200, %182, %cst_66 {dimension_numbers = #tpu.dot_dimension_numbers<[1], [0], [0], [1], [0, 0, 1, 1], [], []>} : vector<8x8xbf16>, vector<8x8xbf16>, vector<8x8xf32> -> vector<8x8xf32>
    %202 = vector.extract_strided_slice %133 {offsets = [0, 24], sizes = [8, 8], strides = [1, 1]} : vector<8x32xbf16> to vector<8x8xbf16>
    %203 = vector.extract_strided_slice %134 {offsets = [0, 24], sizes = [8, 8], strides = [1, 1]} : vector<8x32xbf16> to vector<8x8xbf16>
    %204 = vector.extract_strided_slice %135 {offsets = [0, 24], sizes = [8, 8], strides = [1, 1]} : vector<8x32xbf16> to vector<8x8xbf16>
    %cst_67 = arith.constant dense<0.000000e+00> : vector<8x8xf32>
    %205 = tpu.matmul %202, %203, %cst_67 {dimension_numbers = #tpu.dot_dimension_numbers<[1], [1], [0], [0], [0, 0, 1, 0], [], []>} : vector<8x8xbf16>, vector<8x8xbf16>, vector<8x8xf32> -> vector<8x8xf32>
    %cst_68 = arith.constant 0.353553385 : f32
    %206 = vector.broadcast %cst_68 : f32 to vector<8x8xf32>
    %207 = arith.mulf %205, %206 : vector<8x8xf32>
    %c0_i32_69 = arith.constant 0 : i32
    %208 = vector.broadcast %c0_i32_69 : i32 to vector<8x8xi32>
    %209 = arith.cmpi eq, %132, %208 : vector<8x8xi32>
    %cst_70 = arith.constant -1.000000e+09 : f32
    %210 = vector.broadcast %cst_70 : f32 to vector<8x8xf32>
    %211 = arith.select %209, %210, %207 : vector<8x8xi1>, vector<8x8xf32>
    %cst_71 = arith.constant dense<0xFF800000> : vector<8xf32>
    %212 = vector.multi_reduction <maximumf>, %211, %cst_71 [1] : vector<8x8xf32> to vector<8xf32>
    %213 = vector.shape_cast %212 : vector<8xf32> to vector<8x1xf32>
    %214 = vector.broadcast %213 : vector<8x1xf32> to vector<8x8xf32>
    %215 = arith.subf %211, %214 : vector<8x8xf32>
    %216 = math.exp %215 : vector<8x8xf32>
    %cst_72 = arith.constant dense<0.000000e+00> : vector<8xf32>
    %217 = vector.multi_reduction <add>, %216, %cst_72 [1] : vector<8x8xf32> to vector<8xf32>
    %218 = vector.shape_cast %217 : vector<8xf32> to vector<8x1xf32>
    %219 = tpu.reciprocal %218 {approx = true} : vector<8x1xf32> -> vector<8x1xf32>
    %220 = vector.broadcast %219 : vector<8x1xf32> to vector<8x8xf32>
    %221 = arith.mulf %216, %220 : vector<8x8xf32>
    %222 = arith.truncf %221 : vector<8x8xf32> to vector<8x8xbf16>
    %cst_73 = arith.constant dense<0.000000e+00> : vector<8x8xf32>
    %223 = tpu.matmul %222, %204, %cst_73 {dimension_numbers = #tpu.dot_dimension_numbers<[1], [0], [0], [1], [0, 0, 1, 1], [], []>} : vector<8x8xbf16>, vector<8x8xbf16>, vector<8x8xf32> -> vector<8x8xf32>
    %224 = tpu.concatenate %157, %179, %201, %223 in 1 : vector<8x8xf32>, vector<8x8xf32>, vector<8x8xf32>, vector<8x8xf32> -> vector<8x32xf32>
    %225 = tpu.concatenate %130, %224 in 0 : vector<8x32xf32>, vector<8x32xf32> -> vector<16x32xf32>
    %226 = arith.truncf %225 : vector<16x32xf32> to vector<16x32xbf16>
    %c0_74 = arith.constant 0 : index
    %c0_75 = arith.constant 0 : index
    %227 = vector.load %arg8[%c0_74, %c0_75] : memref<32x32xbf16, #tpu.memory_space<vmem>>, vector<32x32xbf16>
    %cst_76 = arith.constant dense<0.000000e+00> : vector<16x32xf32>
    %228 = tpu.matmul %226, %227, %cst_76 {dimension_numbers = #tpu.dot_dimension_numbers<[1], [0], [0], [1], [0, 0, 1, 1], [], []>} : vector<16x32xbf16>, vector<32x32xbf16>, vector<16x32xf32> -> vector<16x32xf32>
    %c0_77 = arith.constant 0 : index
    %c0_78 = arith.constant 0 : index
    %229 = vector.load %arg9[%c0_77, %c0_78] : memref<1x32xf32, #tpu.memory_space<vmem>>, vector<1x32xf32>
    %230 = vector.broadcast %229 : vector<1x32xf32> to vector<16x32xf32>
    %231 = arith.addf %228, %230 : vector<16x32xf32>
    %232 = arith.addf %0, %231 : vector<16x32xf32>
    %c0_79 = arith.constant 0 : index
    %c0_80 = arith.constant 0 : index
    %233 = vector.load %arg10[%c0_79, %c0_80] : memref<1x32xf32, #tpu.memory_space<vmem>>, vector<1x32xf32>
    %c0_81 = arith.constant 0 : index
    %c0_82 = arith.constant 0 : index
    %234 = vector.load %arg11[%c0_81, %c0_82] : memref<1x32xf32, #tpu.memory_space<vmem>>, vector<1x32xf32>
    %cst_83 = arith.constant dense<0.000000e+00> : vector<16xf32>
    %235 = vector.multi_reduction <add>, %232, %cst_83 [1] : vector<16x32xf32> to vector<16xf32>
    %236 = vector.shape_cast %235 : vector<16xf32> to vector<16x1xf32>
    %cst_84 = arith.constant 3.200000e+01 : f32
    %237 = vector.broadcast %cst_84 : f32 to vector<16x1xf32>
    %238 = arith.divf %236, %237 : vector<16x1xf32>
    %239 = vector.broadcast %238 : vector<16x1xf32> to vector<16x32xf32>
    %240 = arith.subf %232, %239 : vector<16x32xf32>
    %241 = arith.mulf %240, %240 : vector<16x32xf32>
    %cst_85 = arith.constant dense<0.000000e+00> : vector<16xf32>
    %242 = vector.multi_reduction <add>, %241, %cst_85 [1] : vector<16x32xf32> to vector<16xf32>
    %243 = vector.shape_cast %242 : vector<16xf32> to vector<16x1xf32>
    %cst_86 = arith.constant 0.0322580636 : f32
    %244 = vector.broadcast %cst_86 : f32 to vector<16x1xf32>
    %245 = arith.mulf %243, %244 : vector<16x1xf32>
    %246 = vector.broadcast %233 : vector<1x32xf32> to vector<16x32xf32>
    %247 = arith.mulf %246, %240 : vector<16x32xf32>
    %248 = math.sqrt %245 : vector<16x1xf32>
    %cst_87 = arith.constant 9.99999997E-7 : f32
    %249 = vector.broadcast %cst_87 : f32 to vector<16x1xf32>
    %250 = arith.addf %248, %249 : vector<16x1xf32>
    %251 = vector.broadcast %250 : vector<16x1xf32> to vector<16x32xf32>
    %252 = arith.divf %247, %251 : vector<16x32xf32>
    %253 = vector.broadcast %234 : vector<1x32xf32> to vector<16x32xf32>
    %254 = arith.addf %252, %253 : vector<16x32xf32>
    %255 = arith.truncf %254 : vector<16x32xf32> to vector<16x32xbf16>
    %c0_88 = arith.constant 0 : index
    %c0_89 = arith.constant 0 : index
    %256 = vector.load %arg12[%c0_88, %c0_89] : memref<32x32xbf16, #tpu.memory_space<vmem>>, vector<32x32xbf16>
    %cst_90 = arith.constant dense<0.000000e+00> : vector<16x32xf32>
    %257 = tpu.matmul %255, %256, %cst_90 {dimension_numbers = #tpu.dot_dimension_numbers<[1], [0], [0], [1], [0, 0, 1, 1], [], []>} : vector<16x32xbf16>, vector<32x32xbf16>, vector<16x32xf32> -> vector<16x32xf32>
    %c0_91 = arith.constant 0 : index
    %c0_92 = arith.constant 0 : index
    %258 = vector.load %arg13[%c0_91, %c0_92] : memref<1x32xf32, #tpu.memory_space<vmem>>, vector<1x32xf32>
    %259 = vector.broadcast %258 : vector<1x32xf32> to vector<16x32xf32>
    %260 = arith.addf %257, %259 : vector<16x32xf32>
    %261 = arith.truncf %1 : vector<16x32xf32> to vector<16x32xbf16>
    %c0_93 = arith.constant 0 : index
    %c0_94 = arith.constant 0 : index
    %262 = vector.load %arg14[%c0_93, %c0_94] : memref<32x64xbf16, #tpu.memory_space<vmem>>, vector<32x64xbf16>
    %cst_95 = arith.constant dense<0.000000e+00> : vector<16x64xf32>
    %263 = tpu.matmul %261, %262, %cst_95 {dimension_numbers = #tpu.dot_dimension_numbers<[1], [0], [0], [1], [0, 0, 1, 1], [], []>} : vector<16x32xbf16>, vector<32x64xbf16>, vector<16x64xf32> -> vector<16x64xf32>
    %c0_96 = arith.constant 0 : index
    %c0_97 = arith.constant 0 : index
    %264 = vector.load %arg15[%c0_96, %c0_97] : memref<1x64xf32, #tpu.memory_space<vmem>>, vector<1x64xf32>
    %265 = vector.broadcast %264 : vector<1x64xf32> to vector<16x64xf32>
    %266 = arith.addf %263, %265 : vector<16x64xf32>
    %267 = vector.extract_strided_slice %266 {offsets = [0, 0], sizes = [16, 32], strides = [1, 1]} : vector<16x64xf32> to vector<16x32xf32>
    %268 = vector.extract_strided_slice %266 {offsets = [0, 32], sizes = [16, 32], strides = [1, 1]} : vector<16x64xf32> to vector<16x32xf32>
    %c0_98 = arith.constant 0 : index
    %c0_99 = arith.constant 0 : index
    %c0_100 = arith.constant 0 : index
    %269 = vector.load %arg2[%c0_98, %c0_99, %c0_100] : memref<2x1x8xi32, #tpu.memory_space<vmem>>, vector<2x1x8xi32>
    %270 = arith.truncf %260 : vector<16x32xf32> to vector<16x32xbf16>
    %271 = arith.truncf %267 : vector<16x32xf32> to vector<16x32xbf16>
    %272 = arith.truncf %268 : vector<16x32xf32> to vector<16x32xbf16>
    %273 = vector.extract_strided_slice %269 {offsets = [0, 0, 0], sizes = [1, 1, 8], strides = [1, 1, 1]} : vector<2x1x8xi32> to vector<1x1x8xi32>
    %274 = vector.shape_cast %273 : vector<1x1x8xi32> to vector<1x8xi32>
    %275 = vector.extract_strided_slice %270 {offsets = [0, 0], sizes = [8, 32], strides = [1, 1]} : vector<16x32xbf16> to vector<8x32xbf16>
    %276 = vector.extract_strided_slice %271 {offsets = [0, 0], sizes = [8, 32], strides = [1, 1]} : vector<16x32xbf16> to vector<8x32xbf16>
    %277 = vector.extract_strided_slice %272 {offsets = [0, 0], sizes = [8, 32], strides = [1, 1]} : vector<16x32xbf16> to vector<8x32xbf16>
    %278 = vector.extract_strided_slice %275 {offsets = [0, 0], sizes = [8, 8], strides = [1, 1]} : vector<8x32xbf16> to vector<8x8xbf16>
    %279 = vector.extract_strided_slice %276 {offsets = [0, 0], sizes = [8, 8], strides = [1, 1]} : vector<8x32xbf16> to vector<8x8xbf16>
    %280 = vector.extract_strided_slice %277 {offsets = [0, 0], sizes = [8, 8], strides = [1, 1]} : vector<8x32xbf16> to vector<8x8xbf16>
    %cst_101 = arith.constant dense<0.000000e+00> : vector<8x8xf32>
    %281 = tpu.matmul %278, %279, %cst_101 {dimension_numbers = #tpu.dot_dimension_numbers<[1], [1], [0], [0], [0, 0, 1, 0], [], []>} : vector<8x8xbf16>, vector<8x8xbf16>, vector<8x8xf32> -> vector<8x8xf32>
    %cst_102 = arith.constant 0.353553385 : f32
    %282 = vector.broadcast %cst_102 : f32 to vector<8x8xf32>
    %283 = arith.mulf %281, %282 : vector<8x8xf32>
    %c0_i32_103 = arith.constant 0 : i32
    %284 = vector.broadcast %c0_i32_103 : i32 to vector<1x8xi32>
    %285 = arith.cmpi eq, %274, %284 : vector<1x8xi32>
    %cst_104 = arith.constant -1.000000e+09 : f32
    %286 = vector.shape_cast %285 : vector<1x8xi1> to vector<1x8xi1>
    %287 = vector.broadcast %286 : vector<1x8xi1> to vector<8x8xi1>
    %288 = vector.broadcast %cst_104 : f32 to vector<8x8xf32>
    %289 = arith.select %287, %288, %283 : vector<8x8xi1>, vector<8x8xf32>
    %cst_105 = arith.constant dense<0xFF800000> : vector<8xf32>
    %290 = vector.multi_reduction <maximumf>, %289, %cst_105 [1] : vector<8x8xf32> to vector<8xf32>
    %291 = vector.shape_cast %290 : vector<8xf32> to vector<8x1xf32>
    %292 = vector.broadcast %291 : vector<8x1xf32> to vector<8x8xf32>
    %293 = arith.subf %289, %292 : vector<8x8xf32>
    %294 = math.exp %293 : vector<8x8xf32>
    %cst_106 = arith.constant dense<0.000000e+00> : vector<8xf32>
    %295 = vector.multi_reduction <add>, %294, %cst_106 [1] : vector<8x8xf32> to vector<8xf32>
    %296 = vector.shape_cast %295 : vector<8xf32> to vector<8x1xf32>
    %297 = tpu.reciprocal %296 {approx = true} : vector<8x1xf32> -> vector<8x1xf32>
    %298 = vector.broadcast %297 : vector<8x1xf32> to vector<8x8xf32>
    %299 = arith.mulf %294, %298 : vector<8x8xf32>
    %300 = arith.truncf %299 : vector<8x8xf32> to vector<8x8xbf16>
    %cst_107 = arith.constant dense<0.000000e+00> : vector<8x8xf32>
    %301 = tpu.matmul %300, %280, %cst_107 {dimension_numbers = #tpu.dot_dimension_numbers<[1], [0], [0], [1], [0, 0, 1, 1], [], []>} : vector<8x8xbf16>, vector<8x8xbf16>, vector<8x8xf32> -> vector<8x8xf32>
    %302 = vector.extract_strided_slice %275 {offsets = [0, 8], sizes = [8, 8], strides = [1, 1]} : vector<8x32xbf16> to vector<8x8xbf16>
    %303 = vector.extract_strided_slice %276 {offsets = [0, 8], sizes = [8, 8], strides = [1, 1]} : vector<8x32xbf16> to vector<8x8xbf16>
    %304 = vector.extract_strided_slice %277 {offsets = [0, 8], sizes = [8, 8], strides = [1, 1]} : vector<8x32xbf16> to vector<8x8xbf16>
    %cst_108 = arith.constant dense<0.000000e+00> : vector<8x8xf32>
    %305 = tpu.matmul %302, %303, %cst_108 {dimension_numbers = #tpu.dot_dimension_numbers<[1], [1], [0], [0], [0, 0, 1, 0], [], []>} : vector<8x8xbf16>, vector<8x8xbf16>, vector<8x8xf32> -> vector<8x8xf32>
    %cst_109 = arith.constant 0.353553385 : f32
    %306 = vector.broadcast %cst_109 : f32 to vector<8x8xf32>
    %307 = arith.mulf %305, %306 : vector<8x8xf32>
    %c0_i32_110 = arith.constant 0 : i32
    %308 = vector.broadcast %c0_i32_110 : i32 to vector<1x8xi32>
    %309 = arith.cmpi eq, %274, %308 : vector<1x8xi32>
    %cst_111 = arith.constant -1.000000e+09 : f32
    %310 = vector.shape_cast %309 : vector<1x8xi1> to vector<1x8xi1>
    %311 = vector.broadcast %310 : vector<1x8xi1> to vector<8x8xi1>
    %312 = vector.broadcast %cst_111 : f32 to vector<8x8xf32>
    %313 = arith.select %311, %312, %307 : vector<8x8xi1>, vector<8x8xf32>
    %cst_112 = arith.constant dense<0xFF800000> : vector<8xf32>
    %314 = vector.multi_reduction <maximumf>, %313, %cst_112 [1] : vector<8x8xf32> to vector<8xf32>
    %315 = vector.shape_cast %314 : vector<8xf32> to vector<8x1xf32>
    %316 = vector.broadcast %315 : vector<8x1xf32> to vector<8x8xf32>
    %317 = arith.subf %313, %316 : vector<8x8xf32>
    %318 = math.exp %317 : vector<8x8xf32>
    %cst_113 = arith.constant dense<0.000000e+00> : vector<8xf32>
    %319 = vector.multi_reduction <add>, %318, %cst_113 [1] : vector<8x8xf32> to vector<8xf32>
    %320 = vector.shape_cast %319 : vector<8xf32> to vector<8x1xf32>
    %321 = tpu.reciprocal %320 {approx = true} : vector<8x1xf32> -> vector<8x1xf32>
    %322 = vector.broadcast %321 : vector<8x1xf32> to vector<8x8xf32>
    %323 = arith.mulf %318, %322 : vector<8x8xf32>
    %324 = arith.truncf %323 : vector<8x8xf32> to vector<8x8xbf16>
    %cst_114 = arith.constant dense<0.000000e+00> : vector<8x8xf32>
    %325 = tpu.matmul %324, %304, %cst_114 {dimension_numbers = #tpu.dot_dimension_numbers<[1], [0], [0], [1], [0, 0, 1, 1], [], []>} : vector<8x8xbf16>, vector<8x8xbf16>, vector<8x8xf32> -> vector<8x8xf32>
    %326 = vector.extract_strided_slice %275 {offsets = [0, 16], sizes = [8, 8], strides = [1, 1]} : vector<8x32xbf16> to vector<8x8xbf16>
    %327 = vector.extract_strided_slice %276 {offsets = [0, 16], sizes = [8, 8], strides = [1, 1]} : vector<8x32xbf16> to vector<8x8xbf16>
    %328 = vector.extract_strided_slice %277 {offsets = [0, 16], sizes = [8, 8], strides = [1, 1]} : vector<8x32xbf16> to vector<8x8xbf16>
    %cst_115 = arith.constant dense<0.000000e+00> : vector<8x8xf32>
    %329 = tpu.matmul %326, %327, %cst_115 {dimension_numbers = #tpu.dot_dimension_numbers<[1], [1], [0], [0], [0, 0, 1, 0], [], []>} : vector<8x8xbf16>, vector<8x8xbf16>, vector<8x8xf32> -> vector<8x8xf32>
    %cst_116 = arith.constant 0.353553385 : f32
    %330 = vector.broadcast %cst_116 : f32 to vector<8x8xf32>
    %331 = arith.mulf %329, %330 : vector<8x8xf32>
    %c0_i32_117 = arith.constant 0 : i32
    %332 = vector.broadcast %c0_i32_117 : i32 to vector<1x8xi32>
    %333 = arith.cmpi eq, %274, %332 : vector<1x8xi32>
    %cst_118 = arith.constant -1.000000e+09 : f32
    %334 = vector.shape_cast %333 : vector<1x8xi1> to vector<1x8xi1>
    %335 = vector.broadcast %334 : vector<1x8xi1> to vector<8x8xi1>
    %336 = vector.broadcast %cst_118 : f32 to vector<8x8xf32>
    %337 = arith.select %335, %336, %331 : vector<8x8xi1>, vector<8x8xf32>
    %cst_119 = arith.constant dense<0xFF800000> : vector<8xf32>
    %338 = vector.multi_reduction <maximumf>, %337, %cst_119 [1] : vector<8x8xf32> to vector<8xf32>
    %339 = vector.shape_cast %338 : vector<8xf32> to vector<8x1xf32>
    %340 = vector.broadcast %339 : vector<8x1xf32> to vector<8x8xf32>
    %341 = arith.subf %337, %340 : vector<8x8xf32>
    %342 = math.exp %341 : vector<8x8xf32>
    %cst_120 = arith.constant dense<0.000000e+00> : vector<8xf32>
    %343 = vector.multi_reduction <add>, %342, %cst_120 [1] : vector<8x8xf32> to vector<8xf32>
    %344 = vector.shape_cast %343 : vector<8xf32> to vector<8x1xf32>
    %345 = tpu.reciprocal %344 {approx = true} : vector<8x1xf32> -> vector<8x1xf32>
    %346 = vector.broadcast %345 : vector<8x1xf32> to vector<8x8xf32>
    %347 = arith.mulf %342, %346 : vector<8x8xf32>
    %348 = arith.truncf %347 : vector<8x8xf32> to vector<8x8xbf16>
    %cst_121 = arith.constant dense<0.000000e+00> : vector<8x8xf32>
    %349 = tpu.matmul %348, %328, %cst_121 {dimension_numbers = #tpu.dot_dimension_numbers<[1], [0], [0], [1], [0, 0, 1, 1], [], []>} : vector<8x8xbf16>, vector<8x8xbf16>, vector<8x8xf32> -> vector<8x8xf32>
    %350 = vector.extract_strided_slice %275 {offsets = [0, 24], sizes = [8, 8], strides = [1, 1]} : vector<8x32xbf16> to vector<8x8xbf16>
    %351 = vector.extract_strided_slice %276 {offsets = [0, 24], sizes = [8, 8], strides = [1, 1]} : vector<8x32xbf16> to vector<8x8xbf16>
    %352 = vector.extract_strided_slice %277 {offsets = [0, 24], sizes = [8, 8], strides = [1, 1]} : vector<8x32xbf16> to vector<8x8xbf16>
    %cst_122 = arith.constant dense<0.000000e+00> : vector<8x8xf32>
    %353 = tpu.matmul %350, %351, %cst_122 {dimension_numbers = #tpu.dot_dimension_numbers<[1], [1], [0], [0], [0, 0, 1, 0], [], []>} : vector<8x8xbf16>, vector<8x8xbf16>, vector<8x8xf32> -> vector<8x8xf32>
    %cst_123 = arith.constant 0.353553385 : f32
    %354 = vector.broadcast %cst_123 : f32 to vector<8x8xf32>
    %355 = arith.mulf %353, %354 : vector<8x8xf32>
    %c0_i32_124 = arith.constant 0 : i32
    %356 = vector.broadcast %c0_i32_124 : i32 to vector<1x8xi32>
    %357 = arith.cmpi eq, %274, %356 : vector<1x8xi32>
    %cst_125 = arith.constant -1.000000e+09 : f32
    %358 = vector.shape_cast %357 : vector<1x8xi1> to vector<1x8xi1>
    %359 = vector.broadcast %358 : vector<1x8xi1> to vector<8x8xi1>
    %360 = vector.broadcast %cst_125 : f32 to vector<8x8xf32>
    %361 = arith.select %359, %360, %355 : vector<8x8xi1>, vector<8x8xf32>
    %cst_126 = arith.constant dense<0xFF800000> : vector<8xf32>
    %362 = vector.multi_reduction <maximumf>, %361, %cst_126 [1] : vector<8x8xf32> to vector<8xf32>
    %363 = vector.shape_cast %362 : vector<8xf32> to vector<8x1xf32>
    %364 = vector.broadcast %363 : vector<8x1xf32> to vector<8x8xf32>
    %365 = arith.subf %361, %364 : vector<8x8xf32>
    %366 = math.exp %365 : vector<8x8xf32>
    %cst_127 = arith.constant dense<0.000000e+00> : vector<8xf32>
    %367 = vector.multi_reduction <add>, %366, %cst_127 [1] : vector<8x8xf32> to vector<8xf32>
    %368 = vector.shape_cast %367 : vector<8xf32> to vector<8x1xf32>
    %369 = tpu.reciprocal %368 {approx = true} : vector<8x1xf32> -> vector<8x1xf32>
    %370 = vector.broadcast %369 : vector<8x1xf32> to vector<8x8xf32>
    %371 = arith.mulf %366, %370 : vector<8x8xf32>
    %372 = arith.truncf %371 : vector<8x8xf32> to vector<8x8xbf16>
    %cst_128 = arith.constant dense<0.000000e+00> : vector<8x8xf32>
    %373 = tpu.matmul %372, %352, %cst_128 {dimension_numbers = #tpu.dot_dimension_numbers<[1], [0], [0], [1], [0, 0, 1, 1], [], []>} : vector<8x8xbf16>, vector<8x8xbf16>, vector<8x8xf32> -> vector<8x8xf32>
    %374 = tpu.concatenate %301, %325, %349, %373 in 1 : vector<8x8xf32>, vector<8x8xf32>, vector<8x8xf32>, vector<8x8xf32> -> vector<8x32xf32>
    %375 = vector.extract_strided_slice %269 {offsets = [1, 0, 0], sizes = [1, 1, 8], strides = [1, 1, 1]} : vector<2x1x8xi32> to vector<1x1x8xi32>
    %376 = vector.shape_cast %375 : vector<1x1x8xi32> to vector<1x8xi32>
    %377 = vector.extract_strided_slice %270 {offsets = [8, 0], sizes = [8, 32], strides = [1, 1]} : vector<16x32xbf16> to vector<8x32xbf16>
    %378 = vector.extract_strided_slice %271 {offsets = [8, 0], sizes = [8, 32], strides = [1, 1]} : vector<16x32xbf16> to vector<8x32xbf16>
    %379 = vector.extract_strided_slice %272 {offsets = [8, 0], sizes = [8, 32], strides = [1, 1]} : vector<16x32xbf16> to vector<8x32xbf16>
    %380 = vector.extract_strided_slice %377 {offsets = [0, 0], sizes = [8, 8], strides = [1, 1]} : vector<8x32xbf16> to vector<8x8xbf16>
    %381 = vector.extract_strided_slice %378 {offsets = [0, 0], sizes = [8, 8], strides = [1, 1]} : vector<8x32xbf16> to vector<8x8xbf16>
    %382 = vector.extract_strided_slice %379 {offsets = [0, 0], sizes = [8, 8], strides = [1, 1]} : vector<8x32xbf16> to vector<8x8xbf16>
    %cst_129 = arith.constant dense<0.000000e+00> : vector<8x8xf32>
    %383 = tpu.matmul %380, %381, %cst_129 {dimension_numbers = #tpu.dot_dimension_numbers<[1], [1], [0], [0], [0, 0, 1, 0], [], []>} : vector<8x8xbf16>, vector<8x8xbf16>, vector<8x8xf32> -> vector<8x8xf32>
    %cst_130 = arith.constant 0.353553385 : f32
    %384 = vector.broadcast %cst_130 : f32 to vector<8x8xf32>
    %385 = arith.mulf %383, %384 : vector<8x8xf32>
    %c0_i32_131 = arith.constant 0 : i32
    %386 = vector.broadcast %c0_i32_131 : i32 to vector<1x8xi32>
    %387 = arith.cmpi eq, %376, %386 : vector<1x8xi32>
    %cst_132 = arith.constant -1.000000e+09 : f32
    %388 = vector.shape_cast %387 : vector<1x8xi1> to vector<1x8xi1>
    %389 = vector.broadcast %388 : vector<1x8xi1> to vector<8x8xi1>
    %390 = vector.broadcast %cst_132 : f32 to vector<8x8xf32>
    %391 = arith.select %389, %390, %385 : vector<8x8xi1>, vector<8x8xf32>
    %cst_133 = arith.constant dense<0xFF800000> : vector<8xf32>
    %392 = vector.multi_reduction <maximumf>, %391, %cst_133 [1] : vector<8x8xf32> to vector<8xf32>
    %393 = vector.shape_cast %392 : vector<8xf32> to vector<8x1xf32>
    %394 = vector.broadcast %393 : vector<8x1xf32> to vector<8x8xf32>
    %395 = arith.subf %391, %394 : vector<8x8xf32>
    %396 = math.exp %395 : vector<8x8xf32>
    %cst_134 = arith.constant dense<0.000000e+00> : vector<8xf32>
    %397 = vector.multi_reduction <add>, %396, %cst_134 [1] : vector<8x8xf32> to vector<8xf32>
    %398 = vector.shape_cast %397 : vector<8xf32> to vector<8x1xf32>
    %399 = tpu.reciprocal %398 {approx = true} : vector<8x1xf32> -> vector<8x1xf32>
    %400 = vector.broadcast %399 : vector<8x1xf32> to vector<8x8xf32>
    %401 = arith.mulf %396, %400 : vector<8x8xf32>
    %402 = arith.truncf %401 : vector<8x8xf32> to vector<8x8xbf16>
    %cst_135 = arith.constant dense<0.000000e+00> : vector<8x8xf32>
    %403 = tpu.matmul %402, %382, %cst_135 {dimension_numbers = #tpu.dot_dimension_numbers<[1], [0], [0], [1], [0, 0, 1, 1], [], []>} : vector<8x8xbf16>, vector<8x8xbf16>, vector<8x8xf32> -> vector<8x8xf32>
    %404 = vector.extract_strided_slice %377 {offsets = [0, 8], sizes = [8, 8], strides = [1, 1]} : vector<8x32xbf16> to vector<8x8xbf16>
    %405 = vector.extract_strided_slice %378 {offsets = [0, 8], sizes = [8, 8], strides = [1, 1]} : vector<8x32xbf16> to vector<8x8xbf16>
    %406 = vector.extract_strided_slice %379 {offsets = [0, 8], sizes = [8, 8], strides = [1, 1]} : vector<8x32xbf16> to vector<8x8xbf16>
    %cst_136 = arith.constant dense<0.000000e+00> : vector<8x8xf32>
    %407 = tpu.matmul %404, %405, %cst_136 {dimension_numbers = #tpu.dot_dimension_numbers<[1], [1], [0], [0], [0, 0, 1, 0], [], []>} : vector<8x8xbf16>, vector<8x8xbf16>, vector<8x8xf32> -> vector<8x8xf32>
    %cst_137 = arith.constant 0.353553385 : f32
    %408 = vector.broadcast %cst_137 : f32 to vector<8x8xf32>
    %409 = arith.mulf %407, %408 : vector<8x8xf32>
    %c0_i32_138 = arith.constant 0 : i32
    %410 = vector.broadcast %c0_i32_138 : i32 to vector<1x8xi32>
    %411 = arith.cmpi eq, %376, %410 : vector<1x8xi32>
    %cst_139 = arith.constant -1.000000e+09 : f32
    %412 = vector.shape_cast %411 : vector<1x8xi1> to vector<1x8xi1>
    %413 = vector.broadcast %412 : vector<1x8xi1> to vector<8x8xi1>
    %414 = vector.broadcast %cst_139 : f32 to vector<8x8xf32>
    %415 = arith.select %413, %414, %409 : vector<8x8xi1>, vector<8x8xf32>
    %cst_140 = arith.constant dense<0xFF800000> : vector<8xf32>
    %416 = vector.multi_reduction <maximumf>, %415, %cst_140 [1] : vector<8x8xf32> to vector<8xf32>
    %417 = vector.shape_cast %416 : vector<8xf32> to vector<8x1xf32>
    %418 = vector.broadcast %417 : vector<8x1xf32> to vector<8x8xf32>
    %419 = arith.subf %415, %418 : vector<8x8xf32>
    %420 = math.exp %419 : vector<8x8xf32>
    %cst_141 = arith.constant dense<0.000000e+00> : vector<8xf32>
    %421 = vector.multi_reduction <add>, %420, %cst_141 [1] : vector<8x8xf32> to vector<8xf32>
    %422 = vector.shape_cast %421 : vector<8xf32> to vector<8x1xf32>
    %423 = tpu.reciprocal %422 {approx = true} : vector<8x1xf32> -> vector<8x1xf32>
    %424 = vector.broadcast %423 : vector<8x1xf32> to vector<8x8xf32>
    %425 = arith.mulf %420, %424 : vector<8x8xf32>
    %426 = arith.truncf %425 : vector<8x8xf32> to vector<8x8xbf16>
    %cst_142 = arith.constant dense<0.000000e+00> : vector<8x8xf32>
    %427 = tpu.matmul %426, %406, %cst_142 {dimension_numbers = #tpu.dot_dimension_numbers<[1], [0], [0], [1], [0, 0, 1, 1], [], []>} : vector<8x8xbf16>, vector<8x8xbf16>, vector<8x8xf32> -> vector<8x8xf32>
    %428 = vector.extract_strided_slice %377 {offsets = [0, 16], sizes = [8, 8], strides = [1, 1]} : vector<8x32xbf16> to vector<8x8xbf16>
    %429 = vector.extract_strided_slice %378 {offsets = [0, 16], sizes = [8, 8], strides = [1, 1]} : vector<8x32xbf16> to vector<8x8xbf16>
    %430 = vector.extract_strided_slice %379 {offsets = [0, 16], sizes = [8, 8], strides = [1, 1]} : vector<8x32xbf16> to vector<8x8xbf16>
    %cst_143 = arith.constant dense<0.000000e+00> : vector<8x8xf32>
    %431 = tpu.matmul %428, %429, %cst_143 {dimension_numbers = #tpu.dot_dimension_numbers<[1], [1], [0], [0], [0, 0, 1, 0], [], []>} : vector<8x8xbf16>, vector<8x8xbf16>, vector<8x8xf32> -> vector<8x8xf32>
    %cst_144 = arith.constant 0.353553385 : f32
    %432 = vector.broadcast %cst_144 : f32 to vector<8x8xf32>
    %433 = arith.mulf %431, %432 : vector<8x8xf32>
    %c0_i32_145 = arith.constant 0 : i32
    %434 = vector.broadcast %c0_i32_145 : i32 to vector<1x8xi32>
    %435 = arith.cmpi eq, %376, %434 : vector<1x8xi32>
    %cst_146 = arith.constant -1.000000e+09 : f32
    %436 = vector.shape_cast %435 : vector<1x8xi1> to vector<1x8xi1>
    %437 = vector.broadcast %436 : vector<1x8xi1> to vector<8x8xi1>
    %438 = vector.broadcast %cst_146 : f32 to vector<8x8xf32>
    %439 = arith.select %437, %438, %433 : vector<8x8xi1>, vector<8x8xf32>
    %cst_147 = arith.constant dense<0xFF800000> : vector<8xf32>
    %440 = vector.multi_reduction <maximumf>, %439, %cst_147 [1] : vector<8x8xf32> to vector<8xf32>
    %441 = vector.shape_cast %440 : vector<8xf32> to vector<8x1xf32>
    %442 = vector.broadcast %441 : vector<8x1xf32> to vector<8x8xf32>
    %443 = arith.subf %439, %442 : vector<8x8xf32>
    %444 = math.exp %443 : vector<8x8xf32>
    %cst_148 = arith.constant dense<0.000000e+00> : vector<8xf32>
    %445 = vector.multi_reduction <add>, %444, %cst_148 [1] : vector<8x8xf32> to vector<8xf32>
    %446 = vector.shape_cast %445 : vector<8xf32> to vector<8x1xf32>
    %447 = tpu.reciprocal %446 {approx = true} : vector<8x1xf32> -> vector<8x1xf32>
    %448 = vector.broadcast %447 : vector<8x1xf32> to vector<8x8xf32>
    %449 = arith.mulf %444, %448 : vector<8x8xf32>
    %450 = arith.truncf %449 : vector<8x8xf32> to vector<8x8xbf16>
    %cst_149 = arith.constant dense<0.000000e+00> : vector<8x8xf32>
    %451 = tpu.matmul %450, %430, %cst_149 {dimension_numbers = #tpu.dot_dimension_numbers<[1], [0], [0], [1], [0, 0, 1, 1], [], []>} : vector<8x8xbf16>, vector<8x8xbf16>, vector<8x8xf32> -> vector<8x8xf32>
    %452 = vector.extract_strided_slice %377 {offsets = [0, 24], sizes = [8, 8], strides = [1, 1]} : vector<8x32xbf16> to vector<8x8xbf16>
    %453 = vector.extract_strided_slice %378 {offsets = [0, 24], sizes = [8, 8], strides = [1, 1]} : vector<8x32xbf16> to vector<8x8xbf16>
    %454 = vector.extract_strided_slice %379 {offsets = [0, 24], sizes = [8, 8], strides = [1, 1]} : vector<8x32xbf16> to vector<8x8xbf16>
    %cst_150 = arith.constant dense<0.000000e+00> : vector<8x8xf32>
    %455 = tpu.matmul %452, %453, %cst_150 {dimension_numbers = #tpu.dot_dimension_numbers<[1], [1], [0], [0], [0, 0, 1, 0], [], []>} : vector<8x8xbf16>, vector<8x8xbf16>, vector<8x8xf32> -> vector<8x8xf32>
    %cst_151 = arith.constant 0.353553385 : f32
    %456 = vector.broadcast %cst_151 : f32 to vector<8x8xf32>
    %457 = arith.mulf %455, %456 : vector<8x8xf32>
    %c0_i32_152 = arith.constant 0 : i32
    %458 = vector.broadcast %c0_i32_152 : i32 to vector<1x8xi32>
    %459 = arith.cmpi eq, %376, %458 : vector<1x8xi32>
    %cst_153 = arith.constant -1.000000e+09 : f32
    %460 = vector.shape_cast %459 : vector<1x8xi1> to vector<1x8xi1>
    %461 = vector.broadcast %460 : vector<1x8xi1> to vector<8x8xi1>
    %462 = vector.broadcast %cst_153 : f32 to vector<8x8xf32>
    %463 = arith.select %461, %462, %457 : vector<8x8xi1>, vector<8x8xf32>
    %cst_154 = arith.constant dense<0xFF800000> : vector<8xf32>
    %464 = vector.multi_reduction <maximumf>, %463, %cst_154 [1] : vector<8x8xf32> to vector<8xf32>
    %465 = vector.shape_cast %464 : vector<8xf32> to vector<8x1xf32>
    %466 = vector.broadcast %465 : vector<8x1xf32> to vector<8x8xf32>
    %467 = arith.subf %463, %466 : vector<8x8xf32>
    %468 = math.exp %467 : vector<8x8xf32>
    %cst_155 = arith.constant dense<0.000000e+00> : vector<8xf32>
    %469 = vector.multi_reduction <add>, %468, %cst_155 [1] : vector<8x8xf32> to vector<8xf32>
    %470 = vector.shape_cast %469 : vector<8xf32> to vector<8x1xf32>
    %471 = tpu.reciprocal %470 {approx = true} : vector<8x1xf32> -> vector<8x1xf32>
    %472 = vector.broadcast %471 : vector<8x1xf32> to vector<8x8xf32>
    %473 = arith.mulf %468, %472 : vector<8x8xf32>
    %474 = arith.truncf %473 : vector<8x8xf32> to vector<8x8xbf16>
    %cst_156 = arith.constant dense<0.000000e+00> : vector<8x8xf32>
    %475 = tpu.matmul %474, %454, %cst_156 {dimension_numbers = #tpu.dot_dimension_numbers<[1], [0], [0], [1], [0, 0, 1, 1], [], []>} : vector<8x8xbf16>, vector<8x8xbf16>, vector<8x8xf32> -> vector<8x8xf32>
    %476 = tpu.concatenate %403, %427, %451, %475 in 1 : vector<8x8xf32>, vector<8x8xf32>, vector<8x8xf32>, vector<8x8xf32> -> vector<8x32xf32>
    %477 = tpu.concatenate %374, %476 in 0 : vector<8x32xf32>, vector<8x32xf32> -> vector<16x32xf32>
    %478 = arith.truncf %477 : vector<16x32xf32> to vector<16x32xbf16>
    %c0_157 = arith.constant 0 : index
    %c0_158 = arith.constant 0 : index
    %479 = vector.load %arg16[%c0_157, %c0_158] : memref<32x32xbf16, #tpu.memory_space<vmem>>, vector<32x32xbf16>
    %cst_159 = arith.constant dense<0.000000e+00> : vector<16x32xf32>
    %480 = tpu.matmul %478, %479, %cst_159 {dimension_numbers = #tpu.dot_dimension_numbers<[1], [0], [0], [1], [0, 0, 1, 1], [], []>} : vector<16x32xbf16>, vector<32x32xbf16>, vector<16x32xf32> -> vector<16x32xf32>
    %c0_160 = arith.constant 0 : index
    %c0_161 = arith.constant 0 : index
    %481 = vector.load %arg17[%c0_160, %c0_161] : memref<1x32xf32, #tpu.memory_space<vmem>>, vector<1x32xf32>
    %482 = vector.broadcast %481 : vector<1x32xf32> to vector<16x32xf32>
    %483 = arith.addf %480, %482 : vector<16x32xf32>
    %484 = arith.addf %232, %483 : vector<16x32xf32>
    %c0_162 = arith.constant 0 : index
    %c0_163 = arith.constant 0 : index
    %485 = vector.load %arg18[%c0_162, %c0_163] : memref<1x32xf32, #tpu.memory_space<vmem>>, vector<1x32xf32>
    %c0_164 = arith.constant 0 : index
    %c0_165 = arith.constant 0 : index
    %486 = vector.load %arg19[%c0_164, %c0_165] : memref<1x32xf32, #tpu.memory_space<vmem>>, vector<1x32xf32>
    %cst_166 = arith.constant dense<0.000000e+00> : vector<16xf32>
    %487 = vector.multi_reduction <add>, %484, %cst_166 [1] : vector<16x32xf32> to vector<16xf32>
    %488 = vector.shape_cast %487 : vector<16xf32> to vector<16x1xf32>
    %cst_167 = arith.constant 3.200000e+01 : f32
    %489 = vector.broadcast %cst_167 : f32 to vector<16x1xf32>
    %490 = arith.divf %488, %489 : vector<16x1xf32>
    %491 = vector.broadcast %490 : vector<16x1xf32> to vector<16x32xf32>
    %492 = arith.subf %484, %491 : vector<16x32xf32>
    %493 = arith.mulf %492, %492 : vector<16x32xf32>
    %cst_168 = arith.constant dense<0.000000e+00> : vector<16xf32>
    %494 = vector.multi_reduction <add>, %493, %cst_168 [1] : vector<16x32xf32> to vector<16xf32>
    %495 = vector.shape_cast %494 : vector<16xf32> to vector<16x1xf32>
    %cst_169 = arith.constant 0.0322580636 : f32
    %496 = vector.broadcast %cst_169 : f32 to vector<16x1xf32>
    %497 = arith.mulf %495, %496 : vector<16x1xf32>
    %498 = vector.broadcast %485 : vector<1x32xf32> to vector<16x32xf32>
    %499 = arith.mulf %498, %492 : vector<16x32xf32>
    %500 = math.sqrt %497 : vector<16x1xf32>
    %cst_170 = arith.constant 9.99999997E-7 : f32
    %501 = vector.broadcast %cst_170 : f32 to vector<16x1xf32>
    %502 = arith.addf %500, %501 : vector<16x1xf32>
    %503 = vector.broadcast %502 : vector<16x1xf32> to vector<16x32xf32>
    %504 = arith.divf %499, %503 : vector<16x32xf32>
    %505 = vector.broadcast %486 : vector<1x32xf32> to vector<16x32xf32>
    %506 = arith.addf %504, %505 : vector<16x32xf32>
    %507 = arith.truncf %506 : vector<16x32xf32> to vector<16x32xbf16>
    %c0_171 = arith.constant 0 : index
    %c0_172 = arith.constant 0 : index
    %508 = vector.load %arg20[%c0_171, %c0_172] : memref<32x64xbf16, #tpu.memory_space<vmem>>, vector<32x64xbf16>
    %cst_173 = arith.constant dense<0.000000e+00> : vector<16x64xf32>
    %509 = tpu.matmul %507, %508, %cst_173 {dimension_numbers = #tpu.dot_dimension_numbers<[1], [0], [0], [1], [0, 0, 1, 1], [], []>} : vector<16x32xbf16>, vector<32x64xbf16>, vector<16x64xf32> -> vector<16x64xf32>
    %c0_174 = arith.constant 0 : index
    %c0_175 = arith.constant 0 : index
    %510 = vector.load %arg21[%c0_174, %c0_175] : memref<1x64xf32, #tpu.memory_space<vmem>>, vector<1x64xf32>
    %511 = vector.broadcast %510 : vector<1x64xf32> to vector<16x64xf32>
    %512 = arith.addf %509, %511 : vector<16x64xf32>
    %cst_176 = arith.constant 0.000000e+00 : f32
    %513 = vector.broadcast %cst_176 : f32 to vector<16x64xf32>
    %514 = arith.maximumf %512, %513 : vector<16x64xf32>
    %515 = arith.truncf %514 : vector<16x64xf32> to vector<16x64xbf16>
    %c0_177 = arith.constant 0 : index
    %c0_178 = arith.constant 0 : index
    %516 = vector.load %arg22[%c0_177, %c0_178] : memref<64x32xbf16, #tpu.memory_space<vmem>>, vector<64x32xbf16>
    %cst_179 = arith.constant dense<0.000000e+00> : vector<16x32xf32>
    %517 = tpu.matmul %515, %516, %cst_179 {dimension_numbers = #tpu.dot_dimension_numbers<[1], [0], [0], [1], [0, 0, 1, 1], [], []>} : vector<16x64xbf16>, vector<64x32xbf16>, vector<16x32xf32> -> vector<16x32xf32>
    %c0_180 = arith.constant 0 : index
    %c0_181 = arith.constant 0 : index
    %518 = vector.load %arg23[%c0_180, %c0_181] : memref<1x32xf32, #tpu.memory_space<vmem>>, vector<1x32xf32>
    %519 = vector.broadcast %518 : vector<1x32xf32> to vector<16x32xf32>
    %520 = arith.addf %517, %519 : vector<16x32xf32>
    %521 = arith.addf %484, %520 : vector<16x32xf32>
    %c0_182 = arith.constant 0 : index
    %c0_183 = arith.constant 0 : index
    %522 = vector.load %arg24[%c0_182, %c0_183] : memref<16x32xf32, #tpu.memory_space<vmem>>, vector<16x32xf32>
    tpu.vector_store %arg24[%c0_182, %c0_183], %521 {strides = array<i32>} : memref<16x32xf32, #tpu.memory_space<vmem>>, vector<16x32xf32>,
    return
  }
}

module attributes {stable_mosaic.version = 11 : i64} {
  func.func @_decoder_layer_kernel(%arg0: memref<16x32xf32, #tpu.memory_space<vmem>>, %arg1: memref<16x32xf32, #tpu.memory_space<vmem>>, %arg2: memref<2x1x8xi32, #tpu.memory_space<vmem>>, %arg3: memref<2x8x8xi32, #tpu.memory_space<vmem>>, %arg4: memref<1x32xf32, #tpu.memory_space<vmem>>, %arg5: memref<1x32xf32, #tpu.memory_space<vmem>>, %arg6: memref<32x96xbf16, #tpu.memory_space<vmem>>, %arg7: memref<1x96xf32, #tpu.memory_space<vmem>>, %arg8: memref<32x32xbf16, #tpu.memory_space<vmem>>, %arg9: memref<1x32xf32, #tpu.memory_space<vmem>>, %arg10: memref<1x32xf32, #tpu.memory_space<vmem>>, %arg11: memref<1x32xf32, #tpu.memory_space<vmem>>, %arg12: memref<32x32xbf16, #tpu.memory_space<vmem>>, %arg13: memref<1x32xf32, #tpu.memory_space<vmem>>, %arg14: memref<32x64xbf16, #tpu.memory_space<vmem>>, %arg15: memref<1x64xf32, #tpu.memory_space<vmem>>, %arg16: memref<32x32xbf16, #tpu.memory_space<vmem>>, %arg17: memref<1x32xf32, #tpu.memory_space<vmem>>, %arg18: memref<1x32xf32, #tpu.memory_space<vmem>>, %arg19: memref<1x32xf32, #tpu.memory_space<vmem>>, %arg20: memref<32x64xbf16, #tpu.memory_space<vmem>>, %arg21: memref<1x64xf32, #tpu.memory_space<vmem>>, %arg22: memref<64x32xbf16, #tpu.memory_space<vmem>>, %arg23: memref<1x32xf32, #tpu.memory_space<vmem>>, %arg24: memref<16x32xf32, #tpu.memory_space<vmem>>) attributes {dimension_semantics = [], scalar_prefetch = 0 : i64, scratch_operands = 0 : i64, tpu.core_type = #tpu.core_type<tc>} {
    %c0 = arith.constant 0 : index
    %c0_0 = arith.constant 0 : index
    %0 = vector.load %arg0[%c0, %c0_0] : memref<16x32xf32, #tpu.memory_space<vmem>>, vector<16x32xf32>
    %c0_1 = arith.constant 0 : index
    %c0_2 = arith.constant 0 : index
    %1 = vector.load %arg1[%c0_1, %c0_2] : memref<16x32xf32, #tpu.memory_space<vmem>>, vector<16x32xf32>
    %c0_3 = arith.constant 0 : index
    %c0_4 = arith.constant 0 : index
    %2 = vector.load %arg4[%c0_3, %c0_4] : memref<1x32xf32, #tpu.memory_space<vmem>>, vector<1x32xf32>
    %c0_5 = arith.constant 0 : index
    %c0_6 = arith.constant 0 : index
    %3 = vector.load %arg5[%c0_5, %c0_6] : memref<1x32xf32, #tpu.memory_space<vmem>>, vector<1x32xf32>
    %cst = arith.constant dense<0.000000e+00> : vector<16xf32>
    %4 = vector.multi_reduction <add>, %0, %cst [1] : vector<16x32xf32> to vector<16xf32>
    %5 = vector.shape_cast %4 : vector<16xf32> to vector<16x1xf32>
    %cst_7 = arith.constant 3.200000e+01 : f32
    %6 = vector.broadcast %cst_7 : f32 to vector<16x1xf32>
    %7 = arith.divf %5, %6 : vector<16x1xf32>
    %8 = vector.broadcast %7 : vector<16x1xf32> to vector<16x32xf32>
    %9 = arith.subf %0, %8 : vector<16x32xf32>
    %10 = arith.mulf %9, %9 : vector<16x32xf32>
    %cst_8 = arith.constant dense<0.000000e+00> : vector<16xf32>
    %11 = vector.multi_reduction <add>, %10, %cst_8 [1] : vector<16x32xf32> to vector<16xf32>
    %12 = vector.shape_cast %11 : vector<16xf32> to vector<16x1xf32>
    %cst_9 = arith.constant 0.0322580636 : f32
    %13 = vector.broadcast %cst_9 : f32 to vector<16x1xf32>
    %14 = arith.mulf %12, %13 : vector<16x1xf32>
    %15 = vector.broadcast %2 : vector<1x32xf32> to vector<16x32xf32>
    %16 = arith.mulf %15, %9 : vector<16x32xf32>
    %17 = math.sqrt %14 : vector<16x1xf32>
    %cst_10 = arith.constant 9.99999997E-7 : f32
    %18 = vector.broadcast %cst_10 : f32 to vector<16x1xf32>
    %19 = arith.addf %17, %18 : vector<16x1xf32>
    %20 = vector.broadcast %19 : vector<16x1xf32> to vector<16x32xf32>
    %21 = arith.divf %16, %20 : vector<16x32xf32>
    %22 = vector.broadcast %3 : vector<1x32xf32> to vector<16x32xf32>
    %23 = arith.addf %21, %22 : vector<16x32xf32>
    %24 = arith.truncf %23 : vector<16x32xf32> to vector<16x32xbf16>
    %c0_11 = arith.constant 0 : index
    %c0_12 = arith.constant 0 : index
    %25 = vector.load %arg6[%c0_11, %c0_12] : memref<32x96xbf16, #tpu.memory_space<vmem>>, vector<32x96xbf16>
    %cst_13 = arith.constant dense<0.000000e+00> : vector<16x96xf32>
    %26 = tpu.matmul %24, %25, %cst_13 {dimension_numbers = #tpu.dot_dimension_numbers<[1], [0], [0], [1], [0, 0, 1, 1], [], []>} : vector<16x32xbf16>, vector<32x96xbf16>, vector<16x96xf32> -> vector<16x96xf32>
    %c0_14 = arith.constant 0 : index
    %c0_15 = arith.constant 0 : index
    %27 = vector.load %arg7[%c0_14, %c0_15] : memref<1x96xf32, #tpu.memory_space<vmem>>, vector<1x96xf32>
    %28 = vector.broadcast %27 : vector<1x96xf32> to vector<16x96xf32>
    %29 = arith.addf %26, %28 : vector<16x96xf32>
    %30 = vector.extract_strided_slice %29 {offsets = [0, 0], sizes = [16, 32], strides = [1, 1]} : vector<16x96xf32> to vector<16x32xf32>
    %31 = vector.extract_strided_slice %29 {offsets = [0, 32], sizes = [16, 32], strides = [1, 1]} : vector<16x96xf32> to vector<16x32xf32>
    %32 = vector.extract_strided_slice %29 {offsets = [0, 64], sizes = [16, 32], strides = [1, 1]} : vector<16x96xf32> to vector<16x32xf32>
    %c0_16 = arith.constant 0 : index
    %c0_17 = arith.constant 0 : index
    %c0_18 = arith.constant 0 : index
    %33 = vector.load %arg3[%c0_16, %c0_17, %c0_18] : memref<2x8x8xi32, #tpu.memory_space<vmem>>, vector<2x8x8xi32>
    %34 = arith.truncf %30 : vector<16x32xf32> to vector<16x32xbf16>
    %35 = arith.truncf %31 : vector<16x32xf32> to vector<16x32xbf16>
    %36 = arith.truncf %32 : vector<16x32xf32> to vector<16x32xbf16>
    %37 = vector.extract_strided_slice %33 {offsets = [0, 0, 0], sizes = [1, 8, 8], strides = [1, 1, 1]} : vector<2x8x8xi32> to vector<1x8x8xi32>
    %38 = vector.shape_cast %37 : vector<1x8x8xi32> to vector<8x8xi32>
    %39 = vector.extract_strided_slice %34 {offsets = [0, 0], sizes = [8, 32], strides = [1, 1]} : vector<16x32xbf16> to vector<8x32xbf16>
    %40 = vector.extract_strided_slice %35 {offsets = [0, 0], sizes = [8, 32], strides = [1, 1]} : vector<16x32xbf16> to vector<8x32xbf16>
    %41 = vector.extract_strided_slice %36 {offsets = [0, 0], sizes = [8, 32], strides = [1, 1]} : vector<16x32xbf16> to vector<8x32xbf16>
    %42 = vector.extract_strided_slice %39 {offsets = [0, 0], sizes = [8, 8], strides = [1, 1]} : vector<8x32xbf16> to vector<8x8xbf16>
    %43 = vector.extract_strided_slice %40 {offsets = [0, 0], sizes = [8, 8], strides = [1, 1]} : vector<8x32xbf16> to vector<8x8xbf16>
    %44 = vector.extract_strided_slice %41 {offsets = [0, 0], sizes = [8, 8], strides = [1, 1]} : vector<8x32xbf16> to vector<8x8xbf16>
    %cst_19 = arith.constant dense<0.000000e+00> : vector<8x8xf32>
    %45 = tpu.matmul %42, %43, %cst_19 {dimension_numbers = #tpu.dot_dimension_numbers<[1], [1], [0], [0], [0, 0, 1, 0], [], []>} : vector<8x8xbf16>, vector<8x8xbf16>, vector<8x8xf32> -> vector<8x8xf32>
    %cst_20 = arith.constant 0.353553385 : f32
    %46 = vector.broadcast %cst_20 : f32 to vector<8x8xf32>
    %47 = arith.mulf %45, %46 : vector<8x8xf32>
    %c0_i32 = arith.constant 0 : i32
    %48 = vector.broadcast %c0_i32 : i32 to vector<8x8xi32>
    %49 = arith.cmpi eq, %38, %48 : vector<8x8xi32>
    %cst_21 = arith.constant -1.000000e+09 : f32
    %50 = vector.broadcast %cst_21 : f32 to vector<8x8xf32>
    %51 = arith.select %49, %50, %47 : vector<8x8xi1>, vector<8x8xf32>
    %cst_22 = arith.constant dense<0xFF800000> : vector<8xf32>
    %52 = vector.multi_reduction <maximumf>, %51, %cst_22 [1] : vector<8x8xf32> to vector<8xf32>
    %53 = vector.shape_cast %52 : vector<8xf32> to vector<8x1xf32>
    %54 = vector.broadcast %53 : vector<8x1xf32> to vector<8x8xf32>
    %55 = arith.subf %51, %54 : vector<8x8xf32>
    %56 = math.exp %55 : vector<8x8xf32>
    %cst_23 = arith.constant dense<0.000000e+00> : vector<8xf32>
    %57 = vector.multi_reduction <add>, %56, %cst_23 [1] : vector<8x8xf32> to vector<8xf32>
    %58 = vector.shape_cast %57 : vector<8xf32> to vector<8x1xf32>
    %59 = tpu.reciprocal %58 {approx = true} : vector<8x1xf32> -> vector<8x1xf32>
    %60 = vector.broadcast %59 : vector<8x1xf32> to vector<8x8xf32>
    %61 = arith.mulf %56, %60 : vector<8x8xf32>
    %62 = arith.truncf %61 : vector<8x8xf32> to vector<8x8xbf16>
    %cst_24 = arith.constant dense<0.000000e+00> : vector<8x8xf32>
    %63 = tpu.matmul %62, %44, %cst_24 {dimension_numbers = #tpu.dot_dimension_numbers<[1], [0], [0], [1], [0, 0, 1, 1], [], []>} : vector<8x8xbf16>, vector<8x8xbf16>, vector<8x8xf32> -> vector<8x8xf32>
    %64 = vector.extract_strided_slice %39 {offsets = [0, 8], sizes = [8, 8], strides = [1, 1]} : vector<8x32xbf16> to vector<8x8xbf16>
    %65 = vector.extract_strided_slice %40 {offsets = [0, 8], sizes = [8, 8], strides = [1, 1]} : vector<8x32xbf16> to vector<8x8xbf16>
    %66 = vector.extract_strided_slice %41 {offsets = [0, 8], sizes = [8, 8], strides = [1, 1]} : vector<8x32xbf16> to vector<8x8xbf16>
    %cst_25 = arith.constant dense<0.000000e+00> : vector<8x8xf32>
    %67 = tpu.matmul %64, %65, %cst_25 {dimension_numbers = #tpu.dot_dimension_numbers<[1], [1], [0], [0], [0, 0, 1, 0], [], []>} : vector<8x8xbf16>, vector<8x8xbf16>, vector<8x8xf32> -> vector<8x8xf32>
    %cst_26 = arith.constant 0.353553385 : f32
    %68 = vector.broadcast %cst_26 : f32 to vector<8x8xf32>
    %69 = arith.mulf %67, %68 : vector<8x8xf32>
    %c0_i32_27 = arith.constant 0 : i32
    %70 = vector.broadcast %c0_i32_27 : i32 to vector<8x8xi32>
    %71 = arith.cmpi eq, %38, %70 : vector<8x8xi32>
    %cst_28 = arith.constant -1.000000e+09 : f32
    %72 = vector.broadcast %cst_28 : f32 to vector<8x8xf32>
    %73 = arith.select %71, %72, %69 : vector<8x8xi1>, vector<8x8xf32>
    %cst_29 = arith.constant dense<0xFF800000> : vector<8xf32>
    %74 = vector.multi_reduction <maximumf>, %73, %cst_29 [1] : vector<8x8xf32> to vector<8xf32>
    %75 = vector.shape_cast %74 : vector<8xf32> to vector<8x1xf32>
    %76 = vector.broadcast %75 : vector<8x1xf32> to vector<8x8xf32>
    %77 = arith.subf %73, %76 : vector<8x8xf32>
    %78 = math.exp %77 : vector<8x8xf32>
    %cst_30 = arith.constant dense<0.000000e+00> : vector<8xf32>
    %79 = vector.multi_reduction <add>, %78, %cst_30 [1] : vector<8x8xf32> to vector<8xf32>
    %80 = vector.shape_cast %79 : vector<8xf32> to vector<8x1xf32>
    %81 = tpu.reciprocal %80 {approx = true} : vector<8x1xf32> -> vector<8x1xf32>
    %82 = vector.broadcast %81 : vector<8x1xf32> to vector<8x8xf32>
    %83 = arith.mulf %78, %82 : vector<8x8xf32>
    %84 = arith.truncf %83 : vector<8x8xf32> to vector<8x8xbf16>
    %cst_31 = arith.constant dense<0.000000e+00> : vector<8x8xf32>
    %85 = tpu.matmul %84, %66, %cst_31 {dimension_numbers = #tpu.dot_dimension_numbers<[1], [0], [0], [1], [0, 0, 1, 1], [], []>} : vector<8x8xbf16>, vector<8x8xbf16>, vector<8x8xf32> -> vector<8x8xf32>
    %86 = vector.extract_strided_slice %39 {offsets = [0, 16], sizes = [8, 8], strides = [1, 1]} : vector<8x32xbf16> to vector<8x8xbf16>
    %87 = vector.extract_strided_slice %40 {offsets = [0, 16], sizes = [8, 8], strides = [1, 1]} : vector<8x32xbf16> to vector<8x8xbf16>
    %88 = vector.extract_strided_slice %41 {offsets = [0, 16], sizes = [8, 8], strides = [1, 1]} : vector<8x32xbf16> to vector<8x8xbf16>
    %cst_32 = arith.constant dense<0.000000e+00> : vector<8x8xf32>
    %89 = tpu.matmul %86, %87, %cst_32 {dimension_numbers = #tpu.dot_dimension_numbers<[1], [1], [0], [0], [0, 0, 1, 0], [], []>} : vector<8x8xbf16>, vector<8x8xbf16>, vector<8x8xf32> -> vector<8x8xf32>
    %cst_33 = arith.constant 0.353553385 : f32
    %90 = vector.broadcast %cst_33 : f32 to vector<8x8xf32>
    %91 = arith.mulf %89, %90 : vector<8x8xf32>
    %c0_i32_34 = arith.constant 0 : i32
    %92 = vector.broadcast %c0_i32_34 : i32 to vector<8x8xi32>
    %93 = arith.cmpi eq, %38, %92 : vector<8x8xi32>
    %cst_35 = arith.constant -1.000000e+09 : f32
    %94 = vector.broadcast %cst_35 : f32 to vector<8x8xf32>
    %95 = arith.select %93, %94, %91 : vector<8x8xi1>, vector<8x8xf32>
    %cst_36 = arith.constant dense<0xFF800000> : vector<8xf32>
    %96 = vector.multi_reduction <maximumf>, %95, %cst_36 [1] : vector<8x8xf32> to vector<8xf32>
    %97 = vector.shape_cast %96 : vector<8xf32> to vector<8x1xf32>
    %98 = vector.broadcast %97 : vector<8x1xf32> to vector<8x8xf32>
    %99 = arith.subf %95, %98 : vector<8x8xf32>
    %100 = math.exp %99 : vector<8x8xf32>
    %cst_37 = arith.constant dense<0.000000e+00> : vector<8xf32>
    %101 = vector.multi_reduction <add>, %100, %cst_37 [1] : vector<8x8xf32> to vector<8xf32>
    %102 = vector.shape_cast %101 : vector<8xf32> to vector<8x1xf32>
    %103 = tpu.reciprocal %102 {approx = true} : vector<8x1xf32> -> vector<8x1xf32>
    %104 = vector.broadcast %103 : vector<8x1xf32> to vector<8x8xf32>
    %105 = arith.mulf %100, %104 : vector<8x8xf32>
    %106 = arith.truncf %105 : vector<8x8xf32> to vector<8x8xbf16>
    %cst_38 = arith.constant dense<0.000000e+00> : vector<8x8xf32>
    %107 = tpu.matmul %106, %88, %cst_38 {dimension_numbers = #tpu.dot_dimension_numbers<[1], [0], [0], [1], [0, 0, 1, 1], [], []>} : vector<8x8xbf16>, vector<8x8xbf16>, vector<8x8xf32> -> vector<8x8xf32>
    %108 = vector.extract_strided_slice %39 {offsets = [0, 24], sizes = [8, 8], strides = [1, 1]} : vector<8x32xbf16> to vector<8x8xbf16>
    %109 = vector.extract_strided_slice %40 {offsets = [0, 24], sizes = [8, 8], strides = [1, 1]} : vector<8x32xbf16> to vector<8x8xbf16>
    %110 = vector.extract_strided_slice %41 {offsets = [0, 24], sizes = [8, 8], strides = [1, 1]} : vector<8x32xbf16> to vector<8x8xbf16>
    %cst_39 = arith.constant dense<0.000000e+00> : vector<8x8xf32>
    %111 = tpu.matmul %108, %109, %cst_39 {dimension_numbers = #tpu.dot_dimension_numbers<[1], [1], [0], [0], [0, 0, 1, 0], [], []>} : vector<8x8xbf16>, vector<8x8xbf16>, vector<8x8xf32> -> vector<8x8xf32>
    %cst_40 = arith.constant 0.353553385 : f32
    %112 = vector.broadcast %cst_40 : f32 to vector<8x8xf32>
    %113 = arith.mulf %111, %112 : vector<8x8xf32>
    %c0_i32_41 = arith.constant 0 : i32
    %114 = vector.broadcast %c0_i32_41 : i32 to vector<8x8xi32>
    %115 = arith.cmpi eq, %38, %114 : vector<8x8xi32>
    %cst_42 = arith.constant -1.000000e+09 : f32
    %116 = vector.broadcast %cst_42 : f32 to vector<8x8xf32>
    %117 = arith.select %115, %116, %113 : vector<8x8xi1>, vector<8x8xf32>
    %cst_43 = arith.constant dense<0xFF800000> : vector<8xf32>
    %118 = vector.multi_reduction <maximumf>, %117, %cst_43 [1] : vector<8x8xf32> to vector<8xf32>
    %119 = vector.shape_cast %118 : vector<8xf32> to vector<8x1xf32>
    %120 = vector.broadcast %119 : vector<8x1xf32> to vector<8x8xf32>
    %121 = arith.subf %117, %120 : vector<8x8xf32>
    %122 = math.exp %121 : vector<8x8xf32>
    %cst_44 = arith.constant dense<0.000000e+00> : vector<8xf32>
    %123 = vector.multi_reduction <add>, %122, %cst_44 [1] : vector<8x8xf32> to vector<8xf32>
    %124 = vector.shape_cast %123 : vector<8xf32> to vector<8x1xf32>
    %125 = tpu.reciprocal %124 {approx = true} : vector<8x1xf32> -> vector<8x1xf32>
    %126 = vector.broadcast %125 : vector<8x1xf32> to vector<8x8xf32>
    %127 = arith.mulf %122, %126 : vector<8x8xf32>
    %128 = arith.truncf %127 : vector<8x8xf32> to vector<8x8xbf16>
    %cst_45 = arith.constant dense<0.000000e+00> : vector<8x8xf32>
    %129 = tpu.matmul %128, %110, %cst_45 {dimension_numbers = #tpu.dot_dimension_numbers<[1], [0], [0], [1], [0, 0, 1, 1], [], []>} : vector<8x8xbf16>, vector<8x8xbf16>, vector<8x8xf32> -> vector<8x8xf32>
    %130 = tpu.concatenate %63, %85, %107, %129 in 1 : vector<8x8xf32>, vector<8x8xf32>, vector<8x8xf32>, vector<8x8xf32> -> vector<8x32xf32>
    %131 = vector.extract_strided_slice %33 {offsets = [1, 0, 0], sizes = [1, 8, 8], strides = [1, 1, 1]} : vector<2x8x8xi32> to vector<1x8x8xi32>
    %132 = vector.shape_cast %131 : vector<1x8x8xi32> to vector<8x8xi32>
    %133 = vector.extract_strided_slice %34 {offsets = [8, 0], sizes = [8, 32], strides = [1, 1]} : vector<16x32xbf16> to vector<8x32xbf16>
    %134 = vector.extract_strided_slice %35 {offsets = [8, 0], sizes = [8, 32], strides = [1, 1]} : vector<16x32xbf16> to vector<8x32xbf16>
    %135 = vector.extract_strided_slice %36 {offsets = [8, 0], sizes = [8, 32], strides = [1, 1]} : vector<16x32xbf16> to vector<8x32xbf16>
    %136 = vector.extract_strided_slice %133 {offsets = [0, 0], sizes = [8, 8], strides = [1, 1]} : vector<8x32xbf16> to vector<8x8xbf16>
    %137 = vector.extract_strided_slice %134 {offsets = [0, 0], sizes = [8, 8], strides = [1, 1]} : vector<8x32xbf16> to vector<8x8xbf16>
    %138 = vector.extract_strided_slice %135 {offsets = [0, 0], sizes = [8, 8], strides = [1, 1]} : vector<8x32xbf16> to vector<8x8xbf16>
    %cst_46 = arith.constant dense<0.000000e+00> : vector<8x8xf32>
    %139 = tpu.matmul %136, %137, %cst_46 {dimension_numbers = #tpu.dot_dimension_numbers<[1], [1], [0], [0], [0, 0, 1, 0], [], []>} : vector<8x8xbf16>, vector<8x8xbf16>, vector<8x8xf32> -> vector<8x8xf32>
    %cst_47 = arith.constant 0.353553385 : f32
    %140 = vector.broadcast %cst_47 : f32 to vector<8x8xf32>
    %141 = arith.mulf %139, %140 : vector<8x8xf32>
    %c0_i32_48 = arith.constant 0 : i32
    %142 = vector.broadcast %c0_i32_48 : i32 to vector<8x8xi32>
    %143 = arith.cmpi eq, %132, %142 : vector<8x8xi32>
    %cst_49 = arith.constant -1.000000e+09 : f32
    %144 = vector.broadcast %cst_49 : f32 to vector<8x8xf32>
    %145 = arith.select %143, %144, %141 : vector<8x8xi1>, vector<8x8xf32>
    %cst_50 = arith.constant dense<0xFF800000> : vector<8xf32>
    %146 = vector.multi_reduction <maximumf>, %145, %cst_50 [1] : vector<8x8xf32> to vector<8xf32>
    %147 = vector.shape_cast %146 : vector<8xf32> to vector<8x1xf32>
    %148 = vector.broadcast %147 : vector<8x1xf32> to vector<8x8xf32>
    %149 = arith.subf %145, %148 : vector<8x8xf32>
    %150 = math.exp %149 : vector<8x8xf32>
    %cst_51 = arith.constant dense<0.000000e+00> : vector<8xf32>
    %151 = vector.multi_reduction <add>, %150, %cst_51 [1] : vector<8x8xf32> to vector<8xf32>
    %152 = vector.shape_cast %151 : vector<8xf32> to vector<8x1xf32>
    %153 = tpu.reciprocal %152 {approx = true} : vector<8x1xf32> -> vector<8x1xf32>
    %154 = vector.broadcast %153 : vector<8x1xf32> to vector<8x8xf32>
    %155 = arith.mulf %150, %154 : vector<8x8xf32>
    %156 = arith.truncf %155 : vector<8x8xf32> to vector<8x8xbf16>
    %cst_52 = arith.constant dense<0.000000e+00> : vector<8x8xf32>
    %157 = tpu.matmul %156, %138, %cst_52 {dimension_numbers = #tpu.dot_dimension_numbers<[1], [0], [0], [1], [0, 0, 1, 1], [], []>} : vector<8x8xbf16>, vector<8x8xbf16>, vector<8x8xf32> -> vector<8x8xf32>
    %158 = vector.extract_strided_slice %133 {offsets = [0, 8], sizes = [8, 8], strides = [1, 1]} : vector<8x32xbf16> to vector<8x8xbf16>
    %159 = vector.extract_strided_slice %134 {offsets = [0, 8], sizes = [8, 8], strides = [1, 1]} : vector<8x32xbf16> to vector<8x8xbf16>
    %160 = vector.extract_strided_slice %135 {offsets = [0, 8], sizes = [8, 8], strides = [1, 1]} : vector<8x32xbf16> to vector<8x8xbf16>
    %cst_53 = arith.constant dense<0.000000e+00> : vector<8x8xf32>
    %161 = tpu.matmul %158, %159, %cst_53 {dimension_numbers = #tpu.dot_dimension_numbers<[1], [1], [0], [0], [0, 0, 1, 0], [], []>} : vector<8x8xbf16>, vector<8x8xbf16>, vector<8x8xf32> -> vector<8x8xf32>
    %cst_54 = arith.constant 0.353553385 : f32
    %162 = vector.broadcast %cst_54 : f32 to vector<8x8xf32>
    %163 = arith.mulf %161, %162 : vector<8x8xf32>
    %c0_i32_55 = arith.constant 0 : i32
    %164 = vector.broadcast %c0_i32_55 : i32 to vector<8x8xi32>
    %165 = arith.cmpi eq, %132, %164 : vector<8x8xi32>
    %cst_56 = arith.constant -1.000000e+09 : f32
    %166 = vector.broadcast %cst_56 : f32 to vector<8x8xf32>
    %167 = arith.select %165, %166, %163 : vector<8x8xi1>, vector<8x8xf32>
    %cst_57 = arith.constant dense<0xFF800000> : vector<8xf32>
    %168 = vector.multi_reduction <maximumf>, %167, %cst_57 [1] : vector<8x8xf32> to vector<8xf32>
    %169 = vector.shape_cast %168 : vector<8xf32> to vector<8x1xf32>
    %170 = vector.broadcast %169 : vector<8x1xf32> to vector<8x8xf32>
    %171 = arith.subf %167, %170 : vector<8x8xf32>
    %172 = math.exp %171 : vector<8x8xf32>
    %cst_58 = arith.constant dense<0.000000e+00> : vector<8xf32>
    %173 = vector.multi_reduction <add>, %172, %cst_58 [1] : vector<8x8xf32> to vector<8xf32>
    %174 = vector.shape_cast %173 : vector<8xf32> to vector<8x1xf32>
    %175 = tpu.reciprocal %174 {approx = true} : vector<8x1xf32> -> vector<8x1xf32>
    %176 = vector.broadcast %175 : vector<8x1xf32> to vector<8x8xf32>
    %177 = arith.mulf %172, %176 : vector<8x8xf32>
    %178 = arith.truncf %177 : vector<8x8xf32> to vector<8x8xbf16>
    %cst_59 = arith.constant dense<0.000000e+00> : vector<8x8xf32>
    %179 = tpu.matmul %178, %160, %cst_59 {dimension_numbers = #tpu.dot_dimension_numbers<[1], [0], [0], [1], [0, 0, 1, 1], [], []>} : vector<8x8xbf16>, vector<8x8xbf16>, vector<8x8xf32> -> vector<8x8xf32>
    %180 = vector.extract_strided_slice %133 {offsets = [0, 16], sizes = [8, 8], strides = [1, 1]} : vector<8x32xbf16> to vector<8x8xbf16>
    %181 = vector.extract_strided_slice %134 {offsets = [0, 16], sizes = [8, 8], strides = [1, 1]} : vector<8x32xbf16> to vector<8x8xbf16>
    %182 = vector.extract_strided_slice %135 {offsets = [0, 16], sizes = [8, 8], strides = [1, 1]} : vector<8x32xbf16> to vector<8x8xbf16>
    %cst_60 = arith.constant dense<0.000000e+00> : vector<8x8xf32>
    %183 = tpu.matmul %180, %181, %cst_60 {dimension_numbers = #tpu.dot_dimension_numbers<[1], [1], [0], [0], [0, 0, 1, 0], [], []>} : vector<8x8xbf16>, vector<8x8xbf16>, vector<8x8xf32> -> vector<8x8xf32>
    %cst_61 = arith.constant 0.353553385 : f32
    %184 = vector.broadcast %cst_61 : f32 to vector<8x8xf32>
    %185 = arith.mulf %183, %184 : vector<8x8xf32>
    %c0_i32_62 = arith.constant 0 : i32
    %186 = vector.broadcast %c0_i32_62 : i32 to vector<8x8xi32>
    %187 = arith.cmpi eq, %132, %186 : vector<8x8xi32>
    %cst_63 = arith.constant -1.000000e+09 : f32
    %188 = vector.broadcast %cst_63 : f32 to vector<8x8xf32>
    %189 = arith.select %187, %188, %185 : vector<8x8xi1>, vector<8x8xf32>
    %cst_64 = arith.constant dense<0xFF800000> : vector<8xf32>
    %190 = vector.multi_reduction <maximumf>, %189, %cst_64 [1] : vector<8x8xf32> to vector<8xf32>
    %191 = vector.shape_cast %190 : vector<8xf32> to vector<8x1xf32>
    %192 = vector.broadcast %191 : vector<8x1xf32> to vector<8x8xf32>
    %193 = arith.subf %189, %192 : vector<8x8xf32>
    %194 = math.exp %193 : vector<8x8xf32>
    %cst_65 = arith.constant dense<0.000000e+00> : vector<8xf32>
    %195 = vector.multi_reduction <add>, %194, %cst_65 [1] : vector<8x8xf32> to vector<8xf32>
    %196 = vector.shape_cast %195 : vector<8xf32> to vector<8x1xf32>
    %197 = tpu.reciprocal %196 {approx = true} : vector<8x1xf32> -> vector<8x1xf32>
    %198 = vector.broadcast %197 : vector<8x1xf32> to vector<8x8xf32>
    %199 = arith.mulf %194, %198 : vector<8x8xf32>
    %200 = arith.truncf %199 : vector<8x8xf32> to vector<8x8xbf16>
    %cst_66 = arith.constant dense<0.000000e+00> : vector<8x8xf32>
    %201 = tpu.matmul %200, %182, %cst_66 {dimension_numbers = #tpu.dot_dimension_numbers<[1], [0], [0], [1], [0, 0, 1, 1], [], []>} : vector<8x8xbf16>, vector<8x8xbf16>, vector<8x8xf32> -> vector<8x8xf32>
    %202 = vector.extract_strided_slice %133 {offsets = [0, 24], sizes = [8, 8], strides = [1, 1]} : vector<8x32xbf16> to vector<8x8xbf16>
    %203 = vector.extract_strided_slice %134 {offsets = [0, 24], sizes = [8, 8], strides = [1, 1]} : vector<8x32xbf16> to vector<8x8xbf16>
    %204 = vector.extract_strided_slice %135 {offsets = [0, 24], sizes = [8, 8], strides = [1, 1]} : vector<8x32xbf16> to vector<8x8xbf16>
    %cst_67 = arith.constant dense<0.000000e+00> : vector<8x8xf32>
    %205 = tpu.matmul %202, %203, %cst_67 {dimension_numbers = #tpu.dot_dimension_numbers<[1], [1], [0], [0], [0, 0, 1, 0], [], []>} : vector<8x8xbf16>, vector<8x8xbf16>, vector<8x8xf32> -> vector<8x8xf32>
    %cst_68 = arith.constant 0.353553385 : f32
    %206 = vector.broadcast %cst_68 : f32 to vector<8x8xf32>
    %207 = arith.mulf %205, %206 : vector<8x8xf32>
    %c0_i32_69 = arith.constant 0 : i32
    %208 = vector.broadcast %c0_i32_69 : i32 to vector<8x8xi32>
    %209 = arith.cmpi eq, %132, %208 : vector<8x8xi32>
    %cst_70 = arith.constant -1.000000e+09 : f32
    %210 = vector.broadcast %cst_70 : f32 to vector<8x8xf32>
    %211 = arith.select %209, %210, %207 : vector<8x8xi1>, vector<8x8xf32>
    %cst_71 = arith.constant dense<0xFF800000> : vector<8xf32>
    %212 = vector.multi_reduction <maximumf>, %211, %cst_71 [1] : vector<8x8xf32> to vector<8xf32>
    %213 = vector.shape_cast %212 : vector<8xf32> to vector<8x1xf32>
    %214 = vector.broadcast %213 : vector<8x1xf32> to vector<8x8xf32>
    %215 = arith.subf %211, %214 : vector<8x8xf32>
    %216 = math.exp %215 : vector<8x8xf32>
    %cst_72 = arith.constant dense<0.000000e+00> : vector<8xf32>
    %217 = vector.multi_reduction <add>, %216, %cst_72 [1] : vector<8x8xf32> to vector<8xf32>
    %218 = vector.shape_cast %217 : vector<8xf32> to vector<8x1xf32>
    %219 = tpu.reciprocal %218 {approx = true} : vector<8x1xf32> -> vector<8x1xf32>
    %220 = vector.broadcast %219 : vector<8x1xf32> to vector<8x8xf32>
    %221 = arith.mulf %216, %220 : vector<8x8xf32>
    %222 = arith.truncf %221 : vector<8x8xf32> to vector<8x8xbf16>
    %cst_73 = arith.constant dense<0.000000e+00> : vector<8x8xf32>
    %223 = tpu.matmul %222, %204, %cst_73 {dimension_numbers = #tpu.dot_dimension_numbers<[1], [0], [0], [1], [0, 0, 1, 1], [], []>} : vector<8x8xbf16>, vector<8x8xbf16>, vector<8x8xf32> -> vector<8x8xf32>
    %224 = tpu.concatenate %157, %179, %201, %223 in 1 : vector<8x8xf32>, vector<8x8xf32>, vector<8x8xf32>, vector<8x8xf32> -> vector<8x32xf32>
    %225 = tpu.concatenate %130, %224 in 0 : vector<8x32xf32>, vector<8x32xf32> -> vector<16x32xf32>
    %226 = arith.truncf %225 : vector<16x32xf32> to vector<16x32xbf16>
    %c0_74 = arith.constant 0 : index
    %c0_75 = arith.constant 0 : index
    %227 = vector.load %arg8[%c0_74, %c0_75] : memref<32x32xbf16, #tpu.memory_space<vmem>>, vector<32x32xbf16>
    %cst_76 = arith.constant dense<0.000000e+00> : vector<16x32xf32>
    %228 = tpu.matmul %226, %227, %cst_76 {dimension_numbers = #tpu.dot_dimension_numbers<[1], [0], [0], [1], [0, 0, 1, 1], [], []>} : vector<16x32xbf16>, vector<32x32xbf16>, vector<16x32xf32> -> vector<16x32xf32>
    %c0_77 = arith.constant 0 : index
    %c0_78 = arith.constant 0 : index
    %229 = vector.load %arg9[%c0_77, %c0_78] : memref<1x32xf32, #tpu.memory_space<vmem>>, vector<1x32xf32>
    %230 = vector.broadcast %229 : vector<1x32xf32> to vector<16x32xf32>
    %231 = arith.addf %228, %230 : vector<16x32xf32>
    %232 = arith.addf %0, %231 : vector<16x32xf32>
    %c0_79 = arith.constant 0 : index
    %c0_80 = arith.constant 0 : index
    %233 = vector.load %arg10[%c0_79, %c0_80] : memref<1x32xf32, #tpu.memory_space<vmem>>, vector<1x32xf32>
    %c0_81 = arith.constant 0 : index
    %c0_82 = arith.constant 0 : index
    %234 = vector.load %arg11[%c0_81, %c0_82] : memref<1x32xf32, #tpu.memory_space<vmem>>, vector<1x32xf32>
    %cst_83 = arith.constant dense<0.000000e+00> : vector<16xf32>
    %235 = vector.multi_reduction <add>, %232, %cst_83 [1] : vector<16x32xf32> to vector<16xf32>
    %236 = vector.shape_cast %235 : vector<16xf32> to vector<16x1xf32>
    %cst_84 = arith.constant 3.200000e+01 : f32
    %237 = vector.broadcast %cst_84 : f32 to vector<16x1xf32>
    %238 = arith.divf %236, %237 : vector<16x1xf32>
    %239 = vector.broadcast %238 : vector<16x1xf32> to vector<16x32xf32>
    %240 = arith.subf %232, %239 : vector<16x32xf32>
    %241 = arith.mulf %240, %240 : vector<16x32xf32>
    %cst_85 = arith.constant dense<0.000000e+00> : vector<16xf32>
    %242 = vector.multi_reduction <add>, %241, %cst_85 [1] : vector<16x32xf32> to vector<16xf32>
    %243 = vector.shape_cast %242 : vector<16xf32> to vector<16x1xf32>
    %cst_86 = arith.constant 0.0322580636 : f32
    %244 = vector.broadcast %cst_86 : f32 to vector<16x1xf32>
    %245 = arith.mulf %243, %244 : vector<16x1xf32>
    %246 = vector.broadcast %233 : vector<1x32xf32> to vector<16x32xf32>
    %247 = arith.mulf %246, %240 : vector<16x32xf32>
    %248 = math.sqrt %245 : vector<16x1xf32>
    %cst_87 = arith.constant 9.99999997E-7 : f32
    %249 = vector.broadcast %cst_87 : f32 to vector<16x1xf32>
    %250 = arith.addf %248, %249 : vector<16x1xf32>
    %251 = vector.broadcast %250 : vector<16x1xf32> to vector<16x32xf32>
    %252 = arith.divf %247, %251 : vector<16x32xf32>
    %253 = vector.broadcast %234 : vector<1x32xf32> to vector<16x32xf32>
    %254 = arith.addf %252, %253 : vector<16x32xf32>
    %255 = arith.truncf %254 : vector<16x32xf32> to vector<16x32xbf16>
    %c0_88 = arith.constant 0 : index
    %c0_89 = arith.constant 0 : index
    %256 = vector.load %arg12[%c0_88, %c0_89] : memref<32x32xbf16, #tpu.memory_space<vmem>>, vector<32x32xbf16>
    %cst_90 = arith.constant dense<0.000000e+00> : vector<16x32xf32>
    %257 = tpu.matmul %255, %256, %cst_90 {dimension_numbers = #tpu.dot_dimension_numbers<[1], [0], [0], [1], [0, 0, 1, 1], [], []>} : vector<16x32xbf16>, vector<32x32xbf16>, vector<16x32xf32> -> vector<16x32xf32>
    %c0_91 = arith.constant 0 : index
    %c0_92 = arith.constant 0 : index
    %258 = vector.load %arg13[%c0_91, %c0_92] : memref<1x32xf32, #tpu.memory_space<vmem>>, vector<1x32xf32>
    %259 = vector.broadcast %258 : vector<1x32xf32> to vector<16x32xf32>
    %260 = arith.addf %257, %259 : vector<16x32xf32>
    %261 = arith.truncf %1 : vector<16x32xf32> to vector<16x32xbf16>
    %c0_93 = arith.constant 0 : index
    %c0_94 = arith.constant 0 : index
    %262 = vector.load %arg14[%c0_93, %c0_94] : memref<32x64xbf16, #tpu.memory_space<vmem>>, vector<32x64xbf16>
    %cst_95 = arith.constant dense<0.000000e+00> : vector<16x64xf32>
    %263 = tpu.matmul %261, %262, %cst_95 {dimension_numbers = #tpu.dot_dimension_numbers<[1], [0], [0], [1], [0, 0, 1, 1], [], []>} : vector<16x32xbf16>, vector<32x64xbf16>, vector<16x64xf32> -> vector<16x64xf32>
    %c0_96 = arith.constant 0 : index
    %c0_97 = arith.constant 0 : index
    %264 = vector.load %arg15[%c0_96, %c0_97] : memref<1x64xf32, #tpu.memory_space<vmem>>, vector<1x64xf32>
    %265 = vector.broadcast %264 : vector<1x64xf32> to vector<16x64xf32>
    %266 = arith.addf %263, %265 : vector<16x64xf32>
    %267 = vector.extract_strided_slice %266 {offsets = [0, 0], sizes = [16, 32], strides = [1, 1]} : vector<16x64xf32> to vector<16x32xf32>
    %268 = vector.extract_strided_slice %266 {offsets = [0, 32], sizes = [16, 32], strides = [1, 1]} : vector<16x64xf32> to vector<16x32xf32>
    %c0_98 = arith.constant 0 : index
    %c0_99 = arith.constant 0 : index
    %c0_100 = arith.constant 0 : index
    %269 = vector.load %arg2[%c0_98, %c0_99, %c0_100] : memref<2x1x8xi32, #tpu.memory_space<vmem>>, vector<2x1x8xi32>
    %270 = arith.truncf %260 : vector<16x32xf32> to vector<16x32xbf16>
    %271 = arith.truncf %267 : vector<16x32xf32> to vector<16x32xbf16>
    %272 = arith.truncf %268 : vector<16x32xf32> to vector<16x32xbf16>
    %273 = vector.extract_strided_slice %269 {offsets = [0, 0, 0], sizes = [1, 1, 8], strides = [1, 1, 1]} : vector<2x1x8xi32> to vector<1x1x8xi32>
    %274 = vector.shape_cast %273 : vector<1x1x8xi32> to vector<1x8xi32>
    %275 = vector.extract_strided_slice %270 {offsets = [0, 0], sizes = [8, 32], strides = [1, 1]} : vector<16x32xbf16> to vector<8x32xbf16>
    %276 = vector.extract_strided_slice %271 {offsets = [0, 0], sizes = [8, 32], strides = [1, 1]} : vector<16x32xbf16> to vector<8x32xbf16>
    %277 = vector.extract_strided_slice %272 {offsets = [0, 0], sizes = [8, 32], strides = [1, 1]} : vector<16x32xbf16> to vector<8x32xbf16>
    %278 = vector.extract_strided_slice %275 {offsets = [0, 0], sizes = [8, 8], strides = [1, 1]} : vector<8x32xbf16> to vector<8x8xbf16>
    %279 = vector.extract_strided_slice %276 {offsets = [0, 0], sizes = [8, 8], strides = [1, 1]} : vector<8x32xbf16> to vector<8x8xbf16>
    %280 = vector.extract_strided_slice %277 {offsets = [0, 0], sizes = [8, 8], strides = [1, 1]} : vector<8x32xbf16> to vector<8x8xbf16>
    %cst_101 = arith.constant dense<0.000000e+00> : vector<8x8xf32>
    %281 = tpu.matmul %278, %279, %cst_101 {dimension_numbers = #tpu.dot_dimension_numbers<[1], [1], [0], [0], [0, 0, 1, 0], [], []>} : vector<8x8xbf16>, vector<8x8xbf16>, vector<8x8xf32> -> vector<8x8xf32>
    %cst_102 = arith.constant 0.353553385 : f32
    %282 = vector.broadcast %cst_102 : f32 to vector<8x8xf32>
    %283 = arith.mulf %281, %282 : vector<8x8xf32>
    %c0_i32_103 = arith.constant 0 : i32
    %284 = vector.broadcast %c0_i32_103 : i32 to vector<1x8xi32>
    %285 = arith.cmpi eq, %274, %284 : vector<1x8xi32>
    %cst_104 = arith.constant -1.000000e+09 : f32
    %286 = vector.shape_cast %285 : vector<1x8xi1> to vector<1x8xi1>
    %287 = vector.broadcast %286 : vector<1x8xi1> to vector<8x8xi1>
    %288 = vector.broadcast %cst_104 : f32 to vector<8x8xf32>
    %289 = arith.select %287, %288, %283 : vector<8x8xi1>, vector<8x8xf32>
    %cst_105 = arith.constant dense<0xFF800000> : vector<8xf32>
    %290 = vector.multi_reduction <maximumf>, %289, %cst_105 [1] : vector<8x8xf32> to vector<8xf32>
    %291 = vector.shape_cast %290 : vector<8xf32> to vector<8x1xf32>
    %292 = vector.broadcast %291 : vector<8x1xf32> to vector<8x8xf32>
    %293 = arith.subf %289, %292 : vector<8x8xf32>
    %294 = math.exp %293 : vector<8x8xf32>
    %cst_106 = arith.constant dense<0.000000e+00> : vector<8xf32>
    %295 = vector.multi_reduction <add>, %294, %cst_106 [1] : vector<8x8xf32> to vector<8xf32>
    %296 = vector.shape_cast %295 : vector<8xf32> to vector<8x1xf32>
    %297 = tpu.reciprocal %296 {approx = true} : vector<8x1xf32> -> vector<8x1xf32>
    %298 = vector.broadcast %297 : vector<8x1xf32> to vector<8x8xf32>
    %299 = arith.mulf %294, %298 : vector<8x8xf32>
    %300 = arith.truncf %299 : vector<8x8xf32> to vector<8x8xbf16>
    %cst_107 = arith.constant dense<0.000000e+00> : vector<8x8xf32>
    %301 = tpu.matmul %300, %280, %cst_107 {dimension_numbers = #tpu.dot_dimension_numbers<[1], [0], [0], [1], [0, 0, 1, 1], [], []>} : vector<8x8xbf16>, vector<8x8xbf16>, vector<8x8xf32> -> vector<8x8xf32>
    %302 = vector.extract_strided_slice %275 {offsets = [0, 8], sizes = [8, 8], strides = [1, 1]} : vector<8x32xbf16> to vector<8x8xbf16>
    %303 = vector.extract_strided_slice %276 {offsets = [0, 8], sizes = [8, 8], strides = [1, 1]} : vector<8x32xbf16> to vector<8x8xbf16>
    %304 = vector.extract_strided_slice %277 {offsets = [0, 8], sizes = [8, 8], strides = [1, 1]} : vector<8x32xbf16> to vector<8x8xbf16>
    %cst_108 = arith.constant dense<0.000000e+00> : vector<8x8xf32>
    %305 = tpu.matmul %302, %303, %cst_108 {dimension_numbers = #tpu.dot_dimension_numbers<[1], [1], [0], [0], [0, 0, 1, 0], [], []>} : vector<8x8xbf16>, vector<8x8xbf16>, vector<8x8xf32> -> vector<8x8xf32>
    %cst_109 = arith.constant 0.353553385 : f32
    %306 = vector.broadcast %cst_109 : f32 to vector<8x8xf32>
    %307 = arith.mulf %305, %306 : vector<8x8xf32>
    %c0_i32_110 = arith.constant 0 : i32
    %308 = vector.broadcast %c0_i32_110 : i32 to vector<1x8xi32>
    %309 = arith.cmpi eq, %274, %308 : vector<1x8xi32>
    %cst_111 = arith.constant -1.000000e+09 : f32
    %310 = vector.shape_cast %309 : vector<1x8xi1> to vector<1x8xi1>
    %311 = vector.broadcast %310 : vector<1x8xi1> to vector<8x8xi1>
    %312 = vector.broadcast %cst_111 : f32 to vector<8x8xf32>
    %313 = arith.select %311, %312, %307 : vector<8x8xi1>, vector<8x8xf32>
    %cst_112 = arith.constant dense<0xFF800000> : vector<8xf32>
    %314 = vector.multi_reduction <maximumf>, %313, %cst_112 [1] : vector<8x8xf32> to vector<8xf32>
    %315 = vector.shape_cast %314 : vector<8xf32> to vector<8x1xf32>
    %316 = vector.broadcast %315 : vector<8x1xf32> to vector<8x8xf32>
    %317 = arith.subf %313, %316 : vector<8x8xf32>
    %318 = math.exp %317 : vector<8x8xf32>
    %cst_113 = arith.constant dense<0.000000e+00> : vector<8xf32>
    %319 = vector.multi_reduction <add>, %318, %cst_113 [1] : vector<8x8xf32> to vector<8xf32>
    %320 = vector.shape_cast %319 : vector<8xf32> to vector<8x1xf32>
    %321 = tpu.reciprocal %320 {approx = true} : vector<8x1xf32> -> vector<8x1xf32>
    %322 = vector.broadcast %321 : vector<8x1xf32> to vector<8x8xf32>
    %323 = arith.mulf %318, %322 : vector<8x8xf32>
    %324 = arith.truncf %323 : vector<8x8xf32> to vector<8x8xbf16>
    %cst_114 = arith.constant dense<0.000000e+00> : vector<8x8xf32>
    %325 = tpu.matmul %324, %304, %cst_114 {dimension_numbers = #tpu.dot_dimension_numbers<[1], [0], [0], [1], [0, 0, 1, 1], [], []>} : vector<8x8xbf16>, vector<8x8xbf16>, vector<8x8xf32> -> vector<8x8xf32>
    %326 = vector.extract_strided_slice %275 {offsets = [0, 16], sizes = [8, 8], strides = [1, 1]} : vector<8x32xbf16> to vector<8x8xbf16>
    %327 = vector.extract_strided_slice %276 {offsets = [0, 16], sizes = [8, 8], strides = [1, 1]} : vector<8x32xbf16> to vector<8x8xbf16>
    %328 = vector.extract_strided_slice %277 {offsets = [0, 16], sizes = [8, 8], strides = [1, 1]} : vector<8x32xbf16> to vector<8x8xbf16>
    %cst_115 = arith.constant dense<0.000000e+00> : vector<8x8xf32>
    %329 = tpu.matmul %326, %327, %cst_115 {dimension_numbers = #tpu.dot_dimension_numbers<[1], [1], [0], [0], [0, 0, 1, 0], [], []>} : vector<8x8xbf16>, vector<8x8xbf16>, vector<8x8xf32> -> vector<8x8xf32>
    %cst_116 = arith.constant 0.353553385 : f32
    %330 = vector.broadcast %cst_116 : f32 to vector<8x8xf32>
    %331 = arith.mulf %329, %330 : vector<8x8xf32>
    %c0_i32_117 = arith.constant 0 : i32
    %332 = vector.broadcast %c0_i32_117 : i32 to vector<1x8xi32>
    %333 = arith.cmpi eq, %274, %332 : vector<1x8xi32>
    %cst_118 = arith.constant -1.000000e+09 : f32
    %334 = vector.shape_cast %333 : vector<1x8xi1> to vector<1x8xi1>
    %335 = vector.broadcast %334 : vector<1x8xi1> to vector<8x8xi1>
    %336 = vector.broadcast %cst_118 : f32 to vector<8x8xf32>
    %337 = arith.select %335, %336, %331 : vector<8x8xi1>, vector<8x8xf32>
    %cst_119 = arith.constant dense<0xFF800000> : vector<8xf32>
    %338 = vector.multi_reduction <maximumf>, %337, %cst_119 [1] : vector<8x8xf32> to vector<8xf32>
    %339 = vector.shape_cast %338 : vector<8xf32> to vector<8x1xf32>
    %340 = vector.broadcast %339 : vector<8x1xf32> to vector<8x8xf32>
    %341 = arith.subf %337, %340 : vector<8x8xf32>
    %342 = math.exp %341 : vector<8x8xf32>
    %cst_120 = arith.constant dense<0.000000e+00> : vector<8xf32>
    %343 = vector.multi_reduction <add>, %342, %cst_120 [1] : vector<8x8xf32> to vector<8xf32>
    %344 = vector.shape_cast %343 : vector<8xf32> to vector<8x1xf32>
    %345 = tpu.reciprocal %344 {approx = true} : vector<8x1xf32> -> vector<8x1xf32>
    %346 = vector.broadcast %345 : vector<8x1xf32> to vector<8x8xf32>
    %347 = arith.mulf %342, %346 : vector<8x8xf32>
    %348 = arith.truncf %347 : vector<8x8xf32> to vector<8x8xbf16>
    %cst_121 = arith.constant dense<0.000000e+00> : vector<8x8xf32>
    %349 = tpu.matmul %348, %328, %cst_121 {dimension_numbers = #tpu.dot_dimension_numbers<[1], [0], [0], [1], [0, 0, 1, 1], [], []>} : vector<8x8xbf16>, vector<8x8xbf16>, vector<8x8xf32> -> vector<8x8xf32>
    %350 = vector.extract_strided_slice %275 {offsets = [0, 24], sizes = [8, 8], strides = [1, 1]} : vector<8x32xbf16> to vector<8x8xbf16>
    %351 = vector.extract_strided_slice %276 {offsets = [0, 24], sizes = [8, 8], strides = [1, 1]} : vector<8x32xbf16> to vector<8x8xbf16>
    %352 = vector.extract_strided_slice %277 {offsets = [0, 24], sizes = [8, 8], strides = [1, 1]} : vector<8x32xbf16> to vector<8x8xbf16>
    %cst_122 = arith.constant dense<0.000000e+00> : vector<8x8xf32>
    %353 = tpu.matmul %350, %351, %cst_122 {dimension_numbers = #tpu.dot_dimension_numbers<[1], [1], [0], [0], [0, 0, 1, 0], [], []>} : vector<8x8xbf16>, vector<8x8xbf16>, vector<8x8xf32> -> vector<8x8xf32>
    %cst_123 = arith.constant 0.353553385 : f32
    %354 = vector.broadcast %cst_123 : f32 to vector<8x8xf32>
    %355 = arith.mulf %353, %354 : vector<8x8xf32>
    %c0_i32_124 = arith.constant 0 : i32
    %356 = vector.broadcast %c0_i32_124 : i32 to vector<1x8xi32>
    %357 = arith.cmpi eq, %274, %356 : vector<1x8xi32>
    %cst_125 = arith.constant -1.000000e+09 : f32
    %358 = vector.shape_cast %357 : vector<1x8xi1> to vector<1x8xi1>
    %359 = vector.broadcast %358 : vector<1x8xi1> to vector<8x8xi1>
    %360 = vector.broadcast %cst_125 : f32 to vector<8x8xf32>
    %361 = arith.select %359, %360, %355 : vector<8x8xi1>, vector<8x8xf32>
    %cst_126 = arith.constant dense<0xFF800000> : vector<8xf32>
    %362 = vector.multi_reduction <maximumf>, %361, %cst_126 [1] : vector<8x8xf32> to vector<8xf32>
    %363 = vector.shape_cast %362 : vector<8xf32> to vector<8x1xf32>
    %364 = vector.broadcast %363 : vector<8x1xf32> to vector<8x8xf32>
    %365 = arith.subf %361, %364 : vector<8x8xf32>
    %366 = math.exp %365 : vector<8x8xf32>
    %cst_127 = arith.constant dense<0.000000e+00> : vector<8xf32>
    %367 = vector.multi_reduction <add>, %366, %cst_127 [1] : vector<8x8xf32> to vector<8xf32>
    %368 = vector.shape_cast %367 : vector<8xf32> to vector<8x1xf32>
    %369 = tpu.reciprocal %368 {approx = true} : vector<8x1xf32> -> vector<8x1xf32>
    %370 = vector.broadcast %369 : vector<8x1xf32> to vector<8x8xf32>
    %371 = arith.mulf %366, %370 : vector<8x8xf32>
    %372 = arith.truncf %371 : vector<8x8xf32> to vector<8x8xbf16>
    %cst_128 = arith.constant dense<0.000000e+00> : vector<8x8xf32>
    %373 = tpu.matmul %372, %352, %cst_128 {dimension_numbers = #tpu.dot_dimension_numbers<[1], [0], [0], [1], [0, 0, 1, 1], [], []>} : vector<8x8xbf16>, vector<8x8xbf16>, vector<8x8xf32> -> vector<8x8xf32>
    %374 = tpu.concatenate %301, %325, %349, %373 in 1 : vector<8x8xf32>, vector<8x8xf32>, vector<8x8xf32>, vector<8x8xf32> -> vector<8x32xf32>
    %375 = vector.extract_strided_slice %269 {offsets = [1, 0, 0], sizes = [1, 1, 8], strides = [1, 1, 1]} : vector<2x1x8xi32> to vector<1x1x8xi32>
    %376 = vector.shape_cast %375 : vector<1x1x8xi32> to vector<1x8xi32>
    %377 = vector.extract_strided_slice %270 {offsets = [8, 0], sizes = [8, 32], strides = [1, 1]} : vector<16x32xbf16> to vector<8x32xbf16>
    %378 = vector.extract_strided_slice %271 {offsets = [8, 0], sizes = [8, 32], strides = [1, 1]} : vector<16x32xbf16> to vector<8x32xbf16>
    %379 = vector.extract_strided_slice %272 {offsets = [8, 0], sizes = [8, 32], strides = [1, 1]} : vector<16x32xbf16> to vector<8x32xbf16>
    %380 = vector.extract_strided_slice %377 {offsets = [0, 0], sizes = [8, 8], strides = [1, 1]} : vector<8x32xbf16> to vector<8x8xbf16>
    %381 = vector.extract_strided_slice %378 {offsets = [0, 0], sizes = [8, 8], strides = [1, 1]} : vector<8x32xbf16> to vector<8x8xbf16>
    %382 = vector.extract_strided_slice %379 {offsets = [0, 0], sizes = [8, 8], strides = [1, 1]} : vector<8x32xbf16> to vector<8x8xbf16>
    %cst_129 = arith.constant dense<0.000000e+00> : vector<8x8xf32>
    %383 = tpu.matmul %380, %381, %cst_129 {dimension_numbers = #tpu.dot_dimension_numbers<[1], [1], [0], [0], [0, 0, 1, 0], [], []>} : vector<8x8xbf16>, vector<8x8xbf16>, vector<8x8xf32> -> vector<8x8xf32>
    %cst_130 = arith.constant 0.353553385 : f32
    %384 = vector.broadcast %cst_130 : f32 to vector<8x8xf32>
    %385 = arith.mulf %383, %384 : vector<8x8xf32>
    %c0_i32_131 = arith.constant 0 : i32
    %386 = vector.broadcast %c0_i32_131 : i32 to vector<1x8xi32>
    %387 = arith.cmpi eq, %376, %386 : vector<1x8xi32>
    %cst_132 = arith.constant -1.000000e+09 : f32
    %388 = vector.shape_cast %387 : vector<1x8xi1> to vector<1x8xi1>
    %389 = vector.broadcast %388 : vector<1x8xi1> to vector<8x8xi1>
    %390 = vector.broadcast %cst_132 : f32 to vector<8x8xf32>
    %391 = arith.select %389, %390, %385 : vector<8x8xi1>, vector<8x8xf32>
    %cst_133 = arith.constant dense<0xFF800000> : vector<8xf32>
    %392 = vector.multi_reduction <maximumf>, %391, %cst_133 [1] : vector<8x8xf32> to vector<8xf32>
    %393 = vector.shape_cast %392 : vector<8xf32> to vector<8x1xf32>
    %394 = vector.broadcast %393 : vector<8x1xf32> to vector<8x8xf32>
    %395 = arith.subf %391, %394 : vector<8x8xf32>
    %396 = math.exp %395 : vector<8x8xf32>
    %cst_134 = arith.constant dense<0.000000e+00> : vector<8xf32>
    %397 = vector.multi_reduction <add>, %396, %cst_134 [1] : vector<8x8xf32> to vector<8xf32>
    %398 = vector.shape_cast %397 : vector<8xf32> to vector<8x1xf32>
    %399 = tpu.reciprocal %398 {approx = true} : vector<8x1xf32> -> vector<8x1xf32>
    %400 = vector.broadcast %399 : vector<8x1xf32> to vector<8x8xf32>
    %401 = arith.mulf %396, %400 : vector<8x8xf32>
    %402 = arith.truncf %401 : vector<8x8xf32> to vector<8x8xbf16>
    %cst_135 = arith.constant dense<0.000000e+00> : vector<8x8xf32>
    %403 = tpu.matmul %402, %382, %cst_135 {dimension_numbers = #tpu.dot_dimension_numbers<[1], [0], [0], [1], [0, 0, 1, 1], [], []>} : vector<8x8xbf16>, vector<8x8xbf16>, vector<8x8xf32> -> vector<8x8xf32>
    %404 = vector.extract_strided_slice %377 {offsets = [0, 8], sizes = [8, 8], strides = [1, 1]} : vector<8x32xbf16> to vector<8x8xbf16>
    %405 = vector.extract_strided_slice %378 {offsets = [0, 8], sizes = [8, 8], strides = [1, 1]} : vector<8x32xbf16> to vector<8x8xbf16>
    %406 = vector.extract_strided_slice %379 {offsets = [0, 8], sizes = [8, 8], strides = [1, 1]} : vector<8x32xbf16> to vector<8x8xbf16>
    %cst_136 = arith.constant dense<0.000000e+00> : vector<8x8xf32>
    %407 = tpu.matmul %404, %405, %cst_136 {dimension_numbers = #tpu.dot_dimension_numbers<[1], [1], [0], [0], [0, 0, 1, 0], [], []>} : vector<8x8xbf16>, vector<8x8xbf16>, vector<8x8xf32> -> vector<8x8xf32>
    %cst_137 = arith.constant 0.353553385 : f32
    %408 = vector.broadcast %cst_137 : f32 to vector<8x8xf32>
    %409 = arith.mulf %407, %408 : vector<8x8xf32>
    %c0_i32_138 = arith.constant 0 : i32
    %410 = vector.broadcast %c0_i32_138 : i32 to vector<1x8xi32>
    %411 = arith.cmpi eq, %376, %410 : vector<1x8xi32>
    %cst_139 = arith.constant -1.000000e+09 : f32
    %412 = vector.shape_cast %411 : vector<1x8xi1> to vector<1x8xi1>
    %413 = vector.broadcast %412 : vector<1x8xi1> to vector<8x8xi1>
    %414 = vector.broadcast %cst_139 : f32 to vector<8x8xf32>
    %415 = arith.select %413, %414, %409 : vector<8x8xi1>, vector<8x8xf32>
    %cst_140 = arith.constant dense<0xFF800000> : vector<8xf32>
    %416 = vector.multi_reduction <maximumf>, %415, %cst_140 [1] : vector<8x8xf32> to vector<8xf32>
    %417 = vector.shape_cast %416 : vector<8xf32> to vector<8x1xf32>
    %418 = vector.broadcast %417 : vector<8x1xf32> to vector<8x8xf32>
    %419 = arith.subf %415, %418 : vector<8x8xf32>
    %420 = math.exp %419 : vector<8x8xf32>
    %cst_141 = arith.constant dense<0.000000e+00> : vector<8xf32>
    %421 = vector.multi_reduction <add>, %420, %cst_141 [1] : vector<8x8xf32> to vector<8xf32>
    %422 = vector.shape_cast %421 : vector<8xf32> to vector<8x1xf32>
    %423 = tpu.reciprocal %422 {approx = true} : vector<8x1xf32> -> vector<8x1xf32>
    %424 = vector.broadcast %423 : vector<8x1xf32> to vector<8x8xf32>
    %425 = arith.mulf %420, %424 : vector<8x8xf32>
    %426 = arith.truncf %425 : vector<8x8xf32> to vector<8x8xbf16>
    %cst_142 = arith.constant dense<0.000000e+00> : vector<8x8xf32>
    %427 = tpu.matmul %426, %406, %cst_142 {dimension_numbers = #tpu.dot_dimension_numbers<[1], [0], [0], [1], [0, 0, 1, 1], [], []>} : vector<8x8xbf16>, vector<8x8xbf16>, vector<8x8xf32> -> vector<8x8xf32>
    %428 = vector.extract_strided_slice %377 {offsets = [0, 16], sizes = [8, 8], strides = [1, 1]} : vector<8x32xbf16> to vector<8x8xbf16>
    %429 = vector.extract_strided_slice %378 {offsets = [0, 16], sizes = [8, 8], strides = [1, 1]} : vector<8x32xbf16> to vector<8x8xbf16>
    %430 = vector.extract_strided_slice %379 {offsets = [0, 16], sizes = [8, 8], strides = [1, 1]} : vector<8x32xbf16> to vector<8x8xbf16>
    %cst_143 = arith.constant dense<0.000000e+00> : vector<8x8xf32>
    %431 = tpu.matmul %428, %429, %cst_143 {dimension_numbers = #tpu.dot_dimension_numbers<[1], [1], [0], [0], [0, 0, 1, 0], [], []>} : vector<8x8xbf16>, vector<8x8xbf16>, vector<8x8xf32> -> vector<8x8xf32>
    %cst_144 = arith.constant 0.353553385 : f32
    %432 = vector.broadcast %cst_144 : f32 to vector<8x8xf32>
    %433 = arith.mulf %431, %432 : vector<8x8xf32>
    %c0_i32_145 = arith.constant 0 : i32
    %434 = vector.broadcast %c0_i32_145 : i32 to vector<1x8xi32>
    %435 = arith.cmpi eq, %376, %434 : vector<1x8xi32>
    %cst_146 = arith.constant -1.000000e+09 : f32
    %436 = vector.shape_cast %435 : vector<1x8xi1> to vector<1x8xi1>
    %437 = vector.broadcast %436 : vector<1x8xi1> to vector<8x8xi1>
    %438 = vector.broadcast %cst_146 : f32 to vector<8x8xf32>
    %439 = arith.select %437, %438, %433 : vector<8x8xi1>, vector<8x8xf32>
    %cst_147 = arith.constant dense<0xFF800000> : vector<8xf32>
    %440 = vector.multi_reduction <maximumf>, %439, %cst_147 [1] : vector<8x8xf32> to vector<8xf32>
    %441 = vector.shape_cast %440 : vector<8xf32> to vector<8x1xf32>
    %442 = vector.broadcast %441 : vector<8x1xf32> to vector<8x8xf32>
    %443 = arith.subf %439, %442 : vector<8x8xf32>
    %444 = math.exp %443 : vector<8x8xf32>
    %cst_148 = arith.constant dense<0.000000e+00> : vector<8xf32>
    %445 = vector.multi_reduction <add>, %444, %cst_148 [1] : vector<8x8xf32> to vector<8xf32>
    %446 = vector.shape_cast %445 : vector<8xf32> to vector<8x1xf32>
    %447 = tpu.reciprocal %446 {approx = true} : vector<8x1xf32> -> vector<8x1xf32>
    %448 = vector.broadcast %447 : vector<8x1xf32> to vector<8x8xf32>
    %449 = arith.mulf %444, %448 : vector<8x8xf32>
    %450 = arith.truncf %449 : vector<8x8xf32> to vector<8x8xbf16>
    %cst_149 = arith.constant dense<0.000000e+00> : vector<8x8xf32>
    %451 = tpu.matmul %450, %430, %cst_149 {dimension_numbers = #tpu.dot_dimension_numbers<[1], [0], [0], [1], [0, 0, 1, 1], [], []>} : vector<8x8xbf16>, vector<8x8xbf16>, vector<8x8xf32> -> vector<8x8xf32>
    %452 = vector.extract_strided_slice %377 {offsets = [0, 24], sizes = [8, 8], strides = [1, 1]} : vector<8x32xbf16> to vector<8x8xbf16>
    %453 = vector.extract_strided_slice %378 {offsets = [0, 24], sizes = [8, 8], strides = [1, 1]} : vector<8x32xbf16> to vector<8x8xbf16>
    %454 = vector.extract_strided_slice %379 {offsets = [0, 24], sizes = [8, 8], strides = [1, 1]} : vector<8x32xbf16> to vector<8x8xbf16>
    %cst_150 = arith.constant dense<0.000000e+00> : vector<8x8xf32>
    %455 = tpu.matmul %452, %453, %cst_150 {dimension_numbers = #tpu.dot_dimension_numbers<[1], [1], [0], [0], [0, 0, 1, 0], [], []>} : vector<8x8xbf16>, vector<8x8xbf16>, vector<8x8xf32> -> vector<8x8xf32>
    %cst_151 = arith.constant 0.353553385 : f32
    %456 = vector.broadcast %cst_151 : f32 to vector<8x8xf32>
    %457 = arith.mulf %455, %456 : vector<8x8xf32>
    %c0_i32_152 = arith.constant 0 : i32
    %458 = vector.broadcast %c0_i32_152 : i32 to vector<1x8xi32>
    %459 = arith.cmpi eq, %376, %458 : vector<1x8xi32>
    %cst_153 = arith.constant -1.000000e+09 : f32
    %460 = vector.shape_cast %459 : vector<1x8xi1> to vector<1x8xi1>
    %461 = vector.broadcast %460 : vector<1x8xi1> to vector<8x8xi1>
    %462 = vector.broadcast %cst_153 : f32 to vector<8x8xf32>
    %463 = arith.select %461, %462, %457 : vector<8x8xi1>, vector<8x8xf32>
    %cst_154 = arith.constant dense<0xFF800000> : vector<8xf32>
    %464 = vector.multi_reduction <maximumf>, %463, %cst_154 [1] : vector<8x8xf32> to vector<8xf32>
    %465 = vector.shape_cast %464 : vector<8xf32> to vector<8x1xf32>
    %466 = vector.broadcast %465 : vector<8x1xf32> to vector<8x8xf32>
    %467 = arith.subf %463, %466 : vector<8x8xf32>
    %468 = math.exp %467 : vector<8x8xf32>
    %cst_155 = arith.constant dense<0.000000e+00> : vector<8xf32>
    %469 = vector.multi_reduction <add>, %468, %cst_155 [1] : vector<8x8xf32> to vector<8xf32>
    %470 = vector.shape_cast %469 : vector<8xf32> to vector<8x1xf32>
    %471 = tpu.reciprocal %470 {approx = true} : vector<8x1xf32> -> vector<8x1xf32>
    %472 = vector.broadcast %471 : vector<8x1xf32> to vector<8x8xf32>
    %473 = arith.mulf %468, %472 : vector<8x8xf32>
    %474 = arith.truncf %473 : vector<8x8xf32> to vector<8x8xbf16>
    %cst_156 = arith.constant dense<0.000000e+00> : vector<8x8xf32>
    %475 = tpu.matmul %474, %454, %cst_156 {dimension_numbers = #tpu.dot_dimension_numbers<[1], [0], [0], [1], [0, 0, 1, 1], [], []>} : vector<8x8xbf16>, vector<8x8xbf16>, vector<8x8xf32> -> vector<8x8xf32>
    %476 = tpu.concatenate %403, %427, %451, %475 in 1 : vector<8x8xf32>, vector<8x8xf32>, vector<8x8xf32>, vector<8x8xf32> -> vector<8x32xf32>
    %477 = tpu.concatenate %374, %476 in 0 : vector<8x32xf32>, vector<8x32xf32> -> vector<16x32xf32>
    %478 = arith.truncf %477 : vector<16x32xf32> to vector<16x32xbf16>
    %c0_157 = arith.constant 0 : index
    %c0_158 = arith.constant 0 : index
    %479 = vector.load %arg16[%c0_157, %c0_158] : memref<32x32xbf16, #tpu.memory_space<vmem>>, vector<32x32xbf16>
    %cst_159 = arith.constant dense<0.000000e+00> : vector<16x32xf32>
    %480 = tpu.matmul %478, %479, %cst_159 {dimension_numbers = #tpu.dot_dimension_numbers<[1], [0], [0], [1], [0, 0, 1, 1], [], []>} : vector<16x32xbf16>, vector<32x32xbf16>, vector<16x32xf32> -> vector<16x32xf32>
    %c0_160 = arith.constant 0 : index
    %c0_161 = arith.constant 0 : index
    %481 = vector.load %arg17[%c0_160, %c0_161] : memref<1x32xf32, #tpu.memory_space<vmem>>, vector<1x32xf32>
    %482 = vector.broadcast %481 : vector<1x32xf32> to vector<16x32xf32>
    %483 = arith.addf %480, %482 : vector<16x32xf32>
    %484 = arith.addf %232, %483 : vector<16x32xf32>
    %c0_162 = arith.constant 0 : index
    %c0_163 = arith.constant 0 : index
    %485 = vector.load %arg18[%c0_162, %c0_163] : memref<1x32xf32, #tpu.memory_space<vmem>>, vector<1x32xf32>
    %c0_164 = arith.constant 0 : index
    %c0_165 = arith.constant 0 : index
    %486 = vector.load %arg19[%c0_164, %c0_165] : memref<1x32xf32, #tpu.memory_space<vmem>>, vector<1x32xf32>
    %cst_166 = arith.constant dense<0.000000e+00> : vector<16xf32>
    %487 = vector.multi_reduction <add>, %484, %cst_166 [1] : vector<16x32xf32> to vector<16xf32>
    %488 = vector.shape_cast %487 : vector<16xf32> to vector<16x1xf32>
    %cst_167 = arith.constant 3.200000e+01 : f32
    %489 = vector.broadcast %cst_167 : f32 to vector<16x1xf32>
    %490 = arith.divf %488, %489 : vector<16x1xf32>
    %491 = vector.broadcast %490 : vector<16x1xf32> to vector<16x32xf32>
    %492 = arith.subf %484, %491 : vector<16x32xf32>
    %493 = arith.mulf %492, %492 : vector<16x32xf32>
    %cst_168 = arith.constant dense<0.000000e+00> : vector<16xf32>
    %494 = vector.multi_reduction <add>, %493, %cst_168 [1] : vector<16x32xf32> to vector<16xf32>
    %495 = vector.shape_cast %494 : vector<16xf32> to vector<16x1xf32>
    %cst_169 = arith.constant 0.0322580636 : f32
    %496 = vector.broadcast %cst_169 : f32 to vector<16x1xf32>
    %497 = arith.mulf %495, %496 : vector<16x1xf32>
    %498 = vector.broadcast %485 : vector<1x32xf32> to vector<16x32xf32>
    %499 = arith.mulf %498, %492 : vector<16x32xf32>
    %500 = math.sqrt %497 : vector<16x1xf32>
    %cst_170 = arith.constant 9.99999997E-7 : f32
    %501 = vector.broadcast %cst_170 : f32 to vector<16x1xf32>
    %502 = arith.addf %500, %501 : vector<16x1xf32>
    %503 = vector.broadcast %502 : vector<16x1xf32> to vector<16x32xf32>
    %504 = arith.divf %499, %503 : vector<16x32xf32>
    %505 = vector.broadcast %486 : vector<1x32xf32> to vector<16x32xf32>
    %506 = arith.addf %504, %505 : vector<16x32xf32>
    %507 = arith.truncf %506 : vector<16x32xf32> to vector<16x32xbf16>
    %c0_171 = arith.constant 0 : index
    %c0_172 = arith.constant 0 : index
    %508 = vector.load %arg20[%c0_171, %c0_172] : memref<32x64xbf16, #tpu.memory_space<vmem>>, vector<32x64xbf16>
    %cst_173 = arith.constant dense<0.000000e+00> : vector<16x64xf32>
    %509 = tpu.matmul %507, %508, %cst_173 {dimension_numbers = #tpu.dot_dimension_numbers<[1], [0], [0], [1], [0, 0, 1, 1], [], []>} : vector<16x32xbf16>, vector<32x64xbf16>, vector<16x64xf32> -> vector<16x64xf32>
    %c0_174 = arith.constant 0 : index
    %c0_175 = arith.constant 0 : index
    %510 = vector.load %arg21[%c0_174, %c0_175] : memref<1x64xf32, #tpu.memory_space<vmem>>, vector<1x64xf32>
    %511 = vector.broadcast %510 : vector<1x64xf32> to vector<16x64xf32>
    %512 = arith.addf %509, %511 : vector<16x64xf32>
    %cst_176 = arith.constant 0.000000e+00 : f32
    %513 = vector.broadcast %cst_176 : f32 to vector<16x64xf32>
    %514 = arith.maximumf %512, %513 : vector<16x64xf32>
    %515 = arith.truncf %514 : vector<16x64xf32> to vector<16x64xbf16>
    %c0_177 = arith.constant 0 : index
    %c0_178 = arith.constant 0 : index
    %516 = vector.load %arg22[%c0_177, %c0_178] : memref<64x32xbf16, #tpu.memory_space<vmem>>, vector<64x32xbf16>
    %cst_179 = arith.constant dense<0.000000e+00> : vector<16x32xf32>
    %517 = tpu.matmul %515, %516, %cst_179 {dimension_numbers = #tpu.dot_dimension_numbers<[1], [0], [0], [1], [0, 0, 1, 1], [], []>} : vector<16x64xbf16>, vector<64x32xbf16>, vector<16x32xf32> -> vector<16x32xf32>
    %c0_180 = arith.constant 0 : index
    %c0_181 = arith.constant 0 : index
    %518 = vector.load %arg23[%c0_180, %c0_181] : memref<1x32xf32, #tpu.memory_space<vmem>>, vector<1x32xf32>
    %519 = vector.broadcast %518 : vector<1x32xf32> to vector<16x32xf32>
    %520 = arith.addf %517, %519 : vector<16x32xf32>
    %521 = arith.addf %484, %520 : vector<16x32xf32>
    %c0_182 = arith.constant 0 : index
    %c0_183 = arith.constant 0 : index
    %522 = vector.load %arg24[%c0_182, %c0_183] : memref<16x32xf32, #tpu.memory_space<vmem>>, vector<16x32xf32>
    tpu.vector_store %arg24[%c0_182, %c0_183], %521 {strides = array<i32>} : memref<16x32xf32, #tpu.memory_space<vmem>>, vector<16x32xf32>,
    return
  }
}

module attributes {stable_mosaic.version = 11 : i64} {
  func.func @_ln_out_proj_kernel(%arg0: memref<16x32xf32, #tpu.memory_space<vmem>>, %arg1: memref<1x32xf32, #tpu.memory_space<vmem>>, %arg2: memref<1x32xf32, #tpu.memory_space<vmem>>, %arg3: memref<32x128xbf16, #tpu.memory_space<vmem>>, %arg4: memref<1x128xf32, #tpu.memory_space<vmem>>, %arg5: memref<16x128xf32, #tpu.memory_space<vmem>>) attributes {dimension_semantics = [], scalar_prefetch = 0 : i64, scratch_operands = 0 : i64, tpu.core_type = #tpu.core_type<tc>} {
    %c0 = arith.constant 0 : index
    %c0_0 = arith.constant 0 : index
    %0 = vector.load %arg0[%c0, %c0_0] : memref<16x32xf32, #tpu.memory_space<vmem>>, vector<16x32xf32>
    %c0_1 = arith.constant 0 : index
    %c0_2 = arith.constant 0 : index
    %1 = vector.load %arg1[%c0_1, %c0_2] : memref<1x32xf32, #tpu.memory_space<vmem>>, vector<1x32xf32>
    %c0_3 = arith.constant 0 : index
    %c0_4 = arith.constant 0 : index
    %2 = vector.load %arg2[%c0_3, %c0_4] : memref<1x32xf32, #tpu.memory_space<vmem>>, vector<1x32xf32>
    %cst = arith.constant dense<0.000000e+00> : vector<16xf32>
    %3 = vector.multi_reduction <add>, %0, %cst [1] : vector<16x32xf32> to vector<16xf32>
    %4 = vector.shape_cast %3 : vector<16xf32> to vector<16x1xf32>
    %cst_5 = arith.constant 3.200000e+01 : f32
    %5 = vector.broadcast %cst_5 : f32 to vector<16x1xf32>
    %6 = arith.divf %4, %5 : vector<16x1xf32>
    %7 = vector.broadcast %6 : vector<16x1xf32> to vector<16x32xf32>
    %8 = arith.subf %0, %7 : vector<16x32xf32>
    %9 = arith.mulf %8, %8 : vector<16x32xf32>
    %cst_6 = arith.constant dense<0.000000e+00> : vector<16xf32>
    %10 = vector.multi_reduction <add>, %9, %cst_6 [1] : vector<16x32xf32> to vector<16xf32>
    %11 = vector.shape_cast %10 : vector<16xf32> to vector<16x1xf32>
    %cst_7 = arith.constant 0.0322580636 : f32
    %12 = vector.broadcast %cst_7 : f32 to vector<16x1xf32>
    %13 = arith.mulf %11, %12 : vector<16x1xf32>
    %14 = vector.broadcast %1 : vector<1x32xf32> to vector<16x32xf32>
    %15 = arith.mulf %14, %8 : vector<16x32xf32>
    %16 = math.sqrt %13 : vector<16x1xf32>
    %cst_8 = arith.constant 9.99999997E-7 : f32
    %17 = vector.broadcast %cst_8 : f32 to vector<16x1xf32>
    %18 = arith.addf %16, %17 : vector<16x1xf32>
    %19 = vector.broadcast %18 : vector<16x1xf32> to vector<16x32xf32>
    %20 = arith.divf %15, %19 : vector<16x32xf32>
    %21 = vector.broadcast %2 : vector<1x32xf32> to vector<16x32xf32>
    %22 = arith.addf %20, %21 : vector<16x32xf32>
    %23 = arith.truncf %22 : vector<16x32xf32> to vector<16x32xbf16>
    %c0_9 = arith.constant 0 : index
    %c0_10 = arith.constant 0 : index
    %24 = vector.load %arg3[%c0_9, %c0_10] : memref<32x128xbf16, #tpu.memory_space<vmem>>, vector<32x128xbf16>
    %cst_11 = arith.constant dense<0.000000e+00> : vector<16x128xf32>
    %25 = tpu.matmul %23, %24, %cst_11 {dimension_numbers = #tpu.dot_dimension_numbers<[1], [0], [0], [1], [0, 0, 1, 1], [], []>} : vector<16x32xbf16>, vector<32x128xbf16>, vector<16x128xf32> -> vector<16x128xf32>
    %c0_12 = arith.constant 0 : index
    %c0_13 = arith.constant 0 : index
    %26 = vector.load %arg4[%c0_12, %c0_13] : memref<1x128xf32, #tpu.memory_space<vmem>>, vector<1x128xf32>
    %27 = vector.broadcast %26 : vector<1x128xf32> to vector<16x128xf32>
    %28 = arith.addf %25, %27 : vector<16x128xf32>
    %c0_14 = arith.constant 0 : index
    %c0_15 = arith.constant 0 : index
    %29 = vector.load %arg5[%c0_14, %c0_15] : memref<16x128xf32, #tpu.memory_space<vmem>>, vector<16x128xf32>
    tpu.vector_store %arg5[%c0_14, %c0_15], %28 {strides = array<i32>} : memref<16x128xf32, #tpu.memory_space<vmem>>, vector<16x128xf32>,
    return
  }
}

</mosaic_0001>

<bundles_post_ra>
// kernel: transformer_forward.6
= control target key start
LH: loop header
LB: loop body
LE: loop exit
PB: predicated region body
PF: predicated region fallthrough
CT: control target
= control target key end

     0   :  { %vm60_vm0 = vcmask 261120   ;;  %v1794_v14 = vmov 0.0   ;;  %vm1795_vm1 = vmmov 0   ;;  %s1797_s19 = smov 96   ;;  %s1798_s20 = smov 120   ;;  %vm190_vm6 = vcmask 64512   ;;  %s2213_s0 = inlined_call_operand.vmem [shape: f32[16,32], index: 0, kind: input, shape index: {}]   ;;  %s2214_s4 = inlined_call_operand.vmem [shape: bf16[32,96], index: 4, kind: input, shape index: {}]   ;;  %s2215_s2 = inlined_call_operand.vmem [shape: f32[1,32], index: 2, kind: input, shape index: {}]   ;;  %s2216_s3 = inlined_call_operand.vmem [shape: f32[1,32], index: 3, kind: input, shape index: {}]   ;;  %s2217_s5 = inlined_call_operand.vmem [shape: f32[1,96], index: 5, kind: input, shape index: {}]   ;;  %s2218_s1 = inlined_call_operand.vmem [shape: s32[2,1,8], index: 1, kind: input, shape index: {}]   ;;  %s2219_s6 = inlined_call_operand.vmem [shape: bf16[32,32], index: 6, kind: input, shape index: {}]   ;;  %s2220_s7 = inlined_call_operand.vmem [shape: f32[1,32], index: 7, kind: input, shape index: {}]   ;;  %s2221_s10 = inlined_call_operand.vmem [shape: bf16[32,64], index: 10, kind: input, shape index: {}]   ;;  %s2222_s12 = inlined_call_operand.vmem [shape: bf16[64,32], index: 12, kind: input, shape index: {}]   ;;  %s2223_s8 = inlined_call_operand.vmem [shape: f32[1,32], index: 8, kind: input, shape index: {}]   ;;  %s2224_s9 = inlined_call_operand.vmem [shape: f32[1,32], index: 9, kind: input, shape index: {}]   ;;  %s2225_s11 = inlined_call_operand.vmem [shape: f32[1,64], index: 11, kind: input, shape index: {}]   ;;  %s2226_s13 = inlined_call_operand.vmem [shape: f32[1,32], index: 13, kind: input, shape index: {}]   ;;  %s2227_s14 = inlined_call_operand.vmem [shape: f32[1,32], index: 14, kind: input, shape index: {}]   ;;  %s2228_s15 = inlined_call_operand.vmem [shape: f32[1,32], index: 15, kind: input, shape index: {}]   ;;  %s2229_s16 = inlined_call_operand.vmem [shape: f32[16,32], index: 16, kind: output, shape index: {}]  }
   0x1   :  { %2231 = sst [smem:[#allocation2_spill]] %s2213_s0  ;;  %1564 = vmatprep.subr.bf16.mxu0 %v1794_v14  ;;  %v1728_v15 = vld [vmem:[%s2214_s4] sm:$0xff]   ;;  %1568 = vmatprep.mubr.msk.bf16.mxu0 %vm1795_vm1, %v1794_v14  ;;  %v1729_v16 = vld [vmem:[%s2214_s4 + $0x8] sm:$0xff]   ;;  %s1799_s21 = smov 112   ;;  %vm263_vm11 = vcmask 1043456   ;;  %vm656_vm12 = vcmask 130048  }
   0x2   :  { %s2232_s23 = sld [smem:[#allocation2_spill]]  ;;  %1572 = vmatprep.subr.bf16.mxu1 %v1794_v14  ;;  %1574 = vmatprep.mubr.msk.bf16.mxu1 %vm1795_vm1, %v1794_v14  ;;  %v1478_v33 = vld [vmem:[%s2215_s2] ss:$0 sm:$0xff]  ;;  %s1801_s22 = smov 104   ;;  %vm658_vm13 = vcmask 195584  }
   0x3   :  { %1565 = vmatpush3.bf16.msra.mxu0 %v1728_v15  ;;  %v1479_v39 = vld [vmem:[%s2216_s3] ss:$0 sm:$0xff]  ;;  %s1796_s3 = smov 88   ;;  %s1803_s24 = smov 56  }
   0x4   :  { %1566 = vmatprep.subr.bf16.mxu0 %v1794_v14  ;;  %v1480_v44 = vld [vmem:[%s2217_s5] ss:$0 sm:$0xff]  ;;  %s1800_s5 = smov 80   ;;  %s1805_s27 = smov 64  }
   0x5   :  { %v56_v15 = vld [vmem:[%s2218_s1] sm:$0x1]  ;;  %s1807_s4 = smov 40   ;;  %s1808_s30 = smov 8  }
   0x6   :  { %vm238_vm7 = vcmp.eq.s32.totalorder %v56_v15, 0  ;;  %s1809_s18 = smov 16  }
   0x7   :  { %1567 = vmatpush3.bf16.msra.mxu0 %v1729_v16 }
   0x8   :  { %v1899_v0 = vld [vmem:[%s2232_s23] sm:$0xff]  ;;  %v1904_v1 = vld [vmem:[%s2232_s23 + $0x8] sm:$0xff]  ;;  %1578 = vmatprep.subr.bf16.mxu0 %v1794_v14  ;;  %s1802_s23 = smov 72  }
   0x9   :  { %v61_v2 = vsel %vm60_vm0, %v1899_v0, 0.0  ;;  %v64_v3 = vsel %vm60_vm0, %v1904_v1, 0.0 }
   0xa   :  { %62 = vadd.xlane.f32.xlu0 %v61_v2 }
   0xe   :  { %65 = vadd.xlane.f32.xlu0 %v64_v3 }
  0x97   :  { %v63_v4 = vpop.xlane.xlu0 %62 }
  0x98   :  { %v68_v5 = vmul.f32 0.03125, %v63_v4 }
  0x9a   :  { %v70_v6 = vsub.f32 %v1899_v0, %v68_v5 }
  0x9b   :  { %v66_v7 = vpop.xlane.xlu0 %65 }
  0x9c   :  { %v69_v8 = vmul.f32 0.03125, %v66_v7  ;;  %v72_v9 = vmul.f32 %v70_v6, %v70_v6  ;;  %v88_v35 = vmul.f32 %v1478_v33, %v70_v6 }
  0x9e   :  { %v71_v10 = vsub.f32 %v1904_v1, %v69_v8  ;;  %v74_v11 = vsel %vm60_vm0, %v72_v9, 0.0 }
  0x9f   :  { %75 = vadd.xlane.f32.xlu1 %v74_v11 }
  0xa0   :  { %v73_v12 = vmul.f32 %v71_v10, %v71_v10  ;;  %v89_v36 = vmul.f32 %v1478_v33, %v71_v10 }
  0xa2   :  { %v77_v13 = vsel %vm60_vm0, %v73_v12, 0.0 }
  0xa3   :  { %78 = vadd.xlane.f32.xlu1 %v77_v13  ;;  %v240_v13 = vlaneseq }
  0xa5   :  { %v241_v16 = vshrl.u32 %v240_v13, 7 }
 0x12c   :  { %v76_v17 = vpop.xlane.xlu1 %75 }
 0x12d   :  { %v80_v18 = vmul.f32 0.032258064, %v76_v17  ;;  %v242_v17 = vsub.s32 0, %v241_v16 }
 0x12f   :  { %1738 = vrsqrt.f32 %v80_v18  ;;  %vm92_vm2 = vcmp.eq.f32.partialorder %v80_v18, inf  ;;  %v95_v23 = vand.u32 2147483648, %v80_v18  ;;  %vm94_vm3 = vcmp.eq.f32.partialorder %v80_v18, 0.0 }
 0x130   :  { %v79_v19 = vpop.xlane.xlu1 %78 }
 0x131   :  { %v81_v20 = vmul.f32 0.032258064, %v79_v19 }
 0x133   :  { %1740 = vrsqrt.f32 %v81_v20  ;;  %vm99_vm4 = vcmp.eq.f32.partialorder %v81_v20, inf  ;;  %v102_v29 = vand.u32 2147483648, %v81_v20  ;;  %vm101_vm5 = vcmp.eq.f32.partialorder %v81_v20, 0.0 }
 0x139   :  { %v1739_v21 = vpop.eup %1738 }
 0x13a   :  { %v91_v22 = vmul.f32 %v1739_v21, %v80_v18 }
 0x13c   :  { %v93_v24 = vsel %vm92_vm2, %v80_v18, %v91_v22  ;;  %v1804_v18 = vmov 0  }
 0x13d   :  { %v1741_v25 = vpop.eup %1740  ;;  %v96_v26 = vsel %vm94_vm3, %v95_v23, %v93_v24  ;;  %v239_v19 = vsel %vm238_vm7, 1, %v1804_v18  ;;  %vm1367_vm3 = vcmask 523264  }
 0x13e   :  { %v104_v27 = vadd.f32 1e-06, %v96_v26  ;;  %v98_v28 = vmul.f32 %v1741_v25, %v81_v20 }
 0x140   :  { %1742 = vrcp.f32 %v104_v27  ;;  %v100_v30 = vsel %vm99_vm4, %v81_v20, %v98_v28  ;;  %v243_v20 = vrot.slane %v239_v19, %v242_v17 }
 0x141   :  { %v103_v31 = vsel %vm101_vm5, %v102_v29, %v100_v30 }
 0x142   :  { %v105_v32 = vadd.f32 1e-06, %v103_v31  ;;  %vm244_vm8 = vcmp.eq.s32.totalorder %v243_v20, 1 }
 0x144   :  { %1744 = vrcp.f32 %v105_v32 }
 0x14a   :  { %v1743_v34 = vpop.eup %1742 }
 0x14b   :  { %v107_v37 = vmul.f32 %v1743_v34, %v88_v35 }
 0x14d   :  { %v116_v41 = vadd.f32 %v1479_v39, %v107_v37 }
 0x14e   :  { %v1745_v38 = vpop.eup %1744 }
 0x14f   :  { %v109_v40 = vmul.f32 %v1745_v38, %v89_v36 }
 0x151   :  { %v117_v42 = vadd.f32 %v1479_v39, %v109_v40 }
 0x153   :  { %v118_v43 = vpack.c.bf16 %v117_v42, %v116_v41 }
 0x155   :  { %1569 = vmatmul.mubr.msk.bf16.vlgmr.msra.gmra.mrb[0].mxu0 %vm60_vm0, %v118_v43  ;;  %v57_v43 = vld [vmem:[%s2218_s1 + $0x1] sm:$0x1]  ;;  %s1806_s1 = smov 48  }
 0x156   :  { %1580 = vmatprep.mubr.msk.bf16.mxu0 %vm1795_vm1, %v1794_v14  ;;  %vm710_vm9 = vcmp.eq.s32.totalorder %v57_v43, 0 }
 0x228   :  { %v179_v45 = vpop.f32.mrb[0].mxu0 }
 0x229   :  { %v1570_v46 = vpop.f32.mrb[1].mxu0  ;;  %v180_v48 = vadd.f32 %v1480_v44, %v179_v45 }
 0x22a   :  { %v182_v47 = vpop.f32.mrb[2].mxu0 }
 0x22b   :  { %v183_v49 = vadd.f32 %v1480_v44, %v182_v47  ;;  %v1571_v50 = vpop.f32.mrb[3].mxu0 }
 0x22d   :  { %v1940_v51 = vpack.c.bf16 %v183_v49, %v180_v48  ;;  %v711_v48 = vsel %vm710_vm9, 1, %v1804_v18 }
 0x22e   :  { %v715_v49 = vrot.slane %v711_v48, %v242_v17 }
 0x22f   :  { %309 = vrot.lane.b32.xlu1 %v1940_v51, %s1796_s3  ;;  %188 = vrot.lane.b32.xlu0 %v1940_v51, %s1797_s19  ;;  %v1949_v52 = vrot.slane %v1940_v51, 4 }
 0x230   :  { %vm716_vm10 = vcmp.eq.s32.totalorder %v715_v49, 1 }
 0x233   :  { %307 = vrot.lane.b32.xlu1 %v1940_v51, %s1798_s20  ;;  %419 = vrot.lane.b32.xlu0 %v1940_v51, %s1799_s21 }
 0x237   :  { %421 = vrot.lane.b32.xlu1 %v1940_v51, %s1800_s5  ;;  %531 = vrot.lane.b32.xlu0 %v1940_v51, %s1801_s22 }
 0x23b   :  { %533 = vrot.lane.b32.xlu1 %v1940_v51, %s1802_s23  ;;  %780 = vrot.lane.b32.xlu0 %v1949_v52, %s1796_s3 }
 0x23f   :  { %892 = vrot.lane.b32.xlu0 %v1949_v52, %s1800_s5  ;;  %661 = vrot.lane.b32.xlu1 %v1949_v52, %s1797_s19  ;;  %s1810_s19 = smov 24  }
 0x243   :  { %1004 = vrot.lane.b32.xlu0 %v1949_v52, %s1802_s23  ;;  %778 = vrot.lane.b32.xlu1 %v1949_v52, %s1798_s20 }
 0x247   :  { %890 = vrot.lane.b32.xlu1 %v1949_v52, %s1799_s21 }
 0x24b   :  { %1002 = vrot.lane.b32.xlu1 %v1949_v52, %s1801_s22 }
 0x24f   :  { %371 = vrot.lane.b32.xlu1 %v1940_v51, %s1803_s24 }
 0x2a1   :  { %v189_v53 = vpop.permute.xlu0 %188  ;;  %v310_v55 = vpop.permute.xlu1 %309 }
 0x2a2   :  { %v195_v54 = vsel %vm190_vm6, %v189_v53, 0  ;;  %v315_v57 = vsel %vm190_vm6, %v310_v55, 0 }
 0x2a3   :  { %1573 = vmatpush3.bf16.xpose.msra.mxu1 %v195_v54 }
 0x2a4   :  { %1584 = vmatprep.subr.bf16.mxu1 %v1794_v14 }
 0x2a5   :  { %v308_v56 = vpop.permute.xlu1 %307  ;;  %v420_v61 = vpop.permute.xlu0 %419 }
 0x2a9   :  { %v422_v58 = vpop.permute.xlu1 %421  ;;  %v532_v2 = vpop.permute.xlu0 %531 }
 0x2aa   :  { %1575 = vmatmul.mubr.msk.bf16.vlgmr.msra.gmra.mrb[0].mxu1 %vm190_vm6, %v1940_v51  ;;  %v427_v59 = vsel %vm190_vm6, %v422_v58, 0 }
 0x2ab   :  { %1585 = vmatpush3.bf16.xpose.msra.mxu1 %v315_v57  ;;  %1586 = vmatprep.mubr.msk.bf16.mxu1 %vm1795_vm1, %v1794_v14 }
 0x2ac   :  { %1596 = vmatprep.subr.bf16.mxu1 %v1794_v14 }
 0x2ad   :  { %v534_v60 = vpop.permute.xlu1 %533  ;;  %v781_v4 = vpop.permute.xlu0 %780 }
 0x2ae   :  { %v539_v62 = vsel %vm190_vm6, %v534_v60, 0  ;;  %v786_v5 = vsel %vm190_vm6, %v781_v4, 0 }
 0x2b1   :  { %v662_v63 = vpop.permute.xlu1 %661  ;;  %v893_v6 = vpop.permute.xlu0 %892 }
 0x2b2   :  { %1587 = vmatmul.mubr.msk.bf16.vlgmr.msra.gmra.mrb[4].mxu1 %vm190_vm6, %v308_v56  ;;  %v667_v3 = vsel %vm190_vm6, %v662_v63, 0  ;;  %v898_v8 = vsel %vm190_vm6, %v893_v6, 0 }
 0x2b3   :  { %1597 = vmatpush3.bf16.xpose.msra.mxu1 %v427_v59  ;;  %1598 = vmatprep.mubr.msk.bf16.mxu1 %vm1795_vm1, %v1794_v14 }
 0x2b4   :  { %1608 = vmatprep.subr.bf16.mxu1 %v1794_v14 }
 0x2b5   :  { %v779_v7 = vpop.permute.xlu1 %778  ;;  %v1005_v9 = vpop.permute.xlu0 %1004 }
 0x2b6   :  { %v1010_v11 = vsel %vm190_vm6, %v1005_v9, 0 }
 0x2b9   :  { %v891_v10 = vpop.permute.xlu1 %890 }
 0x2ba   :  { %1599 = vmatmul.mubr.msk.bf16.vlgmr.msra.gmra.mrb[8].mxu1 %vm190_vm6, %v420_v61 }
 0x2bb   :  { %1609 = vmatpush3.bf16.xpose.msra.mxu1 %v539_v62  ;;  %1610 = vmatprep.mubr.msk.bf16.mxu1 %vm1795_vm1, %v1794_v14 }
 0x2bc   :  { %1620 = vmatprep.subr.bf16.mxu1 %v1794_v14 }
 0x2bd   :  { %v1003_v12 = vpop.permute.xlu1 %1002 }
 0x2c2   :  { %1611 = vmatmul.mubr.msk.bf16.vlgmr.msra.gmra.mrb[12].mxu1 %vm190_vm6, %v532_v2 }
 0x2c3   :  { %1621 = vmatpush3.bf16.xpose.msra.mxu1 %v667_v3  ;;  %1622 = vmatprep.mubr.msk.bf16.mxu1 %vm1795_vm1, %v1794_v14 }
 0x2c4   :  { %1632 = vmatprep.subr.bf16.mxu1 %v1794_v14 }
 0x2ca   :  { %1623 = vmatmul.mubr.msk.bf16.vlgmr.msra.gmra.mrb[16].mxu1 %vm190_vm6, %v1949_v52 }
 0x2cb   :  { %1633 = vmatpush3.bf16.xpose.msra.mxu1 %v786_v5  ;;  %1634 = vmatprep.mubr.msk.bf16.mxu1 %vm1795_vm1, %v1794_v14 }
 0x2cc   :  { %1644 = vmatprep.subr.bf16.mxu1 %v1794_v14 }
 0x2d2   :  { %1635 = vmatmul.mubr.msk.bf16.vlgmr.msra.gmra.mrb[20].mxu1 %vm190_vm6, %v779_v7 }
 0x2d3   :  { %1645 = vmatpush3.bf16.xpose.msra.mxu1 %v898_v8  ;;  %1646 = vmatprep.mubr.msk.bf16.mxu1 %vm1795_vm1, %v1794_v14 }
 0x2d4   :  { %1656 = vmatprep.subr.bf16.mxu1 %v1794_v14 }
 0x2da   :  { %1647 = vmatmul.mubr.msk.bf16.vlgmr.msra.gmra.mrb[24].mxu1 %vm190_vm6, %v891_v10 }
 0x2db   :  { %1657 = vmatpush3.bf16.xpose.msra.mxu1 %v1010_v11  ;;  %1658 = vmatprep.mubr.msk.bf16.mxu1 %vm1795_vm1, %v1794_v14 }
 0x2dc   :  { %1668 = vmatprep.subr.bf16.mxu1 %v1794_v14 }
 0x2e2   :  { %1659 = vmatmul.mubr.msk.bf16.vlgmr.msra.gmra.mrb[28].mxu1 %vm190_vm6, %v1003_v12 }
 0x2e3   :  { %1672 = vmatprep.mubr.msk.bf16.mxu1 %vm1795_vm1, %v1794_v14 }
 0x37d   :  { %v231_v21 = vpop.f32.mrb[0].mxu1 }
 0x37e   :  { %v237_v22 = vmul.f32 0.35355338, %v231_v21  ;;  %v1576_v23 = vpop.f32.mrb[1].mxu1 }
 0x37f   :  { %v234_v24 = vpop.f32.mrb[2].mxu1 }
 0x380   :  { %v1577_v25 = vpop.f32.mrb[3].mxu1  ;;  %v2007_v26 = vsel %vm244_vm8, -1e+09, %v237_v22  ;;  %v2042_v24 = vpop.permute.xlu1 %371 }
 0x381   :  { %v246_v27 = vsel %vm190_vm6, %v2007_v26, -inf }
 0x382   :  { %247 = vmax.xlane.f32.xlu0 %v246_v27 }
 0x385   :  { %v351_v28 = vpop.f32.mrb[4].mxu1 }
 0x386   :  { %v357_v29 = vmul.f32 0.35355338, %v351_v28  ;;  %v1588_v30 = vpop.f32.mrb[5].mxu1 }
 0x387   :  { %v354_v31 = vpop.f32.mrb[6].mxu1 }
 0x388   :  { %v1589_v32 = vpop.f32.mrb[7].mxu1  ;;  %v2012_v33 = vsel %vm244_vm8, -1e+09, %v357_v29 }
 0x389   :  { %v359_v34 = vsel %vm190_vm6, %v2012_v33, -inf }
 0x38a   :  { %360 = vmax.xlane.f32.xlu1 %v359_v34 }
 0x38d   :  { %v463_v35 = vpop.f32.mrb[8].mxu1 }
 0x38e   :  { %v1600_v36 = vpop.f32.mrb[9].mxu1  ;;  %v469_v61 = vmul.f32 0.35355338, %v463_v35 }
 0x38f   :  { %v466_v37 = vpop.f32.mrb[10].mxu1 }
 0x390   :  { %v1601_v38 = vpop.f32.mrb[11].mxu1  ;;  %v470_v3 = vsel %vm244_vm8, -1e+09, %v469_v61 }
 0x391   :  { %v471_v7 = vsel %vm190_vm6, %v470_v3, -inf }
 0x395   :  { %v575_v39 = vpop.f32.mrb[12].mxu1 }
 0x396   :  { %v1612_v40 = vpop.f32.mrb[13].mxu1  ;;  %v581_v2 = vmul.f32 0.35355338, %v575_v39 }
 0x397   :  { %v578_v41 = vpop.f32.mrb[14].mxu1 }
 0x398   :  { %v1613_v42 = vpop.f32.mrb[15].mxu1  ;;  %258 = vrot.lane.b32.xlu0 %v1940_v51, %s1805_s27  ;;  %v582_v10 = vsel %vm244_vm8, -1e+09, %v581_v2 }
 0x399   :  { %v583_v15 = vsel %vm190_vm6, %v582_v10, -inf }
 0x39d   :  { %v703_v44 = vpop.f32.mrb[16].mxu1 }
 0x39e   :  { %v1624_v45 = vpop.f32.mrb[17].mxu1  ;;  %v709_v8 = vmul.f32 0.35355338, %v703_v44 }
 0x39f   :  { %v706_v46 = vpop.f32.mrb[18].mxu1 }
 0x3a0   :  { %v1625_v47 = vpop.f32.mrb[19].mxu1  ;;  %v717_v17 = vsel %vm716_vm10, -1e+09, %v709_v8 }
 0x3a1   :  { %v718_v18 = vsel %vm190_vm6, %v717_v17, -inf }
 0x3a5   :  { %v822_v50 = vpop.f32.mrb[20].mxu1 }
 0x3a6   :  { %v828_v53 = vmul.f32 0.35355338, %v822_v50  ;;  %v1636_v54 = vpop.f32.mrb[21].mxu1 }
 0x3a7   :  { %v825_v55 = vpop.f32.mrb[22].mxu1 }
 0x3a8   :  { %v1637_v56 = vpop.f32.mrb[23].mxu1  ;;  %v2022_v57 = vsel %vm716_vm10, -1e+09, %v828_v53 }
 0x3a9   :  { %v830_v58 = vsel %vm190_vm6, %v2022_v57, -inf }
 0x3aa   :  { %831 = vmax.xlane.f32.xlu1 %v830_v58 }
 0x3ad   :  { %v934_v59 = vpop.f32.mrb[24].mxu1 }
 0x3ae   :  { %v1648_v60 = vpop.f32.mrb[25].mxu1  ;;  %v940_v16 = vmul.f32 0.35355338, %v934_v59 }
 0x3af   :  { %v937_v62 = vpop.f32.mrb[26].mxu1 }
 0x3b0   :  { %v1649_v63 = vpop.f32.mrb[27].mxu1  ;;  %v941_v19 = vsel %vm716_vm10, -1e+09, %v940_v16 }
 0x3b1   :  { %v942_v20 = vsel %vm190_vm6, %v941_v19, -inf }
 0x3b5   :  { %v1046_v4 = vpop.f32.mrb[28].mxu1 }
 0x3b6   :  { %v1052_v5 = vmul.f32 0.35355338, %v1046_v4  ;;  %v1660_v6 = vpop.f32.mrb[29].mxu1 }
 0x3b7   :  { %472 = vmax.xlane.f32.xlu0 %v471_v7  ;;  %v1049_v9 = vpop.f32.mrb[30].mxu1 }
 0x3b8   :  { %v1661_v11 = vpop.f32.mrb[31].mxu1  ;;  %v2030_v12 = vsel %vm716_vm10, -1e+09, %v1052_v5  ;;  %v377_v9 = vsel %vm263_vm11, %v2042_v24, 0 }
 0x3b9   :  { %v1054_v13 = vsel %vm190_vm6, %v2030_v12, -inf }
 0x3ba   :  { %1055 = vmax.xlane.f32.xlu1 %v1054_v13 }
 0x3bb   :  { %584 = vmax.xlane.f32.xlu0 %v583_v15 }
 0x3bf   :  { %719 = vmax.xlane.f32.xlu0 %v718_v18 }
 0x3c3   :  { %943 = vmax.xlane.f32.xlu0 %v942_v20 }
 0x3d9   :  { %483 = vrot.lane.b32.xlu0 %v1940_v51, %s1806_s1 }
 0x40f   :  { %v248_v21 = vpop.xlane.xlu0 %247 }
 0x410   :  { %v249_v22 = vsub.f32 %v2007_v26, %v248_v21 }
 0x412   :  { %v250_v23 = vmul.f32 1.442695, %v249_v22 }
 0x413   :  { %v259_v25 = vpop.permute.xlu0 %258 }
 0x414   :  { %1746 = vpow2.f32 %v250_v23  ;;  %v265_v27 = vsel %vm263_vm11, %v259_v25, 0 }
 0x415   :  { %1579 = vmatpush3.bf16.msra.mxu0 %v265_v27 }
 0x416   :  { %1590 = vmatprep.subr.bf16.mxu0 %v1794_v14 }
 0x417   :  { %v361_v28 = vpop.xlane.xlu1 %360 }
 0x418   :  { %v362_v29 = vsub.f32 %v2012_v33, %v361_v28 }
 0x41a   :  { %v363_v30 = vmul.f32 1.442695, %v362_v29 }
 0x41c   :  { %1748 = vpow2.f32 %v363_v30 }
 0x41e   :  { %v1747_v31 = vpop.eup %1746 }
 0x41f   :  { %v252_v32 = vsel %vm190_vm6, %v1747_v31, 0.0 }
 0x420   :  { %253 = vadd.xlane.f32.xlu0 %v252_v32 }
 0x426   :  { %v2048_v26 = vpop.eup %1748 }
 0x427   :  { %v365_v34 = vsel %vm190_vm6, %v2048_v26, 0.0 }
 0x428   :  { %366 = vadd.xlane.f32.xlu1 %v365_v34 }
 0x437   :  { %v832_v40 = vpop.xlane.xlu1 %831 }
 0x438   :  { %v833_v43 = vsub.f32 %v2022_v57, %v832_v40 }
 0x439   :  { %730 = vrot.lane.b32.xlu1 %v1949_v52, %s1805_s27 }
 0x43a   :  { %v834_v46 = vmul.f32 1.442695, %v833_v43 }
 0x444   :  { %v473_v35 = vpop.xlane.xlu0 %472 }
 0x445   :  { %v474_v36 = vsub.f32 %v470_v3, %v473_v35 }
 0x447   :  { %v475_v37 = vmul.f32 1.442695, %v474_v36  ;;  %v1056_v59 = vpop.xlane.xlu1 %1055 }
 0x448   :  { %v585_v38 = vpop.xlane.xlu0 %584  ;;  %v1057_v60 = vsub.f32 %v2030_v12, %v1056_v59 }
 0x449   :  { %1750 = vpow2.f32 %v475_v37  ;;  %v586_v33 = vsub.f32 %v582_v10, %v585_v38 }
 0x44a   :  { %v1058_v62 = vmul.f32 1.442695, %v1057_v60 }
 0x44b   :  { %v587_v39 = vmul.f32 1.442695, %v586_v33 }
 0x44c   :  { %v720_v41 = vpop.xlane.xlu0 %719 }
 0x44d   :  { %v721_v42 = vsub.f32 %v717_v17, %v720_v41  ;;  %1752 = vpow2.f32 %v587_v39 }
 0x44f   :  { %v722_v44 = vmul.f32 1.442695, %v721_v42 }
 0x450   :  { %v944_v56 = vpop.xlane.xlu0 %943 }
 0x451   :  { %1754 = vpow2.f32 %v722_v44  ;;  %v945_v57 = vsub.f32 %v941_v19, %v944_v56 }
 0x452   :  { %1756 = vpow2.f32 %v834_v46 }
 0x453   :  { %v1751_v45 = vpop.eup %1750  ;;  %v946_v58 = vmul.f32 1.442695, %v945_v57 }
 0x454   :  { %v477_v47 = vsel %vm190_vm6, %v1751_v45, 0.0  ;;  %v484_v3 = vpop.permute.xlu0 %483 }
 0x455   :  { %478 = vadd.xlane.f32.xlu0 %v477_v47  ;;  %1758 = vpow2.f32 %v946_v58  ;;  %v489_v12 = vsel %vm263_vm11, %v484_v3, 0 }
 0x456   :  { %1760 = vpow2.f32 %v1058_v62 }
 0x457   :  { %v2056_v48 = vpop.eup %1752 }
 0x458   :  { %v589_v49 = vsel %vm190_vm6, %v2056_v48, 0.0 }
 0x45b   :  { %v2060_v50 = vpop.eup %1754 }
 0x45c   :  { %v724_v53 = vsel %vm190_vm6, %v2060_v50, 0.0  ;;  %v2064_v54 = vpop.eup %1756 }
 0x45d   :  { %590 = vadd.xlane.f32.xlu1 %v589_v49  ;;  %v836_v55 = vsel %vm190_vm6, %v2064_v54, 0.0 }
 0x45f   :  { %v2072_v61 = vpop.eup %1758 }
 0x460   :  { %v948_v63 = vsel %vm190_vm6, %v2072_v61, 0.0  ;;  %v2076_v2 = vpop.eup %1760 }
 0x461   :  { %725 = vadd.xlane.f32.xlu1 %v724_v53 }
 0x465   :  { %837 = vadd.xlane.f32.xlu1 %v836_v55 }
 0x46b   :  { %595 = vrot.lane.b32.xlu0 %v1940_v51, %s1807_s4  ;;  %v1060_v51 = vsel %vm190_vm6, %v2076_v2, 0.0 }
 0x476   :  { %842 = vrot.lane.b32.xlu1 %v1949_v52, %s1803_s24 }
 0x48a   :  { %949 = vadd.xlane.f32.xlu0 %v948_v63 }
 0x49a   :  { %1061 = vadd.xlane.f32.xlu1 %v1060_v51 }
 0x4a0   :  { %954 = vrot.lane.b32.xlu0 %v1949_v52, %s1806_s1 }
 0x4ab   :  { %1066 = vrot.lane.b32.xlu1 %v1949_v52, %s1807_s4 }
 0x4ad   :  { %v254_v4 = vpop.xlane.xlu0 %253 }
 0x4ae   :  { %1762 = vrcp.f32 %v254_v4 }
 0x4b5   :  { %v367_v5 = vpop.xlane.xlu1 %366 }
 0x4b6   :  { %1764 = vrcp.f32 %v367_v5 }
 0x4b8   :  { %v1763_v6 = vpop.eup %1762 }
 0x4b9   :  { %v256_v7 = vmul.f32 %v1763_v6, %v1747_v31  ;;  %v731_v15 = vpop.permute.xlu1 %730 }
 0x4ba   :  { %v736_v29 = vsel %vm263_vm11, %v731_v15, 0 }
 0x4bb   :  { %v257_v8 = vpack.c.bf16 %v256_v7, %v256_v7 }
 0x4bd   :  { %1581 = vmatmul.mubr.msk.bf16.vlgmr.msra.gmra.mrb[4].mxu0 %vm190_vm6, %v257_v8 }
 0x4be   :  { %1591 = vmatpush3.bf16.msra.mxu0 %v377_v9  ;;  %1592 = vmatprep.mubr.msk.bf16.mxu0 %vm1795_vm1, %v1794_v14 }
 0x4bf   :  { %1602 = vmatprep.subr.bf16.mxu0 %v1794_v14 }
 0x4c0   :  { %v1765_v10 = vpop.eup %1764 }
 0x4c1   :  { %v369_v52 = vmul.f32 %v1765_v10, %v2048_v26 }
 0x4c3   :  { %v370_v11 = vpack.c.bf16 %v369_v52, %v369_v52 }
 0x4c5   :  { %1593 = vmatmul.mubr.msk.bf16.vlgmr.msra.gmra.mrb[8].mxu0 %vm190_vm6, %v370_v11  ;;  %v1730_v11 = vld [vmem:[%s2219_s6] sm:$0xff]  }
 0x4c6   :  { %1603 = vmatpush3.bf16.msra.mxu0 %v489_v12  ;;  %1604 = vmatprep.mubr.msk.bf16.mxu0 %vm1795_vm1, %v1794_v14 }
 0x4c7   :  { %1614 = vmatprep.subr.bf16.mxu0 %v1794_v14  ;;  %1669 = vmatpush3.bf16.msra.mxu1 %v1730_v11 }
 0x4c8   :  { %1670 = vmatprep.subr.bf16.mxu1 %v1794_v14 }
 0x4e2   :  { %v479_v13 = vpop.xlane.xlu0 %478 }
 0x4e3   :  { %1766 = vrcp.f32 %v479_v13 }
 0x4e6   :  { %v596_v20 = vpop.permute.xlu0 %595 }
 0x4e7   :  { %v601_v22 = vsel %vm263_vm11, %v596_v20, 0 }
 0x4ea   :  { %v591_v16 = vpop.xlane.xlu1 %590 }
 0x4eb   :  { %1768 = vrcp.f32 %v591_v16 }
 0x4ed   :  { %v1767_v17 = vpop.eup %1766 }
 0x4ee   :  { %v481_v18 = vmul.f32 %v1767_v17, %v1751_v45  ;;  %v726_v19 = vpop.xlane.xlu1 %725 }
 0x4ef   :  { %1770 = vrcp.f32 %v726_v19 }
 0x4f0   :  { %v482_v21 = vpack.c.bf16 %v481_v18, %v481_v18  ;;  %v1731_v18 = vld [vmem:[%s2219_s6 + $0x8] sm:$0xff]  }
 0x4f1   :  { %1671 = vmatpush3.bf16.msra.mxu1 %v1731_v18  ;;  %v1504_v18 = vld [vmem:[%s2223_s8] ss:$0 sm:$0xff] }
 0x4f2   :  { %1605 = vmatmul.mubr.msk.bf16.vlgmr.msra.gmra.mrb[12].mxu0 %vm190_vm6, %v482_v21  ;;  %v838_v23 = vpop.xlane.xlu1 %837  ;;  %1684 = vmatprep.subr.bf16.mxu1 %v1794_v14 }
 0x4f3   :  { %1615 = vmatpush3.bf16.msra.mxu0 %v601_v22  ;;  %1616 = vmatprep.mubr.msk.bf16.mxu0 %vm1795_vm1, %v1794_v14  ;;  %1772 = vrcp.f32 %v838_v23 }
 0x4f4   :  { %1626 = vmatprep.subr.bf16.mxu0 %v1794_v14 }
 0x4f5   :  { %v1769_v24 = vpop.eup %1768 }
 0x4f6   :  { %v593_v25 = vmul.f32 %v1769_v24, %v2056_v48  ;;  %v843_v31 = vpop.permute.xlu1 %842 }
 0x4f7   :  { %v848_v34 = vsel %vm263_vm11, %v843_v31, 0 }
 0x4f8   :  { %v594_v27 = vpack.c.bf16 %v593_v25, %v593_v25 }
 0x4f9   :  { %v1771_v28 = vpop.eup %1770 }
 0x4fa   :  { %1617 = vmatmul.mubr.msk.bf16.vlgmr.msra.gmra.mrb[16].mxu0 %vm190_vm6, %v594_v27  ;;  %v728_v30 = vmul.f32 %v1771_v28, %v2060_v50 }
 0x4fb   :  { %1627 = vmatpush3.bf16.msra.mxu0 %v736_v29  ;;  %1628 = vmatprep.mubr.msk.bf16.mxu0 %vm1795_vm1, %v1794_v14 }
 0x4fc   :  { %1638 = vmatprep.subr.bf16.mxu0 %v1794_v14  ;;  %v729_v32 = vpack.c.bf16 %v728_v30, %v728_v30 }
 0x4fd   :  { %v1773_v26 = vpop.eup %1772 }
 0x4fe   :  { %v840_v35 = vmul.f32 %v1773_v26, %v2064_v54 }
 0x500   :  { %v841_v36 = vpack.c.bf16 %v840_v35, %v840_v35 }
 0x502   :  { %1629 = vmatmul.mubr.msk.bf16.vlgmr.msra.gmra.mrb[20].mxu0 %vm190_vm6, %v729_v32 }
 0x503   :  { %1639 = vmatpush3.bf16.msra.mxu0 %v848_v34  ;;  %1640 = vmatprep.mubr.msk.bf16.mxu0 %vm1795_vm1, %v1794_v14 }
 0x504   :  { %1650 = vmatprep.subr.bf16.mxu0 %v1794_v14 }
 0x50a   :  { %1641 = vmatmul.mubr.msk.bf16.vlgmr.msra.gmra.mrb[24].mxu0 %vm190_vm6, %v841_v36 }
 0x50b   :  { %1652 = vmatprep.mubr.msk.bf16.mxu0 %vm1795_vm1, %v1794_v14 }
 0x517   :  { %v950_v37 = vpop.xlane.xlu0 %949 }
 0x518   :  { %1774 = vrcp.f32 %v950_v37 }
 0x51b   :  { %v955_v38 = vpop.permute.xlu0 %954 }
 0x51c   :  { %v960_v33 = vsel %vm263_vm11, %v955_v38, 0 }
 0x51d   :  { %1651 = vmatpush3.bf16.msra.mxu0 %v960_v33 }
 0x51e   :  { %1662 = vmatprep.subr.bf16.mxu0 %v1794_v14 }
 0x522   :  { %v1775_v39 = vpop.eup %1774 }
 0x523   :  { %v952_v40 = vmul.f32 %v1775_v39, %v2072_v61 }
 0x525   :  { %v953_v41 = vpack.c.bf16 %v952_v40, %v952_v40  ;;  %v1500_v40 = vld [vmem:[%s2220_s7] ss:$0 sm:$0xff] }
 0x527   :  { %1653 = vmatmul.mubr.msk.bf16.vlgmr.msra.gmra.mrb[28].mxu0 %vm190_vm6, %v953_v41  ;;  %v1062_v42 = vpop.xlane.xlu1 %1061 }
 0x528   :  { %1776 = vrcp.f32 %v1062_v42  ;;  %1664 = vmatprep.mubr.msk.bf16.mxu0 %vm1795_vm1, %v1794_v14 }
 0x52b   :  { %v1067_v43 = vpop.permute.xlu1 %1066 }
 0x52c   :  { %v1072_v44 = vsel %vm263_vm11, %v1067_v43, 0 }
 0x52d   :  { %1663 = vmatpush3.bf16.msra.mxu0 %v1072_v44 }
 0x52e   :  { %1676 = vmatprep.subr.bf16.mxu0 %v1794_v14 }
 0x532   :  { %v1777_v45 = vpop.eup %1776 }
 0x533   :  { %v1064_v46 = vmul.f32 %v1777_v45, %v2076_v2 }
 0x535   :  { %v1065_v47 = vpack.c.bf16 %v1064_v46, %v1064_v46 }
 0x537   :  { %1665 = vmatmul.mubr.msk.bf16.vlgmr.msra.gmra.mrb[32].mxu0 %vm190_vm6, %v1065_v47 }
 0x538   :  { %1680 = vmatprep.mubr.msk.bf16.mxu0 %vm1795_vm1, %v1794_v14 }
 0x590   :  { %v301_v48 = vpop.f32.mrb[4].mxu0 }
 0x591   :  { %v1582_v49 = vpop.f32.mrb[5].mxu0 }
 0x592   :  { %v304_v50 = vpop.f32.mrb[6].mxu0 }
 0x593   :  { %v1583_v53 = vpop.f32.mrb[7].mxu0 }
 0x598   :  { %v413_v54 = vpop.f32.mrb[8].mxu0 }
 0x599   :  { %v1594_v55 = vpop.f32.mrb[9].mxu0 }
 0x59a   :  { %v416_v56 = vpop.f32.mrb[10].mxu0 }
 0x59b   :  { %v1595_v57 = vpop.f32.mrb[11].mxu0 }
 0x5c5   :  { %v525_v58 = vpop.f32.mrb[12].mxu0 }
 0x5c6   :  { %v1606_v59 = vpop.f32.mrb[13].mxu0 }
 0x5c7   :  { %v528_v60 = vpop.f32.mrb[14].mxu0 }
 0x5c8   :  { %v1607_v61 = vpop.f32.mrb[15].mxu0 }
 0x5c9   :  { %v1732_v61 = vld [vmem:[%s2221_s10] sm:$0xff]  }
 0x5ca   :  { %1677 = vmatpush3.bf16.msra.mxu0 %v1732_v61 }
 0x5cb   :  { %1678 = vmatprep.subr.bf16.mxu0 %v1794_v14 }
 0x5cd   :  { %v637_v62 = vpop.f32.mrb[16].mxu0 }
 0x5ce   :  { %v1618_v63 = vpop.f32.mrb[17].mxu0 }
 0x5cf   :  { %v640_v2 = vpop.f32.mrb[18].mxu0  ;;  %v1734_v63 = vld [vmem:[%s2222_s12] sm:$0xff]  }
 0x5d0   :  { %v1619_v51 = vpop.f32.mrb[19].mxu0  ;;  %v1735_v2 = vld [vmem:[%s2222_s12 + $0x8] sm:$0xff]  }
 0x5d5   :  { %v772_v3 = vpop.f32.mrb[20].mxu0 }
 0x5d6   :  { %v1630_v4 = vpop.f32.mrb[21].mxu0 }
 0x5d7   :  { %v775_v5 = vpop.f32.mrb[22].mxu0 }
 0x5d8   :  { %v1631_v6 = vpop.f32.mrb[23].mxu0 }
 0x5dd   :  { %v884_v7 = vpop.f32.mrb[24].mxu0 }
 0x5de   :  { %v1713_v8 = vpack.i.bf16 %v884_v7, %v413_v54  ;;  %v1642_v9 = vpop.f32.mrb[25].mxu0 }
 0x5df   :  { %v887_v10 = vpop.f32.mrb[26].mxu0 }
 0x5e0   :  { %1714 = vrot.lane.b32.xlu0 %v1713_v8, %s1808_s30  ;;  %v1643_v52 = vpop.f32.mrb[27].mxu0 }
 0x5fa   :  { %v996_v12 = vpop.f32.mrb[28].mxu0 }
 0x5fb   :  { %v1718_v13 = vpack.i.bf16 %v996_v12, %v525_v58  ;;  %v1654_v15 = vpop.f32.mrb[29].mxu0 }
 0x5fc   :  { %v999_v16 = vpop.f32.mrb[30].mxu0 }
 0x5fd   :  { %1719 = vrot.lane.b32.xlu1 %v1718_v13, %s1809_s18  ;;  %v1655_v17 = vpop.f32.mrb[31].mxu0 }
 0x60a   :  { %v1108_v19 = vpop.f32.mrb[32].mxu0 }
 0x60b   :  { %v1723_v20 = vpack.i.bf16 %v1108_v19, %v637_v62  ;;  %v1666_v21 = vpop.f32.mrb[33].mxu0  ;;  %v1733_v62 = vld [vmem:[%s2221_s10 + $0x8] sm:$0xff]  }
 0x60c   :  { %v1111_v22 = vpop.f32.mrb[34].mxu0  ;;  %1679 = vmatpush3.bf16.msra.mxu0 %v1733_v62 }
 0x60d   :  { %1724 = vrot.lane.b32.xlu0 %v1723_v20, %s1810_s19  ;;  %v1667_v23 = vpop.f32.mrb[35].mxu0 }
 0x652   :  { %v1715_v24 = vpop.permute.xlu0 %1714 }
 0x653   :  { %v1717_v27 = vunpack.i.h.bf16 %v1715_v24  ;;  %v1716_v28 = vunpack.i.l.bf16 %v1715_v24  ;;  %v1505_v24 = vld [vmem:[%s2224_s9] ss:$0 sm:$0xff] }
 0x655   :  { %v1126_v32 = vsel %vm190_vm6, %v772_v3, %v1717_v27  ;;  %v655_v26 = vsel %vm190_vm6, %v301_v48, %v1716_v28 }
 0x66f   :  { %v1720_v25 = vpop.permute.xlu1 %1719 }
 0x670   :  { %v1722_v29 = vunpack.i.h.bf16 %v1720_v25  ;;  %v1721_v30 = vunpack.i.l.bf16 %v1720_v25 }
 0x672   :  { %v1127_v36 = vsel %vm656_vm12, %v1126_v32, %v1722_v29  ;;  %v657_v37 = vsel %vm656_vm12, %v655_v26, %v1721_v30  ;;  %v1736_v30 = vld [vmem:[%s2222_s12 + $0x10] sm:$0xff]   ;;  %v1506_v32 = vld [vmem:[%s2225_s11] ss:$0 sm:$0xff] }
 0x67f   :  { %v1725_v31 = vpop.permute.xlu0 %1724 }
 0x680   :  { %v1727_v34 = vunpack.i.h.bf16 %v1725_v31  ;;  %v1726_v35 = vunpack.i.l.bf16 %v1725_v31  ;;  %v1737_v31 = vld [vmem:[%s2222_s12 + $0x18] sm:$0xff]  }
 0x682   :  { %v1128_v38 = vsel %vm658_vm13, %v1127_v36, %v1727_v34  ;;  %v659_v33 = vsel %vm658_vm13, %v657_v37, %v1726_v35 }
 0x683   :  { %v1129_v39 = vpack.c.bf16 %v1128_v38, %v659_v33 }
 0x685   :  { %1673 = vmatmul.mubr.msk.bf16.vlgmr.msra.gmra.mrb[32].mxu1 %vm60_vm0, %v1129_v39 }
 0x686   :  { %1692 = vmatprep.mubr.msk.bf16.mxu1 %vm1795_vm1, %v1794_v14  ;;  %1685 = vmatpush3.bf16.msra.mxu1 %v1734_v63 }
 0x687   :  { %1686 = vmatprep.subr.bf16.mxu1 %v1794_v14 }
 0x68a   :  { %1687 = vmatpush3.bf16.msra.mxu1 %v1735_v2 }
 0x68b   :  { %1688 = vmatprep.subr.bf16.mxu1 %v1794_v14 }
 0x68e   :  { %1689 = vmatpush3.bf16.msra.mxu1 %v1736_v30 }
 0x68f   :  { %1690 = vmatprep.subr.bf16.mxu1 %v1794_v14  ;;  %v1510_v14 = vld [vmem:[%s2226_s13] ss:$0 sm:$0xff] }
 0x692   :  { %1691 = vmatpush3.bf16.msra.mxu1 %v1737_v31 }
 0x758   :  { %v1190_v41 = vpop.f32.mrb[32].mxu1 }
 0x759   :  { %v1191_v42 = vadd.f32 %v1500_v40, %v1190_v41  ;;  %v1674_v43 = vpop.f32.mrb[33].mxu1 }
 0x75a   :  { %v1193_v44 = vpop.f32.mrb[34].mxu1 }
 0x75b   :  { %v2145_v45 = vadd.f32 %v1191_v42, %v1899_v0  ;;  %v1194_v46 = vadd.f32 %v1500_v40, %v1193_v44  ;;  %v1675_v47 = vpop.f32.mrb[35].mxu1 }
 0x75d   :  { %v2148_v48 = vadd.f32 %v1194_v46, %v1904_v1  ;;  %v1201_v49 = vsel %vm60_vm0, %v2145_v45, 0.0 }
 0x75e   :  { %1202 = vadd.xlane.f32.xlu1 %v1201_v49 }
 0x75f   :  { %v1204_v50 = vsel %vm60_vm0, %v2148_v48, 0.0 }
 0x760   :  { %1205 = vadd.xlane.f32.xlu0 %v1204_v50 }
 0x7eb   :  { %v1203_v53 = vpop.xlane.xlu1 %1202 }
 0x7ec   :  { %v1207_v54 = vmul.f32 0.03125, %v1203_v53 }
 0x7ed   :  { %v1206_v55 = vpop.xlane.xlu0 %1205 }
 0x7ee   :  { %v1209_v56 = vsub.f32 %v2145_v45, %v1207_v54  ;;  %v1208_v0 = vmul.f32 0.03125, %v1206_v55 }
 0x7f0   :  { %v1210_v57 = vsub.f32 %v2148_v48, %v1208_v0  ;;  %v1211_v58 = vmul.f32 %v1209_v56, %v1209_v56  ;;  %v1227_v20 = vmul.f32 %v1504_v18, %v1209_v56 }
 0x7f2   :  { %v1213_v1 = vsel %vm60_vm0, %v1211_v58, 0.0  ;;  %v1212_v59 = vmul.f32 %v1210_v57, %v1210_v57  ;;  %v1228_v21 = vmul.f32 %v1504_v18, %v1210_v57 }
 0x7f3   :  { %1214 = vadd.xlane.f32.xlu0 %v1213_v1 }
 0x7f4   :  { %v1216_v60 = vsel %vm60_vm0, %v1212_v59, 0.0 }
 0x7f7   :  { %1217 = vadd.xlane.f32.xlu0 %v1216_v60 }
 0x880   :  { %v1215_v51 = vpop.xlane.xlu0 %1214 }
 0x881   :  { %v1219_v3 = vmul.f32 0.032258064, %v1215_v51 }
 0x883   :  { %1778 = vrsqrt.f32 %v1219_v3  ;;  %vm1231_vm14 = vcmp.eq.f32.partialorder %v1219_v3, inf  ;;  %v1234_v8 = vand.u32 2147483648, %v1219_v3  ;;  %vm1233_vm15 = vcmp.eq.f32.partialorder %v1219_v3, 0.0 }
 0x884   :  { %v1218_v4 = vpop.xlane.xlu0 %1217 }
 0x885   :  { %v1220_v5 = vmul.f32 0.032258064, %v1218_v4 }
 0x887   :  { %1780 = vrsqrt.f32 %v1220_v5  ;;  %vm1238_vm1 = vcmp.eq.f32.partialorder %v1220_v5, inf  ;;  %v1241_v13 = vand.u32 2147483648, %v1220_v5  ;;  %vm1240_vm2 = vcmp.eq.f32.partialorder %v1220_v5, 0.0 }
 0x88d   :  { %v1779_v6 = vpop.eup %1778 }
 0x88e   :  { %v1230_v7 = vmul.f32 %v1779_v6, %v1219_v3 }
 0x890   :  { %v1232_v9 = vsel %vm1231_vm14, %v1219_v3, %v1230_v7 }
 0x891   :  { %v1781_v10 = vpop.eup %1780  ;;  %v1235_v52 = vsel %vm1233_vm15, %v1234_v8, %v1232_v9 }
 0x892   :  { %v1243_v11 = vadd.f32 1e-06, %v1235_v52  ;;  %v1237_v12 = vmul.f32 %v1781_v10, %v1220_v5 }
 0x894   :  { %1782 = vrcp.f32 %v1243_v11  ;;  %v1239_v15 = vsel %vm1238_vm1, %v1220_v5, %v1237_v12 }
 0x895   :  { %v1242_v16 = vsel %vm1240_vm2, %v1241_v13, %v1239_v15  ;;  %v1516_v13 = vld [vmem:[%s2227_s14] ss:$0 sm:$0xff] }
 0x896   :  { %v1244_v17 = vadd.f32 1e-06, %v1242_v16 }
 0x898   :  { %1784 = vrcp.f32 %v1244_v17  ;;  %v1517_v17 = vld [vmem:[%s2228_s15] ss:$0 sm:$0xff] }
 0x89e   :  { %v1783_v19 = vpop.eup %1782 }
 0x89f   :  { %v1246_v22 = vmul.f32 %v1783_v19, %v1227_v20 }
 0x8a1   :  { %v1255_v27 = vadd.f32 %v1505_v24, %v1246_v22 }
 0x8a2   :  { %v1785_v23 = vpop.eup %1784 }
 0x8a3   :  { %v1248_v25 = vmul.f32 %v1785_v23, %v1228_v21 }
 0x8a5   :  { %v1256_v28 = vadd.f32 %v1505_v24, %v1248_v25 }
 0x8a7   :  { %v1257_v29 = vpack.c.bf16 %v1256_v28, %v1255_v27 }
 0x8a9   :  { %1681 = vmatmul.mubr.msk.bf16.vlgmr.msra.gmra.mrb[36].mxu0 %vm60_vm0, %v1257_v29 }
 0x97c   :  { %v1318_v26 = vpop.f32.mrb[36].mxu0 }
 0x97d   :  { %v1319_v34 = vadd.f32 %v1506_v32, %v1318_v26  ;;  %v1682_v35 = vpop.f32.mrb[37].mxu0 }
 0x97e   :  { %v1321_v36 = vpop.f32.mrb[38].mxu0 }
 0x97f   :  { %v1322_v37 = vadd.f32 %v1506_v32, %v1321_v36  ;;  %v1683_v38 = vpop.f32.mrb[39].mxu0  ;;  %v1325_v33 = vmax.f32 %v1319_v34, 0.0 }
 0x981   :  { %v1326_v39 = vmax.f32 %v1322_v37, 0.0 }
 0x983   :  { %v1327_v40 = vpack.c.bf16 %v1326_v39, %v1325_v33 }
 0x985   :  { %1693 = vmatmul.mubr.msk.bf16.vlgmr.msra.gmra.mrb[36].mxu1 %vm1367_vm3, %v1327_v40 }
 0xa58   :  { %v1405_v41 = vpop.f32.mrb[36].mxu1 }
 0xa59   :  { %v1406_v42 = vadd.f32 %v1510_v14, %v1405_v41  ;;  %v1694_v43 = vpop.f32.mrb[37].mxu1 }
 0xa5a   :  { %v1408_v44 = vpop.f32.mrb[38].mxu1 }
 0xa5b   :  { %v1409_v46 = vadd.f32 %v1510_v14, %v1408_v44  ;;  %v1695_v47 = vpop.f32.mrb[39].mxu1  ;;  %v1412_v49 = vadd.f32 %v1406_v42, %v2145_v45 }
 0xa5d   :  { %v1416_v50 = vsel %vm60_vm0, %v1412_v49, 0.0  ;;  %v1413_v53 = vadd.f32 %v1409_v46, %v2148_v48 }
 0xa5e   :  { %1417 = vadd.xlane.f32.xlu1 %v1416_v50 }
 0xa5f   :  { %v1419_v54 = vsel %vm60_vm0, %v1413_v53, 0.0 }
 0xa60   :  { %1420 = vadd.xlane.f32.xlu0 %v1419_v54 }
 0xaeb   :  { %v1418_v55 = vpop.xlane.xlu1 %1417 }
 0xaec   :  { %v1422_v56 = vmul.f32 0.03125, %v1418_v55 }
 0xaed   :  { %v1421_v0 = vpop.xlane.xlu0 %1420 }
 0xaee   :  { %v1424_v57 = vsub.f32 %v1412_v49, %v1422_v56  ;;  %v1423_v58 = vmul.f32 0.03125, %v1421_v0 }
 0xaf0   :  { %v1425_v1 = vsub.f32 %v1413_v53, %v1423_v58  ;;  %v1426_v59 = vmul.f32 %v1424_v57, %v1424_v57  ;;  %v1442_v15 = vmul.f32 %v1516_v13, %v1424_v57 }
 0xaf2   :  { %v1428_v60 = vsel %vm60_vm0, %v1426_v59, 0.0  ;;  %v1427_v61 = vmul.f32 %v1425_v1, %v1425_v1  ;;  %v1443_v19 = vmul.f32 %v1516_v13, %v1425_v1 }
 0xaf3   :  { %1429 = vadd.xlane.f32.xlu1 %v1428_v60 }
 0xaf4   :  { %v1431_v45 = vsel %vm60_vm0, %v1427_v61, 0.0 }
 0xaf5   :  { %1432 = vadd.xlane.f32.xlu0 %v1431_v45 }
 0xb80   :  { %v1430_v62 = vpop.xlane.xlu1 %1429 }
 0xb81   :  { %v1434_v48 = vmul.f32 0.032258064, %v1430_v62 }
 0xb82   :  { %v1433_v63 = vpop.xlane.xlu0 %1432 }
 0xb83   :  { %1786 = vrsqrt.f32 %v1434_v48  ;;  %v1435_v2 = vmul.f32 0.032258064, %v1433_v63  ;;  %vm1446_vm4 = vcmp.eq.f32.partialorder %v1434_v48, inf  ;;  %v1449_v4 = vand.u32 2147483648, %v1434_v48 }
 0xb84   :  { %vm1448_vm5 = vcmp.eq.f32.partialorder %v1434_v48, 0.0 }
 0xb85   :  { %1788 = vrsqrt.f32 %v1435_v2  ;;  %vm1453_vm6 = vcmp.eq.f32.partialorder %v1435_v2, inf  ;;  %v1456_v10 = vand.u32 2147483648, %v1435_v2  ;;  %vm1455_vm7 = vcmp.eq.f32.partialorder %v1435_v2, 0.0 }
 0xb8d   :  { %v1787_v51 = vpop.eup %1786 }
 0xb8e   :  { %v1445_v3 = vmul.f32 %v1787_v51, %v1434_v48 }
 0xb8f   :  { %v1789_v5 = vpop.eup %1788 }
 0xb90   :  { %v1447_v6 = vsel %vm1446_vm4, %v1434_v48, %v1445_v3  ;;  %v1452_v8 = vmul.f32 %v1789_v5, %v1435_v2 }
 0xb91   :  { %v1450_v7 = vsel %vm1448_vm5, %v1449_v4, %v1447_v6 }
 0xb92   :  { %v1458_v9 = vadd.f32 1e-06, %v1450_v7  ;;  %v1454_v52 = vsel %vm1453_vm6, %v1435_v2, %v1452_v8 }
 0xb93   :  { %v1457_v11 = vsel %vm1455_vm7, %v1456_v10, %v1454_v52 }
 0xb94   :  { %1790 = vrcp.f32 %v1458_v9  ;;  %v1459_v12 = vadd.f32 1e-06, %v1457_v11 }
 0xb96   :  { %1792 = vrcp.f32 %v1459_v12 }
 0xb9e   :  { %v1791_v16 = vpop.eup %1790 }
 0xb9f   :  { %v1461_v18 = vmul.f32 %v1791_v16, %v1442_v15 }
 0xba0   :  { %v1793_v20 = vpop.eup %1792 }
 0xba1   :  { %v1470_v21 = vadd.f32 %v1517_v17, %v1461_v18  ;;  %v1463_v22 = vmul.f32 %v1793_v20, %v1443_v19 }
 0xba3   :  { %1472 = vst.msk [vmem:[%s2229_s16] sm:$0xff] %vm60_vm0, %v1470_v21  ;;  %v1471_v23 = vadd.f32 %v1517_v17, %v1463_v22 }
 0xba5   :  { %1473 = vst.msk [vmem:[%s2229_s16 + $0x8] sm:$0xff] %vm60_vm0, %v1471_v23 }

// kernel: transformer_forward.5
= control target key start
LH: loop header
LB: loop body
LE: loop exit
PB: predicated region body
PF: predicated region fallthrough
CT: control target
= control target key end

     0   :  { %vm60_vm0 = vcmask 261120   ;;  %v1726_v14 = vmov 0.0   ;;  %vm1727_vm1 = vmmov 0   ;;  %s1729_s29 = smov 96   ;;  %s1730_s30 = smov 120   ;;  %vm190_vm6 = vcmask 64512   ;;  %s2135_s0 = inlined_call_operand.vmem [shape: f32[16,32], index: 0, kind: input, shape index: {}]   ;;  %s2136_s14 = inlined_call_operand.vmem [shape: f32[1,32], index: 14, kind: input, shape index: {}]   ;;  %s2137_s15 = inlined_call_operand.vmem [shape: f32[1,32], index: 15, kind: input, shape index: {}]   ;;  %s2138_s4 = inlined_call_operand.vmem [shape: bf16[32,96], index: 4, kind: input, shape index: {}]   ;;  %s2139_s2 = inlined_call_operand.vmem [shape: f32[1,32], index: 2, kind: input, shape index: {}]   ;;  %s2140_s3 = inlined_call_operand.vmem [shape: f32[1,32], index: 3, kind: input, shape index: {}]   ;;  %s2141_s5 = inlined_call_operand.vmem [shape: f32[1,96], index: 5, kind: input, shape index: {}]   ;;  %s2142_s1 = inlined_call_operand.vmem [shape: s32[2,1,8], index: 1, kind: input, shape index: {}]   ;;  %s2143_s6 = inlined_call_operand.vmem [shape: bf16[32,32], index: 6, kind: input, shape index: {}]   ;;  %s2144_s7 = inlined_call_operand.vmem [shape: f32[1,32], index: 7, kind: input, shape index: {}]   ;;  %s2145_s10 = inlined_call_operand.vmem [shape: bf16[32,64], index: 10, kind: input, shape index: {}]   ;;  %s2146_s12 = inlined_call_operand.vmem [shape: bf16[64,32], index: 12, kind: input, shape index: {}]   ;;  %s2147_s8 = inlined_call_operand.vmem [shape: f32[1,32], index: 8, kind: input, shape index: {}]   ;;  %s2148_s9 = inlined_call_operand.vmem [shape: f32[1,32], index: 9, kind: input, shape index: {}]   ;;  %s2149_s11 = inlined_call_operand.vmem [shape: f32[1,64], index: 11, kind: input, shape index: {}]   ;;  %s2150_s13 = inlined_call_operand.vmem [shape: f32[1,32], index: 13, kind: input, shape index: {}]   ;;  %s2151_s16 = inlined_call_operand.vmem [shape: f32[16,32], index: 16, kind: output, shape index: {}]  }
   0x1   :  { %2153 = sst [smem:[#allocation2_spill]] %s2135_s0  ;;  %1504 = vmatprep.subr.bf16.mxu0 %v1726_v14  ;;  %v1668_v15 = vld [vmem:[%s2138_s4] sm:$0xff]   ;;  %1508 = vmatprep.mubr.msk.bf16.mxu0 %vm1727_vm1, %v1726_v14  ;;  %v1669_v16 = vld [vmem:[%s2138_s4 + $0x8] sm:$0xff]   ;;  %s1731_s17 = smov 112   ;;  %vm263_vm11 = vcmask 1043456   ;;  %vm656_vm12 = vcmask 130048  }
   0x2   :  { %s2154_s15 = sld [smem:[#allocation2_spill]]  ;;  %1512 = vmatprep.subr.bf16.mxu1 %v1726_v14  ;;  %1514 = vmatprep.mubr.msk.bf16.mxu1 %vm1727_vm1, %v1726_v14  ;;  %v1420_v33 = vld [vmem:[%s2139_s2] ss:$0 sm:$0xff]  ;;  %s1733_s18 = smov 104   ;;  %vm658_vm13 = vcmask 195584  }
   0x3   :  { %1505 = vmatpush3.bf16.msra.mxu0 %v1668_v15  ;;  %v1421_v39 = vld [vmem:[%s2140_s3] ss:$0 sm:$0xff]  ;;  %s1728_s3 = smov 88   ;;  %s1734_s14 = smov 72  }
   0x4   :  { %1506 = vmatprep.subr.bf16.mxu0 %v1726_v14  ;;  %v1422_v44 = vld [vmem:[%s2141_s5] ss:$0 sm:$0xff]  ;;  %s1732_s5 = smov 80   ;;  %s1735_s19 = smov 56  }
   0x5   :  { %v56_v15 = vld [vmem:[%s2142_s1] sm:$0x1]  ;;  %s1737_s21 = smov 64   ;;  %s1739_s24 = smov 40  }
   0x6   :  { %vm238_vm7 = vcmp.eq.s32.totalorder %v56_v15, 0  ;;  %s1740_s25 = smov 8   ;;  %s1741_s27 = smov 16  }
   0x7   :  { %1507 = vmatpush3.bf16.msra.mxu0 %v1669_v16  ;;  %s1742_s2 = smov 24  }
   0x8   :  { %v1831_v0 = vld [vmem:[%s2154_s15] sm:$0xff]  ;;  %v1836_v1 = vld [vmem:[%s2154_s15 + $0x8] sm:$0xff]  ;;  %1518 = vmatprep.subr.bf16.mxu0 %v1726_v14 }
   0x9   :  { %v61_v2 = vsel %vm60_vm0, %v1831_v0, 0.0  ;;  %v64_v3 = vsel %vm60_vm0, %v1836_v1, 0.0 }
   0xa   :  { %62 = vadd.xlane.f32.xlu0 %v61_v2 }
   0xe   :  { %65 = vadd.xlane.f32.xlu0 %v64_v3 }
  0x97   :  { %v63_v4 = vpop.xlane.xlu0 %62 }
  0x98   :  { %v68_v5 = vmul.f32 0.03125, %v63_v4 }
  0x9a   :  { %v70_v6 = vsub.f32 %v1831_v0, %v68_v5 }
  0x9b   :  { %v66_v7 = vpop.xlane.xlu0 %65 }
  0x9c   :  { %v69_v8 = vmul.f32 0.03125, %v66_v7  ;;  %v72_v9 = vmul.f32 %v70_v6, %v70_v6  ;;  %v88_v35 = vmul.f32 %v1420_v33, %v70_v6 }
  0x9e   :  { %v71_v10 = vsub.f32 %v1836_v1, %v69_v8  ;;  %v74_v11 = vsel %vm60_vm0, %v72_v9, 0.0 }
  0x9f   :  { %75 = vadd.xlane.f32.xlu1 %v74_v11 }
  0xa0   :  { %v73_v12 = vmul.f32 %v71_v10, %v71_v10  ;;  %v89_v36 = vmul.f32 %v1420_v33, %v71_v10 }
  0xa2   :  { %v77_v13 = vsel %vm60_vm0, %v73_v12, 0.0 }
  0xa3   :  { %78 = vadd.xlane.f32.xlu1 %v77_v13  ;;  %v240_v13 = vlaneseq }
  0xa5   :  { %v241_v16 = vshrl.u32 %v240_v13, 7 }
 0x12c   :  { %v76_v17 = vpop.xlane.xlu1 %75 }
 0x12d   :  { %v80_v18 = vmul.f32 0.032258064, %v76_v17  ;;  %v242_v17 = vsub.s32 0, %v241_v16 }
 0x12f   :  { %1678 = vrsqrt.f32 %v80_v18  ;;  %vm92_vm2 = vcmp.eq.f32.partialorder %v80_v18, inf  ;;  %v95_v23 = vand.u32 2147483648, %v80_v18  ;;  %vm94_vm3 = vcmp.eq.f32.partialorder %v80_v18, 0.0 }
 0x130   :  { %v79_v19 = vpop.xlane.xlu1 %78 }
 0x131   :  { %v81_v20 = vmul.f32 0.032258064, %v79_v19 }
 0x133   :  { %1680 = vrsqrt.f32 %v81_v20  ;;  %vm99_vm4 = vcmp.eq.f32.partialorder %v81_v20, inf  ;;  %v102_v29 = vand.u32 2147483648, %v81_v20  ;;  %vm101_vm5 = vcmp.eq.f32.partialorder %v81_v20, 0.0 }
 0x139   :  { %v1679_v21 = vpop.eup %1678 }
 0x13a   :  { %v91_v22 = vmul.f32 %v1679_v21, %v80_v18 }
 0x13c   :  { %v93_v24 = vsel %vm92_vm2, %v80_v18, %v91_v22  ;;  %v1736_v18 = vmov 0  }
 0x13d   :  { %v1681_v25 = vpop.eup %1680  ;;  %v96_v26 = vsel %vm94_vm3, %v95_v23, %v93_v24  ;;  %v239_v19 = vsel %vm238_vm7, 1, %v1736_v18  ;;  %vm1367_vm3 = vcmask 523264  }
 0x13e   :  { %v104_v27 = vadd.f32 1e-06, %v96_v26  ;;  %v98_v28 = vmul.f32 %v1681_v25, %v81_v20 }
 0x140   :  { %1682 = vrcp.f32 %v104_v27  ;;  %v100_v30 = vsel %vm99_vm4, %v81_v20, %v98_v28  ;;  %v243_v20 = vrot.slane %v239_v19, %v242_v17 }
 0x141   :  { %v103_v31 = vsel %vm101_vm5, %v102_v29, %v100_v30 }
 0x142   :  { %v105_v32 = vadd.f32 1e-06, %v103_v31  ;;  %vm244_vm8 = vcmp.eq.s32.totalorder %v243_v20, 1 }
 0x144   :  { %1684 = vrcp.f32 %v105_v32 }
 0x14a   :  { %v1683_v34 = vpop.eup %1682 }
 0x14b   :  { %v107_v37 = vmul.f32 %v1683_v34, %v88_v35 }
 0x14d   :  { %v116_v41 = vadd.f32 %v1421_v39, %v107_v37 }
 0x14e   :  { %v1685_v38 = vpop.eup %1684 }
 0x14f   :  { %v109_v40 = vmul.f32 %v1685_v38, %v89_v36 }
 0x151   :  { %v117_v42 = vadd.f32 %v1421_v39, %v109_v40 }
 0x153   :  { %v118_v43 = vpack.c.bf16 %v117_v42, %v116_v41 }
 0x155   :  { %1509 = vmatmul.mubr.msk.bf16.vlgmr.msra.gmra.mrb[0].mxu0 %vm60_vm0, %v118_v43  ;;  %v57_v43 = vld [vmem:[%s2142_s1 + $0x1] sm:$0x1]  ;;  %s1738_s1 = smov 48  }
 0x156   :  { %1520 = vmatprep.mubr.msk.bf16.mxu0 %vm1727_vm1, %v1726_v14  ;;  %vm710_vm9 = vcmp.eq.s32.totalorder %v57_v43, 0 }
 0x228   :  { %v179_v45 = vpop.f32.mrb[0].mxu0 }
 0x229   :  { %v1510_v46 = vpop.f32.mrb[1].mxu0  ;;  %v180_v48 = vadd.f32 %v1422_v44, %v179_v45 }
 0x22a   :  { %v182_v47 = vpop.f32.mrb[2].mxu0 }
 0x22b   :  { %v183_v49 = vadd.f32 %v1422_v44, %v182_v47  ;;  %v1511_v50 = vpop.f32.mrb[3].mxu0 }
 0x22d   :  { %v1872_v51 = vpack.c.bf16 %v183_v49, %v180_v48  ;;  %v711_v48 = vsel %vm710_vm9, 1, %v1736_v18 }
 0x22e   :  { %v715_v49 = vrot.slane %v711_v48, %v242_v17 }
 0x22f   :  { %309 = vrot.lane.b32.xlu1 %v1872_v51, %s1728_s3  ;;  %188 = vrot.lane.b32.xlu0 %v1872_v51, %s1729_s29  ;;  %v1881_v52 = vrot.slane %v1872_v51, 4 }
 0x230   :  { %vm716_vm10 = vcmp.eq.s32.totalorder %v715_v49, 1 }
 0x233   :  { %307 = vrot.lane.b32.xlu1 %v1872_v51, %s1730_s30  ;;  %419 = vrot.lane.b32.xlu0 %v1872_v51, %s1731_s17 }
 0x237   :  { %421 = vrot.lane.b32.xlu1 %v1872_v51, %s1732_s5  ;;  %531 = vrot.lane.b32.xlu0 %v1872_v51, %s1733_s18 }
 0x23b   :  { %533 = vrot.lane.b32.xlu1 %v1872_v51, %s1734_s14  ;;  %780 = vrot.lane.b32.xlu0 %v1881_v52, %s1728_s3 }
 0x23f   :  { %892 = vrot.lane.b32.xlu0 %v1881_v52, %s1732_s5  ;;  %661 = vrot.lane.b32.xlu1 %v1881_v52, %s1729_s29 }
 0x243   :  { %1004 = vrot.lane.b32.xlu0 %v1881_v52, %s1734_s14  ;;  %778 = vrot.lane.b32.xlu1 %v1881_v52, %s1730_s30 }
 0x247   :  { %890 = vrot.lane.b32.xlu1 %v1881_v52, %s1731_s17 }
 0x24b   :  { %1002 = vrot.lane.b32.xlu1 %v1881_v52, %s1733_s18 }
 0x24f   :  { %371 = vrot.lane.b32.xlu1 %v1872_v51, %s1735_s19 }
 0x2a1   :  { %v189_v53 = vpop.permute.xlu0 %188  ;;  %v310_v55 = vpop.permute.xlu1 %309 }
 0x2a2   :  { %v195_v54 = vsel %vm190_vm6, %v189_v53, 0  ;;  %v315_v57 = vsel %vm190_vm6, %v310_v55, 0 }
 0x2a3   :  { %1513 = vmatpush3.bf16.xpose.msra.mxu1 %v195_v54 }
 0x2a4   :  { %1524 = vmatprep.subr.bf16.mxu1 %v1726_v14 }
 0x2a5   :  { %v308_v56 = vpop.permute.xlu1 %307  ;;  %v420_v61 = vpop.permute.xlu0 %419 }
 0x2a9   :  { %v422_v58 = vpop.permute.xlu1 %421  ;;  %v532_v2 = vpop.permute.xlu0 %531 }
 0x2aa   :  { %1515 = vmatmul.mubr.msk.bf16.vlgmr.msra.gmra.mrb[0].mxu1 %vm190_vm6, %v1872_v51  ;;  %v427_v59 = vsel %vm190_vm6, %v422_v58, 0 }
 0x2ab   :  { %1525 = vmatpush3.bf16.xpose.msra.mxu1 %v315_v57  ;;  %1526 = vmatprep.mubr.msk.bf16.mxu1 %vm1727_vm1, %v1726_v14 }
 0x2ac   :  { %1536 = vmatprep.subr.bf16.mxu1 %v1726_v14 }
 0x2ad   :  { %v534_v60 = vpop.permute.xlu1 %533  ;;  %v781_v4 = vpop.permute.xlu0 %780 }
 0x2ae   :  { %v539_v62 = vsel %vm190_vm6, %v534_v60, 0  ;;  %v786_v5 = vsel %vm190_vm6, %v781_v4, 0 }
 0x2b1   :  { %v662_v63 = vpop.permute.xlu1 %661  ;;  %v893_v6 = vpop.permute.xlu0 %892 }
 0x2b2   :  { %1527 = vmatmul.mubr.msk.bf16.vlgmr.msra.gmra.mrb[4].mxu1 %vm190_vm6, %v308_v56  ;;  %v667_v3 = vsel %vm190_vm6, %v662_v63, 0  ;;  %v898_v8 = vsel %vm190_vm6, %v893_v6, 0 }
 0x2b3   :  { %1537 = vmatpush3.bf16.xpose.msra.mxu1 %v427_v59  ;;  %1538 = vmatprep.mubr.msk.bf16.mxu1 %vm1727_vm1, %v1726_v14 }
 0x2b4   :  { %1548 = vmatprep.subr.bf16.mxu1 %v1726_v14 }
 0x2b5   :  { %v779_v7 = vpop.permute.xlu1 %778  ;;  %v1005_v9 = vpop.permute.xlu0 %1004 }
 0x2b6   :  { %v1010_v11 = vsel %vm190_vm6, %v1005_v9, 0 }
 0x2b9   :  { %v891_v10 = vpop.permute.xlu1 %890 }
 0x2ba   :  { %1539 = vmatmul.mubr.msk.bf16.vlgmr.msra.gmra.mrb[8].mxu1 %vm190_vm6, %v420_v61 }
 0x2bb   :  { %1549 = vmatpush3.bf16.xpose.msra.mxu1 %v539_v62  ;;  %1550 = vmatprep.mubr.msk.bf16.mxu1 %vm1727_vm1, %v1726_v14 }
 0x2bc   :  { %1560 = vmatprep.subr.bf16.mxu1 %v1726_v14 }
 0x2bd   :  { %v1003_v12 = vpop.permute.xlu1 %1002 }
 0x2c2   :  { %1551 = vmatmul.mubr.msk.bf16.vlgmr.msra.gmra.mrb[12].mxu1 %vm190_vm6, %v532_v2 }
 0x2c3   :  { %1561 = vmatpush3.bf16.xpose.msra.mxu1 %v667_v3  ;;  %1562 = vmatprep.mubr.msk.bf16.mxu1 %vm1727_vm1, %v1726_v14 }
 0x2c4   :  { %1572 = vmatprep.subr.bf16.mxu1 %v1726_v14 }
 0x2ca   :  { %1563 = vmatmul.mubr.msk.bf16.vlgmr.msra.gmra.mrb[16].mxu1 %vm190_vm6, %v1881_v52 }
 0x2cb   :  { %1573 = vmatpush3.bf16.xpose.msra.mxu1 %v786_v5  ;;  %1574 = vmatprep.mubr.msk.bf16.mxu1 %vm1727_vm1, %v1726_v14 }
 0x2cc   :  { %1584 = vmatprep.subr.bf16.mxu1 %v1726_v14 }
 0x2d2   :  { %1575 = vmatmul.mubr.msk.bf16.vlgmr.msra.gmra.mrb[20].mxu1 %vm190_vm6, %v779_v7 }
 0x2d3   :  { %1585 = vmatpush3.bf16.xpose.msra.mxu1 %v898_v8  ;;  %1586 = vmatprep.mubr.msk.bf16.mxu1 %vm1727_vm1, %v1726_v14 }
 0x2d4   :  { %1596 = vmatprep.subr.bf16.mxu1 %v1726_v14 }
 0x2da   :  { %1587 = vmatmul.mubr.msk.bf16.vlgmr.msra.gmra.mrb[24].mxu1 %vm190_vm6, %v891_v10 }
 0x2db   :  { %1597 = vmatpush3.bf16.xpose.msra.mxu1 %v1010_v11  ;;  %1598 = vmatprep.mubr.msk.bf16.mxu1 %vm1727_vm1, %v1726_v14 }
 0x2dc   :  { %1608 = vmatprep.subr.bf16.mxu1 %v1726_v14 }
 0x2e2   :  { %1599 = vmatmul.mubr.msk.bf16.vlgmr.msra.gmra.mrb[28].mxu1 %vm190_vm6, %v1003_v12 }
 0x2e3   :  { %1612 = vmatprep.mubr.msk.bf16.mxu1 %vm1727_vm1, %v1726_v14 }
 0x37d   :  { %v231_v21 = vpop.f32.mrb[0].mxu1 }
 0x37e   :  { %v237_v22 = vmul.f32 0.35355338, %v231_v21  ;;  %v1516_v23 = vpop.f32.mrb[1].mxu1 }
 0x37f   :  { %v234_v24 = vpop.f32.mrb[2].mxu1 }
 0x380   :  { %v1517_v25 = vpop.f32.mrb[3].mxu1  ;;  %v1939_v26 = vsel %vm244_vm8, -1e+09, %v237_v22  ;;  %v1974_v24 = vpop.permute.xlu1 %371 }
 0x381   :  { %v246_v27 = vsel %vm190_vm6, %v1939_v26, -inf }
 0x382   :  { %247 = vmax.xlane.f32.xlu0 %v246_v27 }
 0x385   :  { %v351_v28 = vpop.f32.mrb[4].mxu1 }
 0x386   :  { %v357_v29 = vmul.f32 0.35355338, %v351_v28  ;;  %v1528_v30 = vpop.f32.mrb[5].mxu1 }
 0x387   :  { %v354_v31 = vpop.f32.mrb[6].mxu1 }
 0x388   :  { %v1529_v32 = vpop.f32.mrb[7].mxu1  ;;  %v1944_v33 = vsel %vm244_vm8, -1e+09, %v357_v29 }
 0x389   :  { %v359_v34 = vsel %vm190_vm6, %v1944_v33, -inf }
 0x38a   :  { %360 = vmax.xlane.f32.xlu1 %v359_v34 }
 0x38d   :  { %v463_v35 = vpop.f32.mrb[8].mxu1 }
 0x38e   :  { %v1540_v36 = vpop.f32.mrb[9].mxu1  ;;  %v469_v61 = vmul.f32 0.35355338, %v463_v35 }
 0x38f   :  { %v466_v37 = vpop.f32.mrb[10].mxu1 }
 0x390   :  { %v1541_v38 = vpop.f32.mrb[11].mxu1  ;;  %v470_v3 = vsel %vm244_vm8, -1e+09, %v469_v61 }
 0x391   :  { %v471_v7 = vsel %vm190_vm6, %v470_v3, -inf }
 0x395   :  { %v575_v39 = vpop.f32.mrb[12].mxu1 }
 0x396   :  { %v1552_v40 = vpop.f32.mrb[13].mxu1  ;;  %v581_v2 = vmul.f32 0.35355338, %v575_v39 }
 0x397   :  { %v578_v41 = vpop.f32.mrb[14].mxu1 }
 0x398   :  { %v1553_v42 = vpop.f32.mrb[15].mxu1  ;;  %258 = vrot.lane.b32.xlu0 %v1872_v51, %s1737_s21  ;;  %v582_v10 = vsel %vm244_vm8, -1e+09, %v581_v2 }
 0x399   :  { %v583_v15 = vsel %vm190_vm6, %v582_v10, -inf }
 0x39d   :  { %v703_v44 = vpop.f32.mrb[16].mxu1 }
 0x39e   :  { %v1564_v45 = vpop.f32.mrb[17].mxu1  ;;  %v709_v8 = vmul.f32 0.35355338, %v703_v44 }
 0x39f   :  { %v706_v46 = vpop.f32.mrb[18].mxu1 }
 0x3a0   :  { %v1565_v47 = vpop.f32.mrb[19].mxu1  ;;  %v717_v17 = vsel %vm716_vm10, -1e+09, %v709_v8 }
 0x3a1   :  { %v718_v18 = vsel %vm190_vm6, %v717_v17, -inf }
 0x3a5   :  { %v822_v50 = vpop.f32.mrb[20].mxu1 }
 0x3a6   :  { %v828_v53 = vmul.f32 0.35355338, %v822_v50  ;;  %v1576_v54 = vpop.f32.mrb[21].mxu1 }
 0x3a7   :  { %v825_v55 = vpop.f32.mrb[22].mxu1 }
 0x3a8   :  { %v1577_v56 = vpop.f32.mrb[23].mxu1  ;;  %v1954_v57 = vsel %vm716_vm10, -1e+09, %v828_v53 }
 0x3a9   :  { %v830_v58 = vsel %vm190_vm6, %v1954_v57, -inf }
 0x3aa   :  { %831 = vmax.xlane.f32.xlu1 %v830_v58 }
 0x3ad   :  { %v934_v59 = vpop.f32.mrb[24].mxu1 }
 0x3ae   :  { %v1588_v60 = vpop.f32.mrb[25].mxu1  ;;  %v940_v16 = vmul.f32 0.35355338, %v934_v59 }
 0x3af   :  { %v937_v62 = vpop.f32.mrb[26].mxu1 }
 0x3b0   :  { %v1589_v63 = vpop.f32.mrb[27].mxu1  ;;  %v941_v19 = vsel %vm716_vm10, -1e+09, %v940_v16 }
 0x3b1   :  { %v942_v20 = vsel %vm190_vm6, %v941_v19, -inf }
 0x3b5   :  { %v1046_v4 = vpop.f32.mrb[28].mxu1 }
 0x3b6   :  { %v1052_v5 = vmul.f32 0.35355338, %v1046_v4  ;;  %v1600_v6 = vpop.f32.mrb[29].mxu1 }
 0x3b7   :  { %472 = vmax.xlane.f32.xlu0 %v471_v7  ;;  %v1049_v9 = vpop.f32.mrb[30].mxu1 }
 0x3b8   :  { %v1601_v11 = vpop.f32.mrb[31].mxu1  ;;  %v1962_v12 = vsel %vm716_vm10, -1e+09, %v1052_v5  ;;  %v377_v9 = vsel %vm263_vm11, %v1974_v24, 0 }
 0x3b9   :  { %v1054_v13 = vsel %vm190_vm6, %v1962_v12, -inf }
 0x3ba   :  { %1055 = vmax.xlane.f32.xlu1 %v1054_v13 }
 0x3bb   :  { %584 = vmax.xlane.f32.xlu0 %v583_v15 }
 0x3bf   :  { %719 = vmax.xlane.f32.xlu0 %v718_v18 }
 0x3c3   :  { %943 = vmax.xlane.f32.xlu0 %v942_v20 }
 0x3d9   :  { %483 = vrot.lane.b32.xlu0 %v1872_v51, %s1738_s1 }
 0x40f   :  { %v248_v21 = vpop.xlane.xlu0 %247 }
 0x410   :  { %v249_v22 = vsub.f32 %v1939_v26, %v248_v21 }
 0x412   :  { %v250_v23 = vmul.f32 1.442695, %v249_v22 }
 0x413   :  { %v259_v25 = vpop.permute.xlu0 %258 }
 0x414   :  { %1686 = vpow2.f32 %v250_v23  ;;  %v265_v27 = vsel %vm263_vm11, %v259_v25, 0 }
 0x415   :  { %1519 = vmatpush3.bf16.msra.mxu0 %v265_v27 }
 0x416   :  { %1530 = vmatprep.subr.bf16.mxu0 %v1726_v14 }
 0x417   :  { %v361_v28 = vpop.xlane.xlu1 %360 }
 0x418   :  { %v362_v29 = vsub.f32 %v1944_v33, %v361_v28 }
 0x41a   :  { %v363_v30 = vmul.f32 1.442695, %v362_v29 }
 0x41c   :  { %1688 = vpow2.f32 %v363_v30 }
 0x41e   :  { %v1687_v31 = vpop.eup %1686 }
 0x41f   :  { %v252_v32 = vsel %vm190_vm6, %v1687_v31, 0.0 }
 0x420   :  { %253 = vadd.xlane.f32.xlu0 %v252_v32 }
 0x426   :  { %v1980_v26 = vpop.eup %1688 }
 0x427   :  { %v365_v34 = vsel %vm190_vm6, %v1980_v26, 0.0 }
 0x428   :  { %366 = vadd.xlane.f32.xlu1 %v365_v34 }
 0x437   :  { %v832_v40 = vpop.xlane.xlu1 %831 }
 0x438   :  { %v833_v43 = vsub.f32 %v1954_v57, %v832_v40 }
 0x439   :  { %730 = vrot.lane.b32.xlu1 %v1881_v52, %s1737_s21 }
 0x43a   :  { %v834_v46 = vmul.f32 1.442695, %v833_v43 }
 0x444   :  { %v473_v35 = vpop.xlane.xlu0 %472 }
 0x445   :  { %v474_v36 = vsub.f32 %v470_v3, %v473_v35 }
 0x447   :  { %v475_v37 = vmul.f32 1.442695, %v474_v36  ;;  %v1056_v59 = vpop.xlane.xlu1 %1055 }
 0x448   :  { %v585_v38 = vpop.xlane.xlu0 %584  ;;  %v1057_v60 = vsub.f32 %v1962_v12, %v1056_v59 }
 0x449   :  { %1690 = vpow2.f32 %v475_v37  ;;  %v586_v33 = vsub.f32 %v582_v10, %v585_v38 }
 0x44a   :  { %v1058_v62 = vmul.f32 1.442695, %v1057_v60 }
 0x44b   :  { %v587_v39 = vmul.f32 1.442695, %v586_v33 }
 0x44c   :  { %v720_v41 = vpop.xlane.xlu0 %719 }
 0x44d   :  { %v721_v42 = vsub.f32 %v717_v17, %v720_v41  ;;  %1692 = vpow2.f32 %v587_v39 }
 0x44f   :  { %v722_v44 = vmul.f32 1.442695, %v721_v42 }
 0x450   :  { %v944_v56 = vpop.xlane.xlu0 %943 }
 0x451   :  { %1694 = vpow2.f32 %v722_v44  ;;  %v945_v57 = vsub.f32 %v941_v19, %v944_v56 }
 0x452   :  { %1696 = vpow2.f32 %v834_v46 }
 0x453   :  { %v1691_v45 = vpop.eup %1690  ;;  %v946_v58 = vmul.f32 1.442695, %v945_v57 }
 0x454   :  { %v477_v47 = vsel %vm190_vm6, %v1691_v45, 0.0  ;;  %v484_v3 = vpop.permute.xlu0 %483 }
 0x455   :  { %478 = vadd.xlane.f32.xlu0 %v477_v47  ;;  %1698 = vpow2.f32 %v946_v58  ;;  %v489_v12 = vsel %vm263_vm11, %v484_v3, 0 }
 0x456   :  { %1700 = vpow2.f32 %v1058_v62 }
 0x457   :  { %v1988_v48 = vpop.eup %1692 }
 0x458   :  { %v589_v49 = vsel %vm190_vm6, %v1988_v48, 0.0 }
 0x45b   :  { %v1992_v50 = vpop.eup %1694 }
 0x45c   :  { %v724_v53 = vsel %vm190_vm6, %v1992_v50, 0.0  ;;  %v1996_v54 = vpop.eup %1696 }
 0x45d   :  { %590 = vadd.xlane.f32.xlu1 %v589_v49  ;;  %v836_v55 = vsel %vm190_vm6, %v1996_v54, 0.0 }
 0x45f   :  { %v2004_v61 = vpop.eup %1698 }
 0x460   :  { %v948_v63 = vsel %vm190_vm6, %v2004_v61, 0.0  ;;  %v2008_v2 = vpop.eup %1700 }
 0x461   :  { %725 = vadd.xlane.f32.xlu1 %v724_v53 }
 0x465   :  { %837 = vadd.xlane.f32.xlu1 %v836_v55 }
 0x46b   :  { %595 = vrot.lane.b32.xlu0 %v1872_v51, %s1739_s24  ;;  %v1060_v51 = vsel %vm190_vm6, %v2008_v2, 0.0 }
 0x476   :  { %842 = vrot.lane.b32.xlu1 %v1881_v52, %s1735_s19 }
 0x48a   :  { %949 = vadd.xlane.f32.xlu0 %v948_v63 }
 0x49a   :  { %1061 = vadd.xlane.f32.xlu1 %v1060_v51 }
 0x4a0   :  { %954 = vrot.lane.b32.xlu0 %v1881_v52, %s1738_s1 }
 0x4ab   :  { %1066 = vrot.lane.b32.xlu1 %v1881_v52, %s1739_s24 }
 0x4ad   :  { %v254_v4 = vpop.xlane.xlu0 %253 }
 0x4ae   :  { %1702 = vrcp.f32 %v254_v4 }
 0x4b5   :  { %v367_v5 = vpop.xlane.xlu1 %366 }
 0x4b6   :  { %1704 = vrcp.f32 %v367_v5 }
 0x4b8   :  { %v1703_v6 = vpop.eup %1702 }
 0x4b9   :  { %v256_v7 = vmul.f32 %v1703_v6, %v1687_v31  ;;  %v731_v15 = vpop.permute.xlu1 %730 }
 0x4ba   :  { %v736_v29 = vsel %vm263_vm11, %v731_v15, 0 }
 0x4bb   :  { %v257_v8 = vpack.c.bf16 %v256_v7, %v256_v7 }
 0x4bd   :  { %1521 = vmatmul.mubr.msk.bf16.vlgmr.msra.gmra.mrb[4].mxu0 %vm190_vm6, %v257_v8 }
 0x4be   :  { %1531 = vmatpush3.bf16.msra.mxu0 %v377_v9  ;;  %1532 = vmatprep.mubr.msk.bf16.mxu0 %vm1727_vm1, %v1726_v14 }
 0x4bf   :  { %1542 = vmatprep.subr.bf16.mxu0 %v1726_v14 }
 0x4c0   :  { %v1705_v10 = vpop.eup %1704 }
 0x4c1   :  { %v369_v52 = vmul.f32 %v1705_v10, %v1980_v26 }
 0x4c3   :  { %v370_v11 = vpack.c.bf16 %v369_v52, %v369_v52 }
 0x4c5   :  { %1533 = vmatmul.mubr.msk.bf16.vlgmr.msra.gmra.mrb[8].mxu0 %vm190_vm6, %v370_v11  ;;  %v1670_v11 = vld [vmem:[%s2143_s6] sm:$0xff]  }
 0x4c6   :  { %1543 = vmatpush3.bf16.msra.mxu0 %v489_v12  ;;  %1544 = vmatprep.mubr.msk.bf16.mxu0 %vm1727_vm1, %v1726_v14 }
 0x4c7   :  { %1554 = vmatprep.subr.bf16.mxu0 %v1726_v14  ;;  %1609 = vmatpush3.bf16.msra.mxu1 %v1670_v11 }
 0x4c8   :  { %1610 = vmatprep.subr.bf16.mxu1 %v1726_v14 }
 0x4e2   :  { %v479_v13 = vpop.xlane.xlu0 %478 }
 0x4e3   :  { %1706 = vrcp.f32 %v479_v13 }
 0x4e6   :  { %v596_v20 = vpop.permute.xlu0 %595 }
 0x4e7   :  { %v601_v22 = vsel %vm263_vm11, %v596_v20, 0 }
 0x4ea   :  { %v591_v16 = vpop.xlane.xlu1 %590 }
 0x4eb   :  { %1708 = vrcp.f32 %v591_v16 }
 0x4ed   :  { %v1707_v17 = vpop.eup %1706 }
 0x4ee   :  { %v481_v18 = vmul.f32 %v1707_v17, %v1691_v45  ;;  %v726_v19 = vpop.xlane.xlu1 %725 }
 0x4ef   :  { %1710 = vrcp.f32 %v726_v19 }
 0x4f0   :  { %v482_v21 = vpack.c.bf16 %v481_v18, %v481_v18  ;;  %v1671_v18 = vld [vmem:[%s2143_s6 + $0x8] sm:$0xff]  }
 0x4f1   :  { %1611 = vmatpush3.bf16.msra.mxu1 %v1671_v18  ;;  %v1446_v18 = vld [vmem:[%s2147_s8] ss:$0 sm:$0xff] }
 0x4f2   :  { %1545 = vmatmul.mubr.msk.bf16.vlgmr.msra.gmra.mrb[12].mxu0 %vm190_vm6, %v482_v21  ;;  %v838_v23 = vpop.xlane.xlu1 %837  ;;  %1624 = vmatprep.subr.bf16.mxu1 %v1726_v14 }
 0x4f3   :  { %1555 = vmatpush3.bf16.msra.mxu0 %v601_v22  ;;  %1556 = vmatprep.mubr.msk.bf16.mxu0 %vm1727_vm1, %v1726_v14  ;;  %1712 = vrcp.f32 %v838_v23 }
 0x4f4   :  { %1566 = vmatprep.subr.bf16.mxu0 %v1726_v14 }
 0x4f5   :  { %v1709_v24 = vpop.eup %1708 }
 0x4f6   :  { %v593_v25 = vmul.f32 %v1709_v24, %v1988_v48  ;;  %v843_v31 = vpop.permute.xlu1 %842 }
 0x4f7   :  { %v848_v34 = vsel %vm263_vm11, %v843_v31, 0 }
 0x4f8   :  { %v594_v27 = vpack.c.bf16 %v593_v25, %v593_v25 }
 0x4f9   :  { %v1711_v28 = vpop.eup %1710 }
 0x4fa   :  { %1557 = vmatmul.mubr.msk.bf16.vlgmr.msra.gmra.mrb[16].mxu0 %vm190_vm6, %v594_v27  ;;  %v728_v30 = vmul.f32 %v1711_v28, %v1992_v50 }
 0x4fb   :  { %1567 = vmatpush3.bf16.msra.mxu0 %v736_v29  ;;  %1568 = vmatprep.mubr.msk.bf16.mxu0 %vm1727_vm1, %v1726_v14 }
 0x4fc   :  { %1578 = vmatprep.subr.bf16.mxu0 %v1726_v14  ;;  %v729_v32 = vpack.c.bf16 %v728_v30, %v728_v30 }
 0x4fd   :  { %v1713_v26 = vpop.eup %1712 }
 0x4fe   :  { %v840_v35 = vmul.f32 %v1713_v26, %v1996_v54 }
 0x500   :  { %v841_v36 = vpack.c.bf16 %v840_v35, %v840_v35 }
 0x502   :  { %1569 = vmatmul.mubr.msk.bf16.vlgmr.msra.gmra.mrb[20].mxu0 %vm190_vm6, %v729_v32 }
 0x503   :  { %1579 = vmatpush3.bf16.msra.mxu0 %v848_v34  ;;  %1580 = vmatprep.mubr.msk.bf16.mxu0 %vm1727_vm1, %v1726_v14 }
 0x504   :  { %1590 = vmatprep.subr.bf16.mxu0 %v1726_v14 }
 0x50a   :  { %1581 = vmatmul.mubr.msk.bf16.vlgmr.msra.gmra.mrb[24].mxu0 %vm190_vm6, %v841_v36 }
 0x50b   :  { %1592 = vmatprep.mubr.msk.bf16.mxu0 %vm1727_vm1, %v1726_v14 }
 0x517   :  { %v950_v37 = vpop.xlane.xlu0 %949 }
 0x518   :  { %1714 = vrcp.f32 %v950_v37 }
 0x51b   :  { %v955_v38 = vpop.permute.xlu0 %954 }
 0x51c   :  { %v960_v33 = vsel %vm263_vm11, %v955_v38, 0 }
 0x51d   :  { %1591 = vmatpush3.bf16.msra.mxu0 %v960_v33 }
 0x51e   :  { %1602 = vmatprep.subr.bf16.mxu0 %v1726_v14 }
 0x522   :  { %v1715_v39 = vpop.eup %1714 }
 0x523   :  { %v952_v40 = vmul.f32 %v1715_v39, %v2004_v61 }
 0x525   :  { %v953_v41 = vpack.c.bf16 %v952_v40, %v952_v40  ;;  %v1442_v40 = vld [vmem:[%s2144_s7] ss:$0 sm:$0xff] }
 0x527   :  { %1593 = vmatmul.mubr.msk.bf16.vlgmr.msra.gmra.mrb[28].mxu0 %vm190_vm6, %v953_v41  ;;  %v1062_v42 = vpop.xlane.xlu1 %1061 }
 0x528   :  { %1716 = vrcp.f32 %v1062_v42  ;;  %1604 = vmatprep.mubr.msk.bf16.mxu0 %vm1727_vm1, %v1726_v14 }
 0x52b   :  { %v1067_v43 = vpop.permute.xlu1 %1066 }
 0x52c   :  { %v1072_v44 = vsel %vm263_vm11, %v1067_v43, 0 }
 0x52d   :  { %1603 = vmatpush3.bf16.msra.mxu0 %v1072_v44 }
 0x52e   :  { %1616 = vmatprep.subr.bf16.mxu0 %v1726_v14 }
 0x532   :  { %v1717_v45 = vpop.eup %1716 }
 0x533   :  { %v1064_v46 = vmul.f32 %v1717_v45, %v2008_v2 }
 0x535   :  { %v1065_v47 = vpack.c.bf16 %v1064_v46, %v1064_v46 }
 0x537   :  { %1605 = vmatmul.mubr.msk.bf16.vlgmr.msra.gmra.mrb[32].mxu0 %vm190_vm6, %v1065_v47 }
 0x538   :  { %1620 = vmatprep.mubr.msk.bf16.mxu0 %vm1727_vm1, %v1726_v14 }
 0x590   :  { %v301_v48 = vpop.f32.mrb[4].mxu0 }
 0x591   :  { %v1522_v49 = vpop.f32.mrb[5].mxu0 }
 0x592   :  { %v304_v50 = vpop.f32.mrb[6].mxu0 }
 0x593   :  { %v1523_v53 = vpop.f32.mrb[7].mxu0 }
 0x598   :  { %v413_v54 = vpop.f32.mrb[8].mxu0 }
 0x599   :  { %v1534_v55 = vpop.f32.mrb[9].mxu0 }
 0x59a   :  { %v416_v56 = vpop.f32.mrb[10].mxu0 }
 0x59b   :  { %v1535_v57 = vpop.f32.mrb[11].mxu0 }
 0x5c5   :  { %v525_v58 = vpop.f32.mrb[12].mxu0 }
 0x5c6   :  { %v1546_v59 = vpop.f32.mrb[13].mxu0 }
 0x5c7   :  { %v528_v60 = vpop.f32.mrb[14].mxu0 }
 0x5c8   :  { %v1547_v61 = vpop.f32.mrb[15].mxu0 }
 0x5c9   :  { %v1672_v61 = vld [vmem:[%s2145_s10] sm:$0xff]  }
 0x5ca   :  { %1617 = vmatpush3.bf16.msra.mxu0 %v1672_v61 }
 0x5cb   :  { %1618 = vmatprep.subr.bf16.mxu0 %v1726_v14 }
 0x5cd   :  { %v637_v62 = vpop.f32.mrb[16].mxu0 }
 0x5ce   :  { %v1558_v63 = vpop.f32.mrb[17].mxu0 }
 0x5cf   :  { %v640_v2 = vpop.f32.mrb[18].mxu0  ;;  %v1674_v63 = vld [vmem:[%s2146_s12] sm:$0xff]  }
 0x5d0   :  { %v1559_v51 = vpop.f32.mrb[19].mxu0  ;;  %v1675_v2 = vld [vmem:[%s2146_s12 + $0x8] sm:$0xff]  }
 0x5d5   :  { %v772_v3 = vpop.f32.mrb[20].mxu0 }
 0x5d6   :  { %v1570_v4 = vpop.f32.mrb[21].mxu0 }
 0x5d7   :  { %v775_v5 = vpop.f32.mrb[22].mxu0 }
 0x5d8   :  { %v1571_v6 = vpop.f32.mrb[23].mxu0 }
 0x5dd   :  { %v884_v7 = vpop.f32.mrb[24].mxu0 }
 0x5de   :  { %v1653_v8 = vpack.i.bf16 %v884_v7, %v413_v54  ;;  %v1582_v9 = vpop.f32.mrb[25].mxu0 }
 0x5df   :  { %v887_v10 = vpop.f32.mrb[26].mxu0 }
 0x5e0   :  { %1654 = vrot.lane.b32.xlu0 %v1653_v8, %s1740_s25  ;;  %v1583_v52 = vpop.f32.mrb[27].mxu0 }
 0x5fa   :  { %v996_v12 = vpop.f32.mrb[28].mxu0 }
 0x5fb   :  { %v1658_v13 = vpack.i.bf16 %v996_v12, %v525_v58  ;;  %v1594_v15 = vpop.f32.mrb[29].mxu0 }
 0x5fc   :  { %v999_v16 = vpop.f32.mrb[30].mxu0 }
 0x5fd   :  { %1659 = vrot.lane.b32.xlu1 %v1658_v13, %s1741_s27  ;;  %v1595_v17 = vpop.f32.mrb[31].mxu0 }
 0x60a   :  { %v1108_v19 = vpop.f32.mrb[32].mxu0 }
 0x60b   :  { %v1663_v20 = vpack.i.bf16 %v1108_v19, %v637_v62  ;;  %v1606_v21 = vpop.f32.mrb[33].mxu0  ;;  %v1673_v62 = vld [vmem:[%s2145_s10 + $0x8] sm:$0xff]  }
 0x60c   :  { %v1111_v22 = vpop.f32.mrb[34].mxu0  ;;  %1619 = vmatpush3.bf16.msra.mxu0 %v1673_v62 }
 0x60d   :  { %1664 = vrot.lane.b32.xlu0 %v1663_v20, %s1742_s2  ;;  %v1607_v23 = vpop.f32.mrb[35].mxu0 }
 0x652   :  { %v1655_v24 = vpop.permute.xlu0 %1654 }
 0x653   :  { %v1657_v27 = vunpack.i.h.bf16 %v1655_v24  ;;  %v1656_v28 = vunpack.i.l.bf16 %v1655_v24  ;;  %v1447_v24 = vld [vmem:[%s2148_s9] ss:$0 sm:$0xff] }
 0x655   :  { %v1126_v32 = vsel %vm190_vm6, %v772_v3, %v1657_v27  ;;  %v655_v26 = vsel %vm190_vm6, %v301_v48, %v1656_v28 }
 0x66f   :  { %v1660_v25 = vpop.permute.xlu1 %1659 }
 0x670   :  { %v1662_v29 = vunpack.i.h.bf16 %v1660_v25  ;;  %v1661_v30 = vunpack.i.l.bf16 %v1660_v25 }
 0x672   :  { %v1127_v36 = vsel %vm656_vm12, %v1126_v32, %v1662_v29  ;;  %v657_v37 = vsel %vm656_vm12, %v655_v26, %v1661_v30  ;;  %v1676_v30 = vld [vmem:[%s2146_s12 + $0x10] sm:$0xff]   ;;  %v1448_v32 = vld [vmem:[%s2149_s11] ss:$0 sm:$0xff] }
 0x67f   :  { %v1665_v31 = vpop.permute.xlu0 %1664 }
 0x680   :  { %v1667_v34 = vunpack.i.h.bf16 %v1665_v31  ;;  %v1666_v35 = vunpack.i.l.bf16 %v1665_v31  ;;  %v1677_v31 = vld [vmem:[%s2146_s12 + $0x18] sm:$0xff]  }
 0x682   :  { %v1128_v38 = vsel %vm658_vm13, %v1127_v36, %v1667_v34  ;;  %v659_v33 = vsel %vm658_vm13, %v657_v37, %v1666_v35 }
 0x683   :  { %v1129_v39 = vpack.c.bf16 %v1128_v38, %v659_v33 }
 0x685   :  { %1613 = vmatmul.mubr.msk.bf16.vlgmr.msra.gmra.mrb[32].mxu1 %vm60_vm0, %v1129_v39 }
 0x686   :  { %1632 = vmatprep.mubr.msk.bf16.mxu1 %vm1727_vm1, %v1726_v14  ;;  %1625 = vmatpush3.bf16.msra.mxu1 %v1674_v63 }
 0x687   :  { %1626 = vmatprep.subr.bf16.mxu1 %v1726_v14 }
 0x68a   :  { %1627 = vmatpush3.bf16.msra.mxu1 %v1675_v2 }
 0x68b   :  { %1628 = vmatprep.subr.bf16.mxu1 %v1726_v14 }
 0x68e   :  { %1629 = vmatpush3.bf16.msra.mxu1 %v1676_v30 }
 0x68f   :  { %1630 = vmatprep.subr.bf16.mxu1 %v1726_v14  ;;  %v1452_v14 = vld [vmem:[%s2150_s13] ss:$0 sm:$0xff] }
 0x692   :  { %1631 = vmatpush3.bf16.msra.mxu1 %v1677_v31 }
 0x758   :  { %v1190_v41 = vpop.f32.mrb[32].mxu1 }
 0x759   :  { %v1191_v42 = vadd.f32 %v1442_v40, %v1190_v41  ;;  %v1614_v43 = vpop.f32.mrb[33].mxu1 }
 0x75a   :  { %v1193_v44 = vpop.f32.mrb[34].mxu1 }
 0x75b   :  { %v2077_v45 = vadd.f32 %v1191_v42, %v1831_v0  ;;  %v1194_v46 = vadd.f32 %v1442_v40, %v1193_v44  ;;  %v1615_v47 = vpop.f32.mrb[35].mxu1 }
 0x75d   :  { %v2080_v48 = vadd.f32 %v1194_v46, %v1836_v1  ;;  %v1201_v49 = vsel %vm60_vm0, %v2077_v45, 0.0 }
 0x75e   :  { %1202 = vadd.xlane.f32.xlu1 %v1201_v49 }
 0x75f   :  { %v1204_v50 = vsel %vm60_vm0, %v2080_v48, 0.0 }
 0x760   :  { %1205 = vadd.xlane.f32.xlu0 %v1204_v50 }
 0x7eb   :  { %v1203_v53 = vpop.xlane.xlu1 %1202 }
 0x7ec   :  { %v1207_v54 = vmul.f32 0.03125, %v1203_v53 }
 0x7ed   :  { %v1206_v55 = vpop.xlane.xlu0 %1205 }
 0x7ee   :  { %v1209_v56 = vsub.f32 %v2077_v45, %v1207_v54  ;;  %v1208_v0 = vmul.f32 0.03125, %v1206_v55 }
 0x7f0   :  { %v1210_v57 = vsub.f32 %v2080_v48, %v1208_v0  ;;  %v1211_v58 = vmul.f32 %v1209_v56, %v1209_v56  ;;  %v1227_v20 = vmul.f32 %v1446_v18, %v1209_v56 }
 0x7f2   :  { %v1213_v1 = vsel %vm60_vm0, %v1211_v58, 0.0  ;;  %v1212_v59 = vmul.f32 %v1210_v57, %v1210_v57  ;;  %v1228_v21 = vmul.f32 %v1446_v18, %v1210_v57 }
 0x7f3   :  { %1214 = vadd.xlane.f32.xlu0 %v1213_v1 }
 0x7f4   :  { %v1216_v60 = vsel %vm60_vm0, %v1212_v59, 0.0 }
 0x7f7   :  { %1217 = vadd.xlane.f32.xlu0 %v1216_v60 }
 0x880   :  { %v1215_v51 = vpop.xlane.xlu0 %1214 }
 0x881   :  { %v1219_v3 = vmul.f32 0.032258064, %v1215_v51 }
 0x883   :  { %1718 = vrsqrt.f32 %v1219_v3  ;;  %vm1231_vm14 = vcmp.eq.f32.partialorder %v1219_v3, inf  ;;  %v1234_v8 = vand.u32 2147483648, %v1219_v3  ;;  %vm1233_vm15 = vcmp.eq.f32.partialorder %v1219_v3, 0.0 }
 0x884   :  { %v1218_v4 = vpop.xlane.xlu0 %1217 }
 0x885   :  { %v1220_v5 = vmul.f32 0.032258064, %v1218_v4 }
 0x887   :  { %1720 = vrsqrt.f32 %v1220_v5  ;;  %vm1238_vm1 = vcmp.eq.f32.partialorder %v1220_v5, inf  ;;  %v1241_v13 = vand.u32 2147483648, %v1220_v5  ;;  %vm1240_vm2 = vcmp.eq.f32.partialorder %v1220_v5, 0.0 }
 0x88d   :  { %v1719_v6 = vpop.eup %1718 }
 0x88e   :  { %v1230_v7 = vmul.f32 %v1719_v6, %v1219_v3 }
 0x890   :  { %v1232_v9 = vsel %vm1231_vm14, %v1219_v3, %v1230_v7 }
 0x891   :  { %v1721_v10 = vpop.eup %1720  ;;  %v1235_v52 = vsel %vm1233_vm15, %v1234_v8, %v1232_v9 }
 0x892   :  { %v1243_v11 = vadd.f32 1e-06, %v1235_v52  ;;  %v1237_v12 = vmul.f32 %v1721_v10, %v1220_v5 }
 0x894   :  { %1722 = vrcp.f32 %v1243_v11  ;;  %v1239_v15 = vsel %vm1238_vm1, %v1220_v5, %v1237_v12 }
 0x895   :  { %v1242_v16 = vsel %vm1240_vm2, %v1241_v13, %v1239_v15 }
 0x896   :  { %v1244_v17 = vadd.f32 1e-06, %v1242_v16 }
 0x898   :  { %1724 = vrcp.f32 %v1244_v17 }
 0x89e   :  { %v1723_v19 = vpop.eup %1722 }
 0x89f   :  { %v1246_v22 = vmul.f32 %v1723_v19, %v1227_v20 }
 0x8a1   :  { %v1255_v27 = vadd.f32 %v1447_v24, %v1246_v22 }
 0x8a2   :  { %v1725_v23 = vpop.eup %1724 }
 0x8a3   :  { %v1248_v25 = vmul.f32 %v1725_v23, %v1228_v21 }
 0x8a5   :  { %v1256_v28 = vadd.f32 %v1447_v24, %v1248_v25 }
 0x8a7   :  { %v1257_v29 = vpack.c.bf16 %v1256_v28, %v1255_v27 }
 0x8a9   :  { %1621 = vmatmul.mubr.msk.bf16.vlgmr.msra.gmra.mrb[36].mxu0 %vm60_vm0, %v1257_v29 }
 0x97c   :  { %v1318_v26 = vpop.f32.mrb[36].mxu0 }
 0x97d   :  { %v1319_v34 = vadd.f32 %v1448_v32, %v1318_v26  ;;  %v1622_v35 = vpop.f32.mrb[37].mxu0 }
 0x97e   :  { %v1321_v36 = vpop.f32.mrb[38].mxu0 }
 0x97f   :  { %v1322_v37 = vadd.f32 %v1448_v32, %v1321_v36  ;;  %v1623_v38 = vpop.f32.mrb[39].mxu0  ;;  %v1325_v33 = vmax.f32 %v1319_v34, 0.0 }
 0x981   :  { %v1326_v39 = vmax.f32 %v1322_v37, 0.0 }
 0x983   :  { %v1327_v40 = vpack.c.bf16 %v1326_v39, %v1325_v33 }
 0x985   :  { %1633 = vmatmul.mubr.msk.bf16.vlgmr.msra.gmra.mrb[36].mxu1 %vm1367_vm3, %v1327_v40 }
 0xa58   :  { %v1405_v41 = vpop.f32.mrb[36].mxu1 }
 0xa59   :  { %v1406_v42 = vadd.f32 %v1452_v14, %v1405_v41  ;;  %v1634_v43 = vpop.f32.mrb[37].mxu1 }
 0xa5a   :  { %v1408_v44 = vpop.f32.mrb[38].mxu1 }
 0xa5b   :  { %v1412_v46 = vadd.f32 %v1406_v42, %v2077_v45  ;;  %v1409_v47 = vadd.f32 %v1452_v14, %v1408_v44  ;;  %v1635_v49 = vpop.f32.mrb[39].mxu1 }
 0xa5d   :  { %1414 = vst.msk [vmem:[%s2151_s16] sm:$0xff] %vm60_vm0, %v1412_v46  ;;  %v1413_v50 = vadd.f32 %v1409_v47, %v2080_v48 }
 0xa5f   :  { %1415 = vst.msk [vmem:[%s2151_s16 + $0x8] sm:$0xff] %vm60_vm0, %v1413_v50 }

// kernel: transformer_forward.8
= control target key start
LH: loop header
LB: loop body
LE: loop exit
PB: predicated region body
PF: predicated region fallthrough
CT: control target
= control target key end

     0   :  { %s3990_s0 = inlined_call_operand.vmem [shape: f32[16,32], index: 0, kind: input, shape index: {}]   ;;  %s3991_s1 = inlined_call_operand.vmem [shape: f32[16,32], index: 1, kind: input, shape index: {}]   ;;  %s3992_s2 = inlined_call_operand.vmem [shape: s32[2,1,8], index: 2, kind: input, shape index: {}]   ;;  %s3993_s3 = inlined_call_operand.vmem [shape: s32[2,8,8], index: 3, kind: input, shape index: {}]   ;;  %s3994_s4 = inlined_call_operand.vmem [shape: f32[1,32], index: 4, kind: input, shape index: {}]   ;;  %s3995_s5 = inlined_call_operand.vmem [shape: f32[1,32], index: 5, kind: input, shape index: {}]   ;;  %s3996_s6 = inlined_call_operand.vmem [shape: bf16[32,96], index: 6, kind: input, shape index: {}]   ;;  %s3997_s7 = inlined_call_operand.vmem [shape: f32[1,96], index: 7, kind: input, shape index: {}]   ;;  %s3998_s8 = inlined_call_operand.vmem [shape: bf16[32,32], index: 8, kind: input, shape index: {}]   ;;  %s3999_s9 = inlined_call_operand.vmem [shape: f32[1,32], index: 9, kind: input, shape index: {}]   ;;  %s4000_s10 = inlined_call_operand.vmem [shape: f32[1,32], index: 10, kind: input, shape index: {}]   ;;  %s4001_s11 = inlined_call_operand.vmem [shape: f32[1,32], index: 11, kind: input, shape index: {}]   ;;  %s4002_s12 = inlined_call_operand.vmem [shape: bf16[32,32], index: 12, kind: input, shape index: {}]   ;;  %s4003_s13 = inlined_call_operand.vmem [shape: f32[1,32], index: 13, kind: input, shape index: {}]   ;;  %s4004_s14 = inlined_call_operand.vmem [shape: bf16[32,64], index: 14, kind: input, shape index: {}]   ;;  %s4005_s15 = inlined_call_operand.vmem [shape: f32[1,64], index: 15, kind: input, shape index: {}]   ;;  %s4006_s16 = inlined_call_operand.vmem [shape: bf16[32,32], index: 16, kind: input, shape index: {}]   ;;  %s4007_s17 = inlined_call_operand.vmem [shape: f32[1,32], index: 17, kind: input, shape index: {}]   ;;  %s4008_s18 = inlined_call_operand.vmem [shape: f32[1,32], index: 18, kind: input, shape index: {}]   ;;  %s4009_s19 = inlined_call_operand.vmem [shape: f32[1,32], index: 19, kind: input, shape index: {}]   ;;  %s4010_s20 = inlined_call_operand.vmem [shape: bf16[32,64], index: 20, kind: input, shape index: {}]   ;;  %s4011_s21 = inlined_call_operand.vmem [shape: f32[1,64], index: 21, kind: input, shape index: {}]   ;;  %s4012_s22 = inlined_call_operand.vmem [shape: bf16[64,32], index: 22, kind: input, shape index: {}]   ;;  %s4013_s23 = inlined_call_operand.hbm [shape: f32[1,32], index: 23, kind: input, shape index: {}]   ;;  %s4014_s24 = inlined_call_operand.vmem [shape: f32[16,32], index: 24, kind: output, shape index: {}]  }
   0x1   :  { %4026 = sst [smem:[#allocation5_spill]] %s3990_s0 }
   0x2   :  { %4027 = sst [smem:[#allocation6_spill]] %s3991_s1 }
   0x3   :  { %4028 = sst [smem:[#allocation7_spill]] %s3992_s2 }
   0x4   :  { %4029 = sst [smem:[#allocation8_spill]] %s3993_s3 }
   0x5   :  { %4030 = sst [smem:[#allocation9_spill]] %s3994_s4 }
   0x6   :  { %4031 = sst [smem:[#allocation10_spill]] %s3995_s5 }
   0x7   :  { %4032 = sst [smem:[#allocation11_spill]] %s3996_s6 }
   0x8   :  { %4033 = sst [smem:[#allocation12_spill]] %s3997_s7 }
   0x9   :  { %4034 = sst [smem:[#allocation13_spill]] %s3998_s8 }
   0xa   :  { %29 = vsyncpa [#allocation3], 0  ;;  %s3234_s5 = smov [#allocation2]   ;;  %s3210_s6 = scalar_lea.hbm %s4013_s23, 16 }
   0xb   :  { %s82_s26 = sshll.u32 %s3234_s5, 4  ;;  %p3211_p0 = scmp.ne.s32.totalorder %s4013_s23, %s3210_s6  ;;  %s83_s26 = int_to_ptr.vmem [resolvable:$true] %s82_s26 }
   0xc   :  { %p3214_p1 = scmp.lt.u32.totalorder %s3210_s6, %s4013_s23 }
   0xe   :  { %p3216_p2 = pnand %p3214_p1, %p3211_p0 }
  0x10   :  { %3219 = shalt.err (!%p3216_p2)
}
  0x11   :  { %s3220_s30 = scalar_lea.vmem %s83_s26, 16  ;;  %s3224_s3 = scalar_lea.vmem %s83_s26, 32 }
  0x12   :  { %p3221_p3 = scmp.ne.s32.totalorder %s83_s26, %s3220_s30  ;;  %p3225_p4 = scmp.lt.s32.totalorder %s83_s26, %s83_s26 }
  0x13   :  { %p3226_p5 = scmp.lt.s32.totalorder %s3224_s3, %s3220_s30 }
  0x15   :  { %p3227_p6 = por %p3226_p5, %p3225_p4 }
  0x17   :  { %p3228_p7 = pnand %p3227_p6, %p3221_p3 }
  0x19   :  { %3231 = shalt.err (!%p3228_p7)
}
  0x1a   :  { %85 = dma.hbm_to_vmem [thread:$0]  %s4013_s23, 16, %s83_s26, [#allocation3]  }
  0x1b   :  { %3232 = dma.done.wait [#allocation3], 16  }
  0x1c   :  { %3233 = vsyncadd [#allocation3], 4294967280  ;;  %vm96_vm0 = vcmask 261120   ;;  %s4035_s5 = sld [smem:[#allocation5_spill]]  ;;  %s4036_s6 = sld [smem:[#allocation11_spill]]  ;;  %v3235_v15 = vmov 0.0  }
  0x1d   :  { %2806 = vmatprep.subr.bf16.mxu1 %v3235_v15  ;;  %vm3236_vm1 = vmmov 0   ;;  %2820 = vmatprep.subr.bf16.mxu0 %v3235_v15  ;;  %s4037_s30 = sld [smem:[#allocation9_spill]]  ;;  %s4038_s8 = sld [smem:[#allocation10_spill]]  ;;  %vm228_vm6 = vcmask 64512   ;;  %vm295_vm9 = vcmask 1043456   ;;  %vm688_vm10 = vcmask 130048  }
  0x1e   :  { %2810 = vmatprep.mubr.msk.bf16.mxu1 %vm3236_vm1, %v3235_v15  ;;  %2822 = vmatprep.mubr.msk.bf16.mxu0 %vm3236_vm1, %v3235_v15  ;;  %s3237_s27 = smov 88   ;;  %s3238_s28 = smov 96   ;;  %vm690_vm11 = vcmask 195584  }
  0x1f   :  { %s3239_s23 = smov 120   ;;  %s3240_s26 = smov 112  }
  0x20   :  { %s3242_s2 = smov 104   ;;  %s4024_s29 = smov 72  }
  0x21   :  { %s3244_s0 = smov 56   ;;  %s4040_s3 = sld [smem:[#allocation8_spill]] }
  0x22   :  { %v3392_v0 = vld [vmem:[%s4035_s5] sm:$0xff]  ;;  %v3397_v1 = vld [vmem:[%s4035_s5 + $0x8] sm:$0xff]  ;;  %s4039_s5 = sld [smem:[#allocation12_spill]]  ;;  %s3245_s25 = smov 64  }
  0x23   :  { %v97_v2 = vsel %vm96_vm0, %v3392_v0, 0.0  ;;  %v100_v3 = vsel %vm96_vm0, %v3397_v1, 0.0  ;;  %v3106_v14 = vld [vmem:[%s4036_s6] sm:$0xff]   ;;  %v3107_v16 = vld [vmem:[%s4036_s6 + $0x8] sm:$0xff]   ;;  %s3241_s6 = smov 80   ;;  %s3246_s1 = smov 48  }
  0x24   :  { %98 = vadd.xlane.f32.xlu0 %v97_v2  ;;  %2807 = vmatpush3.bf16.msra.mxu1 %v3106_v14  ;;  %v2651_v33 = vld [vmem:[%s4037_s30] ss:$0 sm:$0xff]  ;;  %s4042_s7 = sld [smem:[#allocation6_spill]] }
  0x25   :  { %2808 = vmatprep.subr.bf16.mxu1 %v3235_v15  ;;  %v2652_v39 = vld [vmem:[%s4038_s8] ss:$0 sm:$0xff] }
  0x28   :  { %101 = vadd.xlane.f32.xlu0 %v100_v3  ;;  %2809 = vmatpush3.bf16.msra.mxu1 %v3107_v16  ;;  %v2653_v44 = vld [vmem:[%s4039_s5] ss:$0 sm:$0xff]  ;;  %s3247_s5 = smov 40  }
  0x29   :  { %2814 = vmatprep.subr.bf16.mxu1 %v3235_v15 }
  0xb1   :  { %v99_v4 = vpop.xlane.xlu0 %98 }
  0xb2   :  { %v104_v5 = vmul.f32 0.03125, %v99_v4 }
  0xb4   :  { %v106_v6 = vsub.f32 %v3392_v0, %v104_v5 }
  0xb5   :  { %v102_v7 = vpop.xlane.xlu0 %101 }
  0xb6   :  { %v105_v8 = vmul.f32 0.03125, %v102_v7  ;;  %v108_v9 = vmul.f32 %v106_v6, %v106_v6  ;;  %v124_v35 = vmul.f32 %v2651_v33, %v106_v6 }
  0xb8   :  { %v107_v10 = vsub.f32 %v3397_v1, %v105_v8  ;;  %v110_v11 = vsel %vm96_vm0, %v108_v9, 0.0 }
  0xb9   :  { %111 = vadd.xlane.f32.xlu1 %v110_v11 }
  0xba   :  { %v109_v12 = vmul.f32 %v107_v10, %v107_v10  ;;  %v125_v36 = vmul.f32 %v2651_v33, %v107_v10 }
  0xbc   :  { %v113_v13 = vsel %vm96_vm0, %v109_v12, 0.0 }
  0xbd   :  { %114 = vadd.xlane.f32.xlu1 %v113_v13  ;;  %v222_v13 = vld [vmem:[%s4040_s3] sm:$0xff] }
  0xbe   :  { %vm276_vm7 = vcmp.eq.s32.totalorder %v222_v13, 0 }
 0x146   :  { %v112_v17 = vpop.xlane.xlu1 %111 }
 0x147   :  { %v116_v18 = vmul.f32 0.032258064, %v112_v17 }
 0x149   :  { %3122 = vrsqrt.f32 %v116_v18  ;;  %vm128_vm2 = vcmp.eq.f32.partialorder %v116_v18, inf  ;;  %v131_v23 = vand.u32 2147483648, %v116_v18  ;;  %vm130_vm3 = vcmp.eq.f32.partialorder %v116_v18, 0.0 }
 0x14a   :  { %v115_v19 = vpop.xlane.xlu1 %114 }
 0x14b   :  { %v117_v20 = vmul.f32 0.032258064, %v115_v19 }
 0x14d   :  { %3124 = vrsqrt.f32 %v117_v20  ;;  %vm135_vm4 = vcmp.eq.f32.partialorder %v117_v20, inf  ;;  %v138_v29 = vand.u32 2147483648, %v117_v20  ;;  %vm137_vm5 = vcmp.eq.f32.partialorder %v117_v20, 0.0 }
 0x153   :  { %v3123_v21 = vpop.eup %3122 }
 0x154   :  { %v127_v22 = vmul.f32 %v3123_v21, %v116_v18 }
 0x156   :  { %v129_v24 = vsel %vm128_vm2, %v116_v18, %v127_v22 }
 0x157   :  { %v3125_v25 = vpop.eup %3124  ;;  %v132_v26 = vsel %vm130_vm3, %v131_v23, %v129_v24 }
 0x158   :  { %v140_v27 = vadd.f32 1e-06, %v132_v26  ;;  %v134_v28 = vmul.f32 %v3125_v25, %v117_v20 }
 0x15a   :  { %3126 = vrcp.f32 %v140_v27  ;;  %v136_v30 = vsel %vm135_vm4, %v117_v20, %v134_v28 }
 0x15b   :  { %v139_v31 = vsel %vm137_vm5, %v138_v29, %v136_v30 }
 0x15c   :  { %v141_v32 = vadd.f32 1e-06, %v139_v31 }
 0x15e   :  { %3128 = vrcp.f32 %v141_v32 }
 0x164   :  { %v3127_v34 = vpop.eup %3126 }
 0x165   :  { %v143_v37 = vmul.f32 %v3127_v34, %v124_v35 }
 0x167   :  { %v152_v41 = vadd.f32 %v2652_v39, %v143_v37 }
 0x168   :  { %v3129_v38 = vpop.eup %3128 }
 0x169   :  { %v145_v40 = vmul.f32 %v3129_v38, %v125_v36 }
 0x16b   :  { %v153_v42 = vadd.f32 %v2652_v39, %v145_v40 }
 0x16d   :  { %v154_v43 = vpack.c.bf16 %v153_v42, %v152_v41  ;;  %v223_v41 = vld [vmem:[%s4040_s3 + $0x8] sm:$0xff]  ;;  %s4041_s3 = sld [smem:[#allocation13_spill]] }
 0x16e   :  { %vm742_vm8 = vcmp.eq.s32.totalorder %v223_v41, 0 }
 0x16f   :  { %2811 = vmatmul.mubr.msk.bf16.vlgmr.msra.gmra.mrb[0].mxu1 %vm96_vm0, %v154_v43 }
 0x170   :  { %2816 = vmatprep.mubr.msk.bf16.mxu1 %vm3236_vm1, %v3235_v15 }
 0x242   :  { %v215_v45 = vpop.f32.mrb[0].mxu1 }
 0x243   :  { %v2812_v46 = vpop.f32.mrb[1].mxu1  ;;  %v216_v48 = vadd.f32 %v2653_v44, %v215_v45 }
 0x244   :  { %v218_v47 = vpop.f32.mrb[2].mxu1 }
 0x245   :  { %v219_v49 = vadd.f32 %v2653_v44, %v218_v47  ;;  %v2813_v50 = vpop.f32.mrb[3].mxu1 }
 0x247   :  { %v3433_v51 = vpack.c.bf16 %v219_v49, %v216_v48 }
 0x249   :  { %341 = vrot.lane.b32.xlu1 %v3433_v51, %s3237_s27  ;;  %226 = vrot.lane.b32.xlu0 %v3433_v51, %s3238_s28  ;;  %v3448_v52 = vrot.slane %v3433_v51, 4 }
 0x24d   :  { %339 = vrot.lane.b32.xlu1 %v3433_v51, %s3239_s23  ;;  %451 = vrot.lane.b32.xlu0 %v3433_v51, %s3240_s26 }
 0x251   :  { %453 = vrot.lane.b32.xlu1 %v3433_v51, %s3241_s6  ;;  %563 = vrot.lane.b32.xlu0 %v3433_v51, %s3242_s2 }
 0x255   :  { %565 = vrot.lane.b32.xlu1 %v3433_v51, %s4024_s29  ;;  %806 = vrot.lane.b32.xlu0 %v3448_v52, %s3237_s27 }
 0x259   :  { %918 = vrot.lane.b32.xlu0 %v3448_v52, %s3241_s6  ;;  %693 = vrot.lane.b32.xlu1 %v3448_v52, %s3238_s28 }
 0x25d   :  { %1030 = vrot.lane.b32.xlu0 %v3448_v52, %s4024_s29  ;;  %804 = vrot.lane.b32.xlu1 %v3448_v52, %s3239_s23 }
 0x261   :  { %916 = vrot.lane.b32.xlu1 %v3448_v52, %s3240_s26 }
 0x265   :  { %1028 = vrot.lane.b32.xlu1 %v3448_v52, %s3242_s2 }
 0x269   :  { %403 = vrot.lane.b32.xlu1 %v3433_v51, %s3244_s0 }
 0x2bb   :  { %v227_v53 = vpop.permute.xlu0 %226  ;;  %v342_v55 = vpop.permute.xlu1 %341 }
 0x2bc   :  { %v233_v54 = vsel %vm228_vm6, %v227_v53, 0  ;;  %v347_v57 = vsel %vm228_vm6, %v342_v55, 0 }
 0x2bd   :  { %2815 = vmatpush3.bf16.xpose.msra.mxu1 %v233_v54 }
 0x2be   :  { %2826 = vmatprep.subr.bf16.mxu1 %v3235_v15 }
 0x2bf   :  { %v340_v56 = vpop.permute.xlu1 %339  ;;  %v452_v61 = vpop.permute.xlu0 %451 }
 0x2c3   :  { %v454_v58 = vpop.permute.xlu1 %453  ;;  %v564_v2 = vpop.permute.xlu0 %563 }
 0x2c4   :  { %2817 = vmatmul.mubr.msk.bf16.vlgmr.msra.gmra.mrb[4].mxu1 %vm228_vm6, %v3433_v51  ;;  %v459_v59 = vsel %vm228_vm6, %v454_v58, 0 }
 0x2c5   :  { %2827 = vmatpush3.bf16.xpose.msra.mxu1 %v347_v57  ;;  %2828 = vmatprep.mubr.msk.bf16.mxu1 %vm3236_vm1, %v3235_v15 }
 0x2c6   :  { %2838 = vmatprep.subr.bf16.mxu1 %v3235_v15 }
 0x2c7   :  { %v566_v60 = vpop.permute.xlu1 %565  ;;  %v807_v4 = vpop.permute.xlu0 %806 }
 0x2c8   :  { %v571_v62 = vsel %vm228_vm6, %v566_v60, 0  ;;  %v812_v5 = vsel %vm228_vm6, %v807_v4, 0 }
 0x2cb   :  { %v694_v63 = vpop.permute.xlu1 %693  ;;  %v919_v6 = vpop.permute.xlu0 %918 }
 0x2cc   :  { %2829 = vmatmul.mubr.msk.bf16.vlgmr.msra.gmra.mrb[8].mxu1 %vm228_vm6, %v340_v56  ;;  %v699_v3 = vsel %vm228_vm6, %v694_v63, 0  ;;  %v924_v8 = vsel %vm228_vm6, %v919_v6, 0 }
 0x2cd   :  { %2839 = vmatpush3.bf16.xpose.msra.mxu1 %v459_v59  ;;  %2840 = vmatprep.mubr.msk.bf16.mxu1 %vm3236_vm1, %v3235_v15 }
 0x2ce   :  { %2850 = vmatprep.subr.bf16.mxu1 %v3235_v15 }
 0x2cf   :  { %v805_v7 = vpop.permute.xlu1 %804  ;;  %v1031_v9 = vpop.permute.xlu0 %1030 }
 0x2d0   :  { %v1036_v11 = vsel %vm228_vm6, %v1031_v9, 0 }
 0x2d3   :  { %v917_v10 = vpop.permute.xlu1 %916 }
 0x2d4   :  { %2841 = vmatmul.mubr.msk.bf16.vlgmr.msra.gmra.mrb[12].mxu1 %vm228_vm6, %v452_v61 }
 0x2d5   :  { %2851 = vmatpush3.bf16.xpose.msra.mxu1 %v571_v62  ;;  %2852 = vmatprep.mubr.msk.bf16.mxu1 %vm3236_vm1, %v3235_v15 }
 0x2d6   :  { %2862 = vmatprep.subr.bf16.mxu1 %v3235_v15 }
 0x2d7   :  { %v1029_v12 = vpop.permute.xlu1 %1028 }
 0x2dc   :  { %2853 = vmatmul.mubr.msk.bf16.vlgmr.msra.gmra.mrb[16].mxu1 %vm228_vm6, %v564_v2 }
 0x2dd   :  { %2863 = vmatpush3.bf16.xpose.msra.mxu1 %v699_v3  ;;  %2864 = vmatprep.mubr.msk.bf16.mxu1 %vm3236_vm1, %v3235_v15 }
 0x2de   :  { %2874 = vmatprep.subr.bf16.mxu1 %v3235_v15 }
 0x2e4   :  { %2865 = vmatmul.mubr.msk.bf16.vlgmr.msra.gmra.mrb[20].mxu1 %vm228_vm6, %v3448_v52 }
 0x2e5   :  { %2875 = vmatpush3.bf16.xpose.msra.mxu1 %v812_v5  ;;  %2876 = vmatprep.mubr.msk.bf16.mxu1 %vm3236_vm1, %v3235_v15 }
 0x2e6   :  { %2886 = vmatprep.subr.bf16.mxu1 %v3235_v15 }
 0x2ec   :  { %2877 = vmatmul.mubr.msk.bf16.vlgmr.msra.gmra.mrb[24].mxu1 %vm228_vm6, %v805_v7 }
 0x2ed   :  { %2887 = vmatpush3.bf16.xpose.msra.mxu1 %v924_v8  ;;  %2888 = vmatprep.mubr.msk.bf16.mxu1 %vm3236_vm1, %v3235_v15 }
 0x2ee   :  { %2898 = vmatprep.subr.bf16.mxu1 %v3235_v15 }
 0x2f4   :  { %2889 = vmatmul.mubr.msk.bf16.vlgmr.msra.gmra.mrb[28].mxu1 %vm228_vm6, %v917_v10 }
 0x2f5   :  { %2899 = vmatpush3.bf16.xpose.msra.mxu1 %v1036_v11  ;;  %2900 = vmatprep.mubr.msk.bf16.mxu1 %vm3236_vm1, %v3235_v15 }
 0x2f6   :  { %2910 = vmatprep.subr.bf16.mxu1 %v3235_v15 }
 0x2fc   :  { %2901 = vmatmul.mubr.msk.bf16.vlgmr.msra.gmra.mrb[32].mxu1 %vm228_vm6, %v1029_v12 }
 0x2fd   :  { %2914 = vmatprep.mubr.msk.bf16.mxu1 %vm3236_vm1, %v3235_v15 }
 0x397   :  { %v269_v14 = vpop.f32.mrb[4].mxu1 }
 0x398   :  { %v275_v16 = vmul.f32 0.35355338, %v269_v14  ;;  %v2818_v17 = vpop.f32.mrb[5].mxu1 }
 0x399   :  { %v272_v18 = vpop.f32.mrb[6].mxu1 }
 0x39a   :  { %v2819_v19 = vpop.f32.mrb[7].mxu1  ;;  %v3514_v20 = vsel %vm276_vm7, -1e+09, %v275_v16  ;;  %v3549_v16 = vpop.permute.xlu1 %403 }
 0x39b   :  { %v278_v21 = vsel %vm228_vm6, %v3514_v20, -inf }
 0x39c   :  { %279 = vmax.xlane.f32.xlu0 %v278_v21 }
 0x39f   :  { %v383_v22 = vpop.f32.mrb[8].mxu1 }
 0x3a0   :  { %v389_v23 = vmul.f32 0.35355338, %v383_v22  ;;  %v2830_v24 = vpop.f32.mrb[9].mxu1 }
 0x3a1   :  { %v386_v25 = vpop.f32.mrb[10].mxu1 }
 0x3a2   :  { %v2831_v26 = vpop.f32.mrb[11].mxu1  ;;  %v3519_v27 = vsel %vm276_vm7, -1e+09, %v389_v23 }
 0x3a3   :  { %v391_v28 = vsel %vm228_vm6, %v3519_v27, -inf }
 0x3a4   :  { %392 = vmax.xlane.f32.xlu1 %v391_v28 }
 0x3a7   :  { %v495_v29 = vpop.f32.mrb[12].mxu1 }
 0x3a8   :  { %v2842_v30 = vpop.f32.mrb[13].mxu1  ;;  %v501_v53 = vmul.f32 0.35355338, %v495_v29 }
 0x3a9   :  { %v498_v31 = vpop.f32.mrb[14].mxu1 }
 0x3aa   :  { %v2843_v32 = vpop.f32.mrb[15].mxu1  ;;  %v502_v57 = vsel %vm276_vm7, -1e+09, %v501_v53 }
 0x3ab   :  { %v503_v61 = vsel %vm228_vm6, %v502_v57, -inf }
 0x3af   :  { %v607_v33 = vpop.f32.mrb[16].mxu1 }
 0x3b0   :  { %v2854_v34 = vpop.f32.mrb[17].mxu1  ;;  %v613_v56 = vmul.f32 0.35355338, %v607_v33 }
 0x3b1   :  { %v610_v35 = vpop.f32.mrb[18].mxu1 }
 0x3b2   :  { %290 = vrot.lane.b32.xlu0 %v3433_v51, %s3245_s25  ;;  %v2855_v36 = vpop.f32.mrb[19].mxu1  ;;  %v614_v2 = vsel %vm276_vm7, -1e+09, %v613_v56 }
 0x3b3   :  { %v615_v6 = vsel %vm228_vm6, %v614_v2, -inf }
 0x3b7   :  { %v735_v37 = vpop.f32.mrb[20].mxu1 }
 0x3b8   :  { %v2866_v38 = vpop.f32.mrb[21].mxu1  ;;  %v741_v62 = vmul.f32 0.35355338, %v735_v37 }
 0x3b9   :  { %v738_v39 = vpop.f32.mrb[22].mxu1 }
 0x3ba   :  { %v2867_v40 = vpop.f32.mrb[23].mxu1  ;;  %v743_v8 = vsel %vm742_vm8, -1e+09, %v741_v62 }
 0x3bb   :  { %v744_v9 = vsel %vm228_vm6, %v743_v8, -inf }
 0x3bf   :  { %v848_v42 = vpop.f32.mrb[24].mxu1 }
 0x3c0   :  { %v854_v43 = vmul.f32 0.35355338, %v848_v42  ;;  %v2878_v44 = vpop.f32.mrb[25].mxu1 }
 0x3c1   :  { %v851_v45 = vpop.f32.mrb[26].mxu1 }
 0x3c2   :  { %v2879_v46 = vpop.f32.mrb[27].mxu1  ;;  %v3529_v47 = vsel %vm742_vm8, -1e+09, %v854_v43 }
 0x3c3   :  { %v856_v48 = vsel %vm228_vm6, %v3529_v47, -inf }
 0x3c4   :  { %857 = vmax.xlane.f32.xlu1 %v856_v48 }
 0x3c7   :  { %v960_v49 = vpop.f32.mrb[28].mxu1 }
 0x3c8   :  { %v2890_v50 = vpop.f32.mrb[29].mxu1  ;;  %v966_v7 = vmul.f32 0.35355338, %v960_v49 }
 0x3c9   :  { %v963_v54 = vpop.f32.mrb[30].mxu1 }
 0x3ca   :  { %v2891_v55 = vpop.f32.mrb[31].mxu1  ;;  %v967_v10 = vsel %vm742_vm8, -1e+09, %v966_v7 }
 0x3cb   :  { %v968_v11 = vsel %vm228_vm6, %v967_v10, -inf }
 0x3cf   :  { %v1072_v58 = vpop.f32.mrb[32].mxu1 }
 0x3d0   :  { %v1078_v59 = vmul.f32 0.35355338, %v1072_v58  ;;  %v2902_v60 = vpop.f32.mrb[33].mxu1 }
 0x3d1   :  { %504 = vmax.xlane.f32.xlu0 %v503_v61  ;;  %v1075_v63 = vpop.f32.mrb[34].mxu1 }
 0x3d2   :  { %v2903_v3 = vpop.f32.mrb[35].mxu1  ;;  %v3537_v4 = vsel %vm742_vm8, -1e+09, %v1078_v59  ;;  %v409_v63 = vsel %vm295_vm9, %v3549_v16, 0 }
 0x3d3   :  { %v1080_v5 = vsel %vm228_vm6, %v3537_v4, -inf }
 0x3d4   :  { %1081 = vmax.xlane.f32.xlu1 %v1080_v5 }
 0x3d5   :  { %616 = vmax.xlane.f32.xlu0 %v615_v6 }
 0x3d9   :  { %745 = vmax.xlane.f32.xlu0 %v744_v9 }
 0x3dd   :  { %969 = vmax.xlane.f32.xlu0 %v968_v11 }
 0x3f3   :  { %515 = vrot.lane.b32.xlu0 %v3433_v51, %s3246_s1 }
 0x429   :  { %v280_v12 = vpop.xlane.xlu0 %279 }
 0x42a   :  { %v281_v13 = vsub.f32 %v3514_v20, %v280_v12 }
 0x42c   :  { %v282_v14 = vmul.f32 1.442695, %v281_v13 }
 0x42d   :  { %v291_v17 = vpop.permute.xlu0 %290 }
 0x42e   :  { %3130 = vpow2.f32 %v282_v14  ;;  %v297_v18 = vsel %vm295_vm9, %v291_v17, 0 }
 0x42f   :  { %2821 = vmatpush3.bf16.msra.mxu0 %v297_v18 }
 0x430   :  { %2832 = vmatprep.subr.bf16.mxu0 %v3235_v15 }
 0x431   :  { %v393_v19 = vpop.xlane.xlu1 %392 }
 0x432   :  { %v394_v21 = vsub.f32 %v3519_v27, %v393_v19 }
 0x434   :  { %v395_v22 = vmul.f32 1.442695, %v394_v21 }
 0x436   :  { %3132 = vpow2.f32 %v395_v22 }
 0x438   :  { %v3131_v23 = vpop.eup %3130 }
 0x439   :  { %v284_v24 = vsel %vm228_vm6, %v3131_v23, 0.0 }
 0x43a   :  { %285 = vadd.xlane.f32.xlu0 %v284_v24 }
 0x440   :  { %v3555_v20 = vpop.eup %3132 }
 0x441   :  { %v397_v25 = vsel %vm228_vm6, %v3555_v20, 0.0 }
 0x442   :  { %398 = vadd.xlane.f32.xlu1 %v397_v25 }
 0x451   :  { %v858_v32 = vpop.xlane.xlu1 %857 }
 0x452   :  { %v859_v35 = vsub.f32 %v3529_v47, %v858_v32 }
 0x453   :  { %756 = vrot.lane.b32.xlu1 %v3448_v52, %s3245_s25  ;;  %s4022_s25 = smov 16  }
 0x454   :  { %v860_v38 = vmul.f32 1.442695, %v859_v35 }
 0x45e   :  { %v505_v26 = vpop.xlane.xlu0 %504 }
 0x45f   :  { %v506_v28 = vsub.f32 %v502_v57, %v505_v26 }
 0x461   :  { %v507_v29 = vmul.f32 1.442695, %v506_v28  ;;  %v1082_v49 = vpop.xlane.xlu1 %1081 }
 0x462   :  { %v617_v30 = vpop.xlane.xlu0 %616  ;;  %v1083_v50 = vsub.f32 %v3537_v4, %v1082_v49 }
 0x463   :  { %3134 = vpow2.f32 %v507_v29  ;;  %v618_v27 = vsub.f32 %v614_v2, %v617_v30 }
 0x464   :  { %v1084_v54 = vmul.f32 1.442695, %v1083_v50 }
 0x465   :  { %v619_v31 = vmul.f32 1.442695, %v618_v27 }
 0x466   :  { %v746_v33 = vpop.xlane.xlu0 %745 }
 0x467   :  { %v747_v34 = vsub.f32 %v743_v8, %v746_v33  ;;  %3136 = vpow2.f32 %v619_v31 }
 0x469   :  { %v748_v36 = vmul.f32 1.442695, %v747_v34 }
 0x46a   :  { %v970_v46 = vpop.xlane.xlu0 %969 }
 0x46b   :  { %3138 = vpow2.f32 %v748_v36  ;;  %v971_v47 = vsub.f32 %v967_v10, %v970_v46 }
 0x46c   :  { %3140 = vpow2.f32 %v860_v38 }
 0x46d   :  { %v3135_v37 = vpop.eup %3134  ;;  %v972_v48 = vmul.f32 1.442695, %v971_v47 }
 0x46e   :  { %v509_v39 = vsel %vm228_vm6, %v3135_v37, 0.0  ;;  %v516_v57 = vpop.permute.xlu0 %515 }
 0x46f   :  { %510 = vadd.xlane.f32.xlu0 %v509_v39  ;;  %3142 = vpow2.f32 %v972_v48  ;;  %v521_v4 = vsel %vm295_vm9, %v516_v57, 0 }
 0x470   :  { %3144 = vpow2.f32 %v1084_v54 }
 0x471   :  { %v3563_v40 = vpop.eup %3136 }
 0x472   :  { %v621_v41 = vsel %vm228_vm6, %v3563_v40, 0.0 }
 0x475   :  { %v3567_v42 = vpop.eup %3138 }
 0x476   :  { %v750_v43 = vsel %vm228_vm6, %v3567_v42, 0.0  ;;  %v3571_v44 = vpop.eup %3140 }
 0x477   :  { %622 = vadd.xlane.f32.xlu1 %v621_v41  ;;  %v862_v45 = vsel %vm228_vm6, %v3571_v44, 0.0 }
 0x479   :  { %v3579_v53 = vpop.eup %3142 }
 0x47a   :  { %v974_v55 = vsel %vm228_vm6, %v3579_v53, 0.0  ;;  %v3583_v56 = vpop.eup %3144 }
 0x47b   :  { %751 = vadd.xlane.f32.xlu1 %v750_v43 }
 0x47f   :  { %863 = vadd.xlane.f32.xlu1 %v862_v45 }
 0x485   :  { %627 = vrot.lane.b32.xlu0 %v3433_v51, %s3247_s5  ;;  %v1086_v51 = vsel %vm228_vm6, %v3583_v56, 0.0 }
 0x490   :  { %868 = vrot.lane.b32.xlu1 %v3448_v52, %s3244_s0  ;;  %s4023_s0 = smov 8  }
 0x4a4   :  { %975 = vadd.xlane.f32.xlu0 %v974_v55 }
 0x4b4   :  { %1087 = vadd.xlane.f32.xlu1 %v1086_v51 }
 0x4ba   :  { %980 = vrot.lane.b32.xlu0 %v3448_v52, %s3246_s1  ;;  %s4021_s1 = smov 24  }
 0x4c5   :  { %1092 = vrot.lane.b32.xlu1 %v3448_v52, %s3247_s5  ;;  %s4046_s5 = smov 16  }
 0x4c7   :  { %v286_v58 = vpop.xlane.xlu0 %285 }
 0x4c8   :  { %3146 = vrcp.f32 %v286_v58 }
 0x4cf   :  { %v399_v59 = vpop.xlane.xlu1 %398 }
 0x4d0   :  { %3148 = vrcp.f32 %v399_v59 }
 0x4d2   :  { %v3147_v60 = vpop.eup %3146 }
 0x4d3   :  { %v288_v61 = vmul.f32 %v3147_v60, %v3131_v23  ;;  %v757_v6 = vpop.permute.xlu1 %756 }
 0x4d4   :  { %v762_v21 = vsel %vm295_vm9, %v757_v6, 0 }
 0x4d5   :  { %v289_v62 = vpack.c.bf16 %v288_v61, %v288_v61 }
 0x4d7   :  { %2823 = vmatmul.mubr.msk.bf16.vlgmr.msra.gmra.mrb[0].mxu0 %vm228_vm6, %v289_v62 }
 0x4d8   :  { %2833 = vmatpush3.bf16.msra.mxu0 %v409_v63  ;;  %2834 = vmatprep.mubr.msk.bf16.mxu0 %vm3236_vm1, %v3235_v15 }
 0x4d9   :  { %2844 = vmatprep.subr.bf16.mxu0 %v3235_v15 }
 0x4da   :  { %v3149_v2 = vpop.eup %3148 }
 0x4db   :  { %v401_v52 = vmul.f32 %v3149_v2, %v3555_v20 }
 0x4dd   :  { %v402_v3 = vpack.c.bf16 %v401_v52, %v401_v52 }
 0x4df   :  { %2835 = vmatmul.mubr.msk.bf16.vlgmr.msra.gmra.mrb[4].mxu0 %vm228_vm6, %v402_v3  ;;  %v3108_v3 = vld [vmem:[%s4041_s3] sm:$0xff]  }
 0x4e0   :  { %2845 = vmatpush3.bf16.msra.mxu0 %v521_v4  ;;  %2846 = vmatprep.mubr.msk.bf16.mxu0 %vm3236_vm1, %v3235_v15 }
 0x4e1   :  { %2856 = vmatprep.subr.bf16.mxu0 %v3235_v15  ;;  %2911 = vmatpush3.bf16.msra.mxu1 %v3108_v3 }
 0x4e2   :  { %2912 = vmatprep.subr.bf16.mxu1 %v3235_v15 }
 0x4fc   :  { %v511_v5 = vpop.xlane.xlu0 %510 }
 0x4fd   :  { %3150 = vrcp.f32 %v511_v5 }
 0x500   :  { %v628_v11 = vpop.permute.xlu0 %627 }
 0x501   :  { %v633_v13 = vsel %vm295_vm9, %v628_v11, 0 }
 0x504   :  { %v623_v7 = vpop.xlane.xlu1 %622 }
 0x505   :  { %3152 = vrcp.f32 %v623_v7 }
 0x507   :  { %v3151_v8 = vpop.eup %3150 }
 0x508   :  { %v513_v9 = vmul.f32 %v3151_v8, %v3135_v37  ;;  %v752_v10 = vpop.xlane.xlu1 %751 }
 0x509   :  { %3154 = vrcp.f32 %v752_v10 }
 0x50a   :  { %v514_v12 = vpack.c.bf16 %v513_v9, %v513_v9  ;;  %v3109_v9 = vld [vmem:[%s4041_s3 + $0x8] sm:$0xff]   ;;  %s4044_s3 = smov 72  }
 0x50b   :  { %2913 = vmatpush3.bf16.msra.mxu1 %v3109_v9 }
 0x50c   :  { %2847 = vmatmul.mubr.msk.bf16.vlgmr.msra.gmra.mrb[8].mxu0 %vm228_vm6, %v514_v12  ;;  %v864_v14 = vpop.xlane.xlu1 %863  ;;  %2926 = vmatprep.subr.bf16.mxu1 %v3235_v15 }
 0x50d   :  { %2857 = vmatpush3.bf16.msra.mxu0 %v633_v13  ;;  %2858 = vmatprep.mubr.msk.bf16.mxu0 %vm3236_vm1, %v3235_v15  ;;  %3156 = vrcp.f32 %v864_v14 }
 0x50e   :  { %2868 = vmatprep.subr.bf16.mxu0 %v3235_v15 }
 0x50f   :  { %v3153_v16 = vpop.eup %3152 }
 0x510   :  { %v625_v17 = vmul.f32 %v3153_v16, %v3563_v40  ;;  %v869_v23 = vpop.permute.xlu1 %868 }
 0x511   :  { %v874_v25 = vsel %vm295_vm9, %v869_v23, 0 }
 0x512   :  { %v626_v18 = vpack.c.bf16 %v625_v17, %v625_v17 }
 0x513   :  { %v3155_v19 = vpop.eup %3154 }
 0x514   :  { %2859 = vmatmul.mubr.msk.bf16.vlgmr.msra.gmra.mrb[12].mxu0 %vm228_vm6, %v626_v18  ;;  %v754_v22 = vmul.f32 %v3155_v19, %v3567_v42 }
 0x515   :  { %2869 = vmatpush3.bf16.msra.mxu0 %v762_v21  ;;  %2870 = vmatprep.mubr.msk.bf16.mxu0 %vm3236_vm1, %v3235_v15 }
 0x516   :  { %2880 = vmatprep.subr.bf16.mxu0 %v3235_v15  ;;  %v755_v24 = vpack.c.bf16 %v754_v22, %v754_v22 }
 0x517   :  { %v3157_v20 = vpop.eup %3156 }
 0x518   :  { %v866_v26 = vmul.f32 %v3157_v20, %v3571_v44 }
 0x51a   :  { %v867_v28 = vpack.c.bf16 %v866_v26, %v866_v26 }
 0x51c   :  { %2871 = vmatmul.mubr.msk.bf16.vlgmr.msra.gmra.mrb[16].mxu0 %vm228_vm6, %v755_v24 }
 0x51d   :  { %2881 = vmatpush3.bf16.msra.mxu0 %v874_v25  ;;  %2882 = vmatprep.mubr.msk.bf16.mxu0 %vm3236_vm1, %v3235_v15 }
 0x51e   :  { %2892 = vmatprep.subr.bf16.mxu0 %v3235_v15 }
 0x524   :  { %2883 = vmatmul.mubr.msk.bf16.vlgmr.msra.gmra.mrb[20].mxu0 %vm228_vm6, %v867_v28 }
 0x525   :  { %2894 = vmatprep.mubr.msk.bf16.mxu0 %vm3236_vm1, %v3235_v15 }
 0x531   :  { %v976_v29 = vpop.xlane.xlu0 %975 }
 0x532   :  { %3158 = vrcp.f32 %v976_v29 }
 0x535   :  { %v981_v30 = vpop.permute.xlu0 %980 }
 0x536   :  { %v986_v27 = vsel %vm295_vm9, %v981_v30, 0 }
 0x537   :  { %2893 = vmatpush3.bf16.msra.mxu0 %v986_v27 }
 0x538   :  { %2904 = vmatprep.subr.bf16.mxu0 %v3235_v15 }
 0x53c   :  { %v3159_v31 = vpop.eup %3158 }
 0x53d   :  { %v978_v32 = vmul.f32 %v3159_v31, %v3579_v53 }
 0x53f   :  { %v979_v33 = vpack.c.bf16 %v978_v32, %v978_v32  ;;  %v2673_v32 = vld [vmem:[%s3999_s9] ss:$0 sm:$0xff] }
 0x541   :  { %2895 = vmatmul.mubr.msk.bf16.vlgmr.msra.gmra.mrb[24].mxu0 %vm228_vm6, %v979_v33  ;;  %v1088_v34 = vpop.xlane.xlu1 %1087 }
 0x542   :  { %3160 = vrcp.f32 %v1088_v34  ;;  %2906 = vmatprep.mubr.msk.bf16.mxu0 %vm3236_vm1, %v3235_v15 }
 0x545   :  { %v1093_v35 = vpop.permute.xlu1 %1092 }
 0x546   :  { %v1098_v36 = vsel %vm295_vm9, %v1093_v35, 0 }
 0x547   :  { %2905 = vmatpush3.bf16.msra.mxu0 %v1098_v36 }
 0x548   :  { %2918 = vmatprep.subr.bf16.mxu0 %v3235_v15 }
 0x54c   :  { %v3161_v37 = vpop.eup %3160 }
 0x54d   :  { %v1090_v38 = vmul.f32 %v3161_v37, %v3583_v56 }
 0x54f   :  { %v1091_v39 = vpack.c.bf16 %v1090_v38, %v1090_v38 }
 0x551   :  { %2907 = vmatmul.mubr.msk.bf16.vlgmr.msra.gmra.mrb[28].mxu0 %vm228_vm6, %v1091_v39 }
 0x552   :  { %2922 = vmatprep.mubr.msk.bf16.mxu0 %vm3236_vm1, %v3235_v15 }
 0x5aa   :  { %v333_v40 = vpop.f32.mrb[0].mxu0 }
 0x5ab   :  { %v2824_v41 = vpop.f32.mrb[1].mxu0 }
 0x5ac   :  { %v336_v42 = vpop.f32.mrb[2].mxu0 }
 0x5ad   :  { %v2825_v43 = vpop.f32.mrb[3].mxu0 }
 0x5b2   :  { %v445_v44 = vpop.f32.mrb[4].mxu0 }
 0x5b3   :  { %v2836_v45 = vpop.f32.mrb[5].mxu0 }
 0x5b4   :  { %v448_v46 = vpop.f32.mrb[6].mxu0 }
 0x5b5   :  { %v2837_v47 = vpop.f32.mrb[7].mxu0 }
 0x5df   :  { %v557_v48 = vpop.f32.mrb[8].mxu0 }
 0x5e0   :  { %v2848_v49 = vpop.f32.mrb[9].mxu0 }
 0x5e1   :  { %v560_v50 = vpop.f32.mrb[10].mxu0 }
 0x5e2   :  { %v2849_v53 = vpop.f32.mrb[11].mxu0 }
 0x5e3   :  { %v3110_v53 = vld [vmem:[%s4004_s14] sm:$0xff]  }
 0x5e7   :  { %v669_v54 = vpop.f32.mrb[12].mxu0 }
 0x5e8   :  { %v2860_v55 = vpop.f32.mrb[13].mxu0 }
 0x5e9   :  { %v672_v56 = vpop.f32.mrb[14].mxu0  ;;  %v92_v55 = vld [vmem:[%s4042_s7] sm:$0xff] }
 0x5ea   :  { %v2861_v51 = vpop.f32.mrb[15].mxu0  ;;  %v93_v56 = vld [vmem:[%s4042_s7 + $0x8] sm:$0xff]  ;;  %s4047_s7 = smov 24  }
 0x5eb   :  { %v3112_v51 = vld [vmem:[%s4002_s12] sm:$0xff]  }
 0x5ec   :  { %2919 = vmatpush3.bf16.msra.mxu0 %v3112_v51 }
 0x5ed   :  { %2920 = vmatprep.subr.bf16.mxu0 %v3235_v15 }
 0x5ef   :  { %v798_v57 = vpop.f32.mrb[16].mxu0 }
 0x5f0   :  { %v2872_v58 = vpop.f32.mrb[17].mxu0 }
 0x5f1   :  { %v801_v59 = vpop.f32.mrb[18].mxu0  ;;  %v3113_v58 = vld [vmem:[%s4002_s12 + $0x8] sm:$0xff]  }
 0x5f2   :  { %v2873_v60 = vpop.f32.mrb[19].mxu0  ;;  %2921 = vmatpush3.bf16.msra.mxu0 %v3113_v58 }
 0x5f3   :  { %2934 = vmatprep.subr.bf16.mxu0 %v3235_v15 }
 0x5f7   :  { %v910_v61 = vpop.f32.mrb[20].mxu0 }
 0x5f8   :  { %v3076_v62 = vpack.i.bf16 %v910_v61, %v445_v44  ;;  %v2884_v63 = vpop.f32.mrb[21].mxu0 }
 0x5f9   :  { %v913_v2 = vpop.f32.mrb[22].mxu0 }
 0x5fa   :  { %3077 = vrot.lane.b32.xlu0 %v3076_v62, %s4023_s0  ;;  %v2885_v52 = vpop.f32.mrb[23].mxu0 }
 0x614   :  { %v1022_v4 = vpop.f32.mrb[24].mxu0 }
 0x615   :  { %v3081_v5 = vpack.i.bf16 %v1022_v4, %v557_v48  ;;  %v2896_v6 = vpop.f32.mrb[25].mxu0 }
 0x616   :  { %v1025_v7 = vpop.f32.mrb[26].mxu0 }
 0x617   :  { %3082 = vrot.lane.b32.xlu1 %v3081_v5, %s4022_s25  ;;  %v2897_v8 = vpop.f32.mrb[27].mxu0 }
 0x624   :  { %v1134_v10 = vpop.f32.mrb[28].mxu0 }
 0x625   :  { %v3086_v11 = vpack.i.bf16 %v1134_v10, %v669_v54  ;;  %v2908_v12 = vpop.f32.mrb[29].mxu0  ;;  %v3111_v54 = vld [vmem:[%s4004_s14 + $0x8] sm:$0xff]  }
 0x626   :  { %v1137_v13 = vpop.f32.mrb[30].mxu0  ;;  %v2677_v12 = vld [vmem:[%s4000_s10] ss:$0 sm:$0xff] }
 0x627   :  { %3087 = vrot.lane.b32.xlu0 %v3086_v11, %s4021_s1  ;;  %v2909_v14 = vpop.f32.mrb[31].mxu0 }
 0x66c   :  { %v3078_v16 = vpop.permute.xlu0 %3077 }
 0x66d   :  { %v3080_v18 = vunpack.i.h.bf16 %v3078_v16  ;;  %v3079_v19 = vunpack.i.l.bf16 %v3078_v16 }
 0x66f   :  { %v1152_v24 = vsel %vm228_vm6, %v798_v57, %v3080_v18  ;;  %v687_v20 = vsel %vm228_vm6, %v333_v40, %v3079_v19  ;;  %v1351_v57 = vpack.c.bf16 %v93_v56, %v92_v55  ;;  %v2678_v19 = vld [vmem:[%s4001_s11] ss:$0 sm:$0xff] }
 0x689   :  { %v3083_v17 = vpop.permute.xlu1 %3082 }
 0x68a   :  { %v3085_v21 = vunpack.i.h.bf16 %v3083_v17  ;;  %v3084_v22 = vunpack.i.l.bf16 %v3083_v17 }
 0x68c   :  { %v1153_v28 = vsel %vm688_vm10, %v1152_v24, %v3085_v21  ;;  %v689_v29 = vsel %vm688_vm10, %v687_v20, %v3084_v22  ;;  %v2683_v20 = vld [vmem:[%s4005_s15] ss:$0 sm:$0xff] }
 0x699   :  { %v3088_v23 = vpop.permute.xlu0 %3087 }
 0x69a   :  { %v3090_v25 = vunpack.i.h.bf16 %v3088_v23  ;;  %v3089_v26 = vunpack.i.l.bf16 %v3088_v23 }
 0x69c   :  { %v691_v30 = vsel %vm690_vm11, %v689_v29, %v3089_v26  ;;  %v1154_v27 = vsel %vm690_vm11, %v1153_v28, %v3090_v25 }
 0x69d   :  { %v1155_v31 = vpack.c.bf16 %v1154_v27, %v691_v30 }
 0x69f   :  { %2915 = vmatmul.mubr.msk.bf16.vlgmr.msra.gmra.mrb[36].mxu1 %vm96_vm0, %v1155_v31 }
 0x6a0   :  { %2930 = vmatprep.mubr.msk.bf16.mxu1 %vm3236_vm1, %v3235_v15  ;;  %2927 = vmatpush3.bf16.msra.mxu1 %v3110_v53 }
 0x6a1   :  { %2928 = vmatprep.subr.bf16.mxu1 %v3235_v15 }
 0x6a4   :  { %2929 = vmatpush3.bf16.msra.mxu1 %v3111_v54 }
 0x6a5   :  { %2940 = vmatprep.subr.bf16.mxu1 %v3235_v15 }
 0x6a7   :  { %2931 = vmatmul.mubr.msk.bf16.vlgmr.msra.gmra.mrb[40].mxu1 %vm96_vm0, %v1351_v57 }
 0x6a8   :  { %2942 = vmatprep.mubr.msk.bf16.mxu1 %vm3236_vm1, %v3235_v15 }
 0x772   :  { %v1216_v33 = vpop.f32.mrb[36].mxu1 }
 0x773   :  { %v1217_v34 = vadd.f32 %v2673_v32, %v1216_v33  ;;  %v2916_v35 = vpop.f32.mrb[37].mxu1  ;;  %v2679_v33 = vld [vmem:[%s4003_s13] ss:$0 sm:$0xff] }
 0x774   :  { %v1219_v36 = vpop.f32.mrb[38].mxu1 }
 0x775   :  { %v3659_v37 = vadd.f32 %v1217_v34, %v3392_v0  ;;  %v1220_v38 = vadd.f32 %v2673_v32, %v1219_v36  ;;  %v2917_v39 = vpop.f32.mrb[39].mxu1 }
 0x777   :  { %v3662_v40 = vadd.f32 %v1220_v38, %v3397_v1  ;;  %v1227_v41 = vsel %vm96_vm0, %v3659_v37, 0.0 }
 0x778   :  { %1228 = vadd.xlane.f32.xlu1 %v1227_v41 }
 0x779   :  { %v1230_v42 = vsel %vm96_vm0, %v3662_v40, 0.0 }
 0x77a   :  { %1231 = vadd.xlane.f32.xlu0 %v1230_v42  ;;  %v1412_v25 = vpop.f32.mrb[40].mxu1 }
 0x77b   :  { %v1413_v26 = vadd.f32 %v2683_v20, %v1412_v25  ;;  %v2932_v28 = vpop.f32.mrb[41].mxu1 }
 0x77c   :  { %v1415_v29 = vpop.f32.mrb[42].mxu1 }
 0x77d   :  { %v1416_v30 = vadd.f32 %v2683_v20, %v1415_v29  ;;  %v2933_v27 = vpop.f32.mrb[43].mxu1 }
 0x77f   :  { %v3709_v31 = vpack.c.bf16 %v1416_v30, %v1413_v26 }
 0x781   :  { %v1427_v32 = vsel %vm228_vm6, %v3709_v31, 0 }
 0x789   :  { %1542 = vrot.lane.b32.xlu1 %v3709_v31, %s3239_s23 }
 0x78d   :  { %1654 = vrot.lane.b32.xlu1 %v3709_v31, %s3240_s26 }
 0x805   :  { %v1229_v43 = vpop.xlane.xlu1 %1228 }
 0x806   :  { %v1233_v44 = vmul.f32 0.03125, %v1229_v43 }
 0x807   :  { %v1232_v45 = vpop.xlane.xlu0 %1231 }
 0x808   :  { %v1235_v46 = vsub.f32 %v3659_v37, %v1233_v44  ;;  %v1234_v0 = vmul.f32 0.03125, %v1232_v45 }
 0x809   :  { %v1543_v43 = vpop.permute.xlu1 %1542 }
 0x80a   :  { %v1236_v47 = vsub.f32 %v3662_v40, %v1234_v0  ;;  %v1237_v48 = vmul.f32 %v1235_v46, %v1235_v46  ;;  %v1253_v14 = vmul.f32 %v2677_v12, %v1235_v46  ;;  %v1548_v44 = vsel %vm228_vm6, %v1543_v43, 0 }
 0x80b   :  { %v3732_v46 = vrot.slane %v3709_v31, 4 }
 0x80c   :  { %v1239_v1 = vsel %vm96_vm0, %v1237_v48, 0.0  ;;  %v1238_v49 = vmul.f32 %v1236_v47, %v1236_v47  ;;  %v1254_v16 = vmul.f32 %v2677_v12, %v1236_v47 }
 0x80d   :  { %1240 = vadd.xlane.f32.xlu0 %v1239_v1  ;;  %v1655_v0 = vpop.permute.xlu1 %1654  ;;  %v1897_v54 = vsel %vm228_vm6, %v3732_v46, 0 }
 0x80e   :  { %v1242_v50 = vsel %vm96_vm0, %v1238_v49, 0.0  ;;  %v1660_v1 = vsel %vm228_vm6, %v1655_v0, 0 }
 0x811   :  { %1243 = vadd.xlane.f32.xlu0 %v1242_v50 }
 0x89a   :  { %v1241_v59 = vpop.xlane.xlu0 %1240 }
 0x89b   :  { %v1245_v60 = vmul.f32 0.032258064, %v1241_v59 }
 0x89d   :  { %3162 = vrsqrt.f32 %v1245_v60  ;;  %vm1257_vm12 = vcmp.eq.f32.partialorder %v1245_v60, inf  ;;  %v1260_v52 = vand.u32 2147483648, %v1245_v60  ;;  %vm1259_vm13 = vcmp.eq.f32.partialorder %v1245_v60, 0.0 }
 0x89e   :  { %v1244_v61 = vpop.xlane.xlu0 %1243 }
 0x89f   :  { %v1246_v62 = vmul.f32 0.032258064, %v1244_v61 }
 0x8a1   :  { %3164 = vrsqrt.f32 %v1246_v62  ;;  %vm1264_vm14 = vcmp.eq.f32.partialorder %v1246_v62, inf  ;;  %v1267_v8 = vand.u32 2147483648, %v1246_v62  ;;  %vm1266_vm15 = vcmp.eq.f32.partialorder %v1246_v62, 0.0 }
 0x8a7   :  { %v3163_v63 = vpop.eup %3162 }
 0x8a8   :  { %v1256_v2 = vmul.f32 %v3163_v63, %v1245_v60  ;;  %v1472_v63 = vlaneseq }
 0x8aa   :  { %v1258_v3 = vsel %vm1257_vm12, %v1245_v60, %v1256_v2 }
 0x8ab   :  { %v3165_v4 = vpop.eup %3164  ;;  %v1261_v5 = vsel %vm1259_vm13, %v1260_v52, %v1258_v3  ;;  %v1473_v52 = vshrl.u32 %v1472_v63, 7 }
 0x8ac   :  { %v1269_v6 = vadd.f32 1e-06, %v1261_v5  ;;  %v1263_v7 = vmul.f32 %v3165_v4, %v1246_v62  ;;  %v3251_v4 = vmov 0  }
 0x8ad   :  { %v1474_v3 = vsub.s32 0, %v1473_v52 }
 0x8ae   :  { %3166 = vrcp.f32 %v1269_v6  ;;  %v1265_v9 = vsel %vm1264_vm14, %v1246_v62, %v1263_v7 }
 0x8af   :  { %v1268_v10 = vsel %vm1266_vm15, %v1267_v8, %v1265_v9 }
 0x8b0   :  { %v1270_v11 = vadd.f32 1e-06, %v1268_v10 }
 0x8b2   :  { %3168 = vrcp.f32 %v1270_v11 }
 0x8b8   :  { %v3167_v13 = vpop.eup %3166 }
 0x8b9   :  { %v1272_v17 = vmul.f32 %v3167_v13, %v1253_v14 }
 0x8bb   :  { %v1281_v22 = vadd.f32 %v2678_v19, %v1272_v17 }
 0x8bc   :  { %v3169_v18 = vpop.eup %3168 }
 0x8bd   :  { %v1274_v21 = vmul.f32 %v3169_v18, %v1254_v16 }
 0x8bf   :  { %v1282_v23 = vadd.f32 %v2678_v19, %v1274_v21 }
 0x8c1   :  { %v1283_v24 = vpack.c.bf16 %v1282_v23, %v1281_v22 }
 0x8c3   :  { %2923 = vmatmul.mubr.msk.bf16.vlgmr.msra.gmra.mrb[32].mxu0 %vm96_vm0, %v1283_v24 }
 0x8c4   :  { %2936 = vmatprep.mubr.msk.bf16.mxu0 %vm3236_vm1, %v3235_v15  ;;  %2935 = vmatpush3.bf16.xpose.msra.mxu0 %v1427_v32 }
 0x8c5   :  { %2946 = vmatprep.subr.bf16.mxu0 %v3235_v15 }
 0x996   :  { %v1344_v34 = vpop.f32.mrb[32].mxu0 }
 0x997   :  { %v2924_v35 = vpop.f32.mrb[33].mxu0  ;;  %v1345_v38 = vadd.f32 %v2679_v33, %v1344_v34 }
 0x998   :  { %v1347_v36 = vpop.f32.mrb[34].mxu0 }
 0x999   :  { %v1348_v39 = vadd.f32 %v2679_v33, %v1347_v36  ;;  %v2925_v41 = vpop.f32.mrb[35].mxu0 }
 0x99b   :  { %v1421_v42 = vpack.c.bf16 %v1348_v39, %v1345_v38 }
 0x99d   :  { %1540 = vrot.lane.b32.xlu0 %v1421_v42, %s3239_s23  ;;  %1652 = vrot.lane.b32.xlu1 %v1421_v42, %s3240_s26  ;;  %v1891_v45 = vrot.slane %v1421_v42, 4 }
 0x99e   :  { %2937 = vmatmul.mubr.msk.bf16.vlgmr.msra.gmra.mrb[36].mxu0 %vm228_vm6, %v1421_v42 }
 0x99f   :  { %2947 = vmatpush3.bf16.xpose.msra.mxu0 %v1548_v44  ;;  %2948 = vmatprep.mubr.msk.bf16.mxu0 %vm3236_vm1, %v3235_v15 }
 0x9a0   :  { %2958 = vmatprep.subr.bf16.mxu0 %v3235_v15 }
 0x9a1   :  { %1764 = vrot.lane.b32.xlu0 %v1421_v42, %s3242_s2  ;;  %1766 = vrot.lane.b32.xlu1 %v3709_v31, %s3242_s2 }
 0x9a5   :  { %2008 = vrot.lane.b32.xlu0 %v1891_v45, %s3239_s23  ;;  %2010 = vrot.lane.b32.xlu1 %v3732_v46, %s3239_s23 }
 0x9a9   :  { %2120 = vrot.lane.b32.xlu0 %v1891_v45, %s3240_s26  ;;  %2122 = vrot.lane.b32.xlu1 %v3732_v46, %s3240_s26  ;;  %s4043_s26 = sld [smem:[#allocation7_spill]] }
 0x9ad   :  { %2232 = vrot.lane.b32.xlu0 %v1891_v45, %s3242_s2  ;;  %2234 = vrot.lane.b32.xlu1 %v3732_v46, %s3242_s2 }
 0x9af   :  { %v1419_v2 = vld [vmem:[%s4043_s26] sm:$0x1]  ;;  %v1420_v29 = vld [vmem:[%s4043_s26 + $0x1] sm:$0x1] }
 0x9b0   :  { %vm1470_vm2 = vcmp.eq.s32.totalorder %v1419_v2, 0  ;;  %vm1940_vm4 = vcmp.eq.s32.totalorder %v1420_v29, 0 }
 0x9b1   :  { %v1471_v5 = vsel %vm1470_vm2, 1, %v3251_v4  ;;  %v1941_v34 = vsel %vm1940_vm4, 1, %v3251_v4 }
 0x9b2   :  { %v1475_v6 = vrot.slane %v1471_v5, %v1474_v3  ;;  %v1945_v41 = vrot.slane %v1941_v34, %v1474_v3 }
 0x9b4   :  { %vm1476_vm3 = vcmp.eq.s32.totalorder %v1475_v6, 1  ;;  %vm1946_vm5 = vcmp.eq.s32.totalorder %v1945_v41, 1 }
 0xa0f   :  { %v1541_v47 = vpop.permute.xlu0 %1540  ;;  %v1653_v48 = vpop.permute.xlu1 %1652 }
 0xa10   :  { %2949 = vmatmul.mubr.msk.bf16.vlgmr.msra.gmra.mrb[40].mxu0 %vm228_vm6, %v1541_v47 }
 0xa11   :  { %2959 = vmatpush3.bf16.xpose.msra.mxu0 %v1660_v1  ;;  %2960 = vmatprep.mubr.msk.bf16.mxu0 %vm3236_vm1, %v3235_v15 }
 0xa12   :  { %2970 = vmatprep.subr.bf16.mxu0 %v3235_v15 }
 0xa13   :  { %v1767_v49 = vpop.permute.xlu1 %1766  ;;  %v1765_v53 = vpop.permute.xlu0 %1764 }
 0xa14   :  { %v1772_v50 = vsel %vm228_vm6, %v1767_v49, 0 }
 0xa17   :  { %v2011_v55 = vpop.permute.xlu1 %2010  ;;  %v2009_v57 = vpop.permute.xlu0 %2008 }
 0xa18   :  { %2961 = vmatmul.mubr.msk.bf16.vlgmr.msra.gmra.mrb[44].mxu0 %vm228_vm6, %v1653_v48  ;;  %v2016_v56 = vsel %vm228_vm6, %v2011_v55, 0 }
 0xa19   :  { %2971 = vmatpush3.bf16.xpose.msra.mxu0 %v1772_v50  ;;  %2972 = vmatprep.mubr.msk.bf16.mxu0 %vm3236_vm1, %v3235_v15 }
 0xa1a   :  { %2982 = vmatprep.subr.bf16.mxu0 %v3235_v15 }
 0xa1b   :  { %v2123_v51 = vpop.permute.xlu1 %2122  ;;  %v2121_v60 = vpop.permute.xlu0 %2120 }
 0xa1c   :  { %v2128_v58 = vsel %vm228_vm6, %v2123_v51, 0 }
 0xa1f   :  { %v2235_v59 = vpop.permute.xlu1 %2234  ;;  %v2233_v62 = vpop.permute.xlu0 %2232 }
 0xa20   :  { %2973 = vmatmul.mubr.msk.bf16.vlgmr.msra.gmra.mrb[48].mxu0 %vm228_vm6, %v1765_v53  ;;  %v2240_v61 = vsel %vm228_vm6, %v2235_v59, 0 }
 0xa21   :  { %2983 = vmatpush3.bf16.xpose.msra.mxu0 %v1897_v54  ;;  %2984 = vmatprep.mubr.msk.bf16.mxu0 %vm3236_vm1, %v3235_v15 }
 0xa22   :  { %2994 = vmatprep.subr.bf16.mxu0 %v3235_v15 }
 0xa28   :  { %2985 = vmatmul.mubr.msk.bf16.vlgmr.msra.gmra.mrb[52].mxu0 %vm228_vm6, %v1891_v45 }
 0xa29   :  { %2995 = vmatpush3.bf16.xpose.msra.mxu0 %v2016_v56  ;;  %2996 = vmatprep.mubr.msk.bf16.mxu0 %vm3236_vm1, %v3235_v15 }
 0xa2a   :  { %3006 = vmatprep.subr.bf16.mxu0 %v3235_v15 }
 0xa30   :  { %2997 = vmatmul.mubr.msk.bf16.vlgmr.msra.gmra.mrb[56].mxu0 %vm228_vm6, %v2009_v57 }
 0xa31   :  { %3007 = vmatpush3.bf16.xpose.msra.mxu0 %v2128_v58  ;;  %3008 = vmatprep.mubr.msk.bf16.mxu0 %vm3236_vm1, %v3235_v15 }
 0xa32   :  { %3018 = vmatprep.subr.bf16.mxu0 %v3235_v15 }
 0xa38   :  { %3009 = vmatmul.mubr.msk.bf16.vlgmr.msra.gmra.mrb[60].mxu0 %vm228_vm6, %v2121_v60 }
 0xa39   :  { %3019 = vmatpush3.bf16.xpose.msra.mxu0 %v2240_v61  ;;  %3020 = vmatprep.mubr.msk.bf16.mxu0 %vm3236_vm1, %v3235_v15 }
 0xa3a   :  { %3030 = vmatprep.subr.bf16.mxu0 %v3235_v15 }
 0xa40   :  { %3021 = vmatmul.mubr.msk.bf16.vlgmr.msra.gmra.mrb[64].mxu0 %vm228_vm6, %v2233_v62 }
 0xa41   :  { %3034 = vmatprep.mubr.msk.bf16.mxu0 %vm3236_vm1, %v3235_v15 }
 0xa71   :  { %v1463_v7 = vpop.f32.mrb[36].mxu0 }
 0xa72   :  { %v1469_v8 = vmul.f32 0.35355338, %v1463_v7  ;;  %v2938_v9 = vpop.f32.mrb[37].mxu0 }
 0xa73   :  { %v1466_v10 = vpop.f32.mrb[38].mxu0 }
 0xa74   :  { %v2939_v11 = vpop.f32.mrb[39].mxu0  ;;  %v3781_v12 = vsel %vm1476_vm3, -1e+09, %v1469_v8 }
 0xa75   :  { %v1478_v13 = vsel %vm228_vm6, %v3781_v12, -inf }
 0xa76   :  { %1479 = vmax.xlane.f32.xlu1 %v1478_v13 }
 0xae3   :  { %v1584_v14 = vpop.f32.mrb[40].mxu0 }
 0xae4   :  { %v1590_v16 = vmul.f32 0.35355338, %v1584_v14  ;;  %v2950_v17 = vpop.f32.mrb[41].mxu0 }
 0xae5   :  { %v1587_v18 = vpop.f32.mrb[42].mxu0 }
 0xae6   :  { %v2951_v19 = vpop.f32.mrb[43].mxu0  ;;  %v3786_v21 = vsel %vm1476_vm3, -1e+09, %v1590_v16 }
 0xae7   :  { %v1592_v22 = vsel %vm228_vm6, %v3786_v21, -inf }
 0xae8   :  { %1593 = vmax.xlane.f32.xlu0 %v1592_v22 }
 0xaeb   :  { %v1696_v23 = vpop.f32.mrb[44].mxu0 }
 0xaec   :  { %v1702_v24 = vmul.f32 0.35355338, %v1696_v23  ;;  %v2962_v20 = vpop.f32.mrb[45].mxu0 }
 0xaed   :  { %v1699_v25 = vpop.f32.mrb[46].mxu0 }
 0xaee   :  { %v2963_v26 = vpop.f32.mrb[47].mxu0  ;;  %v3791_v28 = vsel %vm1476_vm3, -1e+09, %v1702_v24 }
 0xaef   :  { %v1704_v30 = vsel %vm228_vm6, %v3791_v28, -inf }
 0xaf0   :  { %1705 = vmax.xlane.f32.xlu0 %v1704_v30 }
 0xaf3   :  { %v1808_v27 = vpop.f32.mrb[48].mxu0 }
 0xaf4   :  { %v1814_v32 = vmul.f32 0.35355338, %v1808_v27  ;;  %v2974_v33 = vpop.f32.mrb[49].mxu0 }
 0xaf5   :  { %v1811_v35 = vpop.f32.mrb[50].mxu0 }
 0xaf6   :  { %v2975_v36 = vpop.f32.mrb[51].mxu0  ;;  %v3799_v38 = vsel %vm1476_vm3, -1e+09, %v1814_v32 }
 0xaf7   :  { %v1816_v39 = vsel %vm228_vm6, %v3799_v38, -inf }
 0xaf8   :  { %1817 = vmax.xlane.f32.xlu0 %v1816_v39 }
 0xafb   :  { %v1933_v42 = vpop.f32.mrb[52].mxu0 }
 0xafc   :  { %v1939_v43 = vmul.f32 0.35355338, %v1933_v42  ;;  %v2986_v44 = vpop.f32.mrb[53].mxu0 }
 0xafd   :  { %v1936_v45 = vpop.f32.mrb[54].mxu0 }
 0xafe   :  { %v2987_v0 = vpop.f32.mrb[55].mxu0  ;;  %v3804_v47 = vsel %vm1946_vm5, -1e+09, %v1939_v43 }
 0xaff   :  { %v1948_v48 = vsel %vm228_vm6, %v3804_v47, -inf }
 0xb00   :  { %1949 = vmax.xlane.f32.xlu1 %v1948_v48 }
 0xb03   :  { %v2052_v1 = vpop.f32.mrb[56].mxu0  ;;  %v1480_v4 = vpop.xlane.xlu1 %1479 }
 0xb04   :  { %v2058_v49 = vmul.f32 0.35355338, %v2052_v1  ;;  %v2998_v50 = vpop.f32.mrb[57].mxu0  ;;  %v1481_v5 = vsub.f32 %v3781_v12, %v1480_v4 }
 0xb05   :  { %v2055_v53 = vpop.f32.mrb[58].mxu0 }
 0xb06   :  { %v2999_v54 = vpop.f32.mrb[59].mxu0  ;;  %v2059_v55 = vsel %vm1946_vm5, -1e+09, %v2058_v49  ;;  %v1482_v6 = vmul.f32 1.442695, %v1481_v5 }
 0xb07   :  { %v2060_v56 = vsel %vm228_vm6, %v2059_v55, -inf }
 0xb08   :  { %2061 = vmax.xlane.f32.xlu0 %v2060_v56  ;;  %3170 = vpow2.f32 %v1482_v6 }
 0xb0b   :  { %v2164_v51 = vpop.f32.mrb[60].mxu0 }
 0xb0c   :  { %v2170_v57 = vmul.f32 0.35355338, %v2164_v51  ;;  %v3010_v58 = vpop.f32.mrb[61].mxu0 }
 0xb0d   :  { %v2167_v59 = vpop.f32.mrb[62].mxu0 }
 0xb0e   :  { %v3011_v60 = vpop.f32.mrb[63].mxu0  ;;  %v2171_v61 = vsel %vm1946_vm5, -1e+09, %v2170_v57 }
 0xb0f   :  { %v2172_v62 = vsel %vm228_vm6, %v2171_v61, -inf }
 0xb10   :  { %2173 = vmax.xlane.f32.xlu1 %v2172_v62 }
 0xb12   :  { %v3819_v10 = vpop.eup %3170 }
 0xb13   :  { %v2276_v63 = vpop.f32.mrb[64].mxu0  ;;  %v1484_v11 = vsel %vm228_vm6, %v3819_v10, 0.0 }
 0xb14   :  { %v3022_v2 = vpop.f32.mrb[65].mxu0  ;;  %v2282_v7 = vmul.f32 0.35355338, %v2276_v63 }
 0xb15   :  { %v2279_v52 = vpop.f32.mrb[66].mxu0 }
 0xb16   :  { %v3023_v3 = vpop.f32.mrb[67].mxu0  ;;  %v2283_v8 = vsel %vm1946_vm5, -1e+09, %v2282_v7 }
 0xb17   :  { %v2284_v9 = vsel %vm228_vm6, %v2283_v8, -inf }
 0xb1e   :  { %1604 = vrot.lane.b32.xlu0 %v3709_v31, %s3237_s27 }
 0xb21   :  { %1491 = vrot.lane.b32.xlu1 %v3709_v31, %s3238_s28 }
 0xb3d   :  { %2285 = vmax.xlane.f32.xlu0 %v2284_v9 }
 0xb45   :  { %1485 = vadd.xlane.f32.xlu1 %v1484_v11 }
 0xb75   :  { %v1594_v13 = vpop.xlane.xlu0 %1593 }
 0xb76   :  { %v1595_v14 = vsub.f32 %v3786_v21, %v1594_v13 }
 0xb78   :  { %v1596_v16 = vmul.f32 1.442695, %v1595_v14 }
 0xb7a   :  { %3172 = vpow2.f32 %v1596_v16 }
 0xb7d   :  { %v1706_v12 = vpop.xlane.xlu0 %1705 }
 0xb7e   :  { %v1707_v17 = vsub.f32 %v3791_v28, %v1706_v12 }
 0xb80   :  { %v1708_v18 = vmul.f32 1.442695, %v1707_v17 }
 0xb82   :  { %3174 = vpow2.f32 %v1708_v18 }
 0xb84   :  { %v3825_v19 = vpop.eup %3172 }
 0xb85   :  { %v1598_v22 = vsel %vm228_vm6, %v3825_v19, 0.0  ;;  %v1818_v26 = vpop.xlane.xlu0 %1817 }
 0xb86   :  { %1599 = vadd.xlane.f32.xlu0 %v1598_v22  ;;  %v1819_v29 = vsub.f32 %v3799_v38, %v1818_v26 }
 0xb88   :  { %v1820_v30 = vmul.f32 1.442695, %v1819_v29 }
 0xb8a   :  { %3176 = vpow2.f32 %v1820_v30 }
 0xb8c   :  { %v3829_v23 = vpop.eup %3174 }
 0xb8d   :  { %v1710_v24 = vsel %vm228_vm6, %v3829_v23, 0.0  ;;  %v1950_v21 = vpop.xlane.xlu1 %1949 }
 0xb8e   :  { %1711 = vadd.xlane.f32.xlu1 %v1710_v24  ;;  %v1951_v27 = vsub.f32 %v3804_v47, %v1950_v21 }
 0xb90   :  { %v1952_v34 = vmul.f32 1.442695, %v1951_v27 }
 0xb92   :  { %3178 = vpow2.f32 %v1952_v34 }
 0xb94   :  { %v3177_v39 = vpop.eup %3176 }
 0xb95   :  { %v2062_v32 = vpop.xlane.xlu0 %2061  ;;  %v1822_v41 = vsel %vm228_vm6, %v3177_v39, 0.0 }
 0xb96   :  { %v2063_v33 = vsub.f32 %v2059_v55, %v2062_v32 }
 0xb98   :  { %v2064_v36 = vmul.f32 1.442695, %v2063_v33 }
 0xb99   :  { %v1605_v47 = vpop.permute.xlu0 %1604 }
 0xb9a   :  { %3180 = vpow2.f32 %v2064_v36  ;;  %v1610_v57 = vsel %vm295_vm9, %v1605_v47, 0 }
 0xb9c   :  { %1716 = vrot.lane.b32.xlu0 %v3709_v31, %s3241_s6  ;;  %v3842_v42 = vpop.eup %3178 }
 0xb9d   :  { %v2174_v20 = vpop.xlane.xlu1 %2173  ;;  %v1954_v43 = vsel %vm228_vm6, %v3842_v42, 0.0 }
 0xb9e   :  { %v2175_v35 = vsub.f32 %v2171_v61, %v2174_v20 }
 0xb9f   :  { %1828 = vrot.lane.b32.xlu1 %v3709_v31, %s4044_s3 }
 0xba0   :  { %v2176_v31 = vmul.f32 1.442695, %v2175_v35 }
 0xba1   :  { %v1492_v25 = vpop.permute.xlu1 %1491 }
 0xba2   :  { %v1497_v28 = vsel %vm295_vm9, %v1492_v25, 0  ;;  %3182 = vpow2.f32 %v2176_v31 }
 0xba3   :  { %2941 = vmatpush3.bf16.msra.mxu1 %v1497_v28 }
 0xba4   :  { %2952 = vmatprep.subr.bf16.mxu1 %v3235_v15  ;;  %v3844_v38 = vpop.eup %3180 }
 0xba5   :  { %v2066_v45 = vsel %vm228_vm6, %v3844_v38, 0.0 }
 0xbac   :  { %v3848_v44 = vpop.eup %3182 }
 0xbad   :  { %v2178_v0 = vsel %vm228_vm6, %v3848_v44, 0.0 }
 0xbbb   :  { %1823 = vadd.xlane.f32.xlu0 %v1822_v41 }
 0xbbf   :  { %1955 = vadd.xlane.f32.xlu0 %v1954_v43 }
 0xbc3   :  { %2067 = vadd.xlane.f32.xlu1 %v2066_v45  ;;  %2179 = vadd.xlane.f32.xlu0 %v2178_v0 }
 0xbca   :  { %v2286_v48 = vpop.xlane.xlu0 %2285 }
 0xbcb   :  { %v2287_v1 = vsub.f32 %v2283_v8, %v2286_v48 }
 0xbcd   :  { %v2288_v49 = vmul.f32 1.442695, %v2287_v1 }
 0xbcf   :  { %3184 = vpow2.f32 %v2288_v49 }
 0xbd2   :  { %v1486_v50 = vpop.xlane.xlu1 %1485 }
 0xbd3   :  { %3186 = vrcp.f32 %v1486_v50 }
 0xbd4   :  { %2072 = vrot.lane.b32.xlu1 %v3732_v46, %s3237_s27 }
 0xbd8   :  { %2184 = vrot.lane.b32.xlu1 %v3732_v46, %s3241_s6  ;;  %s4045_s6 = smov 8  }
 0xbd9   :  { %v3858_v53 = vpop.eup %3184 }
 0xbda   :  { %v2290_v54 = vsel %vm228_vm6, %v3858_v53, 0.0 }
 0xbdb   :  { %2291 = vadd.xlane.f32.xlu0 %v2290_v54 }
 0xbdc   :  { %2296 = vrot.lane.b32.xlu1 %v3732_v46, %s4044_s3 }
 0xbdd   :  { %v3187_v55 = vpop.eup %3186 }
 0xbde   :  { %v1488_v56 = vmul.f32 %v3187_v55, %v3819_v10 }
 0xbe0   :  { %v1489_v51 = vpack.c.bf16 %v1488_v56, %v1488_v56 }
 0xbe2   :  { %2943 = vmatmul.mubr.msk.bf16.vlgmr.msra.gmra.mrb[44].mxu1 %vm228_vm6, %v1489_v51 }
 0xbe3   :  { %2953 = vmatpush3.bf16.msra.mxu1 %v1610_v57  ;;  %2954 = vmatprep.mubr.msk.bf16.mxu1 %vm3236_vm1, %v3235_v15 }
 0xbe4   :  { %2964 = vmatprep.subr.bf16.mxu1 %v3235_v15 }
 0xbf1   :  { %1960 = vrot.lane.b32.xlu0 %v3732_v46, %s3238_s28 }
 0xc13   :  { %v1600_v58 = vpop.xlane.xlu0 %1599 }
 0xc14   :  { %3188 = vrcp.f32 %v1600_v58  ;;  %v3114_v58 = vld [vmem:[%s4006_s16] sm:$0xff]  }
 0xc15   :  { %3031 = vmatpush3.bf16.msra.mxu0 %v3114_v58 }
 0xc16   :  { %3032 = vmatprep.subr.bf16.mxu0 %v3235_v15 }
 0xc17   :  { %v1717_v62 = vpop.permute.xlu0 %1716 }
 0xc18   :  { %v1722_v2 = vsel %vm295_vm9, %v1717_v62, 0 }
 0xc1b   :  { %v1712_v59 = vpop.xlane.xlu1 %1711 }
 0xc1c   :  { %3190 = vrcp.f32 %v1712_v59 }
 0xc1e   :  { %v3189_v60 = vpop.eup %3188 }
 0xc1f   :  { %v1602_v61 = vmul.f32 %v3189_v60, %v3825_v19  ;;  %v1829_v3 = vpop.permute.xlu1 %1828 }
 0xc20   :  { %v1834_v5 = vsel %vm295_vm9, %v1829_v3, 0 }
 0xc21   :  { %v1603_v63 = vpack.c.bf16 %v1602_v61, %v1602_v61 }
 0xc23   :  { %2955 = vmatmul.mubr.msk.bf16.vlgmr.msra.gmra.mrb[48].mxu1 %vm228_vm6, %v1603_v63  ;;  %v3115_v63 = vld [vmem:[%s4006_s16 + $0x8] sm:$0xff]  }
 0xc24   :  { %2965 = vmatpush3.bf16.msra.mxu1 %v1722_v2  ;;  %2966 = vmatprep.mubr.msk.bf16.mxu1 %vm3236_vm1, %v3235_v15 }
 0xc25   :  { %2976 = vmatprep.subr.bf16.mxu1 %v3235_v15  ;;  %3033 = vmatpush3.bf16.msra.mxu0 %v3115_v63 }
 0xc26   :  { %v3191_v46 = vpop.eup %3190  ;;  %3046 = vmatprep.subr.bf16.mxu0 %v3235_v15 }
 0xc27   :  { %v1714_v52 = vmul.f32 %v3191_v46, %v3829_v23 }
 0xc29   :  { %v1715_v4 = vpack.c.bf16 %v1714_v52, %v1714_v52 }
 0xc2b   :  { %2967 = vmatmul.mubr.msk.bf16.vlgmr.msra.gmra.mrb[52].mxu1 %vm228_vm6, %v1715_v4 }
 0xc2c   :  { %2977 = vmatpush3.bf16.msra.mxu1 %v1834_v5  ;;  %2978 = vmatprep.mubr.msk.bf16.mxu1 %vm3236_vm1, %v3235_v15 }
 0xc2d   :  { %2988 = vmatprep.subr.bf16.mxu1 %v3235_v15 }
 0xc48   :  { %v1824_v6 = vpop.xlane.xlu0 %1823 }
 0xc49   :  { %3192 = vrcp.f32 %v1824_v6 }
 0xc4c   :  { %v1956_v10 = vpop.xlane.xlu0 %1955 }
 0xc4d   :  { %3194 = vrcp.f32 %v1956_v10 }
 0xc50   :  { %v2068_v11 = vpop.xlane.xlu1 %2067  ;;  %v2180_v13 = vpop.xlane.xlu0 %2179 }
 0xc51   :  { %3196 = vrcp.f32 %v2068_v11 }
 0xc52   :  { %3198 = vrcp.f32 %v2180_v13 }
 0xc53   :  { %v3193_v7 = vpop.eup %3192 }
 0xc54   :  { %v1826_v8 = vmul.f32 %v3193_v7, %v3177_v39  ;;  %v2073_v19 = vpop.permute.xlu1 %2072 }
 0xc55   :  { %v2078_v24 = vsel %vm295_vm9, %v2073_v19, 0 }
 0xc56   :  { %v1827_v9 = vpack.c.bf16 %v1826_v8, %v1826_v8 }
 0xc57   :  { %v3195_v14 = vpop.eup %3194 }
 0xc58   :  { %2979 = vmatmul.mubr.msk.bf16.vlgmr.msra.gmra.mrb[56].mxu1 %vm228_vm6, %v1827_v9  ;;  %v1958_v12 = vmul.f32 %v3195_v14, %v3842_v42  ;;  %v2185_v20 = vpop.permute.xlu1 %2184 }
 0xc59   :  { %2990 = vmatprep.mubr.msk.bf16.mxu1 %vm3236_vm1, %v3235_v15  ;;  %v2190_v28 = vsel %vm295_vm9, %v2185_v20, 0 }
 0xc5a   :  { %v1959_v22 = vpack.c.bf16 %v1958_v12, %v1958_v12 }
 0xc5b   :  { %v3197_v23 = vpop.eup %3196 }
 0xc5c   :  { %v2070_v21 = vmul.f32 %v3197_v23, %v3844_v38  ;;  %v3199_v26 = vpop.eup %3198  ;;  %v2297_v30 = vpop.permute.xlu1 %2296 }
 0xc5d   :  { %v2182_v29 = vmul.f32 %v3199_v26, %v3848_v44  ;;  %v2302_v33 = vsel %vm295_vm9, %v2297_v30, 0 }
 0xc5e   :  { %v2071_v25 = vpack.c.bf16 %v2070_v21, %v2070_v21 }
 0xc5f   :  { %v2183_v27 = vpack.c.bf16 %v2182_v29, %v2182_v29 }
 0xc68   :  { %v2292_v16 = vpop.xlane.xlu0 %2291 }
 0xc69   :  { %3200 = vrcp.f32 %v2292_v16 }
 0xc6c   :  { %v1961_v17 = vpop.permute.xlu0 %1960 }
 0xc6d   :  { %v1966_v18 = vsel %vm295_vm9, %v1961_v17, 0  ;;  %vm2597_vm9 = vcmask 523264  }
 0xc6e   :  { %2989 = vmatpush3.bf16.msra.mxu1 %v1966_v18 }
 0xc6f   :  { %3000 = vmatprep.subr.bf16.mxu1 %v3235_v15 }
 0xc71   :  { %2991 = vmatmul.mubr.msk.bf16.vlgmr.msra.gmra.mrb[60].mxu1 %vm228_vm6, %v1959_v22 }
 0xc72   :  { %3001 = vmatpush3.bf16.msra.mxu1 %v2078_v24  ;;  %3002 = vmatprep.mubr.msk.bf16.mxu1 %vm3236_vm1, %v3235_v15 }
 0xc73   :  { %3012 = vmatprep.subr.bf16.mxu1 %v3235_v15  ;;  %v3201_v32 = vpop.eup %3200 }
 0xc74   :  { %v2294_v34 = vmul.f32 %v3201_v32, %v3858_v53 }
 0xc76   :  { %v2295_v35 = vpack.c.bf16 %v2294_v34, %v2294_v34 }
 0xc79   :  { %3003 = vmatmul.mubr.msk.bf16.vlgmr.msra.gmra.mrb[64].mxu1 %vm228_vm6, %v2071_v25 }
 0xc7a   :  { %3013 = vmatpush3.bf16.msra.mxu1 %v2190_v28  ;;  %3014 = vmatprep.mubr.msk.bf16.mxu1 %vm3236_vm1, %v3235_v15  ;;  %v2703_v28 = vld [vmem:[%s4007_s17] ss:$0 sm:$0xff] }
 0xc7b   :  { %3024 = vmatprep.subr.bf16.mxu1 %v3235_v15 }
 0xc81   :  { %3015 = vmatmul.mubr.msk.bf16.vlgmr.msra.gmra.mrb[68].mxu1 %vm228_vm6, %v2183_v27 }
 0xc82   :  { %3025 = vmatpush3.bf16.msra.mxu1 %v2302_v33  ;;  %3026 = vmatprep.mubr.msk.bf16.mxu1 %vm3236_vm1, %v3235_v15 }
 0xc83   :  { %3038 = vmatprep.subr.bf16.mxu1 %v3235_v15 }
 0xc89   :  { %3027 = vmatmul.mubr.msk.bf16.vlgmr.msra.gmra.mrb[72].mxu1 %vm228_vm6, %v2295_v35 }
 0xc8a   :  { %3042 = vmatprep.mubr.msk.bf16.mxu1 %vm3236_vm1, %v3235_v15 }
 0xcb5   :  { %v1533_v36 = vpop.f32.mrb[44].mxu1 }
 0xcb6   :  { %v2944_v31 = vpop.f32.mrb[45].mxu1 }
 0xcb7   :  { %v1536_v39 = vpop.f32.mrb[46].mxu1 }
 0xcb8   :  { %v2945_v41 = vpop.f32.mrb[47].mxu1 }
 0xcf6   :  { %v1646_v42 = vpop.f32.mrb[48].mxu1 }
 0xcf7   :  { %v2956_v38 = vpop.f32.mrb[49].mxu1 }
 0xcf8   :  { %v1649_v43 = vpop.f32.mrb[50].mxu1 }
 0xcf9   :  { %v2957_v44 = vpop.f32.mrb[51].mxu1 }
 0xcfe   :  { %v1758_v45 = vpop.f32.mrb[52].mxu1 }
 0xcff   :  { %v2968_v0 = vpop.f32.mrb[53].mxu1 }
 0xd00   :  { %v1761_v47 = vpop.f32.mrb[54].mxu1 }
 0xd01   :  { %v2969_v48 = vpop.f32.mrb[55].mxu1 }
 0xd02   :  { %v3116_v48 = vld [vmem:[%s4010_s20] sm:$0xff]  }
 0xd03   :  { %3039 = vmatpush3.bf16.msra.mxu1 %v3116_v48 }
 0xd04   :  { %3040 = vmatprep.subr.bf16.mxu1 %v3235_v15 }
 0xd2b   :  { %v1870_v1 = vpop.f32.mrb[56].mxu1 }
 0xd2c   :  { %v2980_v49 = vpop.f32.mrb[57].mxu1 }
 0xd2d   :  { %v1873_v50 = vpop.f32.mrb[58].mxu1  ;;  %v3118_v49 = vld [vmem:[%s4012_s22] sm:$0xff]  }
 0xd2e   :  { %v2981_v53 = vpop.f32.mrb[59].mxu1  ;;  %v3119_v50 = vld [vmem:[%s4012_s22 + $0x8] sm:$0xff]  }
 0xd44   :  { %v2002_v54 = vpop.f32.mrb[60].mxu1 }
 0xd45   :  { %v2992_v55 = vpop.f32.mrb[61].mxu1 }
 0xd46   :  { %v2005_v56 = vpop.f32.mrb[62].mxu1 }
 0xd47   :  { %v2993_v51 = vpop.f32.mrb[63].mxu1 }
 0xd4c   :  { %v2114_v57 = vpop.f32.mrb[64].mxu1 }
 0xd4d   :  { %v3091_v59 = vpack.i.bf16 %v2114_v57, %v1646_v42  ;;  %v3004_v60 = vpop.f32.mrb[65].mxu1 }
 0xd4e   :  { %v2117_v61 = vpop.f32.mrb[66].mxu1 }
 0xd4f   :  { %3092 = vrot.lane.b32.xlu1 %v3091_v59, %s4045_s6  ;;  %v3005_v62 = vpop.f32.mrb[67].mxu1 }
 0xd54   :  { %v2226_v2 = vpop.f32.mrb[68].mxu1 }
 0xd55   :  { %v3096_v46 = vpack.i.bf16 %v2226_v2, %v1758_v45  ;;  %v3016_v52 = vpop.f32.mrb[69].mxu1 }
 0xd56   :  { %v2229_v3 = vpop.f32.mrb[70].mxu1 }
 0xd57   :  { %3097 = vrot.lane.b32.xlu1 %v3096_v46, %s4046_s5  ;;  %v3017_v4 = vpop.f32.mrb[71].mxu1 }
 0xd58   :  { %v2707_v4 = vld [vmem:[%s4008_s18] ss:$0 sm:$0xff] }
 0xd5c   :  { %v2338_v5 = vpop.f32.mrb[72].mxu1 }
 0xd5d   :  { %v3101_v6 = vpack.i.bf16 %v2338_v5, %v1870_v1  ;;  %v3028_v7 = vpop.f32.mrb[73].mxu1  ;;  %v3117_v1 = vld [vmem:[%s4010_s20 + $0x8] sm:$0xff]  }
 0xd5e   :  { %v2341_v8 = vpop.f32.mrb[74].mxu1  ;;  %3041 = vmatpush3.bf16.msra.mxu1 %v3117_v1 }
 0xd5f   :  { %3102 = vrot.lane.b32.xlu1 %v3101_v6, %s4047_s7  ;;  %v3029_v9 = vpop.f32.mrb[75].mxu1 }
 0xdc1   :  { %v3093_v10 = vpop.permute.xlu1 %3092 }
 0xdc2   :  { %v3095_v13 = vunpack.i.h.bf16 %v3093_v10  ;;  %v3094_v14 = vunpack.i.l.bf16 %v3093_v10  ;;  %v2708_v10 = vld [vmem:[%s4009_s19] ss:$0 sm:$0xff] }
 0xdc4   :  { %v2356_v18 = vsel %vm228_vm6, %v2002_v54, %v3095_v13  ;;  %v1888_v19 = vsel %vm228_vm6, %v1533_v36, %v3094_v14 }
 0xdc9   :  { %v3098_v11 = vpop.permute.xlu1 %3097 }
 0xdca   :  { %v3100_v16 = vunpack.i.h.bf16 %v3098_v11  ;;  %v3099_v12 = vunpack.i.l.bf16 %v3098_v11 }
 0xdcc   :  { %v2357_v24 = vsel %vm688_vm10, %v2356_v18, %v3100_v16  ;;  %v1889_v21 = vsel %vm688_vm10, %v1888_v19, %v3099_v12  ;;  %v3120_v12 = vld [vmem:[%s4012_s22 + $0x10] sm:$0xff]   ;;  %v2709_v18 = vld [vmem:[%s4011_s21] ss:$0 sm:$0xff] }
 0xdd1   :  { %v3103_v17 = vpop.permute.xlu1 %3102 }
 0xdd2   :  { %v3105_v22 = vunpack.i.h.bf16 %v3103_v17  ;;  %v3104_v23 = vunpack.i.l.bf16 %v3103_v17  ;;  %v3121_v17 = vld [vmem:[%s4012_s22 + $0x18] sm:$0xff]  }
 0xdd4   :  { %v2358_v20 = vsel %vm690_vm11, %v2357_v24, %v3105_v22  ;;  %v1890_v25 = vsel %vm690_vm11, %v1889_v21, %v3104_v23 }
 0xdd5   :  { %v2359_v26 = vpack.c.bf16 %v2358_v20, %v1890_v25 }
 0xdd7   :  { %3035 = vmatmul.mubr.msk.bf16.vlgmr.msra.gmra.mrb[68].mxu0 %vm96_vm0, %v2359_v26 }
 0xdd8   :  { %3054 = vmatprep.mubr.msk.bf16.mxu0 %vm3236_vm1, %v3235_v15  ;;  %3047 = vmatpush3.bf16.msra.mxu0 %v3118_v49 }
 0xdd9   :  { %3048 = vmatprep.subr.bf16.mxu0 %v3235_v15 }
 0xddc   :  { %3049 = vmatpush3.bf16.msra.mxu0 %v3119_v50 }
 0xddd   :  { %3050 = vmatprep.subr.bf16.mxu0 %v3235_v15 }
 0xde0   :  { %3051 = vmatpush3.bf16.msra.mxu0 %v3120_v12 }
 0xde1   :  { %3052 = vmatprep.subr.bf16.mxu0 %v3235_v15  ;;  %v2713_v15 = vld [vmem:[#allocation2] ss:$0 sm:$0xff] }
 0xde4   :  { %3053 = vmatpush3.bf16.msra.mxu0 %v3121_v17 }
 0xeaa   :  { %v2420_v29 = vpop.f32.mrb[68].mxu0 }
 0xeab   :  { %v2421_v30 = vadd.f32 %v2703_v28, %v2420_v29  ;;  %v3036_v27 = vpop.f32.mrb[69].mxu0 }
 0xeac   :  { %v2423_v32 = vpop.f32.mrb[70].mxu0 }
 0xead   :  { %v3935_v33 = vadd.f32 %v2421_v30, %v3659_v37  ;;  %v2424_v34 = vadd.f32 %v2703_v28, %v2423_v32  ;;  %v3037_v35 = vpop.f32.mrb[71].mxu0 }
 0xeaf   :  { %v3938_v36 = vadd.f32 %v2424_v34, %v3662_v40  ;;  %v2431_v31 = vsel %vm96_vm0, %v3935_v33, 0.0 }
 0xeb0   :  { %2432 = vadd.xlane.f32.xlu0 %v2431_v31 }
 0xeb1   :  { %v2434_v39 = vsel %vm96_vm0, %v3938_v36, 0.0 }
 0xeb2   :  { %2435 = vadd.xlane.f32.xlu1 %v2434_v39 }
 0xf3d   :  { %v2433_v41 = vpop.xlane.xlu0 %2432 }
 0xf3e   :  { %v2437_v42 = vmul.f32 0.03125, %v2433_v41 }
 0xf3f   :  { %v2436_v38 = vpop.xlane.xlu1 %2435 }
 0xf40   :  { %v2439_v43 = vsub.f32 %v3935_v33, %v2437_v42  ;;  %v2438_v37 = vmul.f32 0.03125, %v2436_v38 }
 0xf42   :  { %v2440_v44 = vsub.f32 %v3938_v36, %v2438_v37  ;;  %v2441_v45 = vmul.f32 %v2439_v43, %v2439_v43  ;;  %v2457_v6 = vmul.f32 %v2707_v4, %v2439_v43 }
 0xf44   :  { %v2443_v40 = vsel %vm96_vm0, %v2441_v45, 0.0  ;;  %v2442_v0 = vmul.f32 %v2440_v44, %v2440_v44  ;;  %v2458_v7 = vmul.f32 %v2707_v4, %v2440_v44 }
 0xf45   :  { %2444 = vadd.xlane.f32.xlu0 %v2443_v40 }
 0xf46   :  { %v2446_v47 = vsel %vm96_vm0, %v2442_v0, 0.0 }
 0xf49   :  { %2447 = vadd.xlane.f32.xlu0 %v2446_v47 }
 0xfd2   :  { %v2445_v53 = vpop.xlane.xlu0 %2444 }
 0xfd3   :  { %v2449_v54 = vmul.f32 0.032258064, %v2445_v53 }
 0xfd5   :  { %3202 = vrsqrt.f32 %v2449_v54  ;;  %vm2461_vm1 = vcmp.eq.f32.partialorder %v2449_v54, inf  ;;  %v2464_v58 = vand.u32 2147483648, %v2449_v54  ;;  %vm2463_vm6 = vcmp.eq.f32.partialorder %v2449_v54, 0.0 }
 0xfd6   :  { %v2448_v55 = vpop.xlane.xlu0 %2447 }
 0xfd7   :  { %v2450_v56 = vmul.f32 0.032258064, %v2448_v55 }
 0xfd9   :  { %3204 = vrsqrt.f32 %v2450_v56  ;;  %vm2468_vm7 = vcmp.eq.f32.partialorder %v2450_v56, inf  ;;  %v2471_v2 = vand.u32 2147483648, %v2450_v56  ;;  %vm2470_vm8 = vcmp.eq.f32.partialorder %v2450_v56, 0.0 }
 0xfdf   :  { %v3203_v51 = vpop.eup %3202 }
 0xfe0   :  { %v2460_v57 = vmul.f32 %v3203_v51, %v2449_v54 }
 0xfe2   :  { %v2462_v59 = vsel %vm2461_vm1, %v2449_v54, %v2460_v57 }
 0xfe3   :  { %v3205_v60 = vpop.eup %3204  ;;  %v2465_v61 = vsel %vm2463_vm6, %v2464_v58, %v2462_v59 }
 0xfe4   :  { %v2473_v62 = vadd.f32 1e-06, %v2465_v61  ;;  %v2467_v63 = vmul.f32 %v3205_v60, %v2450_v56 }
 0xfe6   :  { %3206 = vrcp.f32 %v2473_v62  ;;  %v2469_v46 = vsel %vm2468_vm7, %v2450_v56, %v2467_v63 }
 0xfe7   :  { %v2472_v52 = vsel %vm2470_vm8, %v2471_v2, %v2469_v46 }
 0xfe8   :  { %v2474_v3 = vadd.f32 1e-06, %v2472_v52 }
 0xfea   :  { %3208 = vrcp.f32 %v2474_v3 }
 0xff0   :  { %v3207_v5 = vpop.eup %3206 }
 0xff1   :  { %v2476_v8 = vmul.f32 %v3207_v5, %v2457_v6 }
 0xff3   :  { %v2485_v13 = vadd.f32 %v2708_v10, %v2476_v8 }
 0xff4   :  { %v3209_v9 = vpop.eup %3208 }
 0xff5   :  { %v2478_v11 = vmul.f32 %v3209_v9, %v2458_v7 }
 0xff7   :  { %v2486_v14 = vadd.f32 %v2708_v10, %v2478_v11 }
 0xff9   :  { %v2487_v16 = vpack.c.bf16 %v2486_v14, %v2485_v13 }
 0xffb   :  { %3043 = vmatmul.mubr.msk.bf16.vlgmr.msra.gmra.mrb[76].mxu1 %vm96_vm0, %v2487_v16 }
0x10ce   :  { %v2548_v19 = vpop.f32.mrb[76].mxu1 }
0x10cf   :  { %v2549_v22 = vadd.f32 %v2709_v18, %v2548_v19  ;;  %v3044_v23 = vpop.f32.mrb[77].mxu1 }
0x10d0   :  { %v2551_v24 = vpop.f32.mrb[78].mxu1 }
0x10d1   :  { %v2552_v21 = vadd.f32 %v2709_v18, %v2551_v24  ;;  %v3045_v20 = vpop.f32.mrb[79].mxu1  ;;  %v2555_v25 = vmax.f32 %v2549_v22, 0.0 }
0x10d3   :  { %v2556_v26 = vmax.f32 %v2552_v21, 0.0 }
0x10d5   :  { %v2557_v28 = vpack.c.bf16 %v2556_v26, %v2555_v25 }
0x10d7   :  { %3055 = vmatmul.mubr.msk.bf16.vlgmr.msra.gmra.mrb[72].mxu0 %vm2597_vm9, %v2557_v28 }
0x11aa   :  { %v2635_v29 = vpop.f32.mrb[72].mxu0 }
0x11ab   :  { %v2636_v30 = vadd.f32 %v2713_v15, %v2635_v29  ;;  %v3056_v27 = vpop.f32.mrb[73].mxu0 }
0x11ac   :  { %v2638_v32 = vpop.f32.mrb[74].mxu0 }
0x11ad   :  { %v2642_v34 = vadd.f32 %v2636_v30, %v3935_v33  ;;  %v2639_v35 = vadd.f32 %v2713_v15, %v2638_v32  ;;  %v3057_v31 = vpop.f32.mrb[75].mxu0 }
0x11af   :  { %2644 = vst.msk [vmem:[%s4014_s24] sm:$0xff] %vm96_vm0, %v2642_v34  ;;  %v2643_v39 = vadd.f32 %v2639_v35, %v3938_v36 }
0x11b1   :  { %2645 = vst.msk [vmem:[%s4014_s24 + $0x8] sm:$0xff] %vm96_vm0, %v2643_v39 }
0x11b2   :  { %2650 = vsyncpa [#allocation3], 1 }

// kernel: transformer_forward.7
= control target key start
LH: loop header
LB: loop body
LE: loop exit
PB: predicated region body
PF: predicated region fallthrough
CT: control target
= control target key end

     0   :  { %vm84_vm0 = vcmask 261120   ;;  %v3196_v14 = vmov 0.0   ;;  %vm3197_vm1 = vmmov 0   ;;  %s3200_s29 = smov 120   ;;  %s3203_s30 = smov 104   ;;  %vm216_vm6 = vcmask 64512   ;;  %s3942_s0 = inlined_call_operand.vmem [shape: f32[16,32], index: 0, kind: input, shape index: {}]   ;;  %s3943_s6 = inlined_call_operand.vmem [shape: bf16[32,96], index: 6, kind: input, shape index: {}]   ;;  %s3944_s4 = inlined_call_operand.vmem [shape: f32[1,32], index: 4, kind: input, shape index: {}]   ;;  %s3945_s5 = inlined_call_operand.vmem [shape: f32[1,32], index: 5, kind: input, shape index: {}]   ;;  %s3946_s7 = inlined_call_operand.vmem [shape: f32[1,96], index: 7, kind: input, shape index: {}]   ;;  %s3947_s3 = inlined_call_operand.vmem [shape: s32[2,8,8], index: 3, kind: input, shape index: {}]   ;;  %s3948_s8 = inlined_call_operand.vmem [shape: bf16[32,32], index: 8, kind: input, shape index: {}]   ;;  %s3949_s9 = inlined_call_operand.vmem [shape: f32[1,32], index: 9, kind: input, shape index: {}]   ;;  %s3950_s14 = inlined_call_operand.vmem [shape: bf16[32,64], index: 14, kind: input, shape index: {}]   ;;  %s3951_s1 = inlined_call_operand.vmem [shape: f32[16,32], index: 1, kind: input, shape index: {}]   ;;  %s3952_s12 = inlined_call_operand.vmem [shape: bf16[32,32], index: 12, kind: input, shape index: {}]   ;;  %s3953_s10 = inlined_call_operand.vmem [shape: f32[1,32], index: 10, kind: input, shape index: {}]   ;;  %s3954_s11 = inlined_call_operand.vmem [shape: f32[1,32], index: 11, kind: input, shape index: {}]   ;;  %s3955_s15 = inlined_call_operand.vmem [shape: f32[1,64], index: 15, kind: input, shape index: {}]   ;;  %s3956_s13 = inlined_call_operand.vmem [shape: f32[1,32], index: 13, kind: input, shape index: {}]   ;;  %s3957_s2 = inlined_call_operand.vmem [shape: s32[2,1,8], index: 2, kind: input, shape index: {}]   ;;  %s3958_s16 = inlined_call_operand.vmem [shape: bf16[32,32], index: 16, kind: input, shape index: {}]   ;;  %s3959_s17 = inlined_call_operand.vmem [shape: f32[1,32], index: 17, kind: input, shape index: {}]   ;;  %s3960_s20 = inlined_call_operand.vmem [shape: bf16[32,64], index: 20, kind: input, shape index: {}]   ;;  %s3961_s22 = inlined_call_operand.vmem [shape: bf16[64,32], index: 22, kind: input, shape index: {}]   ;;  %s3962_s18 = inlined_call_operand.vmem [shape: f32[1,32], index: 18, kind: input, shape index: {}]   ;;  %s3963_s19 = inlined_call_operand.vmem [shape: f32[1,32], index: 19, kind: input, shape index: {}]   ;;  %s3964_s21 = inlined_call_operand.vmem [shape: f32[1,64], index: 21, kind: input, shape index: {}]   ;;  %s3965_s23 = inlined_call_operand.vmem [shape: f32[1,32], index: 23, kind: input, shape index: {}]   ;;  %s3966_s24 = inlined_call_operand.vmem [shape: f32[16,32], index: 24, kind: output, shape index: {}]  }
   0x1   :  { %3979 = sst [smem:[#allocation2_spill]] %s3942_s0  ;;  %2793 = vmatprep.subr.bf16.mxu1 %v3196_v14  ;;  %2797 = vmatprep.mubr.msk.bf16.mxu1 %vm3197_vm1, %v3196_v14  ;;  %s3205_s25 = smov 56   ;;  %vm283_vm9 = vcmask 1043456   ;;  %vm676_vm10 = vcmask 130048   ;;  %vm678_vm11 = vcmask 195584  }
   0x2   :  { %3980 = sst [smem:[#allocation3_spill]] %s3943_s6  ;;  %s3988_s27 = sld [smem:[#allocation2_spill]]  ;;  %2807 = vmatprep.subr.bf16.mxu0 %v3196_v14  ;;  %2809 = vmatprep.mubr.msk.bf16.mxu0 %vm3197_vm1, %v3196_v14 }
   0x3   :  { %3981 = sst [smem:[#allocation4_spill]] %s3944_s4  ;;  %s3989_s0 = sld [smem:[#allocation3_spill]] }
   0x4   :  { %3982 = sst [smem:[#allocation5_spill]] %s3945_s5  ;;  %s3199_s4 = smov 96  }
   0x5   :  { %3983 = sst [smem:[#allocation6_spill]] %s3946_s7  ;;  %s3975_s5 = smov 72  }
   0x6   :  { %3984 = sst [smem:[#allocation7_spill]] %s3947_s3  ;;  %s3991_s3 = sld [smem:[#allocation5_spill]] }
   0x7   :  { %3985 = sst [smem:[#allocation8_spill]] %s3948_s8  ;;  %s3992_s28 = sld [smem:[#allocation6_spill]] }
   0x8   :  { %3986 = sst [smem:[#allocation9_spill]] %s3949_s9  ;;  %v3341_v0 = vld [vmem:[%s3988_s27] sm:$0xff]  ;;  %v3346_v1 = vld [vmem:[%s3988_s27 + $0x8] sm:$0xff]  ;;  %s3198_s8 = smov 88  }
   0x9   :  { %3987 = sst [smem:[#allocation10_spill]] %s3950_s14  ;;  %v85_v2 = vsel %vm84_vm0, %v3341_v0, 0.0  ;;  %v88_v3 = vsel %vm84_vm0, %v3346_v1, 0.0  ;;  %v3092_v15 = vld [vmem:[%s3989_s0] sm:$0xff]   ;;  %v3093_v16 = vld [vmem:[%s3989_s0 + $0x8] sm:$0xff]   ;;  %s3990_s14 = sld [smem:[#allocation4_spill]] }
   0xa   :  { %86 = vadd.xlane.f32.xlu0 %v85_v2  ;;  %2794 = vmatpush3.bf16.msra.mxu1 %v3092_v15  ;;  %s3201_s0 = smov 112   ;;  %s3977_s9 = smov 80  }
   0xb   :  { %2795 = vmatprep.subr.bf16.mxu1 %v3196_v14  ;;  %s3993_s6 = sld [smem:[#allocation7_spill]]  ;;  %s3973_s26 = smov 16  }
   0xc   :  { %v2639_v39 = vld [vmem:[%s3991_s3] ss:$0 sm:$0xff]  ;;  %s3206_s3 = smov 64   ;;  %s3996_s7 = sld [smem:[#allocation10_spill]] }
   0xd   :  { %v2640_v44 = vld [vmem:[%s3992_s28] ss:$0 sm:$0xff]  ;;  %s3207_s28 = smov 48   ;;  %s4000_s27 = smov 16  }
   0xe   :  { %89 = vadd.xlane.f32.xlu0 %v88_v3  ;;  %2796 = vmatpush3.bf16.msra.mxu1 %v3093_v16 }
   0xf   :  { %2801 = vmatprep.subr.bf16.mxu1 %v3196_v14  ;;  %v2638_v33 = vld [vmem:[%s3990_s14] ss:$0 sm:$0xff]  ;;  %s3208_s14 = smov 40  }
  0x97   :  { %v87_v4 = vpop.xlane.xlu0 %86 }
  0x98   :  { %v92_v5 = vmul.f32 0.03125, %v87_v4 }
  0x9a   :  { %v94_v6 = vsub.f32 %v3341_v0, %v92_v5 }
  0x9b   :  { %v90_v7 = vpop.xlane.xlu0 %89 }
  0x9c   :  { %v93_v8 = vmul.f32 0.03125, %v90_v7  ;;  %v96_v9 = vmul.f32 %v94_v6, %v94_v6  ;;  %v112_v35 = vmul.f32 %v2638_v33, %v94_v6 }
  0x9e   :  { %v95_v10 = vsub.f32 %v3346_v1, %v93_v8  ;;  %v98_v11 = vsel %vm84_vm0, %v96_v9, 0.0 }
  0x9f   :  { %99 = vadd.xlane.f32.xlu1 %v98_v11 }
  0xa0   :  { %v97_v12 = vmul.f32 %v95_v10, %v95_v10  ;;  %v113_v36 = vmul.f32 %v2638_v33, %v95_v10 }
  0xa2   :  { %v101_v13 = vsel %vm84_vm0, %v97_v12, 0.0 }
  0xa3   :  { %102 = vadd.xlane.f32.xlu1 %v101_v13  ;;  %v210_v13 = vld [vmem:[%s3993_s6] sm:$0xff] }
  0xa4   :  { %vm264_vm7 = vcmp.eq.s32.totalorder %v210_v13, 0 }
 0x12c   :  { %v100_v17 = vpop.xlane.xlu1 %99 }
 0x12d   :  { %v104_v18 = vmul.f32 0.032258064, %v100_v17 }
 0x12f   :  { %3108 = vrsqrt.f32 %v104_v18  ;;  %vm116_vm2 = vcmp.eq.f32.partialorder %v104_v18, inf  ;;  %v119_v23 = vand.u32 2147483648, %v104_v18  ;;  %vm118_vm3 = vcmp.eq.f32.partialorder %v104_v18, 0.0 }
 0x130   :  { %v103_v19 = vpop.xlane.xlu1 %102 }
 0x131   :  { %v105_v20 = vmul.f32 0.032258064, %v103_v19 }
 0x133   :  { %3110 = vrsqrt.f32 %v105_v20  ;;  %vm123_vm4 = vcmp.eq.f32.partialorder %v105_v20, inf  ;;  %v126_v29 = vand.u32 2147483648, %v105_v20  ;;  %vm125_vm5 = vcmp.eq.f32.partialorder %v105_v20, 0.0 }
 0x139   :  { %v3109_v21 = vpop.eup %3108 }
 0x13a   :  { %v115_v22 = vmul.f32 %v3109_v21, %v104_v18 }
 0x13c   :  { %v117_v24 = vsel %vm116_vm2, %v104_v18, %v115_v22 }
 0x13d   :  { %v3111_v25 = vpop.eup %3110  ;;  %v120_v26 = vsel %vm118_vm3, %v119_v23, %v117_v24 }
 0x13e   :  { %v128_v27 = vadd.f32 1e-06, %v120_v26  ;;  %v122_v28 = vmul.f32 %v3111_v25, %v105_v20 }
 0x140   :  { %3112 = vrcp.f32 %v128_v27  ;;  %v124_v30 = vsel %vm123_vm4, %v105_v20, %v122_v28 }
 0x141   :  { %v127_v31 = vsel %vm125_vm5, %v126_v29, %v124_v30 }
 0x142   :  { %v129_v32 = vadd.f32 1e-06, %v127_v31 }
 0x144   :  { %3114 = vrcp.f32 %v129_v32 }
 0x14a   :  { %v3113_v34 = vpop.eup %3112 }
 0x14b   :  { %v131_v37 = vmul.f32 %v3113_v34, %v112_v35 }
 0x14d   :  { %v140_v41 = vadd.f32 %v2639_v39, %v131_v37 }
 0x14e   :  { %v3115_v38 = vpop.eup %3114 }
 0x14f   :  { %v133_v40 = vmul.f32 %v3115_v38, %v113_v36 }
 0x151   :  { %v141_v42 = vadd.f32 %v2639_v39, %v133_v40 }
 0x153   :  { %v142_v43 = vpack.c.bf16 %v141_v42, %v140_v41  ;;  %v211_v41 = vld [vmem:[%s3993_s6 + $0x8] sm:$0xff] }
 0x154   :  { %vm730_vm8 = vcmp.eq.s32.totalorder %v211_v41, 0 }
 0x155   :  { %2798 = vmatmul.mubr.msk.bf16.vlgmr.msra.gmra.mrb[0].mxu1 %vm84_vm0, %v142_v43 }
 0x156   :  { %2803 = vmatprep.mubr.msk.bf16.mxu1 %vm3197_vm1, %v3196_v14 }
 0x228   :  { %v203_v45 = vpop.f32.mrb[0].mxu1 }
 0x229   :  { %v2799_v46 = vpop.f32.mrb[1].mxu1  ;;  %v204_v48 = vadd.f32 %v2640_v44, %v203_v45 }
 0x22a   :  { %v206_v47 = vpop.f32.mrb[2].mxu1 }
 0x22b   :  { %v207_v49 = vadd.f32 %v2640_v44, %v206_v47  ;;  %v2800_v50 = vpop.f32.mrb[3].mxu1 }
 0x22d   :  { %v3382_v51 = vpack.c.bf16 %v207_v49, %v204_v48 }
 0x22f   :  { %329 = vrot.lane.b32.xlu1 %v3382_v51, %s3198_s8  ;;  %214 = vrot.lane.b32.xlu0 %v3382_v51, %s3199_s4  ;;  %v3397_v52 = vrot.slane %v3382_v51, 4 }
 0x233   :  { %327 = vrot.lane.b32.xlu1 %v3382_v51, %s3200_s29  ;;  %439 = vrot.lane.b32.xlu0 %v3382_v51, %s3201_s0 }
 0x237   :  { %441 = vrot.lane.b32.xlu1 %v3382_v51, %s3977_s9  ;;  %551 = vrot.lane.b32.xlu0 %v3382_v51, %s3203_s30 }
 0x23b   :  { %553 = vrot.lane.b32.xlu1 %v3382_v51, %s3975_s5  ;;  %794 = vrot.lane.b32.xlu0 %v3397_v52, %s3198_s8 }
 0x23f   :  { %906 = vrot.lane.b32.xlu0 %v3397_v52, %s3977_s9  ;;  %681 = vrot.lane.b32.xlu1 %v3397_v52, %s3199_s4 }
 0x243   :  { %1018 = vrot.lane.b32.xlu0 %v3397_v52, %s3975_s5  ;;  %792 = vrot.lane.b32.xlu1 %v3397_v52, %s3200_s29 }
 0x247   :  { %904 = vrot.lane.b32.xlu1 %v3397_v52, %s3201_s0 }
 0x24b   :  { %1016 = vrot.lane.b32.xlu1 %v3397_v52, %s3203_s30 }
 0x24f   :  { %391 = vrot.lane.b32.xlu1 %v3382_v51, %s3205_s25 }
 0x2a1   :  { %v215_v53 = vpop.permute.xlu0 %214  ;;  %v330_v55 = vpop.permute.xlu1 %329 }
 0x2a2   :  { %v221_v54 = vsel %vm216_vm6, %v215_v53, 0  ;;  %v335_v57 = vsel %vm216_vm6, %v330_v55, 0 }
 0x2a3   :  { %2802 = vmatpush3.bf16.xpose.msra.mxu1 %v221_v54 }
 0x2a4   :  { %2813 = vmatprep.subr.bf16.mxu1 %v3196_v14 }
 0x2a5   :  { %v328_v56 = vpop.permute.xlu1 %327  ;;  %v440_v61 = vpop.permute.xlu0 %439 }
 0x2a9   :  { %v442_v58 = vpop.permute.xlu1 %441  ;;  %v552_v2 = vpop.permute.xlu0 %551 }
 0x2aa   :  { %2804 = vmatmul.mubr.msk.bf16.vlgmr.msra.gmra.mrb[4].mxu1 %vm216_vm6, %v3382_v51  ;;  %v447_v59 = vsel %vm216_vm6, %v442_v58, 0 }
 0x2ab   :  { %2814 = vmatpush3.bf16.xpose.msra.mxu1 %v335_v57  ;;  %2815 = vmatprep.mubr.msk.bf16.mxu1 %vm3197_vm1, %v3196_v14 }
 0x2ac   :  { %2825 = vmatprep.subr.bf16.mxu1 %v3196_v14 }
 0x2ad   :  { %v554_v60 = vpop.permute.xlu1 %553  ;;  %v795_v4 = vpop.permute.xlu0 %794 }
 0x2ae   :  { %v559_v62 = vsel %vm216_vm6, %v554_v60, 0  ;;  %v800_v5 = vsel %vm216_vm6, %v795_v4, 0 }
 0x2b1   :  { %v682_v63 = vpop.permute.xlu1 %681  ;;  %v907_v6 = vpop.permute.xlu0 %906 }
 0x2b2   :  { %2816 = vmatmul.mubr.msk.bf16.vlgmr.msra.gmra.mrb[8].mxu1 %vm216_vm6, %v328_v56  ;;  %v687_v3 = vsel %vm216_vm6, %v682_v63, 0  ;;  %v912_v8 = vsel %vm216_vm6, %v907_v6, 0 }
 0x2b3   :  { %2826 = vmatpush3.bf16.xpose.msra.mxu1 %v447_v59  ;;  %2827 = vmatprep.mubr.msk.bf16.mxu1 %vm3197_vm1, %v3196_v14 }
 0x2b4   :  { %2837 = vmatprep.subr.bf16.mxu1 %v3196_v14 }
 0x2b5   :  { %v793_v7 = vpop.permute.xlu1 %792  ;;  %v1019_v9 = vpop.permute.xlu0 %1018 }
 0x2b6   :  { %v1024_v11 = vsel %vm216_vm6, %v1019_v9, 0 }
 0x2b9   :  { %v905_v10 = vpop.permute.xlu1 %904 }
 0x2ba   :  { %2828 = vmatmul.mubr.msk.bf16.vlgmr.msra.gmra.mrb[12].mxu1 %vm216_vm6, %v440_v61 }
 0x2bb   :  { %2838 = vmatpush3.bf16.xpose.msra.mxu1 %v559_v62  ;;  %2839 = vmatprep.mubr.msk.bf16.mxu1 %vm3197_vm1, %v3196_v14 }
 0x2bc   :  { %2849 = vmatprep.subr.bf16.mxu1 %v3196_v14 }
 0x2bd   :  { %v1017_v12 = vpop.permute.xlu1 %1016 }
 0x2c2   :  { %2840 = vmatmul.mubr.msk.bf16.vlgmr.msra.gmra.mrb[16].mxu1 %vm216_vm6, %v552_v2 }
 0x2c3   :  { %2850 = vmatpush3.bf16.xpose.msra.mxu1 %v687_v3  ;;  %2851 = vmatprep.mubr.msk.bf16.mxu1 %vm3197_vm1, %v3196_v14 }
 0x2c4   :  { %2861 = vmatprep.subr.bf16.mxu1 %v3196_v14 }
 0x2ca   :  { %2852 = vmatmul.mubr.msk.bf16.vlgmr.msra.gmra.mrb[20].mxu1 %vm216_vm6, %v3397_v52 }
 0x2cb   :  { %2862 = vmatpush3.bf16.xpose.msra.mxu1 %v800_v5  ;;  %2863 = vmatprep.mubr.msk.bf16.mxu1 %vm3197_vm1, %v3196_v14 }
 0x2cc   :  { %2873 = vmatprep.subr.bf16.mxu1 %v3196_v14 }
 0x2d2   :  { %2864 = vmatmul.mubr.msk.bf16.vlgmr.msra.gmra.mrb[24].mxu1 %vm216_vm6, %v793_v7 }
 0x2d3   :  { %2874 = vmatpush3.bf16.xpose.msra.mxu1 %v912_v8  ;;  %2875 = vmatprep.mubr.msk.bf16.mxu1 %vm3197_vm1, %v3196_v14 }
 0x2d4   :  { %2885 = vmatprep.subr.bf16.mxu1 %v3196_v14 }
 0x2da   :  { %2876 = vmatmul.mubr.msk.bf16.vlgmr.msra.gmra.mrb[28].mxu1 %vm216_vm6, %v905_v10 }
 0x2db   :  { %2886 = vmatpush3.bf16.xpose.msra.mxu1 %v1024_v11  ;;  %2887 = vmatprep.mubr.msk.bf16.mxu1 %vm3197_vm1, %v3196_v14 }
 0x2dc   :  { %2897 = vmatprep.subr.bf16.mxu1 %v3196_v14 }
 0x2e2   :  { %2888 = vmatmul.mubr.msk.bf16.vlgmr.msra.gmra.mrb[32].mxu1 %vm216_vm6, %v1017_v12 }
 0x2e3   :  { %2901 = vmatprep.mubr.msk.bf16.mxu1 %vm3197_vm1, %v3196_v14 }
 0x37d   :  { %v257_v15 = vpop.f32.mrb[4].mxu1 }
 0x37e   :  { %v263_v16 = vmul.f32 0.35355338, %v257_v15  ;;  %v2805_v17 = vpop.f32.mrb[5].mxu1 }
 0x37f   :  { %v260_v18 = vpop.f32.mrb[6].mxu1 }
 0x380   :  { %v2806_v19 = vpop.f32.mrb[7].mxu1  ;;  %v3463_v20 = vsel %vm264_vm7, -1e+09, %v263_v16  ;;  %v3498_v16 = vpop.permute.xlu1 %391 }
 0x381   :  { %v266_v21 = vsel %vm216_vm6, %v3463_v20, -inf }
 0x382   :  { %267 = vmax.xlane.f32.xlu0 %v266_v21 }
 0x385   :  { %v371_v22 = vpop.f32.mrb[8].mxu1 }
 0x386   :  { %v377_v23 = vmul.f32 0.35355338, %v371_v22  ;;  %v2817_v24 = vpop.f32.mrb[9].mxu1 }
 0x387   :  { %v374_v25 = vpop.f32.mrb[10].mxu1 }
 0x388   :  { %v2818_v26 = vpop.f32.mrb[11].mxu1  ;;  %v3468_v27 = vsel %vm264_vm7, -1e+09, %v377_v23 }
 0x389   :  { %v379_v28 = vsel %vm216_vm6, %v3468_v27, -inf }
 0x38a   :  { %380 = vmax.xlane.f32.xlu1 %v379_v28 }
 0x38d   :  { %v483_v29 = vpop.f32.mrb[12].mxu1 }
 0x38e   :  { %v2829_v30 = vpop.f32.mrb[13].mxu1  ;;  %v489_v53 = vmul.f32 0.35355338, %v483_v29 }
 0x38f   :  { %v486_v31 = vpop.f32.mrb[14].mxu1 }
 0x390   :  { %v2830_v32 = vpop.f32.mrb[15].mxu1  ;;  %v490_v57 = vsel %vm264_vm7, -1e+09, %v489_v53 }
 0x391   :  { %v491_v61 = vsel %vm216_vm6, %v490_v57, -inf }
 0x395   :  { %v595_v33 = vpop.f32.mrb[16].mxu1 }
 0x396   :  { %v2841_v34 = vpop.f32.mrb[17].mxu1  ;;  %v601_v56 = vmul.f32 0.35355338, %v595_v33 }
 0x397   :  { %v598_v35 = vpop.f32.mrb[18].mxu1 }
 0x398   :  { %278 = vrot.lane.b32.xlu0 %v3382_v51, %s3206_s3  ;;  %v2842_v36 = vpop.f32.mrb[19].mxu1  ;;  %v602_v2 = vsel %vm264_vm7, -1e+09, %v601_v56 }
 0x399   :  { %v603_v6 = vsel %vm216_vm6, %v602_v2, -inf }
 0x39d   :  { %v723_v37 = vpop.f32.mrb[20].mxu1 }
 0x39e   :  { %v2853_v38 = vpop.f32.mrb[21].mxu1  ;;  %v729_v62 = vmul.f32 0.35355338, %v723_v37 }
 0x39f   :  { %v726_v39 = vpop.f32.mrb[22].mxu1 }
 0x3a0   :  { %v2854_v40 = vpop.f32.mrb[23].mxu1  ;;  %v731_v8 = vsel %vm730_vm8, -1e+09, %v729_v62 }
 0x3a1   :  { %v732_v9 = vsel %vm216_vm6, %v731_v8, -inf }
 0x3a5   :  { %v836_v42 = vpop.f32.mrb[24].mxu1 }
 0x3a6   :  { %v842_v43 = vmul.f32 0.35355338, %v836_v42  ;;  %v2865_v44 = vpop.f32.mrb[25].mxu1 }
 0x3a7   :  { %v839_v45 = vpop.f32.mrb[26].mxu1 }
 0x3a8   :  { %v2866_v46 = vpop.f32.mrb[27].mxu1  ;;  %v3478_v47 = vsel %vm730_vm8, -1e+09, %v842_v43 }
 0x3a9   :  { %v844_v48 = vsel %vm216_vm6, %v3478_v47, -inf }
 0x3aa   :  { %845 = vmax.xlane.f32.xlu1 %v844_v48 }
 0x3ad   :  { %v948_v49 = vpop.f32.mrb[28].mxu1 }
 0x3ae   :  { %v2877_v50 = vpop.f32.mrb[29].mxu1  ;;  %v954_v7 = vmul.f32 0.35355338, %v948_v49 }
 0x3af   :  { %v951_v54 = vpop.f32.mrb[30].mxu1 }
 0x3b0   :  { %v2878_v55 = vpop.f32.mrb[31].mxu1  ;;  %v955_v10 = vsel %vm730_vm8, -1e+09, %v954_v7 }
 0x3b1   :  { %v956_v11 = vsel %vm216_vm6, %v955_v10, -inf }
 0x3b5   :  { %v1060_v58 = vpop.f32.mrb[32].mxu1 }
 0x3b6   :  { %v1066_v59 = vmul.f32 0.35355338, %v1060_v58  ;;  %v2889_v60 = vpop.f32.mrb[33].mxu1 }
 0x3b7   :  { %492 = vmax.xlane.f32.xlu0 %v491_v61  ;;  %v1063_v63 = vpop.f32.mrb[34].mxu1 }
 0x3b8   :  { %v2890_v3 = vpop.f32.mrb[35].mxu1  ;;  %v3486_v4 = vsel %vm730_vm8, -1e+09, %v1066_v59  ;;  %v397_v63 = vsel %vm283_vm9, %v3498_v16, 0 }
 0x3b9   :  { %v1068_v5 = vsel %vm216_vm6, %v3486_v4, -inf }
 0x3ba   :  { %1069 = vmax.xlane.f32.xlu1 %v1068_v5 }
 0x3bb   :  { %604 = vmax.xlane.f32.xlu0 %v603_v6 }
 0x3bf   :  { %733 = vmax.xlane.f32.xlu0 %v732_v9 }
 0x3c3   :  { %957 = vmax.xlane.f32.xlu0 %v956_v11 }
 0x3d9   :  { %503 = vrot.lane.b32.xlu0 %v3382_v51, %s3207_s28 }
 0x40f   :  { %v268_v12 = vpop.xlane.xlu0 %267 }
 0x410   :  { %v269_v13 = vsub.f32 %v3463_v20, %v268_v12 }
 0x412   :  { %v270_v15 = vmul.f32 1.442695, %v269_v13 }
 0x413   :  { %v279_v17 = vpop.permute.xlu0 %278 }
 0x414   :  { %3116 = vpow2.f32 %v270_v15  ;;  %v285_v18 = vsel %vm283_vm9, %v279_v17, 0 }
 0x415   :  { %2808 = vmatpush3.bf16.msra.mxu0 %v285_v18 }
 0x416   :  { %2819 = vmatprep.subr.bf16.mxu0 %v3196_v14 }
 0x417   :  { %v381_v19 = vpop.xlane.xlu1 %380 }
 0x418   :  { %v382_v21 = vsub.f32 %v3468_v27, %v381_v19 }
 0x41a   :  { %v383_v22 = vmul.f32 1.442695, %v382_v21 }
 0x41c   :  { %3118 = vpow2.f32 %v383_v22 }
 0x41e   :  { %v3117_v23 = vpop.eup %3116 }
 0x41f   :  { %v272_v24 = vsel %vm216_vm6, %v3117_v23, 0.0 }
 0x420   :  { %273 = vadd.xlane.f32.xlu0 %v272_v24 }
 0x426   :  { %v3504_v20 = vpop.eup %3118 }
 0x427   :  { %v385_v25 = vsel %vm216_vm6, %v3504_v20, 0.0 }
 0x428   :  { %386 = vadd.xlane.f32.xlu1 %v385_v25 }
 0x437   :  { %v846_v32 = vpop.xlane.xlu1 %845 }
 0x438   :  { %v847_v35 = vsub.f32 %v3478_v47, %v846_v32 }
 0x439   :  { %744 = vrot.lane.b32.xlu1 %v3397_v52, %s3206_s3  ;;  %s3994_s3 = sld [smem:[#allocation8_spill]] }
 0x43a   :  { %v848_v38 = vmul.f32 1.442695, %v847_v35 }
 0x444   :  { %v493_v26 = vpop.xlane.xlu0 %492 }
 0x445   :  { %v494_v28 = vsub.f32 %v490_v57, %v493_v26 }
 0x447   :  { %v495_v29 = vmul.f32 1.442695, %v494_v28  ;;  %v1070_v49 = vpop.xlane.xlu1 %1069 }
 0x448   :  { %v605_v30 = vpop.xlane.xlu0 %604  ;;  %v1071_v50 = vsub.f32 %v3486_v4, %v1070_v49 }
 0x449   :  { %3120 = vpow2.f32 %v495_v29  ;;  %v606_v27 = vsub.f32 %v602_v2, %v605_v30 }
 0x44a   :  { %v1072_v54 = vmul.f32 1.442695, %v1071_v50 }
 0x44b   :  { %v607_v31 = vmul.f32 1.442695, %v606_v27 }
 0x44c   :  { %v734_v33 = vpop.xlane.xlu0 %733 }
 0x44d   :  { %v735_v34 = vsub.f32 %v731_v8, %v734_v33  ;;  %3122 = vpow2.f32 %v607_v31 }
 0x44f   :  { %v736_v36 = vmul.f32 1.442695, %v735_v34 }
 0x450   :  { %v958_v46 = vpop.xlane.xlu0 %957 }
 0x451   :  { %3124 = vpow2.f32 %v736_v36  ;;  %v959_v47 = vsub.f32 %v955_v10, %v958_v46 }
 0x452   :  { %3126 = vpow2.f32 %v848_v38 }
 0x453   :  { %v3121_v37 = vpop.eup %3120  ;;  %v960_v48 = vmul.f32 1.442695, %v959_v47 }
 0x454   :  { %v497_v39 = vsel %vm216_vm6, %v3121_v37, 0.0  ;;  %v504_v57 = vpop.permute.xlu0 %503 }
 0x455   :  { %498 = vadd.xlane.f32.xlu0 %v497_v39  ;;  %3128 = vpow2.f32 %v960_v48  ;;  %v509_v4 = vsel %vm283_vm9, %v504_v57, 0 }
 0x456   :  { %3130 = vpow2.f32 %v1072_v54 }
 0x457   :  { %v3512_v40 = vpop.eup %3122 }
 0x458   :  { %v609_v41 = vsel %vm216_vm6, %v3512_v40, 0.0 }
 0x45b   :  { %v3516_v42 = vpop.eup %3124 }
 0x45c   :  { %v738_v43 = vsel %vm216_vm6, %v3516_v42, 0.0  ;;  %v3520_v44 = vpop.eup %3126 }
 0x45d   :  { %610 = vadd.xlane.f32.xlu1 %v609_v41  ;;  %v850_v45 = vsel %vm216_vm6, %v3520_v44, 0.0 }
 0x45f   :  { %v3528_v53 = vpop.eup %3128 }
 0x460   :  { %v962_v55 = vsel %vm216_vm6, %v3528_v53, 0.0  ;;  %v3532_v56 = vpop.eup %3130 }
 0x461   :  { %739 = vadd.xlane.f32.xlu1 %v738_v43 }
 0x465   :  { %851 = vadd.xlane.f32.xlu1 %v850_v45 }
 0x46b   :  { %615 = vrot.lane.b32.xlu0 %v3382_v51, %s3208_s14  ;;  %v1074_v51 = vsel %vm216_vm6, %v3532_v56, 0.0 }
 0x476   :  { %856 = vrot.lane.b32.xlu1 %v3397_v52, %s3205_s25  ;;  %s3974_s25 = smov 8  }
 0x48a   :  { %963 = vadd.xlane.f32.xlu0 %v962_v55 }
 0x49a   :  { %1075 = vadd.xlane.f32.xlu1 %v1074_v51 }
 0x4a0   :  { %968 = vrot.lane.b32.xlu0 %v3397_v52, %s3207_s28  ;;  %s4001_s28 = smov 24  }
 0x4ab   :  { %1080 = vrot.lane.b32.xlu1 %v3397_v52, %s3208_s14  ;;  %s3972_s14 = smov 24  }
 0x4ad   :  { %v274_v58 = vpop.xlane.xlu0 %273 }
 0x4ae   :  { %3132 = vrcp.f32 %v274_v58 }
 0x4b5   :  { %v387_v59 = vpop.xlane.xlu1 %386 }
 0x4b6   :  { %3134 = vrcp.f32 %v387_v59 }
 0x4b8   :  { %v3133_v60 = vpop.eup %3132 }
 0x4b9   :  { %v276_v61 = vmul.f32 %v3133_v60, %v3117_v23  ;;  %v745_v6 = vpop.permute.xlu1 %744 }
 0x4ba   :  { %v750_v21 = vsel %vm283_vm9, %v745_v6, 0 }
 0x4bb   :  { %v277_v62 = vpack.c.bf16 %v276_v61, %v276_v61 }
 0x4bd   :  { %2810 = vmatmul.mubr.msk.bf16.vlgmr.msra.gmra.mrb[0].mxu0 %vm216_vm6, %v277_v62 }
 0x4be   :  { %2820 = vmatpush3.bf16.msra.mxu0 %v397_v63  ;;  %2821 = vmatprep.mubr.msk.bf16.mxu0 %vm3197_vm1, %v3196_v14 }
 0x4bf   :  { %2831 = vmatprep.subr.bf16.mxu0 %v3196_v14 }
 0x4c0   :  { %v3135_v2 = vpop.eup %3134 }
 0x4c1   :  { %v389_v52 = vmul.f32 %v3135_v2, %v3504_v20 }
 0x4c3   :  { %v390_v3 = vpack.c.bf16 %v389_v52, %v389_v52 }
 0x4c5   :  { %2822 = vmatmul.mubr.msk.bf16.vlgmr.msra.gmra.mrb[4].mxu0 %vm216_vm6, %v390_v3  ;;  %v3094_v3 = vld [vmem:[%s3994_s3] sm:$0xff]  }
 0x4c6   :  { %2832 = vmatpush3.bf16.msra.mxu0 %v509_v4  ;;  %2833 = vmatprep.mubr.msk.bf16.mxu0 %vm3197_vm1, %v3196_v14 }
 0x4c7   :  { %2843 = vmatprep.subr.bf16.mxu0 %v3196_v14  ;;  %2898 = vmatpush3.bf16.msra.mxu1 %v3094_v3 }
 0x4c8   :  { %2899 = vmatprep.subr.bf16.mxu1 %v3196_v14 }
 0x4e2   :  { %v499_v5 = vpop.xlane.xlu0 %498 }
 0x4e3   :  { %3136 = vrcp.f32 %v499_v5 }
 0x4e6   :  { %v616_v11 = vpop.permute.xlu0 %615 }
 0x4e7   :  { %v621_v13 = vsel %vm283_vm9, %v616_v11, 0 }
 0x4ea   :  { %v611_v7 = vpop.xlane.xlu1 %610 }
 0x4eb   :  { %3138 = vrcp.f32 %v611_v7 }
 0x4ed   :  { %v3137_v8 = vpop.eup %3136 }
 0x4ee   :  { %v501_v9 = vmul.f32 %v3137_v8, %v3121_v37  ;;  %v740_v10 = vpop.xlane.xlu1 %739 }
 0x4ef   :  { %3140 = vrcp.f32 %v740_v10 }
 0x4f0   :  { %v502_v12 = vpack.c.bf16 %v501_v9, %v501_v9  ;;  %v3095_v9 = vld [vmem:[%s3994_s3 + $0x8] sm:$0xff]   ;;  %s3995_s3 = sld [smem:[#allocation9_spill]] }
 0x4f1   :  { %2900 = vmatpush3.bf16.msra.mxu1 %v3095_v9 }
 0x4f2   :  { %2834 = vmatmul.mubr.msk.bf16.vlgmr.msra.gmra.mrb[8].mxu0 %vm216_vm6, %v502_v12  ;;  %v852_v15 = vpop.xlane.xlu1 %851  ;;  %2913 = vmatprep.subr.bf16.mxu1 %v3196_v14 }
 0x4f3   :  { %2844 = vmatpush3.bf16.msra.mxu0 %v621_v13  ;;  %2845 = vmatprep.mubr.msk.bf16.mxu0 %vm3197_vm1, %v3196_v14  ;;  %3142 = vrcp.f32 %v852_v15 }
 0x4f4   :  { %2855 = vmatprep.subr.bf16.mxu0 %v3196_v14 }
 0x4f5   :  { %v3139_v16 = vpop.eup %3138 }
 0x4f6   :  { %v613_v17 = vmul.f32 %v3139_v16, %v3512_v40  ;;  %v857_v23 = vpop.permute.xlu1 %856 }
 0x4f7   :  { %v862_v25 = vsel %vm283_vm9, %v857_v23, 0 }
 0x4f8   :  { %v614_v18 = vpack.c.bf16 %v613_v17, %v613_v17 }
 0x4f9   :  { %v3141_v19 = vpop.eup %3140 }
 0x4fa   :  { %2846 = vmatmul.mubr.msk.bf16.vlgmr.msra.gmra.mrb[12].mxu0 %vm216_vm6, %v614_v18  ;;  %v742_v22 = vmul.f32 %v3141_v19, %v3516_v42 }
 0x4fb   :  { %2856 = vmatpush3.bf16.msra.mxu0 %v750_v21  ;;  %2857 = vmatprep.mubr.msk.bf16.mxu0 %vm3197_vm1, %v3196_v14 }
 0x4fc   :  { %2867 = vmatprep.subr.bf16.mxu0 %v3196_v14  ;;  %v743_v24 = vpack.c.bf16 %v742_v22, %v742_v22 }
 0x4fd   :  { %v3143_v20 = vpop.eup %3142 }
 0x4fe   :  { %v854_v26 = vmul.f32 %v3143_v20, %v3520_v44 }
 0x500   :  { %v855_v28 = vpack.c.bf16 %v854_v26, %v854_v26 }
 0x502   :  { %2858 = vmatmul.mubr.msk.bf16.vlgmr.msra.gmra.mrb[16].mxu0 %vm216_vm6, %v743_v24 }
 0x503   :  { %2868 = vmatpush3.bf16.msra.mxu0 %v862_v25  ;;  %2869 = vmatprep.mubr.msk.bf16.mxu0 %vm3197_vm1, %v3196_v14 }
 0x504   :  { %2879 = vmatprep.subr.bf16.mxu0 %v3196_v14 }
 0x50a   :  { %2870 = vmatmul.mubr.msk.bf16.vlgmr.msra.gmra.mrb[20].mxu0 %vm216_vm6, %v855_v28 }
 0x50b   :  { %2881 = vmatprep.mubr.msk.bf16.mxu0 %vm3197_vm1, %v3196_v14 }
 0x517   :  { %v964_v29 = vpop.xlane.xlu0 %963 }
 0x518   :  { %3144 = vrcp.f32 %v964_v29 }
 0x51b   :  { %v969_v30 = vpop.permute.xlu0 %968 }
 0x51c   :  { %v974_v27 = vsel %vm283_vm9, %v969_v30, 0 }
 0x51d   :  { %2880 = vmatpush3.bf16.msra.mxu0 %v974_v27 }
 0x51e   :  { %2891 = vmatprep.subr.bf16.mxu0 %v3196_v14 }
 0x522   :  { %v3145_v31 = vpop.eup %3144 }
 0x523   :  { %v966_v32 = vmul.f32 %v3145_v31, %v3528_v53 }
 0x525   :  { %v967_v33 = vpack.c.bf16 %v966_v32, %v966_v32  ;;  %v2660_v32 = vld [vmem:[%s3995_s3] ss:$0 sm:$0xff] }
 0x527   :  { %2882 = vmatmul.mubr.msk.bf16.vlgmr.msra.gmra.mrb[24].mxu0 %vm216_vm6, %v967_v33  ;;  %v1076_v34 = vpop.xlane.xlu1 %1075 }
 0x528   :  { %3146 = vrcp.f32 %v1076_v34  ;;  %2893 = vmatprep.mubr.msk.bf16.mxu0 %vm3197_vm1, %v3196_v14 }
 0x52b   :  { %v1081_v35 = vpop.permute.xlu1 %1080 }
 0x52c   :  { %v1086_v36 = vsel %vm283_vm9, %v1081_v35, 0 }
 0x52d   :  { %2892 = vmatpush3.bf16.msra.mxu0 %v1086_v36 }
 0x52e   :  { %2905 = vmatprep.subr.bf16.mxu0 %v3196_v14 }
 0x532   :  { %v3147_v37 = vpop.eup %3146 }
 0x533   :  { %v1078_v38 = vmul.f32 %v3147_v37, %v3532_v56 }
 0x535   :  { %v1079_v39 = vpack.c.bf16 %v1078_v38, %v1078_v38 }
 0x537   :  { %2894 = vmatmul.mubr.msk.bf16.vlgmr.msra.gmra.mrb[28].mxu0 %vm216_vm6, %v1079_v39 }
 0x538   :  { %2909 = vmatprep.mubr.msk.bf16.mxu0 %vm3197_vm1, %v3196_v14 }
 0x590   :  { %v321_v40 = vpop.f32.mrb[0].mxu0 }
 0x591   :  { %v2811_v41 = vpop.f32.mrb[1].mxu0 }
 0x592   :  { %v324_v42 = vpop.f32.mrb[2].mxu0 }
 0x593   :  { %v2812_v43 = vpop.f32.mrb[3].mxu0 }
 0x598   :  { %v433_v44 = vpop.f32.mrb[4].mxu0 }
 0x599   :  { %v2823_v45 = vpop.f32.mrb[5].mxu0 }
 0x59a   :  { %v436_v46 = vpop.f32.mrb[6].mxu0 }
 0x59b   :  { %v2824_v47 = vpop.f32.mrb[7].mxu0 }
 0x5c5   :  { %v545_v48 = vpop.f32.mrb[8].mxu0 }
 0x5c6   :  { %v2835_v49 = vpop.f32.mrb[9].mxu0 }
 0x5c7   :  { %v548_v50 = vpop.f32.mrb[10].mxu0 }
 0x5c8   :  { %v2836_v53 = vpop.f32.mrb[11].mxu0 }
 0x5c9   :  { %v3096_v53 = vld [vmem:[%s3996_s7] sm:$0xff]  }
 0x5cd   :  { %v657_v54 = vpop.f32.mrb[12].mxu0 }
 0x5ce   :  { %v2847_v55 = vpop.f32.mrb[13].mxu0 }
 0x5cf   :  { %v660_v56 = vpop.f32.mrb[14].mxu0  ;;  %v80_v55 = vld [vmem:[%s3951_s1] sm:$0xff] }
 0x5d0   :  { %v2848_v51 = vpop.f32.mrb[15].mxu0  ;;  %v81_v56 = vld [vmem:[%s3951_s1 + $0x8] sm:$0xff] }
 0x5d1   :  { %v1339_v51 = vpack.c.bf16 %v81_v56, %v80_v55 }
 0x5d5   :  { %v786_v57 = vpop.f32.mrb[16].mxu0 }
 0x5d6   :  { %v2859_v58 = vpop.f32.mrb[17].mxu0 }
 0x5d7   :  { %v789_v59 = vpop.f32.mrb[18].mxu0  ;;  %v3099_v58 = vld [vmem:[%s3952_s12 + $0x8] sm:$0xff]  }
 0x5d8   :  { %v2860_v60 = vpop.f32.mrb[19].mxu0 }
 0x5dd   :  { %v898_v61 = vpop.f32.mrb[20].mxu0 }
 0x5de   :  { %v3062_v62 = vpack.i.bf16 %v898_v61, %v433_v44  ;;  %v2871_v63 = vpop.f32.mrb[21].mxu0 }
 0x5df   :  { %v901_v2 = vpop.f32.mrb[22].mxu0 }
 0x5e0   :  { %3063 = vrot.lane.b32.xlu0 %v3062_v62, %s3974_s25  ;;  %v2872_v52 = vpop.f32.mrb[23].mxu0 }
 0x5fa   :  { %v1010_v4 = vpop.f32.mrb[24].mxu0 }
 0x5fb   :  { %v3067_v5 = vpack.i.bf16 %v1010_v4, %v545_v48  ;;  %v2883_v6 = vpop.f32.mrb[25].mxu0 }
 0x5fc   :  { %v1013_v7 = vpop.f32.mrb[26].mxu0 }
 0x5fd   :  { %3068 = vrot.lane.b32.xlu1 %v3067_v5, %s3973_s26  ;;  %v2884_v8 = vpop.f32.mrb[27].mxu0  ;;  %s3998_s26 = smov 72  }
 0x60a   :  { %v1122_v10 = vpop.f32.mrb[28].mxu0 }
 0x60b   :  { %v3072_v11 = vpack.i.bf16 %v1122_v10, %v657_v54  ;;  %v2895_v12 = vpop.f32.mrb[29].mxu0  ;;  %v3097_v54 = vld [vmem:[%s3996_s7 + $0x8] sm:$0xff]  }
 0x60c   :  { %v1125_v13 = vpop.f32.mrb[30].mxu0  ;;  %v2664_v12 = vld [vmem:[%s3953_s10] ss:$0 sm:$0xff] }
 0x60d   :  { %3073 = vrot.lane.b32.xlu0 %v3072_v11, %s3972_s14  ;;  %v2896_v15 = vpop.f32.mrb[31].mxu0  ;;  %s3999_s14 = smov 8  }
 0x652   :  { %v3064_v16 = vpop.permute.xlu0 %3063 }
 0x653   :  { %v3066_v18 = vunpack.i.h.bf16 %v3064_v16  ;;  %v3065_v19 = vunpack.i.l.bf16 %v3064_v16 }
 0x655   :  { %v1140_v24 = vsel %vm216_vm6, %v786_v57, %v3066_v18  ;;  %v675_v20 = vsel %vm216_vm6, %v321_v40, %v3065_v19  ;;  %v3098_v57 = vld [vmem:[%s3952_s12] sm:$0xff]  }
 0x656   :  { %2906 = vmatpush3.bf16.msra.mxu0 %v3098_v57  ;;  %v2665_v19 = vld [vmem:[%s3954_s11] ss:$0 sm:$0xff] }
 0x657   :  { %2907 = vmatprep.subr.bf16.mxu0 %v3196_v14 }
 0x65a   :  { %2908 = vmatpush3.bf16.msra.mxu0 %v3099_v58 }
 0x65b   :  { %2921 = vmatprep.subr.bf16.mxu0 %v3196_v14 }
 0x66f   :  { %v3069_v17 = vpop.permute.xlu1 %3068 }
 0x670   :  { %v3071_v21 = vunpack.i.h.bf16 %v3069_v17  ;;  %v3070_v22 = vunpack.i.l.bf16 %v3069_v17 }
 0x672   :  { %v1141_v28 = vsel %vm676_vm10, %v1140_v24, %v3071_v21  ;;  %v677_v29 = vsel %vm676_vm10, %v675_v20, %v3070_v22  ;;  %v2670_v20 = vld [vmem:[%s3955_s15] ss:$0 sm:$0xff] }
 0x67f   :  { %v3074_v23 = vpop.permute.xlu0 %3073 }
 0x680   :  { %v3076_v25 = vunpack.i.h.bf16 %v3074_v23  ;;  %v3075_v26 = vunpack.i.l.bf16 %v3074_v23 }
 0x682   :  { %v679_v30 = vsel %vm678_vm11, %v677_v29, %v3075_v26  ;;  %v1142_v27 = vsel %vm678_vm11, %v1141_v28, %v3076_v25 }
 0x683   :  { %v1143_v31 = vpack.c.bf16 %v1142_v27, %v679_v30 }
 0x685   :  { %2902 = vmatmul.mubr.msk.bf16.vlgmr.msra.gmra.mrb[36].mxu1 %vm84_vm0, %v1143_v31 }
 0x686   :  { %2917 = vmatprep.mubr.msk.bf16.mxu1 %vm3197_vm1, %v3196_v14  ;;  %2914 = vmatpush3.bf16.msra.mxu1 %v3096_v53 }
 0x687   :  { %2915 = vmatprep.subr.bf16.mxu1 %v3196_v14 }
 0x68a   :  { %2916 = vmatpush3.bf16.msra.mxu1 %v3097_v54 }
 0x68b   :  { %2927 = vmatprep.subr.bf16.mxu1 %v3196_v14 }
 0x68d   :  { %2918 = vmatmul.mubr.msk.bf16.vlgmr.msra.gmra.mrb[40].mxu1 %vm84_vm0, %v1339_v51 }
 0x68e   :  { %2929 = vmatprep.mubr.msk.bf16.mxu1 %vm3197_vm1, %v3196_v14 }
 0x758   :  { %v1204_v33 = vpop.f32.mrb[36].mxu1 }
 0x759   :  { %v1205_v34 = vadd.f32 %v2660_v32, %v1204_v33  ;;  %v2903_v35 = vpop.f32.mrb[37].mxu1  ;;  %v2666_v33 = vld [vmem:[%s3956_s13] ss:$0 sm:$0xff] }
 0x75a   :  { %v1207_v36 = vpop.f32.mrb[38].mxu1 }
 0x75b   :  { %v3608_v37 = vadd.f32 %v1205_v34, %v3341_v0  ;;  %v1208_v38 = vadd.f32 %v2660_v32, %v1207_v36  ;;  %v2904_v39 = vpop.f32.mrb[39].mxu1 }
 0x75d   :  { %v3611_v40 = vadd.f32 %v1208_v38, %v3346_v1  ;;  %v1215_v41 = vsel %vm84_vm0, %v3608_v37, 0.0 }
 0x75e   :  { %1216 = vadd.xlane.f32.xlu1 %v1215_v41 }
 0x75f   :  { %v1218_v42 = vsel %vm84_vm0, %v3611_v40, 0.0 }
 0x760   :  { %1219 = vadd.xlane.f32.xlu0 %v1218_v42  ;;  %v1400_v25 = vpop.f32.mrb[40].mxu1 }
 0x761   :  { %v1401_v26 = vadd.f32 %v2670_v20, %v1400_v25  ;;  %v2919_v28 = vpop.f32.mrb[41].mxu1 }
 0x762   :  { %v1403_v29 = vpop.f32.mrb[42].mxu1 }
 0x763   :  { %v1404_v30 = vadd.f32 %v2670_v20, %v1403_v29  ;;  %v2920_v27 = vpop.f32.mrb[43].mxu1  ;;  %v1408_v29 = vld [vmem:[%s3957_s2 + $0x1] sm:$0x1] }
 0x764   :  { %vm1928_vm4 = vcmp.eq.s32.totalorder %v1408_v29, 0 }
 0x765   :  { %v3658_v31 = vpack.c.bf16 %v1404_v30, %v1401_v26 }
 0x767   :  { %v1415_v32 = vsel %vm216_vm6, %v3658_v31, 0 }
 0x76f   :  { %1530 = vrot.lane.b32.xlu1 %v3658_v31, %s3200_s29 }
 0x773   :  { %1642 = vrot.lane.b32.xlu1 %v3658_v31, %s3201_s0 }
 0x7eb   :  { %v1217_v43 = vpop.xlane.xlu1 %1216 }
 0x7ec   :  { %v1221_v44 = vmul.f32 0.03125, %v1217_v43 }
 0x7ed   :  { %v1220_v45 = vpop.xlane.xlu0 %1219 }
 0x7ee   :  { %v1223_v46 = vsub.f32 %v3608_v37, %v1221_v44  ;;  %v1222_v0 = vmul.f32 0.03125, %v1220_v45 }
 0x7ef   :  { %v1531_v43 = vpop.permute.xlu1 %1530 }
 0x7f0   :  { %v1224_v47 = vsub.f32 %v3611_v40, %v1222_v0  ;;  %v1225_v48 = vmul.f32 %v1223_v46, %v1223_v46  ;;  %v1241_v15 = vmul.f32 %v2664_v12, %v1223_v46  ;;  %v1536_v44 = vsel %vm216_vm6, %v1531_v43, 0 }
 0x7f1   :  { %v3681_v46 = vrot.slane %v3658_v31, 4 }
 0x7f2   :  { %v1227_v1 = vsel %vm84_vm0, %v1225_v48, 0.0  ;;  %v1226_v49 = vmul.f32 %v1224_v47, %v1224_v47  ;;  %v1242_v16 = vmul.f32 %v2664_v12, %v1224_v47 }
 0x7f3   :  { %1228 = vadd.xlane.f32.xlu0 %v1227_v1  ;;  %v1643_v0 = vpop.permute.xlu1 %1642  ;;  %v1885_v54 = vsel %vm216_vm6, %v3681_v46, 0 }
 0x7f4   :  { %v1230_v50 = vsel %vm84_vm0, %v1226_v49, 0.0  ;;  %v1648_v1 = vsel %vm216_vm6, %v1643_v0, 0 }
 0x7f7   :  { %1231 = vadd.xlane.f32.xlu0 %v1230_v50 }
 0x880   :  { %v1229_v59 = vpop.xlane.xlu0 %1228 }
 0x881   :  { %v1233_v60 = vmul.f32 0.032258064, %v1229_v59 }
 0x883   :  { %3148 = vrsqrt.f32 %v1233_v60  ;;  %vm1245_vm12 = vcmp.eq.f32.partialorder %v1233_v60, inf  ;;  %v1248_v52 = vand.u32 2147483648, %v1233_v60  ;;  %vm1247_vm13 = vcmp.eq.f32.partialorder %v1233_v60, 0.0 }
 0x884   :  { %v1232_v61 = vpop.xlane.xlu0 %1231 }
 0x885   :  { %v1234_v62 = vmul.f32 0.032258064, %v1232_v61 }
 0x887   :  { %3150 = vrsqrt.f32 %v1234_v62  ;;  %vm1252_vm14 = vcmp.eq.f32.partialorder %v1234_v62, inf  ;;  %v1255_v8 = vand.u32 2147483648, %v1234_v62  ;;  %vm1254_vm15 = vcmp.eq.f32.partialorder %v1234_v62, 0.0 }
 0x88d   :  { %v3149_v63 = vpop.eup %3148 }
 0x88e   :  { %v1244_v2 = vmul.f32 %v3149_v63, %v1233_v60  ;;  %v1460_v63 = vlaneseq }
 0x890   :  { %v1246_v3 = vsel %vm1245_vm12, %v1233_v60, %v1244_v2  ;;  %v1407_v2 = vld [vmem:[%s3957_s2] sm:$0x1]  ;;  %s3997_s2 = smov 80  }
 0x891   :  { %v3151_v4 = vpop.eup %3150  ;;  %v1249_v5 = vsel %vm1247_vm13, %v1248_v52, %v1246_v3  ;;  %v1461_v52 = vshrl.u32 %v1460_v63, 7  ;;  %vm1458_vm2 = vcmp.eq.s32.totalorder %v1407_v2, 0 }
 0x892   :  { %v1257_v6 = vadd.f32 1e-06, %v1249_v5  ;;  %v1251_v7 = vmul.f32 %v3151_v4, %v1234_v62  ;;  %v3212_v4 = vmov 0  }
 0x893   :  { %v1462_v3 = vsub.s32 0, %v1461_v52  ;;  %v1459_v5 = vsel %vm1458_vm2, 1, %v3212_v4 }
 0x894   :  { %3152 = vrcp.f32 %v1257_v6  ;;  %v1253_v9 = vsel %vm1252_vm14, %v1234_v62, %v1251_v7 }
 0x895   :  { %v1256_v10 = vsel %vm1254_vm15, %v1255_v8, %v1253_v9  ;;  %v1463_v6 = vrot.slane %v1459_v5, %v1462_v3 }
 0x896   :  { %v1258_v11 = vadd.f32 1e-06, %v1256_v10 }
 0x897   :  { %vm1464_vm3 = vcmp.eq.s32.totalorder %v1463_v6, 1 }
 0x898   :  { %3154 = vrcp.f32 %v1258_v11 }
 0x89e   :  { %v3153_v13 = vpop.eup %3152 }
 0x89f   :  { %v1260_v17 = vmul.f32 %v3153_v13, %v1241_v15 }
 0x8a1   :  { %v1269_v22 = vadd.f32 %v2665_v19, %v1260_v17 }
 0x8a2   :  { %v3155_v18 = vpop.eup %3154 }
 0x8a3   :  { %v1262_v21 = vmul.f32 %v3155_v18, %v1242_v16 }
 0x8a5   :  { %v1270_v23 = vadd.f32 %v2665_v19, %v1262_v21 }
 0x8a7   :  { %v1271_v24 = vpack.c.bf16 %v1270_v23, %v1269_v22 }
 0x8a9   :  { %2910 = vmatmul.mubr.msk.bf16.vlgmr.msra.gmra.mrb[32].mxu0 %vm84_vm0, %v1271_v24 }
 0x8aa   :  { %2923 = vmatprep.mubr.msk.bf16.mxu0 %vm3197_vm1, %v3196_v14  ;;  %2922 = vmatpush3.bf16.xpose.msra.mxu0 %v1415_v32 }
 0x8ab   :  { %2933 = vmatprep.subr.bf16.mxu0 %v3196_v14 }
 0x97c   :  { %v1332_v34 = vpop.f32.mrb[32].mxu0 }
 0x97d   :  { %v2911_v35 = vpop.f32.mrb[33].mxu0  ;;  %v1333_v38 = vadd.f32 %v2666_v33, %v1332_v34  ;;  %v1929_v34 = vsel %vm1928_vm4, 1, %v3212_v4 }
 0x97e   :  { %v1335_v36 = vpop.f32.mrb[34].mxu0 }
 0x97f   :  { %v1336_v39 = vadd.f32 %v2666_v33, %v1335_v36  ;;  %v2912_v41 = vpop.f32.mrb[35].mxu0 }
 0x980   :  { %v1933_v41 = vrot.slane %v1929_v34, %v1462_v3 }
 0x981   :  { %v1409_v42 = vpack.c.bf16 %v1336_v39, %v1333_v38 }
 0x982   :  { %vm1934_vm5 = vcmp.eq.s32.totalorder %v1933_v41, 1 }
 0x983   :  { %1528 = vrot.lane.b32.xlu0 %v1409_v42, %s3200_s29  ;;  %1640 = vrot.lane.b32.xlu1 %v1409_v42, %s3201_s0  ;;  %v1879_v45 = vrot.slane %v1409_v42, 4 }
 0x984   :  { %2924 = vmatmul.mubr.msk.bf16.vlgmr.msra.gmra.mrb[36].mxu0 %vm216_vm6, %v1409_v42 }
 0x985   :  { %2934 = vmatpush3.bf16.xpose.msra.mxu0 %v1536_v44  ;;  %2935 = vmatprep.mubr.msk.bf16.mxu0 %vm3197_vm1, %v3196_v14 }
 0x986   :  { %2945 = vmatprep.subr.bf16.mxu0 %v3196_v14 }
 0x987   :  { %1752 = vrot.lane.b32.xlu0 %v1409_v42, %s3203_s30  ;;  %1754 = vrot.lane.b32.xlu1 %v3658_v31, %s3203_s30 }
 0x98b   :  { %1996 = vrot.lane.b32.xlu0 %v1879_v45, %s3200_s29  ;;  %1998 = vrot.lane.b32.xlu1 %v3681_v46, %s3200_s29 }
 0x98f   :  { %2108 = vrot.lane.b32.xlu0 %v1879_v45, %s3201_s0  ;;  %2110 = vrot.lane.b32.xlu1 %v3681_v46, %s3201_s0 }
 0x993   :  { %2220 = vrot.lane.b32.xlu0 %v1879_v45, %s3203_s30  ;;  %2222 = vrot.lane.b32.xlu1 %v3681_v46, %s3203_s30 }
 0x9f5   :  { %v1529_v47 = vpop.permute.xlu0 %1528  ;;  %v1641_v48 = vpop.permute.xlu1 %1640 }
 0x9f6   :  { %2936 = vmatmul.mubr.msk.bf16.vlgmr.msra.gmra.mrb[40].mxu0 %vm216_vm6, %v1529_v47 }
 0x9f7   :  { %2946 = vmatpush3.bf16.xpose.msra.mxu0 %v1648_v1  ;;  %2947 = vmatprep.mubr.msk.bf16.mxu0 %vm3197_vm1, %v3196_v14 }
 0x9f8   :  { %2957 = vmatprep.subr.bf16.mxu0 %v3196_v14 }
 0x9f9   :  { %v1755_v49 = vpop.permute.xlu1 %1754  ;;  %v1753_v53 = vpop.permute.xlu0 %1752 }
 0x9fa   :  { %v1760_v50 = vsel %vm216_vm6, %v1755_v49, 0 }
 0x9fd   :  { %v1999_v55 = vpop.permute.xlu1 %1998  ;;  %v1997_v57 = vpop.permute.xlu0 %1996 }
 0x9fe   :  { %2948 = vmatmul.mubr.msk.bf16.vlgmr.msra.gmra.mrb[44].mxu0 %vm216_vm6, %v1641_v48  ;;  %v2004_v56 = vsel %vm216_vm6, %v1999_v55, 0 }
 0x9ff   :  { %2958 = vmatpush3.bf16.xpose.msra.mxu0 %v1760_v50  ;;  %2959 = vmatprep.mubr.msk.bf16.mxu0 %vm3197_vm1, %v3196_v14 }
 0xa00   :  { %2969 = vmatprep.subr.bf16.mxu0 %v3196_v14 }
 0xa01   :  { %v2111_v51 = vpop.permute.xlu1 %2110  ;;  %v2109_v60 = vpop.permute.xlu0 %2108 }
 0xa02   :  { %v2116_v58 = vsel %vm216_vm6, %v2111_v51, 0 }
 0xa05   :  { %v2223_v59 = vpop.permute.xlu1 %2222  ;;  %v2221_v62 = vpop.permute.xlu0 %2220 }
 0xa06   :  { %2960 = vmatmul.mubr.msk.bf16.vlgmr.msra.gmra.mrb[48].mxu0 %vm216_vm6, %v1753_v53  ;;  %v2228_v61 = vsel %vm216_vm6, %v2223_v59, 0 }
 0xa07   :  { %2970 = vmatpush3.bf16.xpose.msra.mxu0 %v1885_v54  ;;  %2971 = vmatprep.mubr.msk.bf16.mxu0 %vm3197_vm1, %v3196_v14 }
 0xa08   :  { %2981 = vmatprep.subr.bf16.mxu0 %v3196_v14 }
 0xa0e   :  { %2972 = vmatmul.mubr.msk.bf16.vlgmr.msra.gmra.mrb[52].mxu0 %vm216_vm6, %v1879_v45 }
 0xa0f   :  { %2982 = vmatpush3.bf16.xpose.msra.mxu0 %v2004_v56  ;;  %2983 = vmatprep.mubr.msk.bf16.mxu0 %vm3197_vm1, %v3196_v14 }
 0xa10   :  { %2993 = vmatprep.subr.bf16.mxu0 %v3196_v14 }
 0xa16   :  { %2984 = vmatmul.mubr.msk.bf16.vlgmr.msra.gmra.mrb[56].mxu0 %vm216_vm6, %v1997_v57 }
 0xa17   :  { %2994 = vmatpush3.bf16.xpose.msra.mxu0 %v2116_v58  ;;  %2995 = vmatprep.mubr.msk.bf16.mxu0 %vm3197_vm1, %v3196_v14 }
 0xa18   :  { %3005 = vmatprep.subr.bf16.mxu0 %v3196_v14 }
 0xa1e   :  { %2996 = vmatmul.mubr.msk.bf16.vlgmr.msra.gmra.mrb[60].mxu0 %vm216_vm6, %v2109_v60 }
 0xa1f   :  { %3006 = vmatpush3.bf16.xpose.msra.mxu0 %v2228_v61  ;;  %3007 = vmatprep.mubr.msk.bf16.mxu0 %vm3197_vm1, %v3196_v14 }
 0xa20   :  { %3017 = vmatprep.subr.bf16.mxu0 %v3196_v14 }
 0xa26   :  { %3008 = vmatmul.mubr.msk.bf16.vlgmr.msra.gmra.mrb[64].mxu0 %vm216_vm6, %v2221_v62 }
 0xa27   :  { %3021 = vmatprep.mubr.msk.bf16.mxu0 %vm3197_vm1, %v3196_v14 }
 0xa57   :  { %v1451_v7 = vpop.f32.mrb[36].mxu0 }
 0xa58   :  { %v1457_v8 = vmul.f32 0.35355338, %v1451_v7  ;;  %v2925_v9 = vpop.f32.mrb[37].mxu0 }
 0xa59   :  { %v1454_v10 = vpop.f32.mrb[38].mxu0 }
 0xa5a   :  { %v2926_v11 = vpop.f32.mrb[39].mxu0  ;;  %v3730_v12 = vsel %vm1464_vm3, -1e+09, %v1457_v8 }
 0xa5b   :  { %v1466_v13 = vsel %vm216_vm6, %v3730_v12, -inf }
 0xa5c   :  { %1467 = vmax.xlane.f32.xlu1 %v1466_v13 }
 0xac9   :  { %v1572_v15 = vpop.f32.mrb[40].mxu0 }
 0xaca   :  { %v1578_v16 = vmul.f32 0.35355338, %v1572_v15  ;;  %v2937_v17 = vpop.f32.mrb[41].mxu0 }
 0xacb   :  { %v1575_v18 = vpop.f32.mrb[42].mxu0 }
 0xacc   :  { %v2938_v19 = vpop.f32.mrb[43].mxu0  ;;  %v3735_v21 = vsel %vm1464_vm3, -1e+09, %v1578_v16 }
 0xacd   :  { %v1580_v22 = vsel %vm216_vm6, %v3735_v21, -inf }
 0xace   :  { %1581 = vmax.xlane.f32.xlu0 %v1580_v22 }
 0xad1   :  { %v1684_v23 = vpop.f32.mrb[44].mxu0 }
 0xad2   :  { %v1690_v24 = vmul.f32 0.35355338, %v1684_v23  ;;  %v2949_v20 = vpop.f32.mrb[45].mxu0 }
 0xad3   :  { %v1687_v25 = vpop.f32.mrb[46].mxu0 }
 0xad4   :  { %v2950_v26 = vpop.f32.mrb[47].mxu0  ;;  %v3740_v28 = vsel %vm1464_vm3, -1e+09, %v1690_v24 }
 0xad5   :  { %v1692_v30 = vsel %vm216_vm6, %v3740_v28, -inf }
 0xad6   :  { %1693 = vmax.xlane.f32.xlu0 %v1692_v30 }
 0xad9   :  { %v1796_v27 = vpop.f32.mrb[48].mxu0 }
 0xada   :  { %v1802_v32 = vmul.f32 0.35355338, %v1796_v27  ;;  %v2961_v33 = vpop.f32.mrb[49].mxu0 }
 0xadb   :  { %v1799_v35 = vpop.f32.mrb[50].mxu0 }
 0xadc   :  { %v2962_v36 = vpop.f32.mrb[51].mxu0  ;;  %v3748_v38 = vsel %vm1464_vm3, -1e+09, %v1802_v32 }
 0xadd   :  { %v1804_v39 = vsel %vm216_vm6, %v3748_v38, -inf }
 0xade   :  { %1805 = vmax.xlane.f32.xlu0 %v1804_v39 }
 0xae1   :  { %v1921_v42 = vpop.f32.mrb[52].mxu0 }
 0xae2   :  { %v1927_v43 = vmul.f32 0.35355338, %v1921_v42  ;;  %v2973_v44 = vpop.f32.mrb[53].mxu0 }
 0xae3   :  { %v1924_v45 = vpop.f32.mrb[54].mxu0 }
 0xae4   :  { %v2974_v0 = vpop.f32.mrb[55].mxu0  ;;  %v3753_v47 = vsel %vm1934_vm5, -1e+09, %v1927_v43 }
 0xae5   :  { %v1936_v48 = vsel %vm216_vm6, %v3753_v47, -inf }
 0xae6   :  { %1937 = vmax.xlane.f32.xlu1 %v1936_v48 }
 0xae9   :  { %v2040_v1 = vpop.f32.mrb[56].mxu0  ;;  %v1468_v4 = vpop.xlane.xlu1 %1467 }
 0xaea   :  { %v2046_v49 = vmul.f32 0.35355338, %v2040_v1  ;;  %v2985_v50 = vpop.f32.mrb[57].mxu0  ;;  %v1469_v5 = vsub.f32 %v3730_v12, %v1468_v4 }
 0xaeb   :  { %v2043_v53 = vpop.f32.mrb[58].mxu0 }
 0xaec   :  { %v2986_v54 = vpop.f32.mrb[59].mxu0  ;;  %v2047_v55 = vsel %vm1934_vm5, -1e+09, %v2046_v49  ;;  %v1470_v6 = vmul.f32 1.442695, %v1469_v5 }
 0xaed   :  { %v2048_v56 = vsel %vm216_vm6, %v2047_v55, -inf }
 0xaee   :  { %2049 = vmax.xlane.f32.xlu0 %v2048_v56  ;;  %3156 = vpow2.f32 %v1470_v6 }
 0xaf1   :  { %v2152_v51 = vpop.f32.mrb[60].mxu0 }
 0xaf2   :  { %v2158_v57 = vmul.f32 0.35355338, %v2152_v51  ;;  %v2997_v58 = vpop.f32.mrb[61].mxu0 }
 0xaf3   :  { %v2155_v59 = vpop.f32.mrb[62].mxu0 }
 0xaf4   :  { %v2998_v60 = vpop.f32.mrb[63].mxu0  ;;  %v2159_v61 = vsel %vm1934_vm5, -1e+09, %v2158_v57 }
 0xaf5   :  { %v2160_v62 = vsel %vm216_vm6, %v2159_v61, -inf }
 0xaf6   :  { %2161 = vmax.xlane.f32.xlu1 %v2160_v62 }
 0xaf8   :  { %v3768_v10 = vpop.eup %3156 }
 0xaf9   :  { %v2264_v63 = vpop.f32.mrb[64].mxu0  ;;  %v1472_v11 = vsel %vm216_vm6, %v3768_v10, 0.0 }
 0xafa   :  { %v3009_v2 = vpop.f32.mrb[65].mxu0  ;;  %v2270_v7 = vmul.f32 0.35355338, %v2264_v63 }
 0xafb   :  { %v2267_v52 = vpop.f32.mrb[66].mxu0 }
 0xafc   :  { %v3010_v3 = vpop.f32.mrb[67].mxu0  ;;  %v2271_v8 = vsel %vm1934_vm5, -1e+09, %v2270_v7 }
 0xafd   :  { %v2272_v9 = vsel %vm216_vm6, %v2271_v8, -inf }
 0xb04   :  { %1592 = vrot.lane.b32.xlu0 %v3658_v31, %s3198_s8 }
 0xb07   :  { %1479 = vrot.lane.b32.xlu1 %v3658_v31, %s3199_s4 }
 0xb23   :  { %2273 = vmax.xlane.f32.xlu0 %v2272_v9 }
 0xb2b   :  { %1473 = vadd.xlane.f32.xlu1 %v1472_v11 }
 0xb5b   :  { %v1582_v13 = vpop.xlane.xlu0 %1581 }
 0xb5c   :  { %v1583_v15 = vsub.f32 %v3735_v21, %v1582_v13 }
 0xb5e   :  { %v1584_v16 = vmul.f32 1.442695, %v1583_v15 }
 0xb60   :  { %3158 = vpow2.f32 %v1584_v16 }
 0xb63   :  { %v1694_v12 = vpop.xlane.xlu0 %1693 }
 0xb64   :  { %v1695_v17 = vsub.f32 %v3740_v28, %v1694_v12 }
 0xb66   :  { %v1696_v18 = vmul.f32 1.442695, %v1695_v17 }
 0xb68   :  { %3160 = vpow2.f32 %v1696_v18 }
 0xb6a   :  { %v3774_v19 = vpop.eup %3158 }
 0xb6b   :  { %v1586_v22 = vsel %vm216_vm6, %v3774_v19, 0.0  ;;  %v1806_v26 = vpop.xlane.xlu0 %1805 }
 0xb6c   :  { %1587 = vadd.xlane.f32.xlu0 %v1586_v22  ;;  %v1807_v29 = vsub.f32 %v3748_v38, %v1806_v26 }
 0xb6e   :  { %v1808_v30 = vmul.f32 1.442695, %v1807_v29 }
 0xb70   :  { %3162 = vpow2.f32 %v1808_v30 }
 0xb72   :  { %v3778_v23 = vpop.eup %3160 }
 0xb73   :  { %v1698_v24 = vsel %vm216_vm6, %v3778_v23, 0.0  ;;  %v1938_v21 = vpop.xlane.xlu1 %1937 }
 0xb74   :  { %1699 = vadd.xlane.f32.xlu1 %v1698_v24  ;;  %v1939_v27 = vsub.f32 %v3753_v47, %v1938_v21 }
 0xb76   :  { %v1940_v34 = vmul.f32 1.442695, %v1939_v27 }
 0xb78   :  { %3164 = vpow2.f32 %v1940_v34 }
 0xb7a   :  { %v3163_v39 = vpop.eup %3162 }
 0xb7b   :  { %v2050_v32 = vpop.xlane.xlu0 %2049  ;;  %v1810_v41 = vsel %vm216_vm6, %v3163_v39, 0.0 }
 0xb7c   :  { %v2051_v33 = vsub.f32 %v2047_v55, %v2050_v32 }
 0xb7e   :  { %v2052_v36 = vmul.f32 1.442695, %v2051_v33 }
 0xb7f   :  { %v1593_v47 = vpop.permute.xlu0 %1592 }
 0xb80   :  { %3166 = vpow2.f32 %v2052_v36  ;;  %v1598_v57 = vsel %vm283_vm9, %v1593_v47, 0 }
 0xb82   :  { %1704 = vrot.lane.b32.xlu0 %v3658_v31, %s3997_s2  ;;  %v3791_v42 = vpop.eup %3164 }
 0xb83   :  { %v2162_v20 = vpop.xlane.xlu1 %2161  ;;  %v1942_v43 = vsel %vm216_vm6, %v3791_v42, 0.0 }
 0xb84   :  { %v2163_v35 = vsub.f32 %v2159_v61, %v2162_v20 }
 0xb85   :  { %1816 = vrot.lane.b32.xlu1 %v3658_v31, %s3998_s26 }
 0xb86   :  { %v2164_v31 = vmul.f32 1.442695, %v2163_v35 }
 0xb87   :  { %v1480_v25 = vpop.permute.xlu1 %1479 }
 0xb88   :  { %v1485_v28 = vsel %vm283_vm9, %v1480_v25, 0  ;;  %3168 = vpow2.f32 %v2164_v31 }
 0xb89   :  { %2928 = vmatpush3.bf16.msra.mxu1 %v1485_v28 }
 0xb8a   :  { %2939 = vmatprep.subr.bf16.mxu1 %v3196_v14  ;;  %v3793_v38 = vpop.eup %3166 }
 0xb8b   :  { %v2054_v45 = vsel %vm216_vm6, %v3793_v38, 0.0 }
 0xb92   :  { %v3797_v44 = vpop.eup %3168 }
 0xb93   :  { %v2166_v0 = vsel %vm216_vm6, %v3797_v44, 0.0 }
 0xba1   :  { %1811 = vadd.xlane.f32.xlu0 %v1810_v41 }
 0xba5   :  { %1943 = vadd.xlane.f32.xlu0 %v1942_v43 }
 0xba9   :  { %2055 = vadd.xlane.f32.xlu1 %v2054_v45  ;;  %2167 = vadd.xlane.f32.xlu0 %v2166_v0 }
 0xbb0   :  { %v2274_v48 = vpop.xlane.xlu0 %2273 }
 0xbb1   :  { %v2275_v1 = vsub.f32 %v2271_v8, %v2274_v48 }
 0xbb3   :  { %v2276_v49 = vmul.f32 1.442695, %v2275_v1 }
 0xbb5   :  { %3170 = vpow2.f32 %v2276_v49 }
 0xbb8   :  { %v1474_v50 = vpop.xlane.xlu1 %1473 }
 0xbb9   :  { %3172 = vrcp.f32 %v1474_v50 }
 0xbba   :  { %2060 = vrot.lane.b32.xlu1 %v3681_v46, %s3198_s8 }
 0xbbe   :  { %2172 = vrot.lane.b32.xlu1 %v3681_v46, %s3997_s2 }
 0xbbf   :  { %v3807_v53 = vpop.eup %3170 }
 0xbc0   :  { %v2278_v54 = vsel %vm216_vm6, %v3807_v53, 0.0 }
 0xbc1   :  { %2279 = vadd.xlane.f32.xlu0 %v2278_v54 }
 0xbc2   :  { %2284 = vrot.lane.b32.xlu1 %v3681_v46, %s3998_s26 }
 0xbc3   :  { %v3173_v55 = vpop.eup %3172 }
 0xbc4   :  { %v1476_v56 = vmul.f32 %v3173_v55, %v3768_v10 }
 0xbc6   :  { %v1477_v51 = vpack.c.bf16 %v1476_v56, %v1476_v56 }
 0xbc8   :  { %2930 = vmatmul.mubr.msk.bf16.vlgmr.msra.gmra.mrb[44].mxu1 %vm216_vm6, %v1477_v51 }
 0xbc9   :  { %2940 = vmatpush3.bf16.msra.mxu1 %v1598_v57  ;;  %2941 = vmatprep.mubr.msk.bf16.mxu1 %vm3197_vm1, %v3196_v14 }
 0xbca   :  { %2951 = vmatprep.subr.bf16.mxu1 %v3196_v14 }
 0xbd7   :  { %1948 = vrot.lane.b32.xlu0 %v3681_v46, %s3199_s4 }
 0xbf9   :  { %v1588_v58 = vpop.xlane.xlu0 %1587 }
 0xbfa   :  { %3174 = vrcp.f32 %v1588_v58 }
 0xbfd   :  { %v1705_v62 = vpop.permute.xlu0 %1704 }
 0xbfe   :  { %v1710_v2 = vsel %vm283_vm9, %v1705_v62, 0 }
 0xc01   :  { %v1700_v59 = vpop.xlane.xlu1 %1699 }
 0xc02   :  { %3176 = vrcp.f32 %v1700_v59 }
 0xc04   :  { %v3175_v60 = vpop.eup %3174 }
 0xc05   :  { %v1590_v61 = vmul.f32 %v3175_v60, %v3774_v19  ;;  %v1817_v3 = vpop.permute.xlu1 %1816  ;;  %v3100_v60 = vld [vmem:[%s3958_s16] sm:$0xff]  }
 0xc06   :  { %v1822_v5 = vsel %vm283_vm9, %v1817_v3, 0  ;;  %3018 = vmatpush3.bf16.msra.mxu0 %v3100_v60 }
 0xc07   :  { %v1591_v63 = vpack.c.bf16 %v1590_v61, %v1590_v61  ;;  %3019 = vmatprep.subr.bf16.mxu0 %v3196_v14 }
 0xc09   :  { %2942 = vmatmul.mubr.msk.bf16.vlgmr.msra.gmra.mrb[48].mxu1 %vm216_vm6, %v1591_v63  ;;  %v3101_v63 = vld [vmem:[%s3958_s16 + $0x8] sm:$0xff]  }
 0xc0a   :  { %2952 = vmatpush3.bf16.msra.mxu1 %v1710_v2  ;;  %2953 = vmatprep.mubr.msk.bf16.mxu1 %vm3197_vm1, %v3196_v14 }
 0xc0b   :  { %2963 = vmatprep.subr.bf16.mxu1 %v3196_v14  ;;  %3020 = vmatpush3.bf16.msra.mxu0 %v3101_v63 }
 0xc0c   :  { %v3177_v46 = vpop.eup %3176  ;;  %3033 = vmatprep.subr.bf16.mxu0 %v3196_v14 }
 0xc0d   :  { %v1702_v52 = vmul.f32 %v3177_v46, %v3778_v23 }
 0xc0f   :  { %v1703_v4 = vpack.c.bf16 %v1702_v52, %v1702_v52 }
 0xc11   :  { %2954 = vmatmul.mubr.msk.bf16.vlgmr.msra.gmra.mrb[52].mxu1 %vm216_vm6, %v1703_v4 }
 0xc12   :  { %2964 = vmatpush3.bf16.msra.mxu1 %v1822_v5  ;;  %2965 = vmatprep.mubr.msk.bf16.mxu1 %vm3197_vm1, %v3196_v14 }
 0xc13   :  { %2975 = vmatprep.subr.bf16.mxu1 %v3196_v14 }
 0xc2e   :  { %v1812_v6 = vpop.xlane.xlu0 %1811 }
 0xc2f   :  { %3178 = vrcp.f32 %v1812_v6 }
 0xc32   :  { %v1944_v10 = vpop.xlane.xlu0 %1943 }
 0xc33   :  { %3180 = vrcp.f32 %v1944_v10 }
 0xc36   :  { %v2056_v11 = vpop.xlane.xlu1 %2055  ;;  %v2168_v13 = vpop.xlane.xlu0 %2167 }
 0xc37   :  { %3182 = vrcp.f32 %v2056_v11 }
 0xc38   :  { %3184 = vrcp.f32 %v2168_v13 }
 0xc39   :  { %v3179_v7 = vpop.eup %3178 }
 0xc3a   :  { %v1814_v8 = vmul.f32 %v3179_v7, %v3163_v39  ;;  %v2061_v19 = vpop.permute.xlu1 %2060 }
 0xc3b   :  { %v2066_v24 = vsel %vm283_vm9, %v2061_v19, 0 }
 0xc3c   :  { %v1815_v9 = vpack.c.bf16 %v1814_v8, %v1814_v8 }
 0xc3d   :  { %v3181_v15 = vpop.eup %3180 }
 0xc3e   :  { %2966 = vmatmul.mubr.msk.bf16.vlgmr.msra.gmra.mrb[56].mxu1 %vm216_vm6, %v1815_v9  ;;  %v1946_v12 = vmul.f32 %v3181_v15, %v3791_v42  ;;  %v2173_v20 = vpop.permute.xlu1 %2172 }
 0xc3f   :  { %2977 = vmatprep.mubr.msk.bf16.mxu1 %vm3197_vm1, %v3196_v14  ;;  %v2178_v28 = vsel %vm283_vm9, %v2173_v20, 0 }
 0xc40   :  { %v1947_v22 = vpack.c.bf16 %v1946_v12, %v1946_v12 }
 0xc41   :  { %v3183_v23 = vpop.eup %3182 }
 0xc42   :  { %v2058_v21 = vmul.f32 %v3183_v23, %v3793_v38  ;;  %v3185_v26 = vpop.eup %3184  ;;  %v2285_v30 = vpop.permute.xlu1 %2284 }
 0xc43   :  { %v2170_v29 = vmul.f32 %v3185_v26, %v3797_v44  ;;  %v2290_v33 = vsel %vm283_vm9, %v2285_v30, 0 }
 0xc44   :  { %v2059_v25 = vpack.c.bf16 %v2058_v21, %v2058_v21 }
 0xc45   :  { %v2171_v27 = vpack.c.bf16 %v2170_v29, %v2170_v29 }
 0xc4e   :  { %v2280_v16 = vpop.xlane.xlu0 %2279 }
 0xc4f   :  { %3186 = vrcp.f32 %v2280_v16 }
 0xc52   :  { %v1949_v17 = vpop.permute.xlu0 %1948 }
 0xc53   :  { %v1954_v18 = vsel %vm283_vm9, %v1949_v17, 0  ;;  %vm2585_vm9 = vcmask 523264  }
 0xc54   :  { %2976 = vmatpush3.bf16.msra.mxu1 %v1954_v18 }
 0xc55   :  { %2987 = vmatprep.subr.bf16.mxu1 %v3196_v14 }
 0xc57   :  { %2978 = vmatmul.mubr.msk.bf16.vlgmr.msra.gmra.mrb[60].mxu1 %vm216_vm6, %v1947_v22 }
 0xc58   :  { %2988 = vmatpush3.bf16.msra.mxu1 %v2066_v24  ;;  %2989 = vmatprep.mubr.msk.bf16.mxu1 %vm3197_vm1, %v3196_v14 }
 0xc59   :  { %2999 = vmatprep.subr.bf16.mxu1 %v3196_v14  ;;  %v3187_v32 = vpop.eup %3186 }
 0xc5a   :  { %v2282_v34 = vmul.f32 %v3187_v32, %v3807_v53 }
 0xc5c   :  { %v2283_v35 = vpack.c.bf16 %v2282_v34, %v2282_v34 }
 0xc5f   :  { %2990 = vmatmul.mubr.msk.bf16.vlgmr.msra.gmra.mrb[64].mxu1 %vm216_vm6, %v2059_v25 }
 0xc60   :  { %3000 = vmatpush3.bf16.msra.mxu1 %v2178_v28  ;;  %3001 = vmatprep.mubr.msk.bf16.mxu1 %vm3197_vm1, %v3196_v14  ;;  %v2690_v28 = vld [vmem:[%s3959_s17] ss:$0 sm:$0xff] }
 0xc61   :  { %3011 = vmatprep.subr.bf16.mxu1 %v3196_v14 }
 0xc67   :  { %3002 = vmatmul.mubr.msk.bf16.vlgmr.msra.gmra.mrb[68].mxu1 %vm216_vm6, %v2171_v27 }
 0xc68   :  { %3012 = vmatpush3.bf16.msra.mxu1 %v2290_v33  ;;  %3013 = vmatprep.mubr.msk.bf16.mxu1 %vm3197_vm1, %v3196_v14 }
 0xc69   :  { %3025 = vmatprep.subr.bf16.mxu1 %v3196_v14 }
 0xc6f   :  { %3014 = vmatmul.mubr.msk.bf16.vlgmr.msra.gmra.mrb[72].mxu1 %vm216_vm6, %v2283_v35 }
 0xc70   :  { %3029 = vmatprep.mubr.msk.bf16.mxu1 %vm3197_vm1, %v3196_v14 }
 0xc9b   :  { %v1521_v36 = vpop.f32.mrb[44].mxu1 }
 0xc9c   :  { %v2931_v31 = vpop.f32.mrb[45].mxu1 }
 0xc9d   :  { %v1524_v39 = vpop.f32.mrb[46].mxu1 }
 0xc9e   :  { %v2932_v41 = vpop.f32.mrb[47].mxu1 }
 0xcdc   :  { %v1634_v42 = vpop.f32.mrb[48].mxu1 }
 0xcdd   :  { %v2943_v38 = vpop.f32.mrb[49].mxu1 }
 0xcde   :  { %v1637_v43 = vpop.f32.mrb[50].mxu1 }
 0xcdf   :  { %v2944_v44 = vpop.f32.mrb[51].mxu1 }
 0xce4   :  { %v1746_v45 = vpop.f32.mrb[52].mxu1 }
 0xce5   :  { %v2955_v0 = vpop.f32.mrb[53].mxu1 }
 0xce6   :  { %v1749_v47 = vpop.f32.mrb[54].mxu1 }
 0xce7   :  { %v2956_v48 = vpop.f32.mrb[55].mxu1 }
 0xce8   :  { %v3102_v48 = vld [vmem:[%s3960_s20] sm:$0xff]  }
 0xce9   :  { %3026 = vmatpush3.bf16.msra.mxu1 %v3102_v48 }
 0xcea   :  { %3027 = vmatprep.subr.bf16.mxu1 %v3196_v14 }
 0xd11   :  { %v1858_v1 = vpop.f32.mrb[56].mxu1 }
 0xd12   :  { %v2967_v49 = vpop.f32.mrb[57].mxu1 }
 0xd13   :  { %v1861_v50 = vpop.f32.mrb[58].mxu1  ;;  %v3104_v49 = vld [vmem:[%s3961_s22] sm:$0xff]  }
 0xd14   :  { %v2968_v53 = vpop.f32.mrb[59].mxu1  ;;  %v3105_v50 = vld [vmem:[%s3961_s22 + $0x8] sm:$0xff]  }
 0xd2a   :  { %v1990_v54 = vpop.f32.mrb[60].mxu1 }
 0xd2b   :  { %v2979_v55 = vpop.f32.mrb[61].mxu1 }
 0xd2c   :  { %v1993_v56 = vpop.f32.mrb[62].mxu1 }
 0xd2d   :  { %v2980_v51 = vpop.f32.mrb[63].mxu1 }
 0xd32   :  { %v2102_v57 = vpop.f32.mrb[64].mxu1 }
 0xd33   :  { %v3077_v58 = vpack.i.bf16 %v2102_v57, %v1634_v42  ;;  %v2991_v59 = vpop.f32.mrb[65].mxu1 }
 0xd34   :  { %v2105_v61 = vpop.f32.mrb[66].mxu1 }
 0xd35   :  { %3078 = vrot.lane.b32.xlu1 %v3077_v58, %s3999_s14  ;;  %v2992_v62 = vpop.f32.mrb[67].mxu1 }
 0xd3a   :  { %v2214_v2 = vpop.f32.mrb[68].mxu1 }
 0xd3b   :  { %v3082_v46 = vpack.i.bf16 %v2214_v2, %v1746_v45  ;;  %v3003_v52 = vpop.f32.mrb[69].mxu1 }
 0xd3c   :  { %v2217_v3 = vpop.f32.mrb[70].mxu1 }
 0xd3d   :  { %3083 = vrot.lane.b32.xlu1 %v3082_v46, %s4000_s27  ;;  %v3004_v4 = vpop.f32.mrb[71].mxu1 }
 0xd3e   :  { %v2694_v4 = vld [vmem:[%s3962_s18] ss:$0 sm:$0xff] }
 0xd42   :  { %v2326_v5 = vpop.f32.mrb[72].mxu1 }
 0xd43   :  { %v3087_v6 = vpack.i.bf16 %v2326_v5, %v1858_v1  ;;  %v3015_v7 = vpop.f32.mrb[73].mxu1  ;;  %v3103_v1 = vld [vmem:[%s3960_s20 + $0x8] sm:$0xff]  }
 0xd44   :  { %v2329_v8 = vpop.f32.mrb[74].mxu1  ;;  %3028 = vmatpush3.bf16.msra.mxu1 %v3103_v1 }
 0xd45   :  { %3088 = vrot.lane.b32.xlu1 %v3087_v6, %s4001_s28  ;;  %v3016_v9 = vpop.f32.mrb[75].mxu1 }
 0xda7   :  { %v3079_v10 = vpop.permute.xlu1 %3078 }
 0xda8   :  { %v3081_v13 = vunpack.i.h.bf16 %v3079_v10  ;;  %v3080_v15 = vunpack.i.l.bf16 %v3079_v10  ;;  %v2695_v10 = vld [vmem:[%s3963_s19] ss:$0 sm:$0xff] }
 0xdaa   :  { %v2344_v18 = vsel %vm216_vm6, %v1990_v54, %v3081_v13  ;;  %v1876_v19 = vsel %vm216_vm6, %v1521_v36, %v3080_v15 }
 0xdaf   :  { %v3084_v11 = vpop.permute.xlu1 %3083 }
 0xdb0   :  { %v3086_v16 = vunpack.i.h.bf16 %v3084_v11  ;;  %v3085_v12 = vunpack.i.l.bf16 %v3084_v11 }
 0xdb2   :  { %v2345_v24 = vsel %vm676_vm10, %v2344_v18, %v3086_v16  ;;  %v1877_v21 = vsel %vm676_vm10, %v1876_v19, %v3085_v12  ;;  %v3106_v12 = vld [vmem:[%s3961_s22 + $0x10] sm:$0xff]   ;;  %v2696_v18 = vld [vmem:[%s3964_s21] ss:$0 sm:$0xff] }
 0xdb7   :  { %v3089_v17 = vpop.permute.xlu1 %3088 }
 0xdb8   :  { %v3091_v22 = vunpack.i.h.bf16 %v3089_v17  ;;  %v3090_v23 = vunpack.i.l.bf16 %v3089_v17  ;;  %v3107_v17 = vld [vmem:[%s3961_s22 + $0x18] sm:$0xff]  }
 0xdba   :  { %v2346_v20 = vsel %vm678_vm11, %v2345_v24, %v3091_v22  ;;  %v1878_v25 = vsel %vm678_vm11, %v1877_v21, %v3090_v23 }
 0xdbb   :  { %v2347_v26 = vpack.c.bf16 %v2346_v20, %v1878_v25 }
 0xdbd   :  { %3022 = vmatmul.mubr.msk.bf16.vlgmr.msra.gmra.mrb[68].mxu0 %vm84_vm0, %v2347_v26 }
 0xdbe   :  { %3041 = vmatprep.mubr.msk.bf16.mxu0 %vm3197_vm1, %v3196_v14  ;;  %3034 = vmatpush3.bf16.msra.mxu0 %v3104_v49 }
 0xdbf   :  { %3035 = vmatprep.subr.bf16.mxu0 %v3196_v14 }
 0xdc2   :  { %3036 = vmatpush3.bf16.msra.mxu0 %v3105_v50 }
 0xdc3   :  { %3037 = vmatprep.subr.bf16.mxu0 %v3196_v14 }
 0xdc6   :  { %3038 = vmatpush3.bf16.msra.mxu0 %v3106_v12 }
 0xdc7   :  { %3039 = vmatprep.subr.bf16.mxu0 %v3196_v14  ;;  %v2700_v14 = vld [vmem:[%s3965_s23] ss:$0 sm:$0xff] }
 0xdca   :  { %3040 = vmatpush3.bf16.msra.mxu0 %v3107_v17 }
 0xe90   :  { %v2408_v29 = vpop.f32.mrb[68].mxu0 }
 0xe91   :  { %v2409_v30 = vadd.f32 %v2690_v28, %v2408_v29  ;;  %v3023_v27 = vpop.f32.mrb[69].mxu0 }
 0xe92   :  { %v2411_v32 = vpop.f32.mrb[70].mxu0 }
 0xe93   :  { %v3884_v33 = vadd.f32 %v2409_v30, %v3608_v37  ;;  %v2412_v34 = vadd.f32 %v2690_v28, %v2411_v32  ;;  %v3024_v35 = vpop.f32.mrb[71].mxu0 }
 0xe95   :  { %v3887_v36 = vadd.f32 %v2412_v34, %v3611_v40  ;;  %v2419_v31 = vsel %vm84_vm0, %v3884_v33, 0.0 }
 0xe96   :  { %2420 = vadd.xlane.f32.xlu0 %v2419_v31 }
 0xe97   :  { %v2422_v39 = vsel %vm84_vm0, %v3887_v36, 0.0 }
 0xe98   :  { %2423 = vadd.xlane.f32.xlu1 %v2422_v39 }
 0xf23   :  { %v2421_v41 = vpop.xlane.xlu0 %2420 }
 0xf24   :  { %v2425_v42 = vmul.f32 0.03125, %v2421_v41 }
 0xf25   :  { %v2424_v38 = vpop.xlane.xlu1 %2423 }
 0xf26   :  { %v2427_v43 = vsub.f32 %v3884_v33, %v2425_v42  ;;  %v2426_v37 = vmul.f32 0.03125, %v2424_v38 }
 0xf28   :  { %v2428_v44 = vsub.f32 %v3887_v36, %v2426_v37  ;;  %v2429_v45 = vmul.f32 %v2427_v43, %v2427_v43  ;;  %v2445_v6 = vmul.f32 %v2694_v4, %v2427_v43 }
 0xf2a   :  { %v2431_v40 = vsel %vm84_vm0, %v2429_v45, 0.0  ;;  %v2430_v0 = vmul.f32 %v2428_v44, %v2428_v44  ;;  %v2446_v7 = vmul.f32 %v2694_v4, %v2428_v44 }
 0xf2b   :  { %2432 = vadd.xlane.f32.xlu0 %v2431_v40 }
 0xf2c   :  { %v2434_v47 = vsel %vm84_vm0, %v2430_v0, 0.0 }
 0xf2f   :  { %2435 = vadd.xlane.f32.xlu0 %v2434_v47 }
 0xfb8   :  { %v2433_v53 = vpop.xlane.xlu0 %2432 }
 0xfb9   :  { %v2437_v54 = vmul.f32 0.032258064, %v2433_v53 }
 0xfbb   :  { %3188 = vrsqrt.f32 %v2437_v54  ;;  %vm2449_vm1 = vcmp.eq.f32.partialorder %v2437_v54, inf  ;;  %v2452_v58 = vand.u32 2147483648, %v2437_v54  ;;  %vm2451_vm6 = vcmp.eq.f32.partialorder %v2437_v54, 0.0 }
 0xfbc   :  { %v2436_v55 = vpop.xlane.xlu0 %2435 }
 0xfbd   :  { %v2438_v56 = vmul.f32 0.032258064, %v2436_v55 }
 0xfbf   :  { %3190 = vrsqrt.f32 %v2438_v56  ;;  %vm2456_vm7 = vcmp.eq.f32.partialorder %v2438_v56, inf  ;;  %v2459_v2 = vand.u32 2147483648, %v2438_v56  ;;  %vm2458_vm8 = vcmp.eq.f32.partialorder %v2438_v56, 0.0 }
 0xfc5   :  { %v3189_v51 = vpop.eup %3188 }
 0xfc6   :  { %v2448_v57 = vmul.f32 %v3189_v51, %v2437_v54 }
 0xfc8   :  { %v2450_v59 = vsel %vm2449_vm1, %v2437_v54, %v2448_v57 }
 0xfc9   :  { %v3191_v60 = vpop.eup %3190  ;;  %v2453_v61 = vsel %vm2451_vm6, %v2452_v58, %v2450_v59 }
 0xfca   :  { %v2461_v62 = vadd.f32 1e-06, %v2453_v61  ;;  %v2455_v63 = vmul.f32 %v3191_v60, %v2438_v56 }
 0xfcc   :  { %3192 = vrcp.f32 %v2461_v62  ;;  %v2457_v46 = vsel %vm2456_vm7, %v2438_v56, %v2455_v63 }
 0xfcd   :  { %v2460_v52 = vsel %vm2458_vm8, %v2459_v2, %v2457_v46 }
 0xfce   :  { %v2462_v3 = vadd.f32 1e-06, %v2460_v52 }
 0xfd0   :  { %3194 = vrcp.f32 %v2462_v3 }
 0xfd6   :  { %v3193_v5 = vpop.eup %3192 }
 0xfd7   :  { %v2464_v8 = vmul.f32 %v3193_v5, %v2445_v6 }
 0xfd9   :  { %v2473_v13 = vadd.f32 %v2695_v10, %v2464_v8 }
 0xfda   :  { %v3195_v9 = vpop.eup %3194 }
 0xfdb   :  { %v2466_v11 = vmul.f32 %v3195_v9, %v2446_v7 }
 0xfdd   :  { %v2474_v15 = vadd.f32 %v2695_v10, %v2466_v11 }
 0xfdf   :  { %v2475_v16 = vpack.c.bf16 %v2474_v15, %v2473_v13 }
 0xfe1   :  { %3030 = vmatmul.mubr.msk.bf16.vlgmr.msra.gmra.mrb[76].mxu1 %vm84_vm0, %v2475_v16 }
0x10b4   :  { %v2536_v19 = vpop.f32.mrb[76].mxu1 }
0x10b5   :  { %v2537_v22 = vadd.f32 %v2696_v18, %v2536_v19  ;;  %v3031_v23 = vpop.f32.mrb[77].mxu1 }
0x10b6   :  { %v2539_v24 = vpop.f32.mrb[78].mxu1 }
0x10b7   :  { %v2540_v21 = vadd.f32 %v2696_v18, %v2539_v24  ;;  %v3032_v20 = vpop.f32.mrb[79].mxu1  ;;  %v2543_v25 = vmax.f32 %v2537_v22, 0.0 }
0x10b9   :  { %v2544_v26 = vmax.f32 %v2540_v21, 0.0 }
0x10bb   :  { %v2545_v28 = vpack.c.bf16 %v2544_v26, %v2543_v25 }
0x10bd   :  { %3042 = vmatmul.mubr.msk.bf16.vlgmr.msra.gmra.mrb[72].mxu0 %vm2585_vm9, %v2545_v28 }
0x1190   :  { %v2623_v29 = vpop.f32.mrb[72].mxu0 }
0x1191   :  { %v2624_v30 = vadd.f32 %v2700_v14, %v2623_v29  ;;  %v3043_v27 = vpop.f32.mrb[73].mxu0 }
0x1192   :  { %v2626_v32 = vpop.f32.mrb[74].mxu0 }
0x1193   :  { %v2630_v34 = vadd.f32 %v2624_v30, %v3884_v33  ;;  %v2627_v35 = vadd.f32 %v2700_v14, %v2626_v32  ;;  %v3044_v31 = vpop.f32.mrb[75].mxu0 }
0x1195   :  { %2632 = vst.msk [vmem:[%s3966_s24] sm:$0xff] %vm84_vm0, %v2630_v34  ;;  %v2631_v39 = vadd.f32 %v2627_v35, %v3887_v36 }
0x1197   :  { %2633 = vst.msk [vmem:[%s3966_s24 + $0x8] sm:$0xff] %vm84_vm0, %v2631_v39 }

// kernel: transformer_forward.9
= control target key start
LH: loop header
LB: loop body
LE: loop exit
PB: predicated region body
PF: predicated region fallthrough
CT: control target
= control target key end

     0   :  { %vm25_vm0 = vcmask 261120   ;;  %v186_v14 = vmov 0.0   ;;  %vm187_vm1 = vmmov 0   ;;  %s250_s0 = inlined_call_operand.vmem [shape: f32[16,32], index: 0, kind: input, shape index: {}]   ;;  %s251_s3 = inlined_call_operand.vmem [shape: bf16[32,128], index: 3, kind: input, shape index: {}]   ;;  %s252_s1 = inlined_call_operand.vmem [shape: f32[1,32], index: 1, kind: input, shape index: {}]   ;;  %s253_s2 = inlined_call_operand.vmem [shape: f32[1,32], index: 2, kind: input, shape index: {}]   ;;  %s254_s4 = inlined_call_operand.vmem [shape: f32[1,128], index: 4, kind: input, shape index: {}]   ;;  %s255_s5 = inlined_call_operand.vmem [shape: f32[16,128], index: 5, kind: output, shape index: {}]  }
   0x1   :  { %v21_v0 = vld [vmem:[%s250_s0] sm:$0xff]  ;;  %v22_v1 = vld [vmem:[%s250_s0 + $0x8] sm:$0xff]  ;;  %166 = vmatprep.subr.bf16.mxu0 %v186_v14  ;;  %170 = vmatprep.mubr.msk.bf16.mxu0 %vm187_vm1, %v186_v14 }
   0x2   :  { %v26_v2 = vsel %vm25_vm0, %v21_v0, 0.0  ;;  %v29_v3 = vsel %vm25_vm0, %v22_v1, 0.0  ;;  %v176_v15 = vld [vmem:[%s251_s3] sm:$0xff]   ;;  %v177_v16 = vld [vmem:[%s251_s3 + $0x8] sm:$0xff]  }
   0x3   :  { %27 = vadd.xlane.f32.xlu0 %v26_v2  ;;  %167 = vmatpush3.bf16.msra.mxu0 %v176_v15  ;;  %v157_v33 = vld [vmem:[%s252_s1] ss:$0 sm:$0xff] }
   0x4   :  { %168 = vmatprep.subr.bf16.mxu0 %v186_v14  ;;  %v158_v39 = vld [vmem:[%s253_s2] ss:$0 sm:$0xff] }
   0x5   :  { %v159_v44 = vld [vmem:[%s254_s4] ss:$0 sm:$0xff] }
   0x7   :  { %30 = vadd.xlane.f32.xlu0 %v29_v3  ;;  %169 = vmatpush3.bf16.msra.mxu0 %v177_v16 }
  0x90   :  { %v28_v4 = vpop.xlane.xlu0 %27 }
  0x91   :  { %v33_v5 = vmul.f32 0.03125, %v28_v4 }
  0x93   :  { %v35_v6 = vsub.f32 %v21_v0, %v33_v5 }
  0x94   :  { %v31_v7 = vpop.xlane.xlu0 %30 }
  0x95   :  { %v34_v8 = vmul.f32 0.03125, %v31_v7  ;;  %v37_v9 = vmul.f32 %v35_v6, %v35_v6  ;;  %v53_v35 = vmul.f32 %v157_v33, %v35_v6 }
  0x97   :  { %v36_v10 = vsub.f32 %v22_v1, %v34_v8  ;;  %v39_v11 = vsel %vm25_vm0, %v37_v9, 0.0 }
  0x98   :  { %40 = vadd.xlane.f32.xlu1 %v39_v11 }
  0x99   :  { %v38_v12 = vmul.f32 %v36_v10, %v36_v10  ;;  %v54_v36 = vmul.f32 %v157_v33, %v36_v10 }
  0x9b   :  { %v42_v13 = vsel %vm25_vm0, %v38_v12, 0.0 }
  0x9c   :  { %43 = vadd.xlane.f32.xlu1 %v42_v13 }
 0x125   :  { %v41_v17 = vpop.xlane.xlu1 %40 }
 0x126   :  { %v45_v18 = vmul.f32 0.032258064, %v41_v17 }
 0x128   :  { %178 = vrsqrt.f32 %v45_v18  ;;  %vm57_vm2 = vcmp.eq.f32.partialorder %v45_v18, inf  ;;  %v60_v23 = vand.u32 2147483648, %v45_v18  ;;  %vm59_vm3 = vcmp.eq.f32.partialorder %v45_v18, 0.0 }
 0x129   :  { %v44_v19 = vpop.xlane.xlu1 %43 }
 0x12a   :  { %v46_v20 = vmul.f32 0.032258064, %v44_v19 }
 0x12c   :  { %180 = vrsqrt.f32 %v46_v20  ;;  %vm64_vm4 = vcmp.eq.f32.partialorder %v46_v20, inf  ;;  %v67_v29 = vand.u32 2147483648, %v46_v20  ;;  %vm66_vm5 = vcmp.eq.f32.partialorder %v46_v20, 0.0 }
 0x132   :  { %v179_v21 = vpop.eup %178 }
 0x133   :  { %v56_v22 = vmul.f32 %v179_v21, %v45_v18 }
 0x135   :  { %v58_v24 = vsel %vm57_vm2, %v45_v18, %v56_v22 }
 0x136   :  { %v181_v25 = vpop.eup %180  ;;  %v61_v26 = vsel %vm59_vm3, %v60_v23, %v58_v24 }
 0x137   :  { %v69_v27 = vadd.f32 1e-06, %v61_v26  ;;  %v63_v28 = vmul.f32 %v181_v25, %v46_v20 }
 0x139   :  { %182 = vrcp.f32 %v69_v27  ;;  %v65_v30 = vsel %vm64_vm4, %v46_v20, %v63_v28 }
 0x13a   :  { %v68_v31 = vsel %vm66_vm5, %v67_v29, %v65_v30 }
 0x13b   :  { %v70_v32 = vadd.f32 1e-06, %v68_v31 }
 0x13d   :  { %184 = vrcp.f32 %v70_v32 }
 0x143   :  { %v183_v34 = vpop.eup %182 }
 0x144   :  { %v72_v37 = vmul.f32 %v183_v34, %v53_v35 }
 0x146   :  { %v81_v41 = vadd.f32 %v158_v39, %v72_v37 }
 0x147   :  { %v185_v38 = vpop.eup %184 }
 0x148   :  { %v74_v40 = vmul.f32 %v185_v38, %v54_v36 }
 0x14a   :  { %v82_v42 = vadd.f32 %v158_v39, %v74_v40 }
 0x14c   :  { %v83_v43 = vpack.c.bf16 %v82_v42, %v81_v41 }
 0x14e   :  { %171 = vmatmul.mubr.msk.bf16.vlgmr.msra.gmra.mrb[0].mxu0 %vm25_vm0, %v83_v43 }
 0x221   :  { %v144_v45 = vpop.f32.mrb[0].mxu0 }
 0x222   :  { %v145_v46 = vadd.f32 %v159_v44, %v144_v45  ;;  %v172_v47 = vpop.f32.mrb[1].mxu0 }
 0x223   :  { %v147_v48 = vpop.f32.mrb[2].mxu0 }
 0x224   :  { %151 = vst [vmem:[%s255_s5] sm:$0xff] %v145_v46  ;;  %v148_v49 = vadd.f32 %v159_v44, %v147_v48  ;;  %v173_v50 = vpop.f32.mrb[3].mxu0 }
 0x226   :  { %152 = vst [vmem:[%s255_s5 + $0x8] sm:$0xff] %v148_v49 }

</bundles_post_ra>
